<compile_context>
chip_gen: v5e
topology: v5e:2x2
jax: 0.10.0
libtpu: 0.0.40
codegen_flags: <defaults>
</compile_context>

<pallas_src>
import functools

import numpy as np
import jax
import jax.numpy as jnp
from jax.experimental import pallas as pl
from jax.experimental.pallas import tpu as pltpu

EPS = 1e-5     # PyTorch GroupNorm default eps
LANE = 128


def _round_up(x, m):
    return (x + m - 1) // m * m


def _group_norm(y, w, b, inv_n):
    """GroupNorm(num_groups=1) over a zero-lane-padded (HW, C) sample.

    Channel-padded lanes are exactly zero, so they contribute nothing to the
    sums; `inv_n` = 1 / (#real elements) is a compile-time constant.  The
    affine transform is folded so the per-element cost is one mul + one add,
    and padded lanes come out exactly zero again (w == b == 0 there).
    """
    s1 = jnp.sum(jnp.sum(y, axis=1, keepdims=True), axis=0, keepdims=True)
    s2 = jnp.sum(jnp.sum(y * y, axis=1, keepdims=True), axis=0, keepdims=True)
    mu = s1 * inv_n
    var = jnp.maximum(s2 * inv_n - mu * mu, 0.0)
    scale = jax.lax.rsqrt(var + EPS) * w          # (1, C); padded lanes -> 0
    shift = b - mu * scale                        # (1, C); padded lanes -> 0
    return y * scale + shift


def bottleneck_kernel(x_ref, w1_ref, g1w_ref, g1b_ref, m_ref, w2_ref,
                      g2w_ref, g2b_ref, w3_ref, g3w_ref, g3b_ref, o_ref,
                      *, img_w, hw, inv_n1, inv_n2, inv_n3):
    x = x_ref[...]                                           # (HW, Cin_p) f32

    # ---- conv1 (1x1) + GN + ReLU -------------------------------------------
    y = jnp.dot(x.astype(jnp.bfloat16), w1_ref[...],
                preferred_element_type=jnp.float32)          # (HW, Cm_p) f32
    y = jnp.maximum(_group_norm(y, g1w_ref[...], g1b_ref[...], inv_n1), 0.0)

    # ---- conv2 (3x3, stride 1, pad 1) + GN + ReLU ----------------------------
    # 9 taps = static sublane rolls of y (XLU) * boundary masks, concatenated
    # along the lane axis and contracted in a single MXU matmul (K = 9*Cm_p).
    m = m_ref[...]                                           # (HW, 9) f32
    taps = []
    for k in range(9):
        off = (k // 3 - 1) * img_w + (k % 3 - 1)
        if off == 0:
            t = y                                            # center tap
        else:
            t = pltpu.roll(y, shift=(-off) % hw, axis=0) * m[:, k:k + 1]
        taps.append(t.astype(jnp.bfloat16))
    cat = jnp.concatenate(taps, axis=1)                      # (HW, 9*Cm_p) bf16
    y = jnp.dot(cat, w2_ref[...], preferred_element_type=jnp.float32)
    y = jnp.maximum(_group_norm(y, g2w_ref[...], g2b_ref[...], inv_n2), 0.0)

    # ---- conv3 (1x1, expansion 4) + GN --------------------------------------
    y = jnp.dot(y.astype(jnp.bfloat16), w3_ref[...],
                preferred_element_type=jnp.float32)          # (HW, Ce_p) f32
    y = _group_norm(y, g3w_ref[...], g3b_ref[...], inv_n3)

    # ---- identity residual + ReLU (f32) --------------------------------------
    # TODO(synk): optional `downsample` sub-module / stride>1 not implemented;
    # identity residual assumed (requires in_ch == 4*out_ch, stride == 1).
    o_ref[...] = jnp.maximum(y + x, 0.0)


def _make_tap_masks(H, W):
    """(HW, 9) f32: mask[f, k] = 1 iff output flat index f has an in-bounds
    (non-zero-padded) input for 3x3 tap k = kh*3 + kw (stride 1, padding 1)."""
    i = np.arange(H).reshape(H, 1)
    j = np.arange(W).reshape(1, W)
    m = np.zeros((H * W, 9), np.float32)
    for kh in range(3):
        for kw in range(3):
            ok = ((i + kh - 1 >= 0) & (i + kh - 1 < H) &
                  (j + kw - 1 >= 0) & (j + kw - 1 < W))
            m[:, kh * 3 + kw] = ok.reshape(-1).astype(np.float32)
    return m


def bottleneck_forward(x_nchw, w1, g1w, g1b, w2, g2w, g2b, w3, g3w, g3b, stride=1):
    """x_nchw: (N, Cin, H, W).  Weights are torch-shaped (OIHW / per-channel)."""
    N, Cin, H, W = x_nchw.shape
    Cm = w1.shape[0]                  # out_channels
    Ce = w3.shape[0]                  # out_channels * expansion
    assert stride == 1 and Cin == Ce, "identity-residual configuration required"

    HW = H * W
    Cin_p = _round_up(Cin, LANE)
    Cm_p = _round_up(Cm, LANE)
    Ce_p = _round_up(Ce, LANE)        # == Cin_p because Cin == Ce

    # activations: NCHW -> (N, HW, Cin) -> lane-pad to 128 (f32; also used for
    # the residual add inside the kernel).
    x = jnp.transpose(x_nchw, (0, 2, 3, 1)).reshape(N, HW, Cin)
    x = jnp.pad(x, ((0, 0), (0, 0), (0, Cin_p - Cin)))

    # conv weights -> lane-padded bf16 matmul operands.
    w1m = (jnp.zeros((Cin_p, Cm_p), jnp.float32)
           .at[:Cin, :Cm].set(jnp.transpose(w1[:, :, 0, 0], (1, 0)))
           .astype(jnp.bfloat16))
    w2t = jnp.transpose(w2, (2, 3, 1, 0)).reshape(9, Cm, Cm)   # [tap, cin, cout]
    w2m = (jnp.zeros((9, Cm_p, Cm_p), jnp.float32)
           .at[:, :Cm, :Cm].set(w2t)
           .reshape(9 * Cm_p, Cm_p)
           .astype(jnp.bfloat16))
    w3m = (jnp.zeros((Cm_p, Ce_p), jnp.float32)
           .at[:Cm, :Ce].set(jnp.transpose(w3[:, :, 0, 0], (1, 0)))
           .astype(jnp.bfloat16))

    def pad_gn(v, cp):
        return jnp.pad(v, (0, cp - v.shape[0])).reshape(1, cp).astype(jnp.float32)

    g1w2, g1b2 = pad_gn(g1w, Cm_p), pad_gn(g1b, Cm_p)
    g2w2, g2b2 = pad_gn(g2w, Cm_p), pad_gn(g2b, Cm_p)
    g3w2, g3b2 = pad_gn(g3w, Ce_p), pad_gn(g3b, Ce_p)

    masks = jnp.asarray(_make_tap_masks(H, W))                 # (HW, 9) f32

    kernel = functools.partial(
        bottleneck_kernel, img_w=W, hw=HW,
        inv_n1=1.0 / float(HW * Cm),
        inv_n2=1.0 / float(HW * Cm),
        inv_n3=1.0 / float(HW * Ce))

    def full(shape):
        nd = len(shape)
        return pl.BlockSpec(shape, lambda n, nd=nd: (0,) * nd)

    out = pl.pallas_call(
        kernel,
        out_shape=jax.ShapeDtypeStruct((N, HW, Ce_p), jnp.float32),
        grid_spec=pltpu.PrefetchScalarGridSpec(
            num_scalar_prefetch=0,
            grid=(N,),
            in_specs=[
                pl.BlockSpec((None, HW, Cin_p), lambda n: (n, 0, 0)),  # x (per sample)
                full((Cin_p, Cm_p)),                                   # w1
                full((1, Cm_p)), full((1, Cm_p)),                      # gn1 w, b
                full((HW, 9)),                                         # 3x3 tap masks
                full((9 * Cm_p, Cm_p)),                                # w2 (fused taps)
                full((1, Cm_p)), full((1, Cm_p)),                      # gn2 w, b
                full((Cm_p, Ce_p)),                                    # w3
                full((1, Ce_p)), full((1, Ce_p)),                      # gn3 w, b
            ],
            out_specs=pl.BlockSpec((None, HW, Ce_p), lambda n: (n, 0, 0)),
        ),
        compiler_params=pltpu.CompilerParams(
            dimension_semantics=("parallel",),       # batch across TCs on v7x
            vmem_limit_bytes=32 * 1024 * 1024,
        ),
    )(x, w1m, g1w2, g1b2, masks, w2m, g2w2, g2b2, w3m, g3w2, g3b2)

    # (N, HW, Ce_p) -> drop channel padding -> NCHW
    out = out[:, :, :Ce].reshape(N, H, W, Ce)
    return jnp.transpose(out, (0, 3, 1, 2))


def _reference_forward(x, w1, g1w, g1b, w2, g2w, g2b, w3, g3w, g3b, stride=1):
    def conv(x, w, s=1, p=0):
        return jax.lax.conv_general_dilated(
            x, w, (s, s), [(p, p), (p, p)],
            dimension_numbers=("NCHW", "OIHW", "NCHW"),
            precision=jax.lax.Precision.HIGHEST)

    def gn(y, w, b):
        mu = jnp.mean(y, axis=(1, 2, 3), keepdims=True)
        var = jnp.mean((y - mu) ** 2, axis=(1, 2, 3), keepdims=True)
        yh = (y - mu) / jnp.sqrt(var + EPS)
        return yh * w[None, :, None, None] + b[None, :, None, None]

    out = jax.nn.relu(gn(conv(x, w1), g1w, g1b))
    out = jax.nn.relu(gn(conv(out, w2, stride, 1), g2w, g2b))
    out = gn(conv(out, w3), g3w, g3b)
    return jax.nn.relu(out + x)


if __name__ == "__main__":
    key = jax.random.PRNGKey(0)
    N, in_ch, H, W = 2, 32, 16, 16
    out_ch = 8                        # expansion=4 -> 4*out_ch == in_ch (identity residual)
    stride = 1

    ks = jax.random.split(key, 10)
    w1 = 0.1 * jax.random.normal(ks[0], (out_ch, in_ch, 1, 1), jnp.float32)
    w2 = 0.1 * jax.random.normal(ks[1], (out_ch, out_ch, 3, 3), jnp.float32)
    w3 = 0.1 * jax.random.normal(ks[2], (4 * out_ch, out_ch, 1, 1), jnp.float32)
    g1w = 1.0 + 0.1 * jax.random.normal(ks[3], (out_ch,), jnp.float32)
    g1b = 0.1 * jax.random.normal(ks[4], (out_ch,), jnp.float32)
    g2w = 1.0 + 0.1 * jax.random.normal(ks[5], (out_ch,), jnp.float32)
    g2b = 0.1 * jax.random.normal(ks[6], (out_ch,), jnp.float32)
    g3w = 1.0 + 0.1 * jax.random.normal(ks[7], (4 * out_ch,), jnp.float32)
    g3b = 0.1 * jax.random.normal(ks[8], (4 * out_ch,), jnp.float32)
    x = jax.random.normal(ks[9], (N, in_ch, H, W), jnp.float32)

    y = bottleneck_forward(x, w1, g1w, g1b, w2, g2w, g2b, w3, g3w, g3b, stride)
    jax.block_until_ready(y)

    # Tolerance accounts for bf16 MXU matmuls (GN statistics / residual stay f32).
    y_ref = _reference_forward(x, w1, g1w, g1b, w2, g2w, g2b, w3, g3w, g3b, stride)
    np.testing.assert_allclose(np.asarray(y), np.asarray(y_ref), atol=5e-2, rtol=5e-2)

    print("KERNEL_OK")
</pallas_src>

<mosaic_0001>
module attributes {stable_mosaic.version = 11 : i64} {
  func.func @bottleneck_kernel(%arg0: i32, %arg1: memref<1x256x128xf32, #tpu.memory_space<vmem>>, %arg2: memref<128x128xbf16, #tpu.memory_space<vmem>>, %arg3: memref<1x128xf32, #tpu.memory_space<vmem>>, %arg4: memref<1x128xf32, #tpu.memory_space<vmem>>, %arg5: memref<256x9xf32, #tpu.memory_space<vmem>>, %arg6: memref<1152x128xbf16, #tpu.memory_space<vmem>>, %arg7: memref<1x128xf32, #tpu.memory_space<vmem>>, %arg8: memref<1x128xf32, #tpu.memory_space<vmem>>, %arg9: memref<128x128xbf16, #tpu.memory_space<vmem>>, %arg10: memref<1x128xf32, #tpu.memory_space<vmem>>, %arg11: memref<1x128xf32, #tpu.memory_space<vmem>>, %arg12: memref<1x256x128xf32, #tpu.memory_space<vmem>>) attributes {dimension_semantics = [#tpu.dimension_semantics<parallel>], iteration_bounds = array<i64: 2>, scalar_prefetch = 0 : i64, scratch_operands = 0 : i64, tpu.core_type = #tpu.core_type<tc>, window_params = [{transform_indices = @transform_0, window_bounds = array<i64: 1, 256, 128>}, {pipeline_mode = #tpu.pipeline_mode<synchronous>, transform_indices = @transform_1, window_bounds = array<i64: 128, 128>}, {pipeline_mode = #tpu.pipeline_mode<synchronous>, transform_indices = @transform_2, window_bounds = array<i64: 1, 128>}, {pipeline_mode = #tpu.pipeline_mode<synchronous>, transform_indices = @transform_3, window_bounds = array<i64: 1, 128>}, {pipeline_mode = #tpu.pipeline_mode<synchronous>, transform_indices = @transform_4, window_bounds = array<i64: 256, 9>}, {pipeline_mode = #tpu.pipeline_mode<synchronous>, transform_indices = @transform_5, window_bounds = array<i64: 1152, 128>}, {pipeline_mode = #tpu.pipeline_mode<synchronous>, transform_indices = @transform_6, window_bounds = array<i64: 1, 128>}, {pipeline_mode = #tpu.pipeline_mode<synchronous>, transform_indices = @transform_7, window_bounds = array<i64: 1, 128>}, {pipeline_mode = #tpu.pipeline_mode<synchronous>, transform_indices = @transform_8, window_bounds = array<i64: 128, 128>}, {pipeline_mode = #tpu.pipeline_mode<synchronous>, transform_indices = @transform_9, window_bounds = array<i64: 1, 128>}, {pipeline_mode = #tpu.pipeline_mode<synchronous>, transform_indices = @transform_10, window_bounds = array<i64: 1, 128>}, {transform_indices = @transform_11, window_bounds = array<i64: 1, 256, 128>}]} {
    %c0 = arith.constant 0 : index
    %c0_0 = arith.constant 0 : index
    %c0_1 = arith.constant 0 : index
    %0 = vector.load %arg1[%c0, %c0_0, %c0_1] : memref<1x256x128xf32, #tpu.memory_space<vmem>>, vector<1x256x128xf32>
    %1 = vector.shape_cast %0 : vector<1x256x128xf32> to vector<256x128xf32>
    %2 = arith.truncf %1 : vector<256x128xf32> to vector<256x128xbf16>
    %c0_2 = arith.constant 0 : index
    %c0_3 = arith.constant 0 : index
    %3 = vector.load %arg2[%c0_2, %c0_3] : memref<128x128xbf16, #tpu.memory_space<vmem>>, vector<128x128xbf16>
    %cst = arith.constant dense<0.000000e+00> : vector<256x128xf32>
    %4 = tpu.matmul %2, %3, %cst {dimension_numbers = #tpu.dot_dimension_numbers<[1], [0], [0], [1], [0, 0, 1, 1], [], []>} : vector<256x128xbf16>, vector<128x128xbf16>, vector<256x128xf32> -> vector<256x128xf32>
    %c0_4 = arith.constant 0 : index
    %c0_5 = arith.constant 0 : index
    %5 = vector.load %arg3[%c0_4, %c0_5] : memref<1x128xf32, #tpu.memory_space<vmem>>, vector<1x128xf32>
    %c0_6 = arith.constant 0 : index
    %c0_7 = arith.constant 0 : index
    %6 = vector.load %arg4[%c0_6, %c0_7] : memref<1x128xf32, #tpu.memory_space<vmem>>, vector<1x128xf32>
    %cst_8 = arith.constant dense<0.000000e+00> : vector<256xf32>
    %7 = vector.multi_reduction <add>, %4, %cst_8 [1] : vector<256x128xf32> to vector<256xf32>
    %8 = vector.shape_cast %7 : vector<256xf32> to vector<256x1xf32>
    %cst_9 = arith.constant dense<0.000000e+00> : vector<1xf32>
    %9 = vector.multi_reduction <add>, %8, %cst_9 [0] : vector<256x1xf32> to vector<1xf32>
    %10 = vector.shape_cast %9 : vector<1xf32> to vector<1x1xf32>
    %11 = arith.mulf %4, %4 : vector<256x128xf32>
    %cst_10 = arith.constant dense<0.000000e+00> : vector<256xf32>
    %12 = vector.multi_reduction <add>, %11, %cst_10 [1] : vector<256x128xf32> to vector<256xf32>
    %13 = vector.shape_cast %12 : vector<256xf32> to vector<256x1xf32>
    %cst_11 = arith.constant dense<0.000000e+00> : vector<1xf32>
    %14 = vector.multi_reduction <add>, %13, %cst_11 [0] : vector<256x1xf32> to vector<1xf32>
    %15 = vector.shape_cast %14 : vector<1xf32> to vector<1x1xf32>
    %cst_12 = arith.constant 4.8828125E-4 : f32
    %16 = vector.broadcast %cst_12 : f32 to vector<1x1xf32>
    %17 = arith.mulf %10, %16 : vector<1x1xf32>
    %cst_13 = arith.constant 4.8828125E-4 : f32
    %18 = vector.broadcast %cst_13 : f32 to vector<1x1xf32>
    %19 = arith.mulf %15, %18 : vector<1x1xf32>
    %20 = arith.mulf %17, %17 : vector<1x1xf32>
    %21 = arith.subf %19, %20 : vector<1x1xf32>
    %cst_14 = arith.constant 0.000000e+00 : f32
    %22 = vector.broadcast %cst_14 : f32 to vector<1x1xf32>
    %23 = arith.maximumf %21, %22 : vector<1x1xf32>
    %cst_15 = arith.constant 9.99999974E-6 : f32
    %24 = vector.broadcast %cst_15 : f32 to vector<1x1xf32>
    %25 = arith.addf %23, %24 : vector<1x1xf32>
    %26 = math.rsqrt %25 : vector<1x1xf32>
    %27 = vector.broadcast %26 : vector<1x1xf32> to vector<1x128xf32>
    %28 = arith.mulf %27, %5 : vector<1x128xf32>
    %29 = vector.broadcast %17 : vector<1x1xf32> to vector<1x128xf32>
    %30 = arith.mulf %29, %28 : vector<1x128xf32>
    %31 = arith.subf %6, %30 : vector<1x128xf32>
    %32 = vector.broadcast %28 : vector<1x128xf32> to vector<256x128xf32>
    %33 = arith.mulf %4, %32 : vector<256x128xf32>
    %34 = vector.broadcast %31 : vector<1x128xf32> to vector<256x128xf32>
    %35 = arith.addf %33, %34 : vector<256x128xf32>
    %cst_16 = arith.constant 0.000000e+00 : f32
    %36 = vector.broadcast %cst_16 : f32 to vector<256x128xf32>
    %37 = arith.maximumf %35, %36 : vector<256x128xf32>
    %c0_17 = arith.constant 0 : index
    %c0_18 = arith.constant 0 : index
    %38 = vector.load %arg5[%c0_17, %c0_18] : memref<256x9xf32, #tpu.memory_space<vmem>>, vector<256x9xf32>
    %c17_i32 = arith.constant 17 : i32
    %39 = tpu.dynamic_rotate %37 by %c17_i32 dim 0 : vector<256x128xf32>, i32 -> vector<256x128xf32>
    %40 = vector.extract_strided_slice %38 {offsets = [0, 0], sizes = [256, 1], strides = [1, 1]} : vector<256x9xf32> to vector<256x1xf32>
    %41 = vector.broadcast %40 : vector<256x1xf32> to vector<256x128xf32>
    %42 = arith.mulf %39, %41 : vector<256x128xf32>
    %43 = arith.truncf %42 : vector<256x128xf32> to vector<256x128xbf16>
    %c16_i32 = arith.constant 16 : i32
    %44 = tpu.dynamic_rotate %37 by %c16_i32 dim 0 : vector<256x128xf32>, i32 -> vector<256x128xf32>
    %45 = vector.extract_strided_slice %38 {offsets = [0, 1], sizes = [256, 1], strides = [1, 1]} : vector<256x9xf32> to vector<256x1xf32>
    %46 = vector.broadcast %45 : vector<256x1xf32> to vector<256x128xf32>
    %47 = arith.mulf %44, %46 : vector<256x128xf32>
    %48 = arith.truncf %47 : vector<256x128xf32> to vector<256x128xbf16>
    %c15_i32 = arith.constant 15 : i32
    %49 = tpu.dynamic_rotate %37 by %c15_i32 dim 0 : vector<256x128xf32>, i32 -> vector<256x128xf32>
    %50 = vector.extract_strided_slice %38 {offsets = [0, 2], sizes = [256, 1], strides = [1, 1]} : vector<256x9xf32> to vector<256x1xf32>
    %51 = vector.broadcast %50 : vector<256x1xf32> to vector<256x128xf32>
    %52 = arith.mulf %49, %51 : vector<256x128xf32>
    %53 = arith.truncf %52 : vector<256x128xf32> to vector<256x128xbf16>
    %c1_i32 = arith.constant 1 : i32
    %54 = tpu.dynamic_rotate %37 by %c1_i32 dim 0 : vector<256x128xf32>, i32 -> vector<256x128xf32>
    %55 = vector.extract_strided_slice %38 {offsets = [0, 3], sizes = [256, 1], strides = [1, 1]} : vector<256x9xf32> to vector<256x1xf32>
    %56 = vector.broadcast %55 : vector<256x1xf32> to vector<256x128xf32>
    %57 = arith.mulf %54, %56 : vector<256x128xf32>
    %58 = arith.truncf %57 : vector<256x128xf32> to vector<256x128xbf16>
    %59 = arith.truncf %37 : vector<256x128xf32> to vector<256x128xbf16>
    %c255_i32 = arith.constant 255 : i32
    %60 = tpu.dynamic_rotate %37 by %c255_i32 dim 0 : vector<256x128xf32>, i32 -> vector<256x128xf32>
    %61 = vector.extract_strided_slice %38 {offsets = [0, 5], sizes = [256, 1], strides = [1, 1]} : vector<256x9xf32> to vector<256x1xf32>
    %62 = vector.broadcast %61 : vector<256x1xf32> to vector<256x128xf32>
    %63 = arith.mulf %60, %62 : vector<256x128xf32>
    %64 = arith.truncf %63 : vector<256x128xf32> to vector<256x128xbf16>
    %c241_i32 = arith.constant 241 : i32
    %65 = tpu.dynamic_rotate %37 by %c241_i32 dim 0 : vector<256x128xf32>, i32 -> vector<256x128xf32>
    %66 = vector.extract_strided_slice %38 {offsets = [0, 6], sizes = [256, 1], strides = [1, 1]} : vector<256x9xf32> to vector<256x1xf32>
    %67 = vector.broadcast %66 : vector<256x1xf32> to vector<256x128xf32>
    %68 = arith.mulf %65, %67 : vector<256x128xf32>
    %69 = arith.truncf %68 : vector<256x128xf32> to vector<256x128xbf16>
    %c240_i32 = arith.constant 240 : i32
    %70 = tpu.dynamic_rotate %37 by %c240_i32 dim 0 : vector<256x128xf32>, i32 -> vector<256x128xf32>
    %71 = vector.extract_strided_slice %38 {offsets = [0, 7], sizes = [256, 1], strides = [1, 1]} : vector<256x9xf32> to vector<256x1xf32>
    %72 = vector.broadcast %71 : vector<256x1xf32> to vector<256x128xf32>
    %73 = arith.mulf %70, %72 : vector<256x128xf32>
    %74 = arith.truncf %73 : vector<256x128xf32> to vector<256x128xbf16>
    %c239_i32 = arith.constant 239 : i32
    %75 = tpu.dynamic_rotate %37 by %c239_i32 dim 0 : vector<256x128xf32>, i32 -> vector<256x128xf32>
    %76 = vector.extract_strided_slice %38 {offsets = [0, 8], sizes = [256, 1], strides = [1, 1]} : vector<256x9xf32> to vector<256x1xf32>
    %77 = vector.broadcast %76 : vector<256x1xf32> to vector<256x128xf32>
    %78 = arith.mulf %75, %77 : vector<256x128xf32>
    %79 = arith.truncf %78 : vector<256x128xf32> to vector<256x128xbf16>
    %80 = tpu.concatenate %43, %48, %53, %58, %59, %64, %69, %74, %79 in 1 : vector<256x128xbf16>, vector<256x128xbf16>, vector<256x128xbf16>, vector<256x128xbf16>, vector<256x128xbf16>, vector<256x128xbf16>, vector<256x128xbf16>, vector<256x128xbf16>, vector<256x128xbf16> -> vector<256x1152xbf16>
    %c0_19 = arith.constant 0 : index
    %c0_20 = arith.constant 0 : index
    %81 = vector.load %arg6[%c0_19, %c0_20] : memref<1152x128xbf16, #tpu.memory_space<vmem>>, vector<1152x128xbf16>
    %cst_21 = arith.constant dense<0.000000e+00> : vector<256x128xf32>
    %82 = tpu.matmul %80, %81, %cst_21 {dimension_numbers = #tpu.dot_dimension_numbers<[1], [0], [0], [1], [0, 0, 1, 1], [], []>} : vector<256x1152xbf16>, vector<1152x128xbf16>, vector<256x128xf32> -> vector<256x128xf32>
    %c0_22 = arith.constant 0 : index
    %c0_23 = arith.constant 0 : index
    %83 = vector.load %arg7[%c0_22, %c0_23] : memref<1x128xf32, #tpu.memory_space<vmem>>, vector<1x128xf32>
    %c0_24 = arith.constant 0 : index
    %c0_25 = arith.constant 0 : index
    %84 = vector.load %arg8[%c0_24, %c0_25] : memref<1x128xf32, #tpu.memory_space<vmem>>, vector<1x128xf32>
    %cst_26 = arith.constant dense<0.000000e+00> : vector<256xf32>
    %85 = vector.multi_reduction <add>, %82, %cst_26 [1] : vector<256x128xf32> to vector<256xf32>
    %86 = vector.shape_cast %85 : vector<256xf32> to vector<256x1xf32>
    %cst_27 = arith.constant dense<0.000000e+00> : vector<1xf32>
    %87 = vector.multi_reduction <add>, %86, %cst_27 [0] : vector<256x1xf32> to vector<1xf32>
    %88 = vector.shape_cast %87 : vector<1xf32> to vector<1x1xf32>
    %89 = arith.mulf %82, %82 : vector<256x128xf32>
    %cst_28 = arith.constant dense<0.000000e+00> : vector<256xf32>
    %90 = vector.multi_reduction <add>, %89, %cst_28 [1] : vector<256x128xf32> to vector<256xf32>
    %91 = vector.shape_cast %90 : vector<256xf32> to vector<256x1xf32>
    %cst_29 = arith.constant dense<0.000000e+00> : vector<1xf32>
    %92 = vector.multi_reduction <add>, %91, %cst_29 [0] : vector<256x1xf32> to vector<1xf32>
    %93 = vector.shape_cast %92 : vector<1xf32> to vector<1x1xf32>
    %cst_30 = arith.constant 4.8828125E-4 : f32
    %94 = vector.broadcast %cst_30 : f32 to vector<1x1xf32>
    %95 = arith.mulf %88, %94 : vector<1x1xf32>
    %cst_31 = arith.constant 4.8828125E-4 : f32
    %96 = vector.broadcast %cst_31 : f32 to vector<1x1xf32>
    %97 = arith.mulf %93, %96 : vector<1x1xf32>
    %98 = arith.mulf %95, %95 : vector<1x1xf32>
    %99 = arith.subf %97, %98 : vector<1x1xf32>
    %cst_32 = arith.constant 0.000000e+00 : f32
    %100 = vector.broadcast %cst_32 : f32 to vector<1x1xf32>
    %101 = arith.maximumf %99, %100 : vector<1x1xf32>
    %cst_33 = arith.constant 9.99999974E-6 : f32
    %102 = vector.broadcast %cst_33 : f32 to vector<1x1xf32>
    %103 = arith.addf %101, %102 : vector<1x1xf32>
    %104 = math.rsqrt %103 : vector<1x1xf32>
    %105 = vector.broadcast %104 : vector<1x1xf32> to vector<1x128xf32>
    %106 = arith.mulf %105, %83 : vector<1x128xf32>
    %107 = vector.broadcast %95 : vector<1x1xf32> to vector<1x128xf32>
    %108 = arith.mulf %107, %106 : vector<1x128xf32>
    %109 = arith.subf %84, %108 : vector<1x128xf32>
    %110 = vector.broadcast %106 : vector<1x128xf32> to vector<256x128xf32>
    %111 = arith.mulf %82, %110 : vector<256x128xf32>
    %112 = vector.broadcast %109 : vector<1x128xf32> to vector<256x128xf32>
    %113 = arith.addf %111, %112 : vector<256x128xf32>
    %cst_34 = arith.constant 0.000000e+00 : f32
    %114 = vector.broadcast %cst_34 : f32 to vector<256x128xf32>
    %115 = arith.maximumf %113, %114 : vector<256x128xf32>
    %116 = arith.truncf %115 : vector<256x128xf32> to vector<256x128xbf16>
    %c0_35 = arith.constant 0 : index
    %c0_36 = arith.constant 0 : index
    %117 = vector.load %arg9[%c0_35, %c0_36] : memref<128x128xbf16, #tpu.memory_space<vmem>>, vector<128x128xbf16>
    %cst_37 = arith.constant dense<0.000000e+00> : vector<256x128xf32>
    %118 = tpu.matmul %116, %117, %cst_37 {dimension_numbers = #tpu.dot_dimension_numbers<[1], [0], [0], [1], [0, 0, 1, 1], [], []>} : vector<256x128xbf16>, vector<128x128xbf16>, vector<256x128xf32> -> vector<256x128xf32>
    %c0_38 = arith.constant 0 : index
    %c0_39 = arith.constant 0 : index
    %119 = vector.load %arg10[%c0_38, %c0_39] : memref<1x128xf32, #tpu.memory_space<vmem>>, vector<1x128xf32>
    %c0_40 = arith.constant 0 : index
    %c0_41 = arith.constant 0 : index
    %120 = vector.load %arg11[%c0_40, %c0_41] : memref<1x128xf32, #tpu.memory_space<vmem>>, vector<1x128xf32>
    %cst_42 = arith.constant dense<0.000000e+00> : vector<256xf32>
    %121 = vector.multi_reduction <add>, %118, %cst_42 [1] : vector<256x128xf32> to vector<256xf32>
    %122 = vector.shape_cast %121 : vector<256xf32> to vector<256x1xf32>
    %cst_43 = arith.constant dense<0.000000e+00> : vector<1xf32>
    %123 = vector.multi_reduction <add>, %122, %cst_43 [0] : vector<256x1xf32> to vector<1xf32>
    %124 = vector.shape_cast %123 : vector<1xf32> to vector<1x1xf32>
    %125 = arith.mulf %118, %118 : vector<256x128xf32>
    %cst_44 = arith.constant dense<0.000000e+00> : vector<256xf32>
    %126 = vector.multi_reduction <add>, %125, %cst_44 [1] : vector<256x128xf32> to vector<256xf32>
    %127 = vector.shape_cast %126 : vector<256xf32> to vector<256x1xf32>
    %cst_45 = arith.constant dense<0.000000e+00> : vector<1xf32>
    %128 = vector.multi_reduction <add>, %127, %cst_45 [0] : vector<256x1xf32> to vector<1xf32>
    %129 = vector.shape_cast %128 : vector<1xf32> to vector<1x1xf32>
    %cst_46 = arith.constant 1.22070313E-4 : f32
    %130 = vector.broadcast %cst_46 : f32 to vector<1x1xf32>
    %131 = arith.mulf %124, %130 : vector<1x1xf32>
    %cst_47 = arith.constant 1.22070313E-4 : f32
    %132 = vector.broadcast %cst_47 : f32 to vector<1x1xf32>
    %133 = arith.mulf %129, %132 : vector<1x1xf32>
    %134 = arith.mulf %131, %131 : vector<1x1xf32>
    %135 = arith.subf %133, %134 : vector<1x1xf32>
    %cst_48 = arith.constant 0.000000e+00 : f32
    %136 = vector.broadcast %cst_48 : f32 to vector<1x1xf32>
    %137 = arith.maximumf %135, %136 : vector<1x1xf32>
    %cst_49 = arith.constant 9.99999974E-6 : f32
    %138 = vector.broadcast %cst_49 : f32 to vector<1x1xf32>
    %139 = arith.addf %137, %138 : vector<1x1xf32>
    %140 = math.rsqrt %139 : vector<1x1xf32>
    %141 = vector.broadcast %140 : vector<1x1xf32> to vector<1x128xf32>
    %142 = arith.mulf %141, %119 : vector<1x128xf32>
    %143 = vector.broadcast %131 : vector<1x1xf32> to vector<1x128xf32>
    %144 = arith.mulf %143, %142 : vector<1x128xf32>
    %145 = arith.subf %120, %144 : vector<1x128xf32>
    %146 = vector.broadcast %142 : vector<1x128xf32> to vector<256x128xf32>
    %147 = arith.mulf %118, %146 : vector<256x128xf32>
    %148 = vector.broadcast %145 : vector<1x128xf32> to vector<256x128xf32>
    %149 = arith.addf %147, %148 : vector<256x128xf32>
    %150 = arith.addf %149, %1 : vector<256x128xf32>
    %cst_50 = arith.constant 0.000000e+00 : f32
    %151 = vector.broadcast %cst_50 : f32 to vector<256x128xf32>
    %152 = arith.maximumf %150, %151 : vector<256x128xf32>
    %c0_51 = arith.constant 0 : index
    %c0_52 = arith.constant 0 : index
    %c0_53 = arith.constant 0 : index
    %153 = vector.load %arg12[%c0_51, %c0_52, %c0_53] : memref<1x256x128xf32, #tpu.memory_space<vmem>>, vector<1x256x128xf32>
    %154 = vector.shape_cast %153 : vector<1x256x128xf32> to vector<256x128xf32>
    %155 = vector.shape_cast %152 : vector<256x128xf32> to vector<1x256x128xf32>
    tpu.vector_store %arg12[%c0_51, %c0_52, %c0_53], %155 {strides = array<i32>} : memref<1x256x128xf32, #tpu.memory_space<vmem>>, vector<1x256x128xf32>,
    return
  }
  func.func @transform_0(%arg0: i32) -> (i32, i32, i32) {
    %c0_i32 = arith.constant 0 : i32
    %c0_i32_0 = arith.constant 0 : i32
    %c0_i32_1 = arith.constant 0 : i32
    return %arg0, %c0_i32, %c0_i32_0 : i32, i32, i32
  }
  func.func @transform_1(%arg0: i32) -> (i32, i32) {
    %c0_i32 = arith.constant 0 : i32
    %c0_i32_0 = arith.constant 0 : i32
    %c0_i32_1 = arith.constant 0 : i32
    return %c0_i32, %c0_i32_0 : i32, i32
  }
  func.func @transform_2(%arg0: i32) -> (i32, i32) {
    %c0_i32 = arith.constant 0 : i32
    %c0_i32_0 = arith.constant 0 : i32
    %c0_i32_1 = arith.constant 0 : i32
    return %c0_i32, %c0_i32_0 : i32, i32
  }
  func.func @transform_3(%arg0: i32) -> (i32, i32) {
    %c0_i32 = arith.constant 0 : i32
    %c0_i32_0 = arith.constant 0 : i32
    %c0_i32_1 = arith.constant 0 : i32
    return %c0_i32, %c0_i32_0 : i32, i32
  }
  func.func @transform_4(%arg0: i32) -> (i32, i32) {
    %c0_i32 = arith.constant 0 : i32
    %c0_i32_0 = arith.constant 0 : i32
    %c0_i32_1 = arith.constant 0 : i32
    return %c0_i32, %c0_i32_0 : i32, i32
  }
  func.func @transform_5(%arg0: i32) -> (i32, i32) {
    %c0_i32 = arith.constant 0 : i32
    %c0_i32_0 = arith.constant 0 : i32
    %c0_i32_1 = arith.constant 0 : i32
    return %c0_i32, %c0_i32_0 : i32, i32
  }
  func.func @transform_6(%arg0: i32) -> (i32, i32) {
    %c0_i32 = arith.constant 0 : i32
    %c0_i32_0 = arith.constant 0 : i32
    %c0_i32_1 = arith.constant 0 : i32
    return %c0_i32, %c0_i32_0 : i32, i32
  }
  func.func @transform_7(%arg0: i32) -> (i32, i32) {
    %c0_i32 = arith.constant 0 : i32
    %c0_i32_0 = arith.constant 0 : i32
    %c0_i32_1 = arith.constant 0 : i32
    return %c0_i32, %c0_i32_0 : i32, i32
  }
  func.func @transform_8(%arg0: i32) -> (i32, i32) {
    %c0_i32 = arith.constant 0 : i32
    %c0_i32_0 = arith.constant 0 : i32
    %c0_i32_1 = arith.constant 0 : i32
    return %c0_i32, %c0_i32_0 : i32, i32
  }
  func.func @transform_9(%arg0: i32) -> (i32, i32) {
    %c0_i32 = arith.constant 0 : i32
    %c0_i32_0 = arith.constant 0 : i32
    %c0_i32_1 = arith.constant 0 : i32
    return %c0_i32, %c0_i32_0 : i32, i32
  }
  func.func @transform_10(%arg0: i32) -> (i32, i32) {
    %c0_i32 = arith.constant 0 : i32
    %c0_i32_0 = arith.constant 0 : i32
    %c0_i32_1 = arith.constant 0 : i32
    return %c0_i32, %c0_i32_0 : i32, i32
  }
  func.func @transform_11(%arg0: i32) -> (i32, i32, i32) {
    %c0_i32 = arith.constant 0 : i32
    %c0_i32_0 = arith.constant 0 : i32
    %c0_i32_1 = arith.constant 0 : i32
    return %arg0, %c0_i32, %c0_i32_0 : i32, i32, i32
  }
}

</mosaic_0001>

<bundles_post_ra>
// kernel: tpu_custom_call.1
= control target key start
LH: loop header
LB: loop body
LE: loop exit
PB: predicated region body
PF: predicated region fallthrough
CT: control target
= control target key end

     0   :  { %s11114_s0 = inlined_call_operand.hbm [shape: f32[2,256,128], index: 0, kind: input, shape index: {}]   ;;  %s11115_s1 = inlined_call_operand.vmem [shape: bf16[128,128], index: 1, kind: input, shape index: {}]   ;;  %s11116_s2 = inlined_call_operand.vmem [shape: f32[1,128], index: 2, kind: input, shape index: {}]   ;;  %s11117_s3 = inlined_call_operand.vmem [shape: f32[1,128], index: 3, kind: input, shape index: {}]   ;;  %s11118_s4 = inlined_call_operand.vmem [shape: f32[256,9], index: 4, kind: input, shape index: {}]   ;;  %s11119_s5 = inlined_call_operand.hbm [shape: bf16[1152,128], index: 5, kind: input, shape index: {}]   ;;  %s11120_s6 = inlined_call_operand.vmem [shape: f32[1,128], index: 6, kind: input, shape index: {}]   ;;  %s11121_s7 = inlined_call_operand.vmem [shape: f32[1,128], index: 7, kind: input, shape index: {}]   ;;  %s11122_s8 = inlined_call_operand.vmem [shape: bf16[128,128], index: 8, kind: input, shape index: {}]   ;;  %s11123_s9 = inlined_call_operand.vmem [shape: f32[1,128], index: 9, kind: input, shape index: {}]   ;;  %s11124_s10 = inlined_call_operand.vmem [shape: f32[1,128], index: 10, kind: input, shape index: {}]   ;;  %s11125_s11 = inlined_call_operand.hbm [shape: f32[2,256,128], index: 11, kind: output, shape index: {}]  }
   0x1   :  { %11443 = sst [smem:[#allocation170_spill]] %s11119_s5 }
   0x2   :  { %16 = vsyncpa [#allocation3], 0 }
   0x3   :  { %18 = vsyncpa [#allocation3 + $0x1], 0 }
   0x4   :  { %19 = vsyncpa [#allocation6], 0 }
   0x5   :  { %20 = vsyncpa [#allocation4], 0 }
   0x6   :  { %22 = vsyncpa [#allocation4 + $0x1], 0  ;;  %s7008_s17 = smov 0   ;;  %s7010_s18 = smov 0  }
   0x7   :  { %s7012_s19 = smov 0   ;;  %s7014_s20 = smov 0  }
   0x8 LB: > { %11444 = sst [smem:[#allocation11_spill]] %s6927_s19  ;;  %s7029_s21 = sadd.s32 4294967295, %s6931_s20   ;;  %s6931_s20 = sphi %s7014_s20, %s12279_s20   ;;  %s6927_s19 = sphi %s7012_s19, %s12281_s19   ;;  %s6923_s18 = sphi %s7010_s18, %s12283_s18   ;;  %s6919_s17 = sphi %s7008_s17, %s12282_s17  }
   0x9   : > { %s6033_s22 = sadd.s32 4294967294, %s6931_s20   ;;  %p48_p0 = scmp.ne.s32.totalorder %s6923_s18, %s6919_s17 }
   0xa   : > { %p49_p1 = scmp.eq.s32.totalorder %s7029_s21, 0  ;;  %p282_p2 = scmp.eq.s32.totalorder %s7029_s21, 1 }
   0xb   : > { %p288_p3 = scmp.eq.s32.totalorder %s6033_s22, 1  ;;  %p6034_p5 = scmp.ge.s32.totalorder %s6931_s20, 1 }
   0xc   : > { %p7038_p4 = por %p49_p1, %p48_p0  ;;  %p295_p7 = scmp.lt.s32.totalorder %s6931_s20, 3 }
   0xd   : > { %p7043_p6 = por %p288_p3, %p48_p0  ;;  %s11448_s5 = sld [smem:[#allocation170_spill]] }
   0xe   : > { %p7051_p8 = pnand %p6034_p5, %p295_p7  ;;  %s6933_s29 = smov [#allocation5]  }
   0xf   : > { %s11446_s24 = scalar_select %p7043_p6, 1, 0 }
  0x10   : > { %p6523_p9 = pneg %p7051_p8  ;;  %s320_s30 = sshll.u32 %s6933_s29, 4  ;;  %s321_s30 = int_to_ptr.vmem [resolvable:$true] %s320_s30 }
  0x11   : > { %11447 = sst [smem:[#allocation12_spill]] %s11446_s24  ;;  %s7061_s12 = sadd.s32 1, %s6931_s20  }
  0x12   : > { %p6524_p10 = pnand %p6523_p9, %p49_p1  ;;  %11450 = sst [smem:[#allocation13_spill]] %s7061_s12 }
  0x13   : > { %s318_s27 = sshll.u32 %s11448_s5, 4  ;;  %s6934_s13 = smov 64   ;;  %s319_s27 = int_to_ptr.hbm [resolvable:$true] %s318_s27 }
  0x14   : > { %s6935_s14 = smov 4   ;;  %s32_s15 = ssub.s32 %s6931_s20, %s7061_s12 }
  0x15   : > { %6526 = dma.hbm_to_vmem [thread:$0]  (!%p6524_p10), %s319_s27, 9216, %s321_s30, [#allocation6], %s6934_s13, %s6934_s13, %s6935_s14  }
  0x16   : > { %s35_s16 = sadd.s32 1, %s6927_s19  ;;  %p33_p12 = scmp.eq.s32.totalorder %s32_s15, 0 }
  0x17   : > { %p42_p13 = scmp.ne.s32.totalorder %s6927_s19, %s6923_s18  ;;  %p43_p0 = scmp.eq.s32.totalorder %s6931_s20, 0 }
  0x18   : > { %p6536_p3 = scmp.lt.s32.totalorder %s6931_s20, 2  ;;  %s349_s26 = sand.u32 1, %s6927_s19  }
  0x19   : > { %s7071_s22 = scalar_select %p33_p12, %s6927_s19, %s35_s16  }
  0x1a   : > { %p44_p5 = por %p43_p0, %p42_p13  ;;  %p7075_p7 = por %p282_p2, %p42_p13 }
  0x1b   : > { %11451 = sst [smem:[#allocation14_spill]] %s7071_s22  ;;  %s6401_s29 = sshll.u32 %s6931_s20, 8 }
  0x1c   : > { %s6037_s5 = sshll.u32 %s349_s26, 8  ;;  %s358_s30 = scalar_lea.hbm %s11114_s0, %s6401_s29 }
  0x1d   : > { %s359_s13 = sshll.u32 %s358_s30, 4  ;;  %s353_s14 = scalar_lea.vmem [#allocation2], %s6037_s5  ;;  %s360_s13 = int_to_ptr.hbm [resolvable:$true] %s359_s13 }
  0x1e   : > { %s361_s15 = sshll.u32 %s353_s14, 4  ;;  %p7086_p9 = pnand %p6536_p3, %p44_p5  ;;  %s362_s15 = int_to_ptr.vmem [resolvable:$true] %s361_s15 }
  0x1f   : > { %s350_s22 = scalar_lea.sflag [#allocation3], %s349_s26  ;;  %s6831_s12 = sshra.s32 %s360_s13, 4  ;;  %s6832_s12 = int_to_ptr.hbm [resolvable:$true] %s6831_s12 }
  0x20   : > { %s6833_s19 = scalar_lea.hbm %s6832_s12, 256  ;;  %p6835_p10 = pneg %p7086_p9 }
  0x21   : > { %p6834_p2 = scmp.ne.s32.totalorder %s6832_s12, %s6833_s19  ;;  %s6838_s29 = scalar_lea.hbm %s11114_s0, 512 }
  0x22   : > { %p6839_p0 = scmp.lt.s32.totalorder %s6832_s12, %s11114_s0  ;;  %p6840_p3 = scmp.lt.s32.totalorder %s6838_s29, %s6833_s19 }
  0x23   : > { %p6836_p12 = pnand %p6835_p10, %p6834_p2 }
  0x24   : > { %p6841_p5 = por %p6840_p3, %p6839_p0 }
  0x25   : > { %p6837_p13 = pneg %p6836_p12 }
  0x27   : > { %p6842_p11 = pnand %p6841_p5, %p6837_p13 }
  0x29   : > { %6845 = shalt.err (!%p6842_p11)
}
  0x2a   : > { %s6936_s26 = smov 128   ;;  %s6937_s14 = smov 8  }
  0x2b   : > { %6530 = dma.hbm_to_vmem [thread:$0]  (!%p7086_p9), %s360_s13, 4096, %s362_s15, %s350_s22, %s6936_s26, %s6936_s26, %s6937_s14  }
  0x2c   : > { %373 = sbr.rel (%p7051_p8) target bundleno = 2303 (0x8ff), region = 64 }
  0x31   : > { %s7103_s24 = sand.u32 1, %s6923_s18  }
  0x32   : > { %s6041_s12 = sshll.u32 %s7103_s24, 8  ;;  %s376_s19 = scalar_lea.sflag [#allocation3], %s7103_s24 }
  0x33   : > { %s7109_s5 = scalar_lea.vmem [#allocation2], %s6041_s12 }
  0x34   : > { %6906 = dma.done.wait (%p7038_p4), %s376_s19, 4096  }
  0x35   : > { %6908 = vsyncadd (%p7038_p4), %s376_s19, 4294963200 }
  0x36   : > { %6910 = dma.done.wait (%p49_p1), [#allocation6], 9216  }
  0x37   : > { %6912 = vsyncadd (%p49_p1), [#allocation6], 4294958080  ;;  %v6409_v0 = vld [vmem:[%s11115_s1 + $0x38] sm:$0xff]  ;;  %v6408_v1 = vld [vmem:[%s11115_s1 + $0x30] sm:$0xff]  ;;  %v6938_v22 = vmov 0   ;;  %s11005_s28 = scalar_lea.vmem [#allocation7], %s6041_s12 }
  0x38   : > { %536 = vmatpush.bf16.msra.mxu0 %v6409_v0  ;;  %6491 = vmatpush.bf16.msra.mxu3 %v6409_v0  ;;  %v6407_v2 = vld [vmem:[%s11115_s1 + $0x28] sm:$0xff]  ;;  %v6406_v3 = vld [vmem:[%s11115_s1 + $0x20] sm:$0xff]  ;;  %v6405_v4 = vld [vmem:[%s11115_s1 + $0x18] sm:$0xff]  ;;  %s6490_s12 = sshll.u32 %s7029_s21, 8  ;;  %s5947_s15 = sshll.u32 %s11005_s28, 4  ;;  %s5948_s15 = int_to_ptr.vmem [resolvable:$true] %s5947_s15 }
  0x39   : > { %v6404_v5 = vld [vmem:[%s11115_s1 + $0x10] sm:$0xff]  ;;  %v6403_v6 = vld [vmem:[%s11115_s1 + $0x8] sm:$0xff]  ;;  %v6402_v7 = vld [vmem:[%s11115_s1] sm:$0xff]  ;;  %6586 = vset.pattern.permute.xlu1 %v6938_v22  ;;  %6587 = vset.pattern.permute.xlu2 %v6938_v22  ;;  %s5946_s13 = scalar_lea.hbm %s11125_s11, %s6490_s12  ;;  %s6881_s26 = scalar_lea.hbm %s11125_s11, 512 }
  0x3a   : > { %v424_v8 = vld [vmem:[%s7109_s5] sm:$0xff]  ;;  %v425_v9 = vld [vmem:[%s7109_s5 + $0x8] sm:$0xff]  ;;  %v426_v14 = vld [vmem:[%s7109_s5 + $0x10] sm:$0xff]  ;;  %6588 = vset.pattern.permute.xlu0 %v6938_v22  ;;  %s5949_s23 = sshll.u32 %s5946_s13, 4  ;;  %s5950_s23 = int_to_ptr.hbm [resolvable:$true] %s5949_s23 }
  0x3b   : > { %v448_v10 = vld [vmem:[%s7109_s5 + $0xc0] sm:$0xff]  ;;  %v449_v11 = vld [vmem:[%s7109_s5 + $0xc8] sm:$0xff]  ;;  %v456_v12 = vpack.c.bf16 %v425_v9, %v424_v8  ;;  %v427_v15 = vld [vmem:[%s7109_s5 + $0x18] sm:$0xff]  ;;  %s6875_s16 = sshra.s32 %s5950_s23, 4  ;;  %s6876_s16 = int_to_ptr.hbm [resolvable:$true] %s6875_s16 }
  0x3c   : > { %537 = vmatpush.bf16.msra.mxu0 %v6408_v1  ;;  %6492 = vmatpush.bf16.msra.mxu3 %v6408_v1  ;;  %v468_v13 = vpack.c.bf16 %v449_v11, %v448_v10  ;;  %v450_v16 = vld [vmem:[%s7109_s5 + $0xd0] sm:$0xff]  ;;  %v451_v17 = vld [vmem:[%s7109_s5 + $0xd8] sm:$0xff]  ;;  %v457_v18 = vpack.c.bf16 %v427_v15, %v426_v14  ;;  %v7154_v20 = vld [vmem:[%s11118_s4] sm:$0xff]  ;;  %s6877_s29 = scalar_lea.hbm %s6876_s16, 256  ;;  %p6882_p11 = scmp.lt.s32.totalorder %s6876_s16, %s11125_s11 }
  0x3d   : > { %v469_v19 = vpack.c.bf16 %v451_v17, %v450_v16  ;;  %v7159_v21 = vld [vmem:[%s11118_s4 + $0x8] sm:$0xff]  ;;  %1083 = vperm.xlu1 %6586, %v7154_v20   ;;  %v428_v23 = vld [vmem:[%s7109_s5 + $0x20] sm:$0xff]  ;;  %v7175_v30 = vld [vmem:[%s11118_s4 + $0x18] sm:$0xff]  ;;  %p6878_p1 = scmp.ne.s32.totalorder %s6876_s16, %s6877_s29  ;;  %p6883_p9 = scmp.lt.s32.totalorder %s6881_s26, %s6877_s29 }
  0x3e   : > { %1088 = vperm.xlu2 %6587, %v7159_v21   ;;  %v429_v24 = vld [vmem:[%s7109_s5 + $0x28] sm:$0xff]  ;;  %v452_v25 = vld [vmem:[%s7109_s5 + $0xe0] sm:$0xff]  ;;  %v7180_v31 = vld [vmem:[%s11118_s4 + $0x10] sm:$0xff] }
  0x3f   : > { %v453_v26 = vld [vmem:[%s7109_s5 + $0xe8] sm:$0xff]  ;;  %v458_v27 = vpack.c.bf16 %v429_v24, %v428_v23  ;;  %v7170_v29 = vld [vmem:[%s11118_s4 + $0x20] sm:$0xff]  ;;  %11454 = vst [vmem:[#allocation15_spill] sm:$0xff] %v7180_v31  ;;  %1093 = vperm.xlu0 %6588, %v7180_v31   ;;  %v7188_v32 = vld [vmem:[%s11118_s4 + $0x30] sm:$0xff]  ;;  %p6879_p4 = pnand %p6878_p1, %p7075_p7  ;;  %p6884_p2 = por %p6883_p9, %p6882_p11 }
  0x40   : > { %538 = vmatpush.bf16.msra.mxu0 %v6407_v2  ;;  %6493 = vmatpush.bf16.msra.mxu3 %v6407_v2  ;;  %v470_v28 = vpack.c.bf16 %v453_v26, %v452_v25  ;;  %v7193_v33 = vld [vmem:[%s11118_s4 + $0x28] sm:$0xff]  ;;  %v430_v34 = vld [vmem:[%s7109_s5 + $0x30] sm:$0xff]  ;;  %v431_v35 = vld [vmem:[%s7109_s5 + $0x38] sm:$0xff] }
  0x41   : > { %v454_v36 = vld [vmem:[%s7109_s5 + $0xf0] sm:$0xff]  ;;  %v455_v37 = vld [vmem:[%s7109_s5 + $0xf8] sm:$0xff]  ;;  %v459_v38 = vpack.c.bf16 %v431_v35, %v430_v34  ;;  %v7204_v40 = vld [vmem:[%s11118_s4 + $0x48] sm:$0xff]  ;;  %p6880_p8 = pneg %p6879_p4 }
  0x42   : > { %v471_v39 = vpack.c.bf16 %v455_v37, %v454_v36  ;;  %11455 = vst [vmem:[#allocation16_spill] sm:$0xff] %v7204_v40  ;;  %v7209_v41 = vld [vmem:[%s11118_s4 + $0x40] sm:$0xff]  ;;  %v7214_v42 = vld [vmem:[%s11118_s4 + $0x38] sm:$0xff]  ;;  %v433_v44 = vld [vmem:[%s7109_s5 + $0x48] sm:$0xff] }
  0x43   : > { %v432_v43 = vld [vmem:[%s7109_s5 + $0x40] sm:$0xff]  ;;  %v434_v46 = vld [vmem:[%s7109_s5 + $0x50] sm:$0xff]  ;;  %v435_v47 = vld [vmem:[%s7109_s5 + $0x58] sm:$0xff]  ;;  %p6885_p10 = pnand %p6884_p2, %p6880_p8 }
  0x44   : > { %539 = vmatpush.bf16.msra.mxu0 %v6406_v3  ;;  %6494 = vmatpush.bf16.msra.mxu3 %v6406_v3  ;;  %v460_v45 = vpack.c.bf16 %v433_v44, %v432_v43  ;;  %v461_v48 = vpack.c.bf16 %v435_v47, %v434_v46  ;;  %v436_v49 = vld [vmem:[%s7109_s5 + $0x60] sm:$0xff]  ;;  %v437_v50 = vld [vmem:[%s7109_s5 + $0x68] sm:$0xff]  ;;  %v438_v52 = vld [vmem:[%s7109_s5 + $0x70] sm:$0xff] }
  0x45   : > { %1103 = vperm.xlu1 %6586, %v7170_v29   ;;  %v462_v51 = vpack.c.bf16 %v437_v50, %v436_v49  ;;  %v439_v53 = vld [vmem:[%s7109_s5 + $0x78] sm:$0xff]  ;;  %v440_v55 = vld [vmem:[%s7109_s5 + $0x80] sm:$0xff]  ;;  %v441_v56 = vld [vmem:[%s7109_s5 + $0x88] sm:$0xff] }
  0x46   : > { %1098 = vperm.xlu2 %6587, %v7175_v30   ;;  %v463_v54 = vpack.c.bf16 %v439_v53, %v438_v52  ;;  %v464_v57 = vpack.c.bf16 %v441_v56, %v440_v55  ;;  %v442_v63 = vld [vmem:[%s7109_s5 + $0x90] sm:$0xff]  ;;  %v443_v0 = vld [vmem:[%s7109_s5 + $0x98] sm:$0xff]  ;;  %v445_v8 = vld [vmem:[%s7109_s5 + $0xa8] sm:$0xff] }
  0x47   : > { %1128 = vperm.xlu0 %6588, %v7204_v40   ;;  %v465_v2 = vpack.c.bf16 %v443_v0, %v442_v63 }
  0x48   : > { %540 = vmatpush.bf16.msra.mxu0 %v6405_v4  ;;  %6495 = vmatpush.bf16.msra.mxu3 %v6405_v4 }
  0x4c   : > { %541 = vmatpush.bf16.msra.mxu0 %v6404_v5  ;;  %6496 = vmatpush.bf16.msra.mxu3 %v6404_v5 }
  0x4d   : > { %1113 = vperm.xlu1 %6586, %v7188_v32  }
  0x4e   : > { %1108 = vperm.xlu2 %6587, %v7193_v33  }
  0x50   : > { %542 = vmatpush.bf16.msra.mxu0 %v6403_v6  ;;  %6497 = vmatpush.bf16.msra.mxu3 %v6403_v6 }
  0x54   : > { %543 = vmatpush.bf16.msra.mxu0 %v6402_v7  ;;  %6498 = vmatpush.bf16.msra.mxu3 %v6402_v7  ;;  %v444_v7 = vld [vmem:[%s7109_s5 + $0xa0] sm:$0xff] }
  0x55   : > { %1123 = vperm.xlu1 %6586, %v7209_v41  }
  0x56   : > { %1118 = vperm.xlu2 %6587, %v7214_v42  }
  0x57   : > { %544 = vmatmul.bf16.vlgmr.msra.gmra.mxu0 %v456_v12  ;;  %604 = vmatmul.bf16.vlgmr.msra.gmra.mxu3 %v468_v13  ;;  %v466_v12 = vpack.c.bf16 %v445_v8, %v444_v7 }
  0x67   : > { %549 = vmatmul.bf16.gmra.mxu0 %v457_v18  ;;  %609 = vmatmul.bf16.gmra.mxu3 %v469_v19  ;;  %v446_v18 = vld [vmem:[%s7109_s5 + $0xb0] sm:$0xff]  ;;  %v447_v19 = vld [vmem:[%s7109_s5 + $0xb8] sm:$0xff] }
  0x68   : > { %v467_v23 = vpack.c.bf16 %v447_v19, %v446_v18 }
  0x77   : > { %554 = vmatmul.bf16.gmra.mxu0 %v458_v27  ;;  %614 = vmatmul.bf16.gmra.mxu3 %v470_v28 }
  0x87   : > { %559 = vmatmul.bf16.gmra.mxu0 %v459_v38  ;;  %619 = vmatmul.bf16.gmra.mxu3 %v471_v39 }
  0x97   : > { %564 = vmatmul.bf16.gmra.mxu0 %v460_v45 }
  0x98   : > { %v7318_v47 = vpop.permute.xlu2 %1088 }
  0x99   : > { %11475 = vst [vmem:[#allocation36_spill] sm:$0xff] %v7318_v47 }
  0xa0   : > { %v7330_v52 = vpop.permute.xlu2 %1098 }
  0xa1   : > { %11477 = vst [vmem:[#allocation38_spill] sm:$0xff] %v7330_v52 }
  0xa7   : > { %569 = vmatmul.bf16.gmra.mxu0 %v461_v48 }
  0xb1   : > { %v7337_v55 = vpop.permute.xlu0 %1093 }
  0xb2   : > { %11480 = vst [vmem:[#allocation41_spill] sm:$0xff] %v7337_v55 }
  0xb7   : > { %574 = vmatmul.bf16.gmra.mxu0 %v462_v51 }
  0xc7   : > { %579 = vmatmul.bf16.gmra.mxu0 %v463_v54  ;;  %v7335_v54 = vpop.permute.xlu1 %1083 }
  0xc8   : > { %11479 = vst [vmem:[#allocation40_spill] sm:$0xff] %v7335_v54 }
  0xd4   : > { %v7229_v58 = vpop.f32.mrf.mxu0 }
  0xd5   : > { %11456 = vst [vmem:[#allocation17_spill] sm:$0xff] %v7229_v58  ;;  %627 = vadd.xlane.f32.xlu0 %v7229_v58  ;;  %v728_v59 = vmul.f32 %v7229_v58, %v7229_v58 }
  0xd7   : > { %584 = vmatmul.bf16.gmra.mxu0 %v464_v57  ;;  %760 = vadd.xlane.f32.xlu2 %v728_v59  ;;  %v7343_v57 = vpop.permute.xlu2 %1108 }
  0xd8   : > { %11481 = vst [vmem:[#allocation42_spill] sm:$0xff] %v7343_v57 }
  0xda   : > { %v7234_v60 = vpop.f32.mrf.mxu3 }
  0xdb   : > { %11457 = vst [vmem:[#allocation18_spill] sm:$0xff] %v7234_v60  ;;  %v752_v61 = vmul.f32 %v7234_v60, %v7234_v60 }
  0xdc   : > { %v7238_v62 = vpop.f32.mrf.mxu0 }
  0xdd   : > { %11458 = vst [vmem:[#allocation19_spill] sm:$0xff] %v7238_v62  ;;  %675 = vadd.xlane.f32.xlu0 %v7234_v60  ;;  %v729_v5 = vmul.f32 %v7238_v62, %v7238_v62 }
  0xdf   : > { %808 = vadd.xlane.f32.xlu2 %v752_v61  ;;  %v7347_v61 = vpop.permute.xlu1 %1103  ;;  %v7358_v7 = vpop.permute.xlu2 %1118 }
  0xe0   : > { %11483 = vst [vmem:[#allocation44_spill] sm:$0xff] %v7347_v61 }
  0xe1   : > { %11486 = vst [vmem:[#allocation47_spill] sm:$0xff] %v7358_v7 }
  0xe2   : > { %v7243_v1 = vpop.f32.mrf.mxu3 }
  0xe3   : > { %11459 = vst [vmem:[#allocation20_spill] sm:$0xff] %v7243_v1  ;;  %677 = vadd.xlane.f32.xlu1 %v7243_v1  ;;  %v753_v11 = vmul.f32 %v7243_v1, %v7243_v1  ;;  %v7501_v1 = vld [vmem:[%s11118_s4 + $0x68] sm:$0xff] }
  0xe4   : > { %v7246_v3 = vpop.f32.mrf.mxu0  ;;  %11509 = vst [vmem:[#allocation70_spill] sm:$0xff] %v7501_v1 }
  0xe5   : > { %11460 = vst [vmem:[#allocation21_spill] sm:$0xff] %v7246_v3  ;;  %629 = vadd.xlane.f32.xlu0 %v7238_v62  ;;  %v730_v9 = vmul.f32 %v7246_v3, %v7246_v3 }
  0xe7   : > { %589 = vmatmul.bf16.gmra.mxu0 %v465_v2  ;;  %v7360_v8 = vpop.permute.xlu1 %1113 }
  0xe8   : > { %11487 = vst [vmem:[#allocation48_spill] sm:$0xff] %v7360_v8 }
  0xea   : > { %v7249_v4 = vpop.f32.mrf.mxu3 }
  0xeb   : > { %11461 = vst [vmem:[#allocation22_spill] sm:$0xff] %v7249_v4  ;;  %679 = vadd.xlane.f32.xlu2 %v7249_v4  ;;  %631 = vadd.xlane.f32.xlu1 %v7246_v3  ;;  %v754_v16 = vmul.f32 %v7249_v4, %v7249_v4  ;;  %v7468_v3 = vld [vmem:[%s11118_s4 + $0x58] sm:$0xff]  ;;  %v7483_v4 = vld [vmem:[%s11118_s4 + $0x50] sm:$0xff] }
  0xec   : > { %v7255_v6 = vpop.f32.mrf.mxu0  ;;  %11504 = vst [vmem:[#allocation65_spill] sm:$0xff] %v7468_v3 }
  0xed   : > { %11462 = vst [vmem:[#allocation23_spill] sm:$0xff] %v7255_v6  ;;  %762 = vadd.xlane.f32.xlu0 %v729_v5  ;;  %v731_v10 = vmul.f32 %v7255_v6, %v7255_v6  ;;  %v7355_v5 = vpop.permute.xlu0 %1128 }
  0xee   : > { %11485 = vst [vmem:[#allocation46_spill] sm:$0xff] %v7355_v5 }
  0xef   : > { %v7378_v19 = vpop.permute.xlu1 %1123  ;;  %11505 = vst [vmem:[#allocation66_spill] sm:$0xff] %v7483_v4 }
  0xf0   : > { %11490 = vst [vmem:[#allocation51_spill] sm:$0xff] %v7378_v19 }
  0xf2   : > { %v7267_v14 = vpop.f32.mrf.mxu3 }
  0xf3   : > { %764 = vadd.xlane.f32.xlu1 %v730_v9  ;;  %766 = vadd.xlane.f32.xlu2 %v731_v10  ;;  %11464 = vst [vmem:[#allocation25_spill] sm:$0xff] %v7267_v14  ;;  %v755_v17 = vmul.f32 %v7267_v14, %v7267_v14 }
  0xf4   : > { %v7265_v13 = vpop.f32.mrf.mxu0 }
  0xf5   : > { %11463 = vst [vmem:[#allocation24_spill] sm:$0xff] %v7265_v13  ;;  %810 = vadd.xlane.f32.xlu0 %v753_v11  ;;  %v732_v22 = vmul.f32 %v7265_v13, %v7265_v13 }
  0xf7   : > { %594 = vmatmul.bf16.gmra.mxu0 %v466_v12 }
  0xfa   : > { %v7284_v25 = vpop.f32.mrf.mxu3 }
  0xfb   : > { %633 = vadd.xlane.f32.xlu1 %v7255_v6  ;;  %635 = vadd.xlane.f32.xlu2 %v7265_v13  ;;  %11467 = vst [vmem:[#allocation28_spill] sm:$0xff] %v7284_v25  ;;  %v756_v26 = vmul.f32 %v7284_v25, %v7284_v25  ;;  %v7460_v6 = vld [vmem:[%s11118_s4 + $0x60] sm:$0xff] }
  0xfc   : > { %v7271_v15 = vpop.f32.mrf.mxu0 }
  0xfd   : > { %11465 = vst [vmem:[#allocation26_spill] sm:$0xff] %v7271_v15  ;;  %681 = vadd.xlane.f32.xlu0 %v7267_v14  ;;  %v733_v34 = vmul.f32 %v7271_v15, %v7271_v15  ;;  %v7478_v14 = vld [vmem:[%s11118_s4 + $0x78] sm:$0xff] }
 0x102   : > { %v7292_v28 = vpop.f32.mrf.mxu3 }
 0x103   : > { %812 = vadd.xlane.f32.xlu1 %v754_v16  ;;  %814 = vadd.xlane.f32.xlu2 %v755_v17  ;;  %11469 = vst [vmem:[#allocation30_spill] sm:$0xff] %v7292_v28  ;;  %v757_v36 = vmul.f32 %v7292_v28, %v7292_v28 }
 0x104   : > { %v7282_v24 = vpop.f32.mrf.mxu0 }
 0x105   : > { %11466 = vst [vmem:[#allocation27_spill] sm:$0xff] %v7282_v24  ;;  %768 = vadd.xlane.f32.xlu0 %v732_v22  ;;  %v734_v37 = vmul.f32 %v7282_v24, %v7282_v24 }
 0x107   : > { %599 = vmatmul.bf16.gmra.mxu0 %v467_v23 }
 0x10a   : > { %v7304_v38 = vpop.f32.mrf.mxu3 }
 0x10b   : > { %683 = vadd.xlane.f32.xlu1 %v7284_v25  ;;  %637 = vadd.xlane.f32.xlu2 %v7271_v15  ;;  %11471 = vst [vmem:[#allocation32_spill] sm:$0xff] %v7304_v38  ;;  %v758_v43 = vmul.f32 %v7304_v38, %v7304_v38 }
 0x10c   : > { %v7290_v27 = vpop.f32.mrf.mxu0 }
 0x10d   : > { %11468 = vst [vmem:[#allocation29_spill] sm:$0xff] %v7290_v27  ;;  %816 = vadd.xlane.f32.xlu0 %v756_v26  ;;  %v735_v44 = vmul.f32 %v7290_v27, %v7290_v27 }
 0x112   : > { %v7316_v46 = vpop.f32.mrf.mxu3 }
 0x113   : > { %685 = vadd.xlane.f32.xlu2 %v7292_v28  ;;  %770 = vadd.xlane.f32.xlu1 %v733_v34  ;;  %11474 = vst [vmem:[#allocation35_spill] sm:$0xff] %v7316_v46  ;;  %v759_v48 = vmul.f32 %v7316_v46, %v7316_v46 }
 0x114   : > { %v7297_v35 = vpop.f32.mrf.mxu0 }
 0x115   : > { %11470 = vst [vmem:[#allocation31_spill] sm:$0xff] %v7297_v35  ;;  %639 = vadd.xlane.f32.xlu0 %v7282_v24  ;;  %v736_v50 = vmul.f32 %v7297_v35, %v7297_v35 }
 0x11b   : > { %818 = vadd.xlane.f32.xlu1 %v757_v36  ;;  %772 = vadd.xlane.f32.xlu2 %v734_v37 }
 0x11c   : > { %v7306_v39 = vpop.f32.mrf.mxu0 }
 0x11d   : > { %11472 = vst [vmem:[#allocation33_spill] sm:$0xff] %v7306_v39  ;;  %687 = vadd.xlane.f32.xlu0 %v7304_v38  ;;  %v737_v51 = vmul.f32 %v7306_v39, %v7306_v39  ;;  %v7494_v38 = vld [vmem:[%s11118_s4 + $0x90] sm:$0xff] }
 0x123   : > { %820 = vadd.xlane.f32.xlu2 %v758_v43  ;;  %641 = vadd.xlane.f32.xlu1 %v7290_v27  ;;  %v7565_v27 = vld [vmem:[%s11118_s4 + $0xc8] sm:$0xff] }
 0x124   : > { %v7314_v45 = vpop.f32.mrf.mxu0 }
 0x125   : > { %11473 = vst [vmem:[#allocation34_spill] sm:$0xff] %v7314_v45  ;;  %774 = vadd.xlane.f32.xlu0 %v735_v44  ;;  %v738_v56 = vmul.f32 %v7314_v45, %v7314_v45 }
 0x12b   : > { %689 = vadd.xlane.f32.xlu1 %v7316_v46  ;;  %643 = vadd.xlane.f32.xlu2 %v7297_v35  ;;  %v7560_v35 = vld [vmem:[%s11118_s4 + $0xf0] sm:$0xff] }
 0x12c   : > { %v7324_v49 = vpop.f32.mrf.mxu0 }
 0x12d   : > { %11476 = vst [vmem:[#allocation37_spill] sm:$0xff] %v7324_v49  ;;  %822 = vadd.xlane.f32.xlu0 %v759_v48  ;;  %v739_v63 = vmul.f32 %v7324_v49, %v7324_v49 }
 0x133   : > { %776 = vadd.xlane.f32.xlu1 %v736_v50  ;;  %778 = vadd.xlane.f32.xlu2 %v737_v51 }
 0x134   : > { %v7332_v53 = vpop.f32.mrf.mxu0 }
 0x135   : > { %11478 = vst [vmem:[#allocation39_spill] sm:$0xff] %v7332_v53  ;;  %645 = vadd.xlane.f32.xlu0 %v7306_v39  ;;  %v740_v0 = vmul.f32 %v7332_v53, %v7332_v53 }
 0x13b   : > { %647 = vadd.xlane.f32.xlu1 %v7314_v45  ;;  %649 = vadd.xlane.f32.xlu2 %v7324_v49 }
 0x13c   : > { %v7345_v59 = vpop.f32.mrf.mxu0 }
 0x13d   : > { %11482 = vst [vmem:[#allocation43_spill] sm:$0xff] %v7345_v59  ;;  %780 = vadd.xlane.f32.xlu0 %v738_v56  ;;  %v741_v9 = vmul.f32 %v7345_v59, %v7345_v59 }
 0x143   : > { %782 = vadd.xlane.f32.xlu1 %v739_v63  ;;  %784 = vadd.xlane.f32.xlu2 %v740_v0 }
 0x144   : > { %v7353_v2 = vpop.f32.mrf.mxu0 }
 0x145   : > { %11484 = vst [vmem:[#allocation45_spill] sm:$0xff] %v7353_v2  ;;  %651 = vadd.xlane.f32.xlu0 %v7332_v53  ;;  %v742_v16 = vmul.f32 %v7353_v2, %v7353_v2  ;;  %v7551_v53 = vld [vmem:[%s11118_s4 + $0xb0] sm:$0xff] }
 0x148   : > { %v7370_v12 = vpop.xlane.xlu0 %627 }
 0x14a   : > { %v7368_v11 = vpop.xlane.xlu2 %760 }
 0x14b   : > { %653 = vadd.xlane.f32.xlu1 %v7345_v59  ;;  %655 = vadd.xlane.f32.xlu2 %v7353_v2  ;;  %v7544_v2 = vld [vmem:[%s11118_s4 + $0xd8] sm:$0xff] }
 0x14c   : > { %v7366_v10 = vpop.f32.mrf.mxu0 }
 0x14d   : > { %11488 = vst [vmem:[#allocation49_spill] sm:$0xff] %v7366_v10  ;;  %786 = vadd.xlane.f32.xlu0 %v741_v9  ;;  %v743_v17 = vmul.f32 %v7366_v10, %v7366_v10 }
 0x150   : > { %v7383_v23 = vpop.xlane.xlu0 %675 }
 0x152   : > { %v7381_v22 = vpop.xlane.xlu2 %808 }
 0x153   : > { %788 = vadd.xlane.f32.xlu1 %v742_v16  ;;  %790 = vadd.xlane.f32.xlu2 %v743_v17  ;;  %11491 = vst [vmem:[#allocation52_spill] sm:$0xff] %v7381_v22 }
 0x154   : > { %v7376_v18 = vpop.f32.mrf.mxu0 }
 0x155   : > { %11489 = vst [vmem:[#allocation50_spill] sm:$0xff] %v7376_v18  ;;  %657 = vadd.xlane.f32.xlu0 %v7366_v10  ;;  %v744_v26 = vmul.f32 %v7376_v18, %v7376_v18 }
 0x156   : > { %v7390_v36 = vpop.xlane.xlu1 %677 }
 0x158   : > { %v7397_v44 = vpop.xlane.xlu0 %629 }
 0x15b   : > { %659 = vadd.xlane.f32.xlu1 %v7376_v18  ;;  %v7535_v18 = vld [vmem:[%s11118_s4 + $0x98] sm:$0xff] }
 0x15c   : > { %v7388_v34 = vpop.f32.mrf.mxu0 }
 0x15d   : > { %11492 = vst [vmem:[#allocation53_spill] sm:$0xff] %v7388_v34  ;;  %792 = vadd.xlane.f32.xlu0 %v744_v26  ;;  %661 = vadd.xlane.f32.xlu2 %v7388_v34  ;;  %v745_v43 = vmul.f32 %v7388_v34, %v7388_v34 }
 0x15e   : > { %v7393_v37 = vpop.xlane.xlu2 %679  ;;  %v7404_v51 = vpop.xlane.xlu1 %631 }
 0x160   : > { %v7410_v0 = vpop.xlane.xlu0 %762 }
 0x163   : > { %794 = vadd.xlane.f32.xlu1 %v745_v43 }
 0x164   : > { %v7399_v48 = vpop.f32.mrf.mxu0 }
 0x165   : > { %11493 = vst [vmem:[#allocation54_spill] sm:$0xff] %v7399_v48  ;;  %663 = vadd.xlane.f32.xlu0 %v7399_v48  ;;  %v746_v50 = vmul.f32 %v7399_v48, %v7399_v48  ;;  %v7528_v48 = vld [vmem:[%s11118_s4 + $0xc0] sm:$0xff] }
 0x166   : > { %v7406_v56 = vpop.xlane.xlu2 %766  ;;  %v7415_v16 = vpop.xlane.xlu1 %764 }
 0x167   : > { %796 = vadd.xlane.f32.xlu2 %v746_v50 }
 0x168   : > { %v7424_v50 = vpop.xlane.xlu0 %810 }
 0x169   : > { %11496 = vst [vmem:[#allocation57_spill] sm:$0xff] %v7424_v50 }
 0x16c   : > { %v7408_v63 = vpop.f32.mrf.mxu0 }
 0x16d   : > { %11494 = vst [vmem:[#allocation55_spill] sm:$0xff] %v7408_v63  ;;  %665 = vadd.xlane.f32.xlu1 %v7408_v63  ;;  %v747_v9 = vmul.f32 %v7408_v63, %v7408_v63 }
 0x16e   : > { %v7417_v17 = vpop.xlane.xlu2 %635  ;;  %v7426_v5 = vpop.xlane.xlu1 %633 }
 0x16f   : > { %798 = vadd.xlane.f32.xlu0 %v747_v9 }
 0x170   : > { %v7435_v8 = vpop.xlane.xlu0 %681 }
 0x174   : > { %v7419_v26 = vpop.f32.mrf.mxu0 }
 0x175   : > { %11495 = vst [vmem:[#allocation56_spill] sm:$0xff] %v7419_v26  ;;  %667 = vadd.xlane.f32.xlu2 %v7419_v26  ;;  %v748_v43 = vmul.f32 %v7419_v26, %v7419_v26 }
 0x176   : > { %v7433_v7 = vpop.xlane.xlu2 %814  ;;  %v7439_v61 = vpop.xlane.xlu1 %812 }
 0x177   : > { %800 = vadd.xlane.f32.xlu1 %v748_v43  ;;  %11498 = vst [vmem:[#allocation59_spill] sm:$0xff] %v7433_v7  ;;  %v7586_v7 = vld [vmem:[%s11118_s4 + $0xf8] sm:$0xff] }
 0x178   : > { %11500 = vst [vmem:[#allocation61_spill] sm:$0xff] %v7439_v61  ;;  %v7446_v13 = vpop.xlane.xlu0 %768 }
 0x179   : > { %11514 = vst [vmem:[#allocation75_spill] sm:$0xff] %v7586_v7 }
 0x17c   : > { %v7428_v19 = vpop.f32.mrf.mxu0 }
 0x17d   : > { %11497 = vst [vmem:[#allocation58_spill] sm:$0xff] %v7428_v19  ;;  %669 = vadd.xlane.f32.xlu0 %v7428_v19  ;;  %v749_v9 = vmul.f32 %v7428_v19, %v7428_v19  ;;  %v7517_v19 = vld [vmem:[%s11118_s4 + $0x80] sm:$0xff] }
 0x17e   : > { %v7444_v15 = vpop.xlane.xlu2 %637 }
 0x17f   : > { %802 = vadd.xlane.f32.xlu2 %v749_v9  ;;  %v7451_v9 = vpop.xlane.xlu1 %683 }
 0x180   : > { %v7455_v55 = vpop.xlane.xlu0 %816 }
 0x181   : > { %11503 = vst [vmem:[#allocation64_spill] sm:$0xff] %v7455_v55 }
 0x184   : > { %v7437_v57 = vpop.f32.mrf.mxu0 }
 0x185   : > { %11499 = vst [vmem:[#allocation60_spill] sm:$0xff] %v7437_v57  ;;  %671 = vadd.xlane.f32.xlu1 %v7437_v57  ;;  %v750_v43 = vmul.f32 %v7437_v57, %v7437_v57  ;;  %v7512_v57 = vld [vmem:[%s11118_s4 + $0xa8] sm:$0xff] }
 0x186   : > { %v7453_v52 = vpop.xlane.xlu2 %685  ;;  %11510 = vst [vmem:[#allocation71_spill] sm:$0xff] %v7512_v57 }
 0x187   : > { %804 = vadd.xlane.f32.xlu0 %v750_v43  ;;  %11502 = vst [vmem:[#allocation63_spill] sm:$0xff] %v7453_v52  ;;  %v7462_v43 = vpop.xlane.xlu1 %770 }
 0x188   : > { %v7473_v54 = vpop.xlane.xlu0 %639 }
 0x18c   : > { %v7448_v25 = vpop.f32.mrf.mxu0 }
 0x18d   : > { %11501 = vst [vmem:[#allocation62_spill] sm:$0xff] %v7448_v25  ;;  %673 = vadd.xlane.f32.xlu2 %v7448_v25  ;;  %v751_v45 = vmul.f32 %v7448_v25, %v7448_v25 }
 0x18e   : > { %v7470_v47 = vpop.xlane.xlu2 %772 }
 0x18f   : > { %v7485_v62 = vpop.xlane.xlu1 %818 }
 0x190   : > { %11506 = vst [vmem:[#allocation67_spill] sm:$0xff] %v7485_v62  ;;  %v7496_v28 = vpop.xlane.xlu0 %687 }
 0x191   : > { %11508 = vst [vmem:[#allocation69_spill] sm:$0xff] %v7496_v28  ;;  %v11516_v28 = vmov 1  }
 0x196   : > { %v7489_v58 = vpop.xlane.xlu2 %820 }
 0x197   : > { %11507 = vst [vmem:[#allocation68_spill] sm:$0xff] %v7489_v58  ;;  %v7504_v60 = vpop.xlane.xlu1 %641  ;;  %v11162_v58 = vmov 1  }
 0x198   : > { %v7519_v26 = vpop.xlane.xlu0 %774 }
 0x19b   : > { %1143 = vperm.xlu0 %6588, %v7460_v6  }
 0x19e   : > { %1138 = vperm.xlu1 %6586, %v7468_v3   ;;  %v7507_v46 = vpop.xlane.xlu2 %643  ;;  %v691_v3 = vadd.f32 %v7397_v44, %v7370_v12  ;;  %v7621_v44 = vld [vmem:[%s11118_s4 + $0xa0] sm:$0xff] }
 0x19f   : > { %v7523_v63 = vpop.xlane.xlu1 %689 }
 0x1a0   : > { %11511 = vst [vmem:[#allocation72_spill] sm:$0xff] %v7523_v63  ;;  %v7538_v10 = vpop.xlane.xlu0 %822 }
 0x1a1   : > { %11512 = vst [vmem:[#allocation73_spill] sm:$0xff] %v7538_v10 }
 0x1a3   : > { %1158 = vperm.xlu0 %6588, %v7478_v14  }
 0x1a5   : > { %1133 = vperm.xlu2 %6587, %v7483_v4  }
 0x1a6   : > { %v7530_v34 = vpop.xlane.xlu2 %778 }
 0x1a7   : > { %v7546_v59 = vpop.xlane.xlu1 %776 }
 0x1a8   : > { %v646_v39 = vpop.xlane.xlu0 %645 }
 0x1ab   : > { %1173 = vperm.xlu0 %6588, %v7494_v38  }
 0x1ad   : > { %1148 = vperm.xlu2 %6587, %v7501_v1  }
 0x1ae   : > { %v650_v49 = vpop.xlane.xlu2 %649 }
 0x1af   : > { %v648_v24 = vpop.xlane.xlu1 %647 }
 0x1b0   : > { %v7571_v25 = vpop.xlane.xlu0 %780 }
 0x1b3   : > { %1188 = vperm.xlu0 %6588, %v7512_v57  }
 0x1b5   : > { %1163 = vperm.xlu2 %6587, %v7517_v19  }
 0x1b6   : > { %v7569_v10 = vpop.xlane.xlu2 %784 }
 0x1b7   : > { %v7580_v62 = vpop.xlane.xlu1 %782 }
 0x1b8   : > { %v652_v61 = vpop.xlane.xlu0 %651 }
 0x1bb   : > { %1203 = vperm.xlu0 %6588, %v7528_v48  }
 0x1bd   : > { %1178 = vperm.xlu2 %6587, %v7535_v18  }
 0x1be   : > { %v656_v55 = vpop.xlane.xlu2 %655 }
 0x1bf   : > { %v654_v50 = vpop.xlane.xlu1 %653 }
 0x1c0   : > { %v7599_v63 = vpop.xlane.xlu0 %786 }
 0x1c3   : > { %1218 = vperm.xlu0 %6588, %v7544_v2  }
 0x1c5   : > { %1193 = vperm.xlu2 %6587, %v7551_v53  }
 0x1c6   : > { %v7596_v22 = vpop.xlane.xlu2 %790 }
 0x1c7   : > { %v7611_v52 = vpop.xlane.xlu1 %788 }
 0x1c8   : > { %806 = vadd.xlane.f32.xlu1 %v751_v45  ;;  %v7576_v45 = vld [vmem:[%s11118_s4 + $0xe0] sm:$0xff] }
 0x1c9   : > { %11513 = vst [vmem:[#allocation74_spill] sm:$0xff] %v7576_v45 }
 0x1cb   : > { %1233 = vperm.xlu0 %6588, %v7560_v35  }
 0x1cd   : > { %1208 = vperm.xlu2 %6587, %v7565_v27  }
 0x1d3   : > { %6590 = vset.pattern.permute.xlu0 %v11162_v58  ;;  %v7593_v58 = vld [vmem:[%s11118_s4 + $0x70] sm:$0xff] }
 0x1d4   : > { %1310 = vperm.xlu0 %6590, %v7159_v21   ;;  %11515 = vst [vmem:[#allocation76_spill] sm:$0xff] %v7593_v58 }
 0x1d5   : > { %1223 = vperm.xlu2 %6587, %v7576_v45   ;;  %v662_v45 = vpop.xlane.xlu2 %661 }
 0x1dc   : > { %1330 = vperm.xlu0 %6590, %v7188_v32  }
 0x1dd   : > { %1238 = vperm.xlu2 %6587, %v7586_v7   ;;  %v7608_v7 = vld [vmem:[%s11118_s4 + $0x88] sm:$0xff] }
 0x1de   : > { %11517 = vst [vmem:[#allocation77_spill] sm:$0xff] %v7608_v7 }
 0x1e1   : > { %1153 = vperm.xlu1 %6586, %v7593_v58   ;;  %v692_v58 = vadd.f32 %v691_v3, %v7404_v51 }
 0x1e4   : > { %1342 = vperm.xlu0 %6590, %v7204_v40   ;;  %v693_v40 = vadd.f32 %v692_v58, %v7426_v5  ;;  %v7626_v58 = vpop.xlane.xlu2 %796  ;;  %v660_v5 = vpop.xlane.xlu1 %659 }
 0x1e5   : > { %6591 = vset.pattern.permute.xlu2 %v11516_v28 }
 0x1e6   : > { %1314 = vperm.xlu2 %6591, %v7180_v31   ;;  %v694_v12 = vadd.f32 %v693_v40, %v7417_v17  ;;  %v658_v31 = vpop.xlane.xlu0 %657  ;;  %v7635_v17 = vld [vmem:[%s11118_s4 + $0xb8] sm:$0xff] }
 0x1e7   : > { %11518 = vst [vmem:[#allocation78_spill] sm:$0xff] %v7635_v17 }
 0x1e8   : > { %v695_v3 = vadd.f32 %v694_v12, %v7444_v15 }
 0x1e9   : > { %1168 = vperm.xlu1 %6586, %v7608_v7  }
 0x1ea   : > { %v696_v51 = vadd.f32 %v695_v3, %v7473_v54 }
 0x1ec   : > { %1354 = vperm.xlu0 %6590, %v7460_v6   ;;  %v697_v7 = vadd.f32 %v696_v51, %v7504_v60  ;;  %v668_v3 = vpop.xlane.xlu2 %667  ;;  %v7641_v60 = vpop.xlane.xlu1 %794 }
 0x1ee   : > { %1322 = vperm.xlu2 %6591, %v7170_v29   ;;  %v698_v40 = vadd.f32 %v697_v7, %v7507_v46  ;;  %v7637_v12 = vpop.xlane.xlu0 %792  ;;  %v7647_v46 = vld [vmem:[%s11118_s4 + $0xd0] sm:$0xff] }
 0x1ef   : > { %11519 = vst [vmem:[#allocation79_spill] sm:$0xff] %v7647_v46 }
 0x1f0   : > { %v699_v15 = vadd.f32 %v698_v40, %v646_v39 }
 0x1f1   : > { %1183 = vperm.xlu1 %6586, %v7621_v44  }
 0x1f2   : > { %v700_v54 = vadd.f32 %v699_v15, %v648_v24 }
 0x1f4   : > { %1366 = vperm.xlu0 %6590, %v7478_v14   ;;  %v701_v51 = vadd.f32 %v700_v54, %v650_v49  ;;  %v7650_v40 = vpop.xlane.xlu2 %802  ;;  %v666_v15 = vpop.xlane.xlu1 %665  ;;  %v7657_v49 = vld [vmem:[%s11118_s4 + $0xe8] sm:$0xff] }
 0x1f6   : > { %1334 = vperm.xlu2 %6591, %v7214_v42   ;;  %v702_v7 = vadd.f32 %v701_v51, %v652_v61  ;;  %v664_v24 = vpop.xlane.xlu0 %663  ;;  %v824_v61 = vadd.f32 %v7410_v0, %v7368_v11 }
 0x1f8   : > { %v703_v39 = vadd.f32 %v702_v7, %v654_v50  ;;  %v825_v50 = vadd.f32 %v824_v61, %v7415_v16  ;;  %v11522_v61 = vld [vmem:[#allocation74_spill] sm:$0xff] }
 0x1f9   : > { %1198 = vperm.xlu1 %6586, %v7635_v17  }
 0x1fa   : > { %v704_v17 = vadd.f32 %v703_v39, %v656_v55  ;;  %v826_v39 = vadd.f32 %v825_v50, %v7406_v56 }
 0x1fc   : > { %1378 = vperm.xlu0 %6590, %v7494_v38   ;;  %v705_v54 = vadd.f32 %v704_v17, %v658_v31  ;;  %v801_v55 = vpop.xlane.xlu1 %800 }
 0x1fe   : > { %1346 = vperm.xlu2 %6591, %v7483_v4   ;;  %v706_v51 = vadd.f32 %v705_v54, %v660_v5  ;;  %v827_v4 = vadd.f32 %v826_v39, %v7446_v13  ;;  %v11523_v54 = vld [vmem:[#allocation63_spill] sm:$0xff]  ;;  %v11527_v39 = vld [vmem:[#allocation69_spill] sm:$0xff] }
 0x200   : > { %v674_v7 = vpop.xlane.xlu2 %673  ;;  %v828_v31 = vadd.f32 %v827_v4, %v7462_v43 }
 0x201   : > { %1213 = vperm.xlu1 %6586, %v7647_v46   ;;  %v799_v46 = vpop.xlane.xlu0 %798 }
 0x202   : > { %v829_v16 = vadd.f32 %v828_v31, %v7470_v47  ;;  %v11528_v31 = vld [vmem:[#allocation75_spill] sm:$0xff] }
 0x204   : > { %1390 = vperm.xlu0 %6590, %v7512_v57   ;;  %v672_v56 = vpop.xlane.xlu1 %671 }
 0x206   : > { %1358 = vperm.xlu2 %6591, %v7501_v1   ;;  %v707_v1 = vadd.f32 %v706_v51, %v662_v45  ;;  %v830_v45 = vadd.f32 %v829_v16, %v7519_v26 }
 0x208   : > { %v708_v57 = vadd.f32 %v707_v1, %v664_v24  ;;  %v7671_v17 = vpop.permute.xlu2 %1133  ;;  %v831_v1 = vadd.f32 %v830_v45, %v7546_v59 }
 0x209   : > { %1228 = vperm.xlu1 %6586, %v7657_v49   ;;  %v670_v0 = vpop.xlane.xlu0 %669 }
 0x20a   : > { %v709_v11 = vadd.f32 %v708_v57, %v666_v15  ;;  %v832_v57 = vadd.f32 %v831_v1, %v7530_v34  ;;  %v6940_v15 = vmov 2  }
 0x20c   : > { %1402 = vperm.xlu0 %6590, %v7528_v48   ;;  %v710_v5 = vadd.f32 %v709_v11, %v668_v3  ;;  %v833_v47 = vadd.f32 %v832_v57, %v7571_v25 }
 0x20e   : > { %1370 = vperm.xlu2 %6591, %v7517_v19   ;;  %v711_v13 = vadd.f32 %v710_v5, %v670_v0  ;;  %v834_v26 = vadd.f32 %v833_v47, %v7580_v62  ;;  %v11529_v0 = vld [vmem:[#allocation72_spill] sm:$0xff] }
 0x20f   : > { %v11530_v5 = vld [vmem:[#allocation76_spill] sm:$0xff] }
 0x210   : > { %v712_v4 = vadd.f32 %v711_v13, %v672_v56  ;;  %v7682_v3 = vpop.permute.xlu2 %1148  ;;  %v835_v24 = vadd.f32 %v834_v26, %v7569_v10 }
 0x211   : > { %6589 = vset.pattern.permute.xlu1 %v11516_v28  ;;  %11520 = vst [vmem:[#allocation80_spill] sm:$0xff] %v7682_v3  ;;  %v805_v11 = vpop.xlane.xlu0 %804 }
 0x212   : > { %1306 = vperm.xlu1 %6589, %v7154_v20   ;;  %v713_v28 = vadd.f32 %v712_v4, %v674_v7  ;;  %v836_v25 = vadd.f32 %v835_v24, %v7599_v63  ;;  %v7710_v7 = vpop.permute.xlu1 %1138  ;;  %v11533_v4 = vld [vmem:[#allocation15_spill] sm:$0xff] }
 0x213   : > { %v11538_v24 = vld [vmem:[#allocation59_spill] sm:$0xff] }
 0x214   : > { %1414 = vperm.xlu0 %6590, %v7544_v2   ;;  %v714_v43 = vadd.f32 %v713_v28, %v7383_v23  ;;  %v837_v34 = vadd.f32 %v836_v25, %v7611_v52  ;;  %v11534_v28 = vld [vmem:[#allocation57_spill] sm:$0xff] }
 0x216   : > { %1382 = vperm.xlu2 %6591, %v7535_v18   ;;  %v715_v59 = vadd.f32 %v714_v43, %v7390_v36  ;;  %v838_v10 = vadd.f32 %v837_v34, %v7596_v22  ;;  %v11536_v43 = vld [vmem:[#allocation61_spill] sm:$0xff]  ;;  %v11539_v34 = vld [vmem:[#allocation64_spill] sm:$0xff] }
 0x218   : > { %v716_v23 = vadd.f32 %v715_v59, %v7393_v37  ;;  %v7695_v62 = vpop.permute.xlu2 %1163  ;;  %v11537_v59 = vld [vmem:[#allocation77_spill] sm:$0xff] }
 0x219   : > { %11521 = vst [vmem:[#allocation81_spill] sm:$0xff] %v7695_v62  ;;  %v7725_v47 = vpop.permute.xlu0 %1143 }
 0x21a   : > { %1318 = vperm.xlu1 %6589, %v7175_v30   ;;  %v717_v36 = vadd.f32 %v716_v23, %v7435_v8  ;;  %v11525_v8 = vld [vmem:[#allocation65_spill] sm:$0xff] }
 0x21b   : > { %11535 = vst [vmem:[#allocation65_spill] sm:$0xff] %v7725_v47 }
 0x21c   : > { %1426 = vperm.xlu0 %6590, %v7560_v35   ;;  %v718_v63 = vadd.f32 %v717_v36, %v7451_v9 }
 0x21e   : > { %1394 = vperm.xlu2 %6591, %v7551_v53   ;;  %v719_v50 = vadd.f32 %v718_v63, %v11523_v54 }
 0x220   : > { %v7707_v51 = vpop.permute.xlu2 %1178  ;;  %v720_v9 = vadd.f32 %v719_v50, %v11527_v39  ;;  %v11543_v50 = vld [vmem:[#allocation73_spill] sm:$0xff] }
 0x221   : > { %11524 = vst [vmem:[#allocation74_spill] sm:$0xff] %v7707_v51  ;;  %v7738_v54 = vpop.permute.xlu0 %1158 }
 0x222   : > { %1326 = vperm.xlu1 %6589, %v7193_v33   ;;  %v721_v16 = vadd.f32 %v720_v9, %v11529_v0 }
 0x224   : > { %6593 = vset.pattern.permute.xlu0 %v6940_v15 }
 0x225   : > { %1567 = vperm.xlu0 %6593, %v7159_v21   ;;  %v839_v21 = vadd.f32 %v838_v10, %v7637_v12  ;;  %v11540_v10 = vld [vmem:[#allocation67_spill] sm:$0xff] }
 0x226   : > { %1406 = vperm.xlu2 %6591, %v7565_v27  }
 0x227   : > { %v840_v37 = vadd.f32 %v839_v21, %v7641_v60 }
 0x228   : > { %v7718_v45 = vpop.permute.xlu2 %1193 }
 0x229   : > { %v841_v52 = vadd.f32 %v840_v37, %v7626_v58  ;;  %11531 = vst [vmem:[#allocation63_spill] sm:$0xff] %v7718_v45  ;;  %v11541_v37 = vld [vmem:[#allocation68_spill] sm:$0xff] }
 0x22a   : > { %1338 = vperm.xlu1 %6589, %v7209_v41  }
 0x22b   : > { %v842_v22 = vadd.f32 %v841_v52, %v799_v46  ;;  %v722_v46 = vrot.slane %v721_v16, 4 }
 0x22d   : > { %1587 = vperm.xlu0 %6593, %v7188_v32   ;;  %v11526_v32 = vld [vmem:[#allocation16_spill] sm:$0xff]  ;;  %v843_v12 = vadd.f32 %v842_v22, %v801_v55  ;;  %v723_v57 = vadd.f32 %v722_v46, %v721_v16  ;;  %v7747_v16 = vpop.permute.xlu0 %1173 }
 0x22e   : > { %1418 = vperm.xlu2 %6591, %v11522_v61   ;;  %v11532_v55 = vld [vmem:[#allocation52_spill] sm:$0xff]  ;;  %11542 = vst [vmem:[#allocation16_spill] sm:$0xff] %v7738_v54 }
 0x22f   : > { %v844_v60 = vadd.f32 %v843_v12, %v7650_v40  ;;  %11546 = vst [vmem:[#allocation69_spill] sm:$0xff] %v7747_v16  ;;  %v7931_v16 = vld [vmem:[#allocation5 + $0x48] sm:$0xff] }
 0x230   : > { %v7731_v23 = vpop.permute.xlu2 %1208 }
 0x231   : > { %v845_v58 = vadd.f32 %v844_v60, %v805_v11  ;;  %v11544_v11 = vld [vmem:[#allocation78_spill] sm:$0xff] }
 0x232   : > { %1350 = vperm.xlu1 %6589, %v11525_v8  }
 0x235   : > { %1599 = vperm.xlu0 %6593, %v11526_v32  }
 0x236   : > { %1430 = vperm.xlu2 %6591, %v11528_v31  }
 0x238   : > { %v7743_v12 = vpop.permute.xlu2 %1223 }
 0x23a   : > { %1362 = vperm.xlu1 %6589, %v11530_v5  }
 0x23b   : > { %v807_v56 = vpop.xlane.xlu1 %806 }
 0x23c   : > { %v846_v13 = vadd.f32 %v845_v58, %v807_v56  ;;  %v11545_v58 = vld [vmem:[#allocation71_spill] sm:$0xff] }
 0x23d   : > { %1611 = vperm.xlu0 %6593, %v7460_v6   ;;  %v724_v6 = vrot.slane %v723_v57, 2 }
 0x23e   : > { %v847_v1 = vadd.f32 %v846_v13, %v11532_v55  ;;  %6594 = vset.pattern.permute.xlu2 %v6940_v15  ;;  %v11547_v13 = vld [vmem:[#allocation66_spill] sm:$0xff] }
 0x23f   : > { %1571 = vperm.xlu2 %6594, %v11533_v4   ;;  %v725_v63 = vadd.f32 %v724_v6, %v723_v57  ;;  %v7755_v57 = vpop.permute.xlu0 %1188 }
 0x240   : > { %v848_v40 = vadd.f32 %v847_v1, %v11534_v28  ;;  %v11548_v1 = vld [vmem:[#allocation79_spill] sm:$0xff]  ;;  %11550 = vst [vmem:[#allocation75_spill] sm:$0xff] %v7755_v57  ;;  %v7920_v57 = vld [vmem:[#allocation5 + $0x50] sm:$0xff] }
 0x242   : > { %v849_v26 = vadd.f32 %v848_v40, %v11536_v43  ;;  %1374 = vperm.xlu1 %6589, %v11537_v59   ;;  %v11549_v40 = vld [vmem:[#allocation70_spill] sm:$0xff] }
 0x244   : > { %v850_v25 = vadd.f32 %v849_v26, %v11538_v24 }
 0x245   : > { %1623 = vperm.xlu0 %6593, %v7478_v14   ;;  %v726_v14 = vrot.slane %v725_v63, 1 }
 0x246   : > { %v851_v36 = vadd.f32 %v850_v25, %v11539_v34 }
 0x247   : > { %1579 = vperm.xlu2 %6594, %v7170_v29   ;;  %v727_v39 = vadd.f32 %v726_v14, %v725_v63  ;;  %v7762_v6 = vpop.permute.xlu0 %1203  ;;  %v11553_v14 = vld [vmem:[#allocation27_spill] sm:$0xff] }
 0x248   : > { %v852_v21 = vadd.f32 %v851_v36, %v11540_v10 }
 0x249   : > { %v861_v0 = vmul.f32 0.00048828125, %v727_v39 }
 0x24a   : > { %v853_v52 = vadd.f32 %v852_v21, %v11541_v37  ;;  %1386 = vperm.xlu1 %6589, %v7621_v44   ;;  %v626_v37 = vld [vmem:[%s11117_s3] sm:$0x1] }
 0x24b   : > { %v863_v46 = vmul.f32 %v861_v0, %v861_v0 }
 0x24c   : > { %v854_v22 = vadd.f32 %v853_v52, %v11543_v50 }
 0x24d   : > { %1635 = vperm.xlu0 %6593, %v7494_v38  }
 0x24e   : > { %v855_v32 = vrot.slane %v854_v22, 4 }
 0x24f   : > { %1591 = vperm.xlu2 %6594, %v7214_v42   ;;  %v7750_v42 = vpop.permute.xlu2 %1238 }
 0x250   : > { %v856_v29 = vadd.f32 %v855_v32, %v854_v22 }
 0x252   : > { %v857_v9 = vrot.slane %v856_v29, 2  ;;  %1398 = vperm.xlu1 %6589, %v11544_v11  }
 0x253   : > { %v7769_v21 = vpop.permute.xlu1 %1153 }
 0x254   : > { %v858_v60 = vadd.f32 %v857_v9, %v856_v29  ;;  %11551 = vst [vmem:[#allocation72_spill] sm:$0xff] %v7769_v21  ;;  %v11554_v29 = vld [vmem:[#allocation29_spill] sm:$0xff]  ;;  %v11555_v9 = vld [vmem:[#allocation31_spill] sm:$0xff] }
 0x255   : > { %1647 = vperm.xlu0 %6593, %v11545_v58   ;;  %v11556_v58 = vld [vmem:[#allocation33_spill] sm:$0xff] }
 0x256   : > { %v859_v56 = vrot.slane %v858_v60, 1 }
 0x257   : > { %1603 = vperm.xlu2 %6594, %v11547_v13   ;;  %v7758_v26 = vpop.permute.xlu2 %1314 }
 0x258   : > { %v860_v38 = vadd.f32 %v859_v56, %v858_v60  ;;  %v11557_v56 = vld [vmem:[#allocation34_spill] sm:$0xff] }
 0x25a   : > { %v862_v55 = vmul.f32 0.00048828125, %v860_v38  ;;  %1410 = vperm.xlu1 %6589, %v11548_v1  }
 0x25b   : > { %v7784_v52 = vpop.permute.xlu1 %1168 }
 0x25c   : > { %v864_v4 = vsub.f32 %v862_v55, %v863_v46  ;;  %11552 = vst [vmem:[#allocation76_spill] sm:$0xff] %v7784_v52  ;;  %v11559_v46 = vld [vmem:[#allocation39_spill] sm:$0xff] }
 0x25d   : > { %1659 = vperm.xlu0 %6593, %v7528_v48  }
 0x25e   : > { %v865_v28 = vmax.f32 %v864_v4, 0.0  ;;  %v11560_v4 = vld [vmem:[#allocation43_spill] sm:$0xff] }
 0x25f   : > { %1615 = vperm.xlu2 %6594, %v11549_v40   ;;  %v7767_v36 = vpop.permute.xlu2 %1322  ;;  %v11561_v40 = vld [vmem:[#allocation45_spill] sm:$0xff] }
 0x260   : > { %v866_v43 = vadd.f32 1e-05, %v865_v28 }
 0x262   : > { %6691 = vrsqrt.f32 %v866_v43  ;;  %1422 = vperm.xlu1 %6589, %v7657_v49   ;;  %vm873_vm1 = vweird.f32 %v866_v43 }
 0x265   : > { %1671 = vperm.xlu0 %6593, %v7544_v2   ;;  %v625_v2 = vld [vmem:[%s11116_s2] sm:$0x1] }
 0x267   : > { %1627 = vperm.xlu2 %6594, %v7517_v19  }
 0x268   : > { %v6692_v24 = vpop.eup %6691 }
 0x269   : > { %v868_v25 = vmul.f32 %v6692_v24, %v866_v43  ;;  %vm874_vm0 = vweird.f32 %v6692_v24 }
 0x26a   : > { %6592 = vset.pattern.permute.xlu1 %v6940_v15  ;;  %vm875_vm2 = vmor %vm873_vm1, %vm874_vm0 }
 0x26b   : > { %v869_v48 = vmul.f32 %v6692_v24, %v868_v25  ;;  %1563 = vperm.xlu1 %6592, %v7154_v20   ;;  %v7776_v20 = vpop.permute.xlu0 %1218 }
 0x26d   : > { %v870_v34 = vmul.f32 0.5, %v869_v48  ;;  %1683 = vperm.xlu0 %6593, %v7560_v35   ;;  %v11563_v48 = vld [vmem:[#allocation50_spill] sm:$0xff] }
 0x26f   : > { %v871_v10 = vsub.f32 1.5, %v870_v34  ;;  %1639 = vperm.xlu2 %6594, %v7535_v18   ;;  %v7782_v18 = vpop.permute.xlu2 %1334 }
 0x271   : > { %v872_v19 = vmul.f32 %v6692_v24, %v871_v10  ;;  %v11564_v10 = vld [vmem:[#allocation53_spill] sm:$0xff] }
 0x273   : > { %v876_v15 = vsel %vm875_vm2, %v6692_v24, %v872_v19  ;;  %1575 = vperm.xlu1 %6592, %v7175_v30   ;;  %v7797_v60 = vpop.permute.xlu0 %1233  ;;  %v11562_v24 = vld [vmem:[#allocation49_spill] sm:$0xff]  ;;  %v11565_v19 = vld [vmem:[#allocation54_spill] sm:$0xff] }
 0x274   : > { %v877_v35 = vmul.f32 %v876_v15, %v625_v2 }
 0x276   : > { %v878_v63 = vmul.f32 %v877_v35, %v861_v0  ;;  %v7786_v22 = vperm.slane %v877_v35, 0  ;;  %v11566_v35 = vld [vmem:[#allocation55_spill] sm:$0xff] }
 0x277   : > { %1651 = vperm.xlu2 %6594, %v7551_v53  }
 0x278   : > { %v879_v50 = vsub.f32 %v626_v37, %v878_v63  ;;  %v889_v32 = vmul.f32 %v7786_v22, %v11553_v14  ;;  %v890_v39 = vmul.f32 %v7786_v22, %v11554_v29  ;;  %v891_v53 = vmul.f32 %v7786_v22, %v11555_v9  ;;  %v11567_v63 = vld [vmem:[#allocation56_spill] sm:$0xff] }
 0x279   : > { %v892_v0 = vmul.f32 %v7786_v22, %v11556_v58  ;;  %v893_v13 = vmul.f32 %v7786_v22, %v11557_v56  ;;  %v895_v55 = vmul.f32 %v7786_v22, %v11559_v46  ;;  %v896_v28 = vmul.f32 %v7786_v22, %v11560_v4  ;;  %v7836_v56 = vpop.permute.xlu2 %1346  ;;  %v7850_v4 = vpop.permute.xlu1 %1183 }
 0x27a   : > { %v7789_v30 = vperm.slane %v879_v50, 0  ;;  %v897_v43 = vmul.f32 %v7786_v22, %v11561_v40  ;;  %v898_v25 = vmul.f32 %v7786_v22, %v11562_v24  ;;  %v899_v34 = vmul.f32 %v7786_v22, %v11563_v48  ;;  %v6417_v50 = vld [vmem:[#allocation5 + $0x38] sm:$0xff]  ;;  %11570 = vst [vmem:[#allocation57_spill] sm:$0xff] %v7850_v4  ;;  %v7880_v48 = vld [vmem:[#allocation5 + $0x70] sm:$0xff] }
 0x27b   : > { %1583 = vperm.xlu1 %6592, %v7193_v33   ;;  %v11558_v33 = vld [vmem:[#allocation37_spill] sm:$0xff]  ;;  %v900_v2 = vmul.f32 %v7786_v22, %v11564_v10  ;;  %v901_v15 = vmul.f32 %v7786_v22, %v11565_v19  ;;  %v903_v37 = vmul.f32 %v7786_v22, %v11567_v63  ;;  %4186 = vmatpush.bf16.msra.mxu1 %v6417_v50 }
 0x27c   : > { %v894_v38 = vmul.f32 %v7786_v22, %v11558_v33  ;;  %v7825_v14 = vadd.f32 %v7789_v30, %v889_v32  ;;  %v7828_v29 = vadd.f32 %v7789_v30, %v890_v39  ;;  %v7831_v9 = vadd.f32 %v7789_v30, %v891_v53  ;;  %v7852_v53 = vld [vmem:[#allocation5 + $0x78] sm:$0xff]  ;;  %6499 = vmatpush.bf16.msrb.mxu3 %v6417_v50 }
 0x27d   : > { %v7834_v58 = vadd.f32 %v7789_v30, %v892_v0  ;;  %v7839_v33 = vadd.f32 %v7789_v30, %v893_v13  ;;  %v7845_v32 = vadd.f32 %v7789_v30, %v895_v55  ;;  %v7848_v39 = vadd.f32 %v7789_v30, %v896_v28  ;;  %4275 = vmatpush.bf16.msra.mxu2 %v7852_v53  ;;  %v11580_v50 = vld [vmem:[#allocation58_spill] sm:$0xff] }
 0x27e   : > { %v7842_v46 = vadd.f32 %v7789_v30, %v894_v38  ;;  %v7855_v0 = vadd.f32 %v7789_v30, %v897_v43  ;;  %v7858_v13 = vadd.f32 %v7789_v30, %v898_v25  ;;  %v7861_v38 = vadd.f32 %v7789_v30, %v899_v34  ;;  %v6416_v43 = vld [vmem:[#allocation5 + $0x30] sm:$0xff]  ;;  %v7878_v25 = vpop.permute.xlu0 %1310 }
 0x27f   : > { %1663 = vperm.xlu2 %6594, %v7565_v27   ;;  %v902_v27 = vmul.f32 %v7786_v22, %v11566_v35  ;;  %11568 = vst [vmem:[#allocation52_spill] sm:$0xff] %v7845_v32  ;;  %v7864_v55 = vadd.f32 %v7789_v30, %v900_v2  ;;  %v7867_v28 = vadd.f32 %v7789_v30, %v901_v15  ;;  %v6415_v2 = vld [vmem:[#allocation5 + $0x28] sm:$0xff] }
 0x280   : > { %11569 = vst [vmem:[#allocation15_spill] sm:$0xff] %v7848_v39  ;;  %v7873_v24 = vadd.f32 %v7789_v30, %v903_v37  ;;  %4187 = vmatpush.bf16.msra.mxu1 %v6416_v43  ;;  %6500 = vmatpush.bf16.msrb.mxu3 %v6416_v43  ;;  %v7898_v35 = vld [vmem:[#allocation5 + $0x68] sm:$0xff]  ;;  %v7909_v37 = vld [vmem:[#allocation5 + $0x58] sm:$0xff]  ;;  %v904_v43 = vmul.f32 %v7786_v22, %v11580_v50 }
 0x281   : > { %11571 = vst [vmem:[#allocation61_spill] sm:$0xff] %v7855_v0  ;;  %v7870_v40 = vadd.f32 %v7789_v30, %v902_v27  ;;  %v7882_v34 = vpop.permute.xlu2 %1358  ;;  %v7884_v10 = vpop.permute.xlu1 %1198  ;;  %4276 = vmatpush.bf16.msra.mxu2 %v7880_v48  ;;  %v6414_v27 = vld [vmem:[#allocation5 + $0x20] sm:$0xff]  ;;  %v11596_v0 = vld [vmem:[#allocation32_spill] sm:$0xff] }
 0x282   : > { %11572 = vst [vmem:[#allocation77_spill] sm:$0xff] %v7858_v13  ;;  %v11595_v13 = vld [vmem:[#allocation30_spill] sm:$0xff]  ;;  %v913_v21 = vmul.f32 %v7786_v22, %v11596_v0 }
 0x283   : > { %11573 = vst [vmem:[#allocation59_spill] sm:$0xff] %v7861_v38  ;;  %1595 = vperm.xlu1 %6592, %v7209_v41  }
 0x284   : > { %11574 = vst [vmem:[#allocation64_spill] sm:$0xff] %v7864_v55  ;;  %4188 = vmatpush.bf16.msra.mxu1 %v6415_v2  ;;  %6501 = vmatpush.bf16.msrb.mxu3 %v6415_v2  ;;  %v11581_v2 = vld [vmem:[#allocation60_spill] sm:$0xff]  ;;  %v6449_v55 = vld [vmem:[#allocation5 + $0x138] sm:$0xff] }
 0x285   : > { %11575 = vst [vmem:[#allocation67_spill] sm:$0xff] %v7867_v28  ;;  %4277 = vmatpush.bf16.msra.mxu2 %v7898_v35  ;;  %v6411_v28 = vld [vmem:[#allocation5 + $0x8] sm:$0xff] }
 0x286   : > { %11576 = vst [vmem:[#allocation68_spill] sm:$0xff] %v7870_v40  ;;  %v7889_v41 = vpop.permute.xlu0 %1330 }
 0x287   : > { %1675 = vperm.xlu2 %6594, %v11522_v61   ;;  %11577 = vst [vmem:[#allocation73_spill] sm:$0xff] %v7884_v10  ;;  %v11582_v10 = vld [vmem:[#allocation62_spill] sm:$0xff] }
 0x288   : > { %4189 = vmatpush.bf16.msra.mxu1 %v6414_v27  ;;  %6502 = vmatpush.bf16.msrb.mxu3 %v6414_v27  ;;  %v906_v45 = vmul.f32 %v7786_v22, %v11582_v10  ;;  %v6412_v27 = vld [vmem:[#allocation5 + $0x10] sm:$0xff]  ;;  %v1046_v10 = vlaneseq }
 0x289   : > { %v7891_v61 = vpop.permute.xlu2 %1370  ;;  %v7894_v19 = vpop.permute.xlu1 %1213 }
 0x28a   : > { %11578 = vst [vmem:[#allocation78_spill] sm:$0xff] %v7891_v61  ;;  %v941_v50 = vadd.f32 %v7789_v30, %v906_v45  ;;  %v7939_v45 = vshrl.u32 %v1046_v10, 7  ;;  %v912_v10 = vmul.f32 %v7786_v22, %v11595_v13 }
 0x28b   : > { %1607 = vperm.xlu1 %6592, %v11525_v8  }
 0x28c   : > { %vm1048_vm3 = vcmp.lt.s32.totalorder %v7939_v45, 1  ;;  %vm1529_vm4 = vcmp.lt.s32.totalorder %v7939_v45, 7 }
 0x28e   : > { %v7896_v15 = vpop.permute.xlu0 %1342 }
 0x28f   : > { %1687 = vperm.xlu2 %6594, %v11528_v31   ;;  %v7904_v31 = vld [vmem:[#allocation5 + $0x60] sm:$0xff] }
 0x290   : > { %4278 = vmatpush.bf16.msra.mxu2 %v7904_v31 }
 0x291   : > { %v7902_v8 = vpop.permute.xlu2 %1382  ;;  %v7906_v63 = vpop.permute.xlu1 %1228 }
 0x292   : > { %11579 = vst [vmem:[#allocation71_spill] sm:$0xff] %v7902_v8 }
 0x293   : > { %1619 = vperm.xlu1 %6592, %v11530_v5   ;;  %v6413_v5 = vld [vmem:[#allocation5 + $0x18] sm:$0xff] }
 0x294   : > { %4190 = vmatpush.bf16.msra.mxu1 %v6413_v5  ;;  %6503 = vmatpush.bf16.msrb.mxu3 %v6413_v5  ;;  %v939_v5 = vadd.f32 %v7789_v30, %v904_v43  ;;  %v7937_v43 = vmax.f32 %v941_v50, 0.0 }
 0x295   : > { %4279 = vmatpush.bf16.msra.mxu2 %v7909_v37 }
 0x296   : > { %v7917_v4 = vpop.permute.xlu0 %1354  ;;  %v7933_v8 = vmax.f32 %v939_v5, 0.0  ;;  %11586 = vst [vmem:[#allocation27_spill] sm:$0xff] %v7937_v43  ;;  %v7946_v5 = vmax.f32 %v7873_v24, 0.0  ;;  %v11590_v62 = vrot.slane %v7937_v43, 7 }
 0x298   : > { %4191 = vmatpush.bf16.msra.mxu1 %v6412_v27  ;;  %6504 = vmatpush.bf16.msrb.mxu3 %v6412_v27  ;;  %11584 = vst [vmem:[#allocation79_spill] sm:$0xff] %v7933_v8  ;;  %v6441_v27 = vld [vmem:[#allocation5 + $0xf8] sm:$0xff] }
 0x299   : > { %v7928_v51 = vpop.permute.xlu1 %1306  ;;  %4280 = vmatpush.bf16.msra.mxu2 %v7920_v57  ;;  %11587 = vst [vmem:[#allocation29_spill] sm:$0xff] %v7946_v5  ;;  %4453 = vmatpush.bf16.msrb.mxu0 %v6441_v27 }
 0x29b   : > { %1631 = vperm.xlu1 %6592, %v11537_v59   ;;  %v905_v59 = vmul.f32 %v7786_v22, %v11581_v2  ;;  %v7926_v2 = vpop.permute.xlu2 %1394 }
 0x29c   : > { %11583 = vst [vmem:[#allocation66_spill] sm:$0xff] %v7926_v2  ;;  %4192 = vmatpush.bf16.msra.mxu1 %v6411_v28  ;;  %6505 = vmatpush.bf16.msrb.mxu3 %v6411_v28  ;;  %v7942_v2 = vld [vmem:[#allocation5 + $0x40] sm:$0xff] }
 0x29d   : > { %v940_v40 = vadd.f32 %v7789_v30, %v905_v59  ;;  %4281 = vmatpush.bf16.msra.mxu2 %v7931_v16  ;;  %v6410_v59 = vld [vmem:[#allocation5] sm:$0xff] }
 0x29e   : > { %v7951_v38 = vpop.permute.xlu0 %1366 }
 0x29f   : > { %11588 = vst [vmem:[#allocation31_spill] sm:$0xff] %v7951_v38 }
 0x2a0   : > { %4193 = vmatpush.bf16.msra.mxu1 %v6410_v59  ;;  %6506 = vmatpush.bf16.msrb.mxu3 %v6410_v59 }
 0x2a1   : > { %v7956_v52 = vpop.permute.xlu1 %1318  ;;  %4282 = vmatpush.bf16.msra.mxu2 %v7942_v2 }
 0x2a3   : > { %1643 = vperm.xlu1 %6592, %v7621_v44   ;;  %v7935_v44 = vmax.f32 %v940_v40, 0.0  ;;  %v1035_v40 = vrot.slane %v7933_v8, 7  ;;  %v7953_v28 = vpop.permute.xlu2 %1406 }
 0x2a4   : > { %4542 = vmatpush.bf16.msrb.mxu1 %v6449_v55  ;;  %6507 = vmatpush.bf16.msra.mxu3 %v7852_v53  ;;  %v11594_v55 = vld [vmem:[#allocation20_spill] sm:$0xff] }
 0x2a5   : > { %11585 = vst [vmem:[#allocation70_spill] sm:$0xff] %v7935_v44  ;;  %v1036_v50 = vrot.slane %v7935_v44, 7 }
 0x2a7   : > { %v7967_v27 = vsel %vm1048_vm3, %v1036_v50, %v11590_v62  ;;  %v7971_v59 = vsel %vm1048_vm3, %v1035_v40, %v1036_v50 }
 0x2a8   : > { %11591 = vst [vmem:[#allocation33_spill] sm:$0xff] %v7967_v27  ;;  %v1265_v62 = vmul.f32 %v7762_v6, %v7971_v59  ;;  %v1266_v50 = vmul.f32 %v7731_v23, %v7967_v27  ;;  %6508 = vmatpush.bf16.msra.mxu3 %v7880_v48  ;;  %v947_v23 = vadd.f32 %v7789_v30, %v912_v10  ;;  %v6941_v10 = vmov 3  }
 0x2a9   : > { %11592 = vst [vmem:[#allocation34_spill] sm:$0xff] %v7971_v59  ;;  %v8001_v6 = vpop.permute.xlu1 %1326  ;;  %6596 = vset.pattern.permute.xlu0 %v6941_v10  ;;  %6597 = vset.pattern.permute.xlu2 %v6941_v10 }
 0x2aa   : > { %v8013_v48 = vmax.f32 %v947_v23, 0.0  ;;  %v8030_v23 = vld [vmem:[%s11118_s4 + $0x10] sm:$0xff] }
 0x2ab   : > { %1655 = vperm.xlu1 %6592, %v11544_v11   ;;  %v11589_v11 = vld [vmem:[#allocation35_spill] sm:$0xff]  ;;  %v7997_v0 = vpop.permute.xlu2 %1418  ;;  %11607 = vst [vmem:[#allocation54_spill] sm:$0xff] %v8030_v23  ;;  %1763 = vperm.xlu2 %6597, %v8030_v23  }
 0x2ac   : > { %v914_v24 = vmul.f32 %v7786_v22, %v11589_v11  ;;  %v11593_v11 = vld [vmem:[#allocation18_spill] sm:$0xff]  ;;  %6509 = vmatpush.bf16.msra.mxu3 %v7898_v35  ;;  %11603 = vst [vmem:[#allocation50_spill] sm:$0xff] %v8013_v48  ;;  %v8099_v23 = vld [vmem:[%s11118_s4 + $0x20] sm:$0xff] }
 0x2ad   : > { %v907_v61 = vmul.f32 %v7786_v22, %v11593_v11 }
 0x2ae   : > { %v949_v8 = vadd.f32 %v7789_v30, %v914_v24  ;;  %v908_v24 = vmul.f32 %v7786_v22, %v11594_v55  ;;  %v11598_v55 = vrot.slane %v7946_v5, 7 }
 0x2af   : > { %v942_v53 = vadd.f32 %v7789_v30, %v907_v61  ;;  %v8004_v61 = vpop.permute.xlu0 %1378 }
 0x2b0   : > { %v943_v11 = vadd.f32 %v7789_v30, %v908_v24  ;;  %v7989_v54 = vmax.f32 %v949_v8, 0.0  ;;  %v7995_v13 = vsel %vm1048_vm3, %v11598_v55, %v1035_v40  ;;  %11600 = vst [vmem:[#allocation43_spill] sm:$0xff] %v8004_v61  ;;  %v1297_v8 = vpack.c.bf16 %v1265_v62, %v1265_v62  ;;  %v11605_v62 = vld [vmem:[#allocation17_spill] sm:$0xff]  ;;  %6510 = vmatpush.bf16.msra.mxu3 %v7904_v31 }
 0x2b1   : > { %11599 = vst [vmem:[#allocation39_spill] sm:$0xff] %v7995_v13  ;;  %v1298_v24 = vpack.c.bf16 %v1266_v50, %v1266_v50  ;;  %v8006_v59 = vmax.f32 %v942_v53, 0.0  ;;  %v883_v50 = vmul.f32 %v7786_v22, %v11605_v62  ;;  %v8045_v38 = vpop.permute.xlu1 %1338  ;;  %v11609_v13 = vld [vmem:[#allocation22_spill] sm:$0xff] }
 0x2b2   : > { %11597 = vst [vmem:[#allocation37_spill] sm:$0xff] %v7989_v54  ;;  %v8008_v27 = vmax.f32 %v943_v11, 0.0  ;;  %v1434_v40 = vmul.f32 %v7878_v25, %v7989_v54  ;;  %v11606_v25 = vld [vmem:[#allocation19_spill] sm:$0xff]  ;;  %v2802_v53 = vunpack.c.l.b16 %v1297_v8  ;;  %v1045_v61 = vrot.slane %v7989_v54, 7 }
 0x2b3   : > { %1667 = vperm.xlu1 %6592, %v11548_v1   ;;  %v948_v1 = vadd.f32 %v7789_v30, %v913_v21  ;;  %11601 = vst [vmem:[#allocation45_spill] sm:$0xff] %v8006_v59  ;;  %v8020_v21 = vld [vmem:[%s11118_s4 + $0x8] sm:$0xff]  ;;  %v884_v35 = vmul.f32 %v7786_v22, %v11606_v25  ;;  %v2803_v11 = vunpack.c.l.b16 %v1298_v24  ;;  %v8038_v25 = vpop.permute.xlu2 %1430  ;;  %v918_v8 = vadd.f32 %v7789_v30, %v883_v50 }
 0x2b4   : > { %11602 = vst [vmem:[#allocation49_spill] sm:$0xff] %v8008_v27  ;;  %1759 = vperm.xlu0 %6596, %v8020_v21   ;;  %v1466_v5 = vpack.c.bf16 %v1434_v40, %v1434_v40  ;;  %v909_v40 = vmul.f32 %v7786_v22, %v11609_v13  ;;  %6511 = vmatpush.bf16.msra.mxu3 %v7909_v37  ;;  %v8084_v37 = vld [vmem:[%s11118_s4 + $0x30] sm:$0xff] }
 0x2b5   : > { %v8015_v55 = vmax.f32 %v948_v1, 0.0  ;;  %v1038_v1 = vrot.slane %v8006_v59, 7  ;;  %11608 = vst [vmem:[#allocation55_spill] sm:$0xff] %v8038_v25  ;;  %v919_v24 = vadd.f32 %v7789_v30, %v884_v35  ;;  %v2822_v32 = vpack.c.b16 %v2803_v11, %v2802_v53  ;;  %1771 = vperm.xlu2 %6597, %v8099_v23  }
 0x2b6   : > { %v11610_v25 = vrot.slane %v8008_v27, 7  ;;  %v2875_v50 = vunpack.c.l.b16 %v1466_v5  ;;  %v11612_v35 = vrot.slane %v7937_v43, 7  ;;  %v8065_v13 = vmax.f32 %v918_v8, 0.0  ;;  %v11621_v8 = vld [vmem:[#allocation40_spill] sm:$0xff] }
 0x2b7   : > { %11604 = vst [vmem:[#allocation53_spill] sm:$0xff] %v8015_v55  ;;  %v1433_v62 = vmul.f32 %v7928_v51, %v8015_v55  ;;  %v1044_v51 = vrot.slane %v8015_v55, 7  ;;  %v8067_v53 = vmax.f32 %v919_v24, 0.0  ;;  %v11618_v5 = vrot.slane %v8013_v48, 7  ;;  %4254 = vmatmul.bf16.vlgmr.msrb.gmra.mxu3 %v2822_v32 }
 0x2b8   : > { %v8054_v31 = vsel %vm1048_vm3, %v1038_v1, %v11610_v25  ;;  %11615 = vst [vmem:[#allocation62_spill] sm:$0xff] %v8065_v13  ;;  %v944_v32 = vadd.f32 %v7789_v30, %v909_v40  ;;  %6512 = vmatpush.bf16.msra.mxu3 %v7920_v57  ;;  %v1435_v57 = vmul.f32 %v7758_v26, %v8065_v13 }
 0x2b9   : > { %v1465_v39 = vpack.c.bf16 %v1433_v62, %v1433_v62  ;;  %11611 = vst [vmem:[#allocation56_spill] sm:$0xff] %v8054_v31  ;;  %v8062_v62 = vpop.permute.xlu0 %1390  ;;  %v8071_v11 = vsel %vm1048_vm3, %v1044_v51, %v1045_v61  ;;  %v8077_v25 = vsel %vm1048_vm3, %v11618_v5, %v1044_v51  ;;  %v6440_v51 = vld [vmem:[#allocation5 + $0xf0] sm:$0xff] }
 0x2ba   : > { %11614 = vst [vmem:[#allocation60_spill] sm:$0xff] %v8062_v62  ;;  %v1241_v24 = vmul.f32 %v11621_v8, %v8077_v25  ;;  %v6448_v5 = vld [vmem:[#allocation5 + $0x130] sm:$0xff]  ;;  %4454 = vmatpush.bf16.msrb.mxu0 %v6440_v51 }
 0x2bb   : > { %1679 = vperm.xlu1 %6592, %v7657_v49   ;;  %v8060_v49 = vsel %vm1048_vm3, %v11612_v35, %v1038_v1  ;;  %v2874_v54 = vunpack.c.l.b16 %v1465_v39  ;;  %11616 = vst [vmem:[#allocation35_spill] sm:$0xff] %v8067_v53  ;;  %v11620_v1 = vld [vmem:[#allocation25_spill] sm:$0xff]  ;;  %v11622_v35 = vld [vmem:[#allocation36_spill] sm:$0xff]  ;;  %v8103_v40 = vpop.permute.xlu2 %1571  ;;  %4543 = vmatpush.bf16.msrb.mxu1 %v6448_v5 }
 0x2bc   : > { %11613 = vst [vmem:[#allocation58_spill] sm:$0xff] %v8060_v49  ;;  %v910_v39 = vmul.f32 %v7786_v22, %v11620_v1  ;;  %1779 = vperm.xlu0 %6596, %v8084_v37   ;;  %v1242_v62 = vmul.f32 %v11622_v35, %v8071_v11  ;;  %v1268_v1 = vmul.f32 %v7776_v20, %v8054_v31  ;;  %v1014_v20 = vrot.slane %v8065_v13, 7  ;;  %v8107_v35 = vpop.permute.xlu1 %1350  ;;  %v11639_v13 = vld [vmem:[#allocation28_spill] sm:$0xff] }
 0x2bd   : > { %11617 = vst [vmem:[#allocation18_spill] sm:$0xff] %v8071_v11  ;;  %v2906_v3 = vpack.c.b16 %v2875_v50, %v2874_v54  ;;  %v1267_v47 = vmul.f32 %v7894_v19, %v8060_v49  ;;  %v1273_v50 = vpack.c.bf16 %v1241_v24, %v1241_v24  ;;  %v11200_v19 = vrot.slane %v8067_v53, 7  ;;  %6513 = vmatpush.bf16.msra.mxu3 %v7931_v16 }
 0x2be   : > { %11619 = vst [vmem:[#allocation20_spill] sm:$0xff] %v8077_v25  ;;  %v945_v54 = vadd.f32 %v7789_v30, %v910_v39  ;;  %v1274_v8 = vpack.c.bf16 %v1242_v62, %v1242_v62  ;;  %v8118_v62 = vmax.f32 %v944_v32, 0.0  ;;  %v1300_v39 = vpack.c.bf16 %v1268_v1, %v1268_v1 }
 0x2bf   : > { %4283 = vmatmul.bf16.vlgmr.msra.gmra.mxu2 %v2906_v3  ;;  %11623 = vst [vmem:[#allocation30_spill] sm:$0xff] %v8103_v40  ;;  %v2778_v25 = vunpack.c.l.b16 %v1273_v50  ;;  %v8115_v3 = vld [vmem:[%s11118_s4] sm:$0xff]  ;;  %v1299_v24 = vpack.c.bf16 %v1267_v47, %v1267_v47  ;;  %v11626_v50 = vld [vmem:[#allocation21_spill] sm:$0xff]  ;;  %v8134_v32 = vsel %vm1048_vm3, %v1045_v61, %v1014_v20 }
 0x2c0   : > { %v2779_v11 = vunpack.c.l.b16 %v1274_v8  ;;  %11624 = vst [vmem:[#allocation32_spill] sm:$0xff] %v8118_v62  ;;  %v8120_v51 = vmax.f32 %v945_v54, 0.0  ;;  %v8130_v8 = vsel %vm1048_vm3, %v1014_v20, %v11200_v19  ;;  %v11629_v47 = vld [vmem:[#allocation23_spill] sm:$0xff]  ;;  %v1040_v61 = vrot.slane %v8118_v62, 7  ;;  %v11630_v19 = vld [vmem:[#allocation41_spill] sm:$0xff] }
 0x2c1   : > { %11627 = vst [vmem:[#allocation19_spill] sm:$0xff] %v8130_v8  ;;  %v886_v1 = vmul.f32 %v7786_v22, %v11629_v47  ;;  %v8139_v26 = vpop.permute.xlu0 %1402  ;;  %v2805_v20 = vunpack.c.l.b16 %v1300_v39  ;;  %v2804_v16 = vunpack.c.l.b16 %v1299_v24  ;;  %v1243_v49 = vmul.f32 %v11630_v19, %v8134_v32  ;;  %6514 = vmatpush.bf16.msra.mxu3 %v7942_v2  ;;  %v8169_v47 = vld [vmem:[%s11118_s4 + $0x18] sm:$0xff] }
 0x2c2   : > { %11625 = vst [vmem:[#allocation17_spill] sm:$0xff] %v8120_v51  ;;  %v2810_v5 = vpack.c.b16 %v2779_v11, %v2778_v25  ;;  %v8144_v11 = vld [vmem:[%s11118_s4 + $0x48] sm:$0xff] }
 0x2c3   : > { %6595 = vset.pattern.permute.xlu1 %v6941_v10  ;;  %v1436_v10 = vmul.f32 %v7956_v52, %v8067_v53  ;;  %v885_v52 = vmul.f32 %v7786_v22, %v11626_v50  ;;  %11628 = vst [vmem:[#allocation22_spill] sm:$0xff] %v8134_v32  ;;  %v8152_v50 = vld [vmem:[%s11118_s4 + $0x38] sm:$0xff]  ;;  %v8160_v31 = vpop.permute.xlu2 %1579  ;;  %v921_v39 = vadd.f32 %v7789_v30, %v886_v1 }
 0x2c4   : > { %1755 = vperm.xlu1 %6595, %v8115_v3   ;;  %1791 = vperm.xlu0 %6596, %v8144_v11   ;;  %11632 = vst [vmem:[#allocation25_spill] sm:$0xff] %v8160_v31  ;;  %v8163_v24 = vpop.permute.xlu1 %1362  ;;  %v2823_v1 = vpack.c.b16 %v2805_v20, %v2804_v16  ;;  %v1275_v32 = vpack.c.bf16 %v1243_v49, %v1243_v49 }
 0x2c5   : > { %4194 = vmatmul.bf16.vlgmr.msra.gmra.mxu1 %v2810_v5  ;;  %v1468_v25 = vpack.c.bf16 %v1436_v10, %v1436_v10  ;;  %v920_v54 = vadd.f32 %v7789_v30, %v885_v52  ;;  %1783 = vperm.xlu2 %6597, %v8152_v50   ;;  %v11631_v10 = vld [vmem:[#allocation38_spill] sm:$0xff]  ;;  %v1467_v52 = vpack.c.bf16 %v1435_v57, %v1435_v57  ;;  %v11635_v57 = vrot.slane %v8008_v27, 7 }
 0x2c6   : > { %v1244_v5 = vmul.f32 %v11631_v10, %v8130_v8  ;;  %11633 = vst [vmem:[#allocation40_spill] sm:$0xff] %v8169_v47 }
 0x2c7   : > { %v2877_v40 = vunpack.c.l.b16 %v1468_v25  ;;  %v8172_v19 = vmax.f32 %v920_v54, 0.0  ;;  %v8178_v10 = vsel %vm1048_vm3, %v11635_v57, %v1040_v61  ;;  %v2876_v2 = vunpack.c.l.b16 %v1467_v52  ;;  %4259 = vmatmul.bf16.gmra.mxu3 %v2823_v1  ;;  %v8193_v57 = vld [vmem:[%s11118_s4 + $0x60] sm:$0xff] }
 0x2c8   : > { %11636 = vst [vmem:[#allocation21_spill] sm:$0xff] %v8178_v10  ;;  %v1276_v8 = vpack.c.bf16 %v1244_v5, %v1244_v5  ;;  %v11637_v25 = vrot.slane %v8120_v51, 7  ;;  %v911_v54 = vmul.f32 %v7786_v22, %v11639_v13  ;;  %v8204_v13 = vld [vmem:[%s11118_s4 + $0x50] sm:$0xff]  ;;  %v2780_v52 = vunpack.c.l.b16 %v1275_v32 }
 0x2c9   : > { %11634 = vst [vmem:[#allocation36_spill] sm:$0xff] %v8172_v19  ;;  %v2907_v49 = vpack.c.b16 %v2877_v40, %v2876_v2  ;;  %v1016_v5 = vrot.slane %v8172_v19, 7  ;;  %v8208_v40 = vpop.permute.xlu0 %1414 }
 0x2ca   : > { %v8184_v31 = vsel %vm1048_vm3, %v1040_v61, %v11637_v25  ;;  %v946_v20 = vadd.f32 %v7789_v30, %v911_v54  ;;  %v1269_v61 = vmul.f32 %v7743_v12, %v8178_v10  ;;  %11641 = vst [vmem:[#allocation38_spill] sm:$0xff] %v8204_v13  ;;  %v8220_v25 = vld [vmem:[%s11118_s4 + $0x28] sm:$0xff] }
 0x2cb   : > { %11638 = vst [vmem:[#allocation23_spill] sm:$0xff] %v8184_v31  ;;  %v1270_v16 = vmul.f32 %v7906_v63, %v8184_v31  ;;  %v8210_v1 = vpop.permute.xlu2 %1591 }
 0x2cc   : > { %1767 = vperm.xlu1 %6595, %v8169_v47   ;;  %v8188_v47 = vmax.f32 %v921_v39, 0.0  ;;  %1803 = vperm.xlu0 %6596, %v8193_v57   ;;  %v2781_v39 = vunpack.c.l.b16 %v1276_v8  ;;  %11642 = vst [vmem:[#allocation28_spill] sm:$0xff] %v8210_v1  ;;  %v8213_v2 = vpop.permute.xlu1 %1374  ;;  %v8223_v8 = vmax.f32 %v946_v20, 0.0  ;;  %v1301_v32 = vpack.c.bf16 %v1269_v61, %v1269_v61  ;;  %v11650_v20 = vld [vmem:[#allocation24_spill] sm:$0xff] }
 0x2cd   : > { %1795 = vperm.xlu2 %6597, %v8204_v13   ;;  %11643 = vst [vmem:[#allocation82_spill] sm:$0xff] %v8213_v2  ;;  %v1302_v54 = vpack.c.bf16 %v1270_v16, %v1270_v16  ;;  %v887_v61 = vmul.f32 %v7786_v22, %v11650_v20  ;;  %v11651_v16 = vld [vmem:[#allocation26_spill] sm:$0xff] }
 0x2ce   : > { %11640 = vst [vmem:[#allocation41_spill] sm:$0xff] %v8188_v47  ;;  %v1438_v63 = vmul.f32 %v8001_v6, %v8188_v47  ;;  %v1437_v6 = vmul.f32 %v7767_v36, %v8172_v19  ;;  %v2811_v31 = vpack.c.b16 %v2781_v39, %v2780_v52  ;;  %v11648_v10 = vrot.slane %v8188_v47, 7  ;;  %v6439_v36 = vld [vmem:[#allocation5 + $0xe8] sm:$0xff] }
 0x2cf   : > { %4288 = vmatmul.bf16.gmra.mxu2 %v2907_v49  ;;  %11644 = vst [vmem:[#allocation83_spill] sm:$0xff] %v8220_v25  ;;  %v11646_v49 = vrot.slane %v8067_v53, 7  ;;  %v888_v53 = vmul.f32 %v7786_v22, %v11651_v16  ;;  %v6447_v52 = vld [vmem:[#allocation5 + $0x128] sm:$0xff]  ;;  %v2806_v20 = vunpack.c.l.b16 %v1301_v32  ;;  %v2807_v19 = vunpack.c.l.b16 %v1302_v54  ;;  %4455 = vmatpush.bf16.msrb.mxu0 %v6439_v36 }
 0x2d0   : > { %11645 = vst [vmem:[#allocation84_spill] sm:$0xff] %v8223_v8  ;;  %v8237_v1 = vsel %vm1048_vm3, %v1016_v5, %v11648_v10  ;;  %v1470_v2 = vpack.c.bf16 %v1438_v63, %v1438_v63  ;;  %v1042_v10 = vrot.slane %v8223_v8, 7  ;;  %v8255_v22 = vld [vmem:[%s11118_s4 + $0x68] sm:$0xff]  ;;  %v11654_v63 = vld [vmem:[#allocation42_spill] sm:$0xff]  ;;  %4544 = vmatpush.bf16.msrb.mxu1 %v6447_v52  ;;  %v922_v13 = vadd.f32 %v7789_v30, %v887_v61 }
 0x2d1   : > { %v8229_v12 = vsel %vm1048_vm3, %v11646_v49, %v1016_v5  ;;  %11649 = vst [vmem:[#allocation86_spill] sm:$0xff] %v8237_v1  ;;  %v8246_v49 = vld [vmem:[%s11118_s4 + $0x78] sm:$0xff]  ;;  %v11652_v5 = vld [vmem:[#allocation44_spill] sm:$0xff]  ;;  %v1246_v16 = vmul.f32 %v11654_v63, %v8237_v1  ;;  %v923_v32 = vadd.f32 %v7789_v30, %v888_v53  ;;  %v11660_v30 = vrot.slane %v8013_v48, 7 }
 0x2d2   : > { %11647 = vst [vmem:[#allocation85_spill] sm:$0xff] %v8229_v12  ;;  %v1245_v39 = vmul.f32 %v11652_v5, %v8229_v12  ;;  %v8266_v5 = vpop.permute.xlu0 %1426  ;;  %v2879_v12 = vunpack.c.l.b16 %v1470_v2  ;;  %v2824_v61 = vpack.c.b16 %v2807_v19, %v2806_v20  ;;  %v11229_v1 = vrot.slane %v8013_v48, 1  ;;  %v8306_v20 = vld [vmem:[%s11118_s4 + $0x80] sm:$0xff] }
 0x2d3   : > { %11653 = vst [vmem:[#allocation24_spill] sm:$0xff] %v8255_v22  ;;  %v8284_v53 = vsel %vm1048_vm3, %v1042_v10, %v11660_v30  ;;  %v1278_v52 = vpack.c.bf16 %v1246_v16, %v1246_v16 }
 0x2d4   : > { %1775 = vperm.xlu1 %6595, %v8220_v25   ;;  %1815 = vperm.xlu0 %6596, %v8246_v49   ;;  %v8260_v25 = vpop.permute.xlu2 %1603  ;;  %v8264_v54 = vpop.permute.xlu1 %1386  ;;  %11661 = vst [vmem:[#allocation88_spill] sm:$0xff] %v8284_v53  ;;  %v1277_v2 = vpack.c.bf16 %v1245_v39, %v1245_v39 }
 0x2d5   : > { %4199 = vmatmul.bf16.gmra.mxu1 %v2811_v31  ;;  %1807 = vperm.xlu2 %6597, %v8255_v22   ;;  %v1469_v31 = vpack.c.bf16 %v1437_v6, %v1437_v6  ;;  %11655 = vst [vmem:[#allocation26_spill] sm:$0xff] %v8260_v25  ;;  %v8271_v22 = vld [vmem:[%s11118_s4 + $0x40] sm:$0xff]  ;;  %v11658_v6 = vrot.slane %v8120_v51, 7  ;;  %v11230_v25 = vrot.slane %v8015_v55, 1 }
 0x2d6   : > { %11656 = vst [vmem:[#allocation44_spill] sm:$0xff] %v8264_v54  ;;  %v8288_v54 = vmax.f32 %v922_v13, 0.0  ;;  %v1272_v13 = vmul.f32 %v7750_v42, %v8284_v53  ;;  %v2782_v16 = vunpack.c.l.b16 %v1277_v2 }
 0x2d7   : > { %11657 = vst [vmem:[#allocation42_spill] sm:$0xff] %v8271_v22  ;;  %v8278_v36 = vsel %vm1048_vm3, %v11658_v6, %v1042_v10  ;;  %v2878_v63 = vunpack.c.l.b16 %v1469_v31  ;;  %4264 = vmatmul.bf16.gmra.mxu3 %v2824_v61  ;;  %v8296_v10 = vld [vmem:[%s11118_s4 + $0x90] sm:$0xff]  ;;  %v2783_v31 = vunpack.c.l.b16 %v1278_v52  ;;  %v8330_v61 = vld [vmem:[%s11118_s4 + $0x58] sm:$0xff] }
 0x2d8   : > { %11659 = vst [vmem:[#allocation87_spill] sm:$0xff] %v8278_v36  ;;  %v1271_v39 = vmul.f32 %v7797_v60, %v8278_v36  ;;  %v8317_v60 = vsel %vm1529_vm4, %v11229_v1, %v11230_v25  ;;  %v1018_v42 = vrot.slane %v8288_v54, 7  ;;  %v1439_v30 = vmul.f32 %v7889_v41, %v8288_v54 }
 0x2d9   : > { %11662 = vst [vmem:[#allocation89_spill] sm:$0xff] %v8288_v54  ;;  %v2908_v19 = vpack.c.b16 %v2879_v12, %v2878_v63  ;;  %v1304_v63 = vpack.c.bf16 %v1272_v13, %v1272_v13  ;;  %v2812_v1 = vpack.c.b16 %v2783_v31, %v2782_v16  ;;  %v11668_v41 = vrot.slane %v8188_v47, 7  ;;  %v8354_v31 = vld [vmem:[%s11118_s4 + $0x98] sm:$0xff] }
 0x2da   : > { %11665 = vst [vmem:[#allocation92_spill] sm:$0xff] %v8317_v60  ;;  %v1303_v52 = vpack.c.bf16 %v1271_v39, %v1271_v39  ;;  %v1471_v36 = vpack.c.bf16 %v1439_v30, %v1439_v30  ;;  %v8348_v39 = vld [vmem:[%s11118_s4 + $0xa8] sm:$0xff] }
 0x2db   : > { %v2809_v16 = vunpack.c.l.b16 %v1304_v63  ;;  %v8368_v63 = vld [vmem:[%s11118_s4 + $0x70] sm:$0xff] }
 0x2dc   : > { %1787 = vperm.xlu1 %6595, %v8271_v22   ;;  %v8290_v22 = vmax.f32 %v923_v32, 0.0  ;;  %1827 = vperm.xlu0 %6596, %v8296_v10   ;;  %v8309_v32 = vpop.permute.xlu2 %1615  ;;  %v8321_v6 = vpop.permute.xlu1 %1398  ;;  %v2808_v13 = vunpack.c.l.b16 %v1303_v52 }
 0x2dd   : > { %1819 = vperm.xlu2 %6597, %v8306_v20   ;;  %11664 = vst [vmem:[#allocation91_spill] sm:$0xff] %v8309_v32 }
 0x2de   : > { %11663 = vst [vmem:[#allocation90_spill] sm:$0xff] %v8290_v22  ;;  %v1019_v12 = vrot.slane %v8290_v22, 7  ;;  %v1440_v2 = vmul.f32 %v7782_v18, %v8290_v22  ;;  %v8343_v18 = vsel %vm1048_vm3, %v11668_v41, %v1018_v42 }
 0x2df   : > { %4293 = vmatmul.bf16.gmra.mxu2 %v2908_v19  ;;  %11666 = vst [vmem:[#allocation93_spill] sm:$0xff] %v8321_v6  ;;  %v8333_v19 = vpop.permute.xlu0 %1567  ;;  %v2825_v6 = vpack.c.b16 %v2809_v16, %v2808_v13  ;;  %v1458_v13 = vmul.f32 %v7953_v28, %v7937_v43  ;;  %v1457_v28 = vmul.f32 %v8139_v26, %v7935_v44  ;;  %v6720_v44 = vld [vmem:[%s11118_s4 + $0xd8] sm:$0xff] }
 0x2e0   : > { %v8337_v25 = vsel %vm1048_vm3, %v1018_v42, %v1019_v12  ;;  %11669 = vst [vmem:[#allocation95_spill] sm:$0xff] %v8343_v18  ;;  %v1472_v53 = vpack.c.bf16 %v1440_v2, %v1440_v2  ;;  %v11670_v42 = vld [vmem:[#allocation48_spill] sm:$0xff]  ;;  %v11671_v2 = vld [vmem:[#allocation47_spill] sm:$0xff] }
 0x2e1   : > { %11667 = vst [vmem:[#allocation94_spill] sm:$0xff] %v8337_v25  ;;  %v1247_v30 = vmul.f32 %v11670_v42, %v8343_v18  ;;  %v1248_v41 = vmul.f32 %v11671_v2, %v8337_v25  ;;  %v8372_v42 = vmax.f32 %v7825_v14, 0.0  ;;  %v8375_v2 = vmax.f32 %v7828_v29, 0.0  ;;  %v8390_v14 = vld [vmem:[%s11118_s4 + $0xb0] sm:$0xff]  ;;  %v6438_v29 = vld [vmem:[#allocation5 + $0xe0] sm:$0xff] }
 0x2e2   : > { %v2881_v52 = vunpack.c.l.b16 %v1472_v53  ;;  %4456 = vmatpush.bf16.msrb.mxu0 %v6438_v29 }
 0x2e3   : > { %v1279_v22 = vpack.c.bf16 %v1247_v30, %v1247_v30  ;;  %v1280_v47 = vpack.c.bf16 %v1248_v41, %v1248_v41  ;;  %11673 = vst [vmem:[#allocation47_spill] sm:$0xff] %v8372_v42  ;;  %v1020_v18 = vrot.slane %v8372_v42, 7  ;;  %v1441_v43 = vmul.f32 %v8045_v38, %v8372_v42 }
 0x2e4   : > { %1799 = vperm.xlu1 %6595, %v8330_v61   ;;  %1839 = vperm.xlu0 %6596, %v8348_v39   ;;  %v8361_v60 = vpop.permute.xlu2 %1627  ;;  %v8363_v32 = vpop.permute.xlu1 %1410  ;;  %11674 = vst [vmem:[#allocation96_spill] sm:$0xff] %v8375_v2  ;;  %v1489_v38 = vpack.c.bf16 %v1457_v28, %v1457_v28 }
 0x2e5   : > { %4204 = vmatmul.bf16.gmra.mxu1 %v2812_v1  ;;  %1831 = vperm.xlu2 %6597, %v8354_v31   ;;  %11672 = vst [vmem:[#allocation48_spill] sm:$0xff] %v8361_v60  ;;  %v2880_v1 = vunpack.c.l.b16 %v1471_v36  ;;  %v8382_v36 = vld [vmem:[%s11118_s4 + $0xc0] sm:$0xff]  ;;  %v2784_v16 = vunpack.c.l.b16 %v1279_v22  ;;  %v2785_v30 = vunpack.c.l.b16 %v1280_v47  ;;  %v8406_v47 = vld [vmem:[%s11118_s4 + $0x88] sm:$0xff]  ;;  %v1490_v22 = vpack.c.bf16 %v1458_v13, %v1458_v13 }
 0x2e6   : > { %v8417_v29 = vsel %vm1048_vm3, %v1019_v12, %v1020_v18  ;;  %v2898_v25 = vunpack.c.l.b16 %v1489_v38  ;;  %v8448_v38 = vmax.f32 %v7834_v58, 0.0 }
 0x2e7   : > { %4269 = vmatmul.bf16.gmra.mxu3 %v2825_v6  ;;  %v8377_v60 = vpop.permute.xlu0 %1587  ;;  %v2909_v53 = vpack.c.b16 %v2881_v52, %v2880_v1  ;;  %v6446_v6 = vld [vmem:[#allocation5 + $0x120] sm:$0xff]  ;;  %v1021_v1 = vrot.slane %v8375_v2, 7  ;;  %11678 = vst [vmem:[#allocation100_spill] sm:$0xff] %v8417_v29  ;;  %v2899_v13 = vunpack.c.l.b16 %v1490_v22 }
 0x2e8   : > { %11675 = vst [vmem:[#allocation97_spill] sm:$0xff] %v8377_v60  ;;  %4545 = vmatpush.bf16.msrb.mxu1 %v6446_v6  ;;  %v1473_v6 = vpack.c.bf16 %v1441_v43, %v1441_v43 }
 0x2e9   : > { %v8413_v26 = vsel %vm1048_vm3, %v1020_v18, %v1021_v1  ;;  %v11680_v18 = vld [vmem:[#allocation46_spill] sm:$0xff]  ;;  %11683 = vst [vmem:[#allocation101_spill] sm:$0xff] %v8448_v38 }
 0x2ea   : > { %11677 = vst [vmem:[#allocation99_spill] sm:$0xff] %v8413_v26  ;;  %v1250_v43 = vmul.f32 %v11680_v18, %v8413_v26  ;;  %v2882_v22 = vunpack.c.l.b16 %v1473_v6  ;;  %v6723_v6 = vld [vmem:[%s11118_s4 + $0xf0] sm:$0xff]  ;;  %v1459_v26 = vmul.f32 %v8363_v32, %v8006_v59  ;;  %v8469_v32 = vld [vmem:[%s11118_s4 + $0xb8] sm:$0xff] }
 0x2ec   : > { %1811 = vperm.xlu1 %6595, %v8368_v63   ;;  %1851 = vperm.xlu0 %6596, %v8382_v36   ;;  %v8393_v41 = vpop.permute.xlu2 %1639  ;;  %v8399_v52 = vpop.permute.xlu1 %1422  ;;  %v1282_v60 = vpack.c.bf16 %v1250_v43, %v1250_v43  ;;  %v1460_v43 = vmul.f32 %v8208_v40, %v8008_v27 }
 0x2ed   : > { %1843 = vperm.xlu2 %6597, %v8390_v14   ;;  %11676 = vst [vmem:[#allocation98_spill] sm:$0xff] %v8393_v41  ;;  %v2813_v41 = vpack.c.b16 %v2785_v30, %v2784_v16  ;;  %v11679_v16 = vld [vmem:[#allocation51_spill] sm:$0xff] }
 0x2ee   : > { %v1249_v12 = vmul.f32 %v11679_v16, %v8417_v29  ;;  %v2918_v16 = vpack.c.b16 %v2899_v13, %v2898_v25  ;;  %v6724_v25 = vld [vmem:[%s11118_s4 + $0xe0] sm:$0xff]  ;;  %v2787_v13 = vunpack.c.l.b16 %v1282_v60  ;;  %v1491_v60 = vpack.c.bf16 %v1459_v26, %v1459_v26 }
 0x2ef   : > { %4298 = vmatmul.bf16.gmra.mxu2 %v2909_v53  ;;  %v1442_v53 = vmul.f32 %v7896_v15, %v8375_v2  ;;  %v8425_v15 = vld [vmem:[%s11118_s4 + $0xc8] sm:$0xff]  ;;  %v8432_v28 = vpop.permute.xlu0 %1599  ;;  %v8441_v2 = vld [vmem:[%s11118_s4 + $0xa0] sm:$0xff] }
 0x2f0   : > { %v1281_v29 = vpack.c.bf16 %v1249_v12, %v1249_v12  ;;  %v11254_v12 = vrot.slane %v8448_v38, 7 }
 0x2f1   : > { %v1474_v30 = vpack.c.bf16 %v1442_v53, %v1442_v53  ;;  %v8445_v53 = vmax.f32 %v7831_v9, 0.0 }
 0x2f2   : > { %v2786_v9 = vunpack.c.l.b16 %v1281_v29 }
 0x2f3   : > { %v2883_v18 = vunpack.c.l.b16 %v1474_v30  ;;  %11682 = vst [vmem:[#allocation46_spill] sm:$0xff] %v8445_v53  ;;  %v1022_v58 = vrot.slane %v8445_v53, 7  ;;  %v1444_v30 = vmul.f32 %v8107_v35, %v8448_v38  ;;  %v1443_v40 = vmul.f32 %v7836_v56, %v8445_v53 }
 0x2f4   : > { %1823 = vperm.xlu1 %6595, %v8406_v47   ;;  %1863 = vperm.xlu0 %6596, %v6720_v44   ;;  %v8434_v44 = vpop.permute.xlu2 %1651  ;;  %v2900_v56 = vunpack.c.l.b16 %v1491_v60 }
 0x2f5   : > { %4209 = vmatmul.bf16.gmra.mxu1 %v2813_v41  ;;  %1855 = vperm.xlu2 %6597, %v8425_v15   ;;  %11681 = vst [vmem:[#allocation51_spill] sm:$0xff] %v8434_v44  ;;  %v8436_v41 = vpop.permute.xlu1 %1563  ;;  %v2910_v44 = vpack.c.b16 %v2883_v18, %v2882_v22  ;;  %v8482_v35 = vsel %vm1048_vm3, %v1022_v58, %v11254_v12 }
 0x2f6   : > { %11685 = vst [vmem:[#allocation103_spill] sm:$0xff] %v8482_v35  ;;  %v8486_v18 = vsel %vm1048_vm3, %v1021_v1, %v1022_v58  ;;  %v1476_v26 = vpack.c.bf16 %v1444_v30, %v1444_v30  ;;  %v1252_v1 = vmul.f32 %v7710_v7, %v8482_v35  ;;  %v1475_v58 = vpack.c.bf16 %v1443_v40, %v1443_v40 }
 0x2f7   : > { %4343 = vmatmul.bf16.vlgmr.msra.gmra.mxu3 %v2918_v16  ;;  %v8464_v22 = vpop.permute.xlu0 %1611  ;;  %v2814_v16 = vpack.c.b16 %v2787_v13, %v2786_v9  ;;  %11686 = vst [vmem:[#allocation104_spill] sm:$0xff] %v8486_v18  ;;  %v6726_v9 = vld [vmem:[%s11118_s4 + $0xf8] sm:$0xff]  ;;  %v1251_v13 = vmul.f32 %v7671_v17, %v8486_v18  ;;  %v8506_v17 = vmax.f32 %v7839_v33, 0.0  ;;  %v8509_v7 = vmax.f32 %v7842_v46, 0.0 }
 0x2f8   : > { %v2885_v30 = vunpack.c.l.b16 %v1476_v26  ;;  %v6445_v26 = vld [vmem:[#allocation5 + $0x118] sm:$0xff] }
 0x2f9   : > { %v1283_v12 = vpack.c.bf16 %v1251_v13, %v1251_v13  ;;  %11687 = vst [vmem:[#allocation105_spill] sm:$0xff] %v8506_v17  ;;  %v1462_v13 = vmul.f32 %v8399_v52, %v8120_v51  ;;  %4546 = vmatpush.bf16.msrb.mxu1 %v6445_v26  ;;  %v1024_v46 = vrot.slane %v8506_v17, 7  ;;  %v1446_v52 = vmul.f32 %v7882_v34, %v8509_v7  ;;  %v6432_v26 = vld [vmem:[#allocation5 + $0xb0] sm:$0xff] }
 0x2fa   : > { %11688 = vst [vmem:[#allocation106_spill] sm:$0xff] %v8509_v7 }
 0x2fb   : > { %v2788_v33 = vunpack.c.l.b16 %v1283_v12  ;;  %v11691_v12 = vld [vmem:[#allocation54_spill] sm:$0xff] }
 0x2fc   : > { %1835 = vperm.xlu1 %6595, %v8441_v2   ;;  %1875 = vperm.xlu0 %6596, %v6723_v6   ;;  %v8472_v29 = vpop.permute.xlu2 %1663  ;;  %v1492_v6 = vpack.c.bf16 %v1460_v43, %v1460_v43 }
 0x2fd   : > { %1867 = vperm.xlu2 %6597, %v6724_v25   ;;  %11684 = vst [vmem:[#allocation102_spill] sm:$0xff] %v8472_v29  ;;  %v11255_v25 = vmov 5   ;;  %v6433_v29 = vld [vmem:[#allocation5 + $0xb8] sm:$0xff] }
 0x2fe   : > { %v2901_v43 = vunpack.c.l.b16 %v1492_v6  ;;  %v6437_v6 = vld [vmem:[#allocation5 + $0xd8] sm:$0xff]  ;;  %4364 = vmatpush.bf16.msrb.mxu3 %v6433_v29 }
 0x2ff   : > { %4303 = vmatmul.bf16.gmra.mxu2 %v2910_v44  ;;  %v8474_v44 = vpop.permute.xlu1 %1575  ;;  %v8503_v27 = vpop.permute.xlu0 %1623  ;;  %4457 = vmatpush.bf16.msrb.mxu0 %v6437_v6 }
 0x300   : > { %v2919_v60 = vpack.c.b16 %v2901_v43, %v2900_v56  ;;  %v1461_v43 = vmul.f32 %v7997_v0, %v8118_v62 }
 0x302   : > { %v1493_v29 = vpack.c.bf16 %v1461_v43, %v1461_v43  ;;  %4365 = vmatpush.bf16.msrb.mxu3 %v6432_v26  ;;  %v11698_v43 = vld [vmem:[#allocation80_spill] sm:$0xff] }
 0x304   : > { %1847 = vperm.xlu1 %6595, %v8469_v32   ;;  %6599 = vset.pattern.permute.xlu0 %v11255_v25  ;;  %v1284_v25 = vpack.c.bf16 %v1252_v1, %v1252_v1  ;;  %v8511_v40 = vpop.permute.xlu2 %1675 }
 0x305   : > { %4214 = vmatmul.bf16.gmra.mxu1 %v2814_v16  ;;  %1983 = vperm.xlu0 %6599, %v8020_v21   ;;  %v8500_v16 = vld [vmem:[%s11118_s4 + $0xd0] sm:$0xff]  ;;  %11689 = vst [vmem:[#allocation107_spill] sm:$0xff] %v8511_v40 }
 0x306   : > { %1879 = vperm.xlu2 %6597, %v6726_v9   ;;  %v2884_v9 = vunpack.c.l.b16 %v1475_v58  ;;  %v2789_v1 = vunpack.c.l.b16 %v1284_v25  ;;  %v11261_v58 = vrot.slane %v8509_v7, 7  ;;  %v6728_v25 = vld [vmem:[%s11118_s4 + $0xe8] sm:$0xff]  ;;  %v11697_v40 = vld [vmem:[#allocation65_spill] sm:$0xff] }
 0x307   : > { %4348 = vmatmul.bf16.gmra.mxu3 %v2919_v60  ;;  %v8513_v59 = vpop.permute.xlu1 %1583  ;;  %v11690_v60 = vmov 5  }
 0x308   : > { %v2911_v56 = vpack.c.b16 %v2885_v30, %v2884_v9  ;;  %v1494_v30 = vpack.c.bf16 %v1462_v13, %v1462_v13  ;;  %v2815_v9 = vpack.c.b16 %v2789_v1, %v2788_v33  ;;  %v8535_v0 = vsel %vm1048_vm3, %v1024_v46, %v11261_v58  ;;  %v8547_v1 = vpop.permute.xlu0 %1635  ;;  %v6431_v58 = vld [vmem:[#allocation5 + $0xa8] sm:$0xff] }
 0x309   : > { %11692 = vst [vmem:[#allocation54_spill] sm:$0xff] %v8535_v0  ;;  %v1478_v33 = vpack.c.bf16 %v1446_v52, %v1446_v52  ;;  %4366 = vmatpush.bf16.msrb.mxu3 %v6431_v58 }
 0x30a   : > { %11696 = vst [vmem:[#allocation110_spill] sm:$0xff] %v8547_v1 }
 0x30b   : > { %v2887_v62 = vunpack.c.l.b16 %v1478_v33 }
 0x30c   : > { %1859 = vperm.xlu1 %6595, %v8500_v16   ;;  %v8543_v6 = vpop.permute.xlu2 %1687 }
 0x30d   : > { %2003 = vperm.xlu0 %6599, %v8084_v37   ;;  %v1445_v37 = vmul.f32 %v7917_v4, %v8506_v17  ;;  %v11693_v4 = vrot.slane %v8448_v38, 7  ;;  %11695 = vst [vmem:[#allocation109_spill] sm:$0xff] %v8543_v6  ;;  %v2902_v6 = vunpack.c.l.b16 %v1493_v29 }
 0x30e   : > { %6600 = vset.pattern.permute.xlu2 %v11690_v60 }
 0x30f   : > { %4308 = vmatmul.bf16.gmra.mxu2 %v2911_v56  ;;  %1987 = vperm.xlu2 %6600, %v11691_v12   ;;  %v8541_v34 = vsel %vm1048_vm3, %v11693_v4, %v1024_v46  ;;  %v8545_v56 = vpop.permute.xlu1 %1595  ;;  %v1477_v13 = vpack.c.bf16 %v1445_v37, %v1445_v37  ;;  %v1254_v4 = vmul.f32 %v11698_v43, %v8535_v0  ;;  %v11716_v0 = vld [vmem:[#allocation62_spill] sm:$0xff] }
 0x310   : > { %11694 = vst [vmem:[#allocation108_spill] sm:$0xff] %v8541_v34  ;;  %v1253_v46 = vmul.f32 %v11697_v40, %v8541_v34  ;;  %v11701_v40 = vld [vmem:[#allocation15_spill] sm:$0xff] }
 0x311   : > { %v2886_v51 = vunpack.c.l.b16 %v1477_v13  ;;  %v1286_v52 = vpack.c.bf16 %v1254_v4, %v1254_v4  ;;  %v8561_v26 = vmax.f32 %v11701_v40, 0.0  ;;  %v6430_v13 = vld [vmem:[#allocation5 + $0xa0] sm:$0xff]  ;;  %v8570_v4 = vpop.permute.xlu0 %1647  ;;  %v1463_v40 = vmul.f32 %v8266_v5, %v8223_v8 }
 0x312   : > { %4367 = vmatpush.bf16.msrb.mxu3 %v6430_v13  ;;  %v11708_v5 = vrot.slane %v8509_v7, 7 }
 0x313   : > { %11702 = vst [vmem:[#allocation80_spill] sm:$0xff] %v8561_v26  ;;  %v2791_v43 = vunpack.c.l.b16 %v1286_v52 }
 0x314   : > { %1871 = vperm.xlu1 %6595, %v6728_v25   ;;  %v2903_v25 = vunpack.c.l.b16 %v1494_v30  ;;  %v11699_v30 = vld [vmem:[#allocation52_spill] sm:$0xff]  ;;  %v8563_v29 = vpop.permute.xlu2 %1763 }
 0x315   : > { %4219 = vmatmul.bf16.gmra.mxu1 %v2815_v9  ;;  %2015 = vperm.xlu0 %6599, %v8144_v11   ;;  %v1285_v11 = vpack.c.bf16 %v1253_v46, %v1253_v46  ;;  %v8558_v9 = vmax.f32 %v11699_v30, 0.0  ;;  %11704 = vst [vmem:[#allocation52_spill] sm:$0xff] %v8570_v4  ;;  %v11266_v30 = vrot.slane %v8561_v26, 7  ;;  %v11712_v4 = vld [vmem:[#allocation37_spill] sm:$0xff] }
 0x316   : > { %v2920_v37 = vpack.c.b16 %v2903_v25, %v2902_v6  ;;  %v11703_v6 = vld [vmem:[#allocation55_spill] sm:$0xff]  ;;  %v6429_v25 = vld [vmem:[#allocation5 + $0x98] sm:$0xff]  ;;  %v1528_v1 = vrot.slane %v11712_v4, 1 }
 0x317   : > { %1995 = vperm.xlu2 %6600, %v8099_v23   ;;  %11700 = vst [vmem:[#allocation65_spill] sm:$0xff] %v8558_v9  ;;  %v8565_v33 = vpop.permute.xlu1 %1607  ;;  %v2912_v23 = vpack.c.b16 %v2887_v62, %v2886_v51  ;;  %v1464_v58 = vmul.f32 %v11703_v6, %v8013_v48  ;;  %v2790_v46 = vunpack.c.l.b16 %v1285_v11  ;;  %v1447_v62 = vmul.f32 %v8163_v24, %v8558_v9  ;;  %v11706_v11 = vld [vmem:[#allocation31_spill] sm:$0xff] }
 0x318   : > { %4353 = vmatmul.bf16.gmra.mxu3 %v2920_v37  ;;  %v1026_v37 = vrot.slane %v8558_v9, 7  ;;  %v1448_v52 = vmul.f32 %v11706_v11, %v8561_v26  ;;  %v6426_v4 = vld [vmem:[#allocation5 + $0x80] sm:$0xff] }
 0x319   : > { %v1496_v51 = vpack.c.bf16 %v1464_v58, %v1464_v58  ;;  %4368 = vmatpush.bf16.msrb.mxu3 %v6429_v25  ;;  %v2816_v13 = vpack.c.b16 %v2791_v43, %v2790_v46  ;;  %v6428_v58 = vld [vmem:[#allocation5 + $0x90] sm:$0xff]  ;;  %v1479_v46 = vpack.c.bf16 %v1447_v62, %v1447_v62  ;;  %v8604_v62 = vpop.permute.xlu0 %1659 }
 0x31a   : > { %v8592_v24 = vsel %vm1048_vm3, %v11708_v5, %v1026_v37  ;;  %v6436_v25 = vld [vmem:[#allocation5 + $0xd0] sm:$0xff]  ;;  %v1480_v5 = vpack.c.bf16 %v1448_v52, %v1448_v52 }
 0x31b   : > { %11709 = vst [vmem:[#allocation55_spill] sm:$0xff] %v8592_v24  ;;  %v2905_v43 = vunpack.c.l.b16 %v1496_v51  ;;  %4458 = vmatpush.bf16.msrb.mxu0 %v6436_v25  ;;  %v2888_v34 = vunpack.c.l.b16 %v1479_v46  ;;  %v11714_v51 = vld [vmem:[#allocation38_spill] sm:$0xff]  ;;  %v11717_v52 = vld [vmem:[#allocation61_spill] sm:$0xff] }
 0x31c   : > { %6598 = vset.pattern.permute.xlu1 %v11690_v60  ;;  %v8594_v6 = vpop.permute.xlu2 %1771  ;;  %v11710_v60 = vld [vmem:[#allocation16_spill] sm:$0xff]  ;;  %v8610_v25 = vmax.f32 %v11717_v52, 0.0 }
 0x31d   : > { %1979 = vperm.xlu1 %6598, %v8115_v3   ;;  %2027 = vperm.xlu0 %6599, %v8193_v57   ;;  %v11705_v57 = vld [vmem:[#allocation40_spill] sm:$0xff] }
 0x31e   : > { %4369 = vmatpush.bf16.msrb.mxu3 %v6428_v58  ;;  %11713 = vst [vmem:[#allocation40_spill] sm:$0xff] %v8604_v62  ;;  %v1028_v52 = vrot.slane %v8610_v25, 7  ;;  %v6443_v62 = vld [vmem:[#allocation5 + $0x108] sm:$0xff] }
 0x31f   : > { %4313 = vmatmul.bf16.gmra.mxu2 %v2912_v23  ;;  %2007 = vperm.xlu2 %6600, %v8152_v50   ;;  %v8586_v23 = vsel %vm1048_vm3, %v1026_v37, %v11266_v30  ;;  %v1495_v50 = vpack.c.bf16 %v1463_v40, %v1463_v40  ;;  %v8596_v11 = vpop.permute.xlu1 %1619  ;;  %v6427_v30 = vld [vmem:[#allocation5 + $0x88] sm:$0xff]  ;;  %11718 = vst [vmem:[#allocation31_spill] sm:$0xff] %v8610_v25 }
 0x320   : > { %11707 = vst [vmem:[#allocation15_spill] sm:$0xff] %v8586_v23  ;;  %v1256_v48 = vmul.f32 %v11710_v60, %v8586_v23  ;;  %v11711_v37 = vld [vmem:[#allocation72_spill] sm:$0xff]  ;;  %v2889_v23 = vunpack.c.l.b16 %v1480_v5 }
 0x321   : > { %v1255_v40 = vmul.f32 %v11711_v37, %v8592_v24  ;;  %v2904_v8 = vunpack.c.l.b16 %v1495_v50  ;;  %v11278_v37 = vrot.slane %v11716_v0, 1  ;;  %v11719_v50 = vld [vmem:[#allocation77_spill] sm:$0xff] }
 0x322   : > { %4370 = vmatpush.bf16.msrb.mxu3 %v6427_v30  ;;  %v1288_v58 = vpack.c.bf16 %v1256_v48, %v1256_v48  ;;  %v2913_v30 = vpack.c.b16 %v2889_v23, %v2888_v34 }
 0x323   : > { %v1287_v60 = vpack.c.bf16 %v1255_v40, %v1255_v40 }
 0x324   : > { %v8615_v46 = vpop.permute.xlu2 %1783  ;;  %v2793_v40 = vunpack.c.l.b16 %v1288_v58  ;;  %v11726_v58 = vld [vmem:[#allocation42_spill] sm:$0xff] }
 0x325   : > { %1991 = vperm.xlu1 %6598, %v11705_v57   ;;  %v6444_v57 = vld [vmem:[#allocation5 + $0x110] sm:$0xff]  ;;  %4224 = vmatmul.bf16.gmra.mxu1 %v2816_v13  ;;  %v11715_v13 = vld [vmem:[#allocation83_spill] sm:$0xff]  ;;  %v2792_v5 = vunpack.c.l.b16 %v1287_v60  ;;  %v11727_v60 = vld [vmem:[#allocation78_spill] sm:$0xff] }
 0x326   : > { %2039 = vperm.xlu0 %6599, %v8246_v49   ;;  %4547 = vmatpush.bf16.msrb.mxu1 %v6444_v57  ;;  %v2921_v49 = vpack.c.b16 %v2905_v43, %v2904_v8  ;;  %v8613_v57 = vmax.f32 %v11719_v50, 0.0  ;;  %v11721_v8 = vrot.slane %v8015_v55, 1 }
 0x327   : > { %2019 = vperm.xlu2 %6600, %v11714_v51   ;;  %v8617_v51 = vpop.permute.xlu1 %1631  ;;  %4371 = vmatpush.bf16.msrb.mxu3 %v6426_v4  ;;  %v11725_v4 = vld [vmem:[#allocation24_spill] sm:$0xff] }
 0x328   : > { %11720 = vst [vmem:[#allocation16_spill] sm:$0xff] %v8613_v57  ;;  %4358 = vmatmul.bf16.gmra.mxu3 %v2921_v49  ;;  %v8623_v48 = vsel %vm1529_vm4, %v11721_v8, %v1528_v1  ;;  %v8632_v49 = vsel %vm1529_vm4, %v1528_v1, %v11278_v37  ;;  %v1449_v1 = vmul.f32 %v11727_v60, %v8610_v25  ;;  %v8644_v8 = vpop.permute.xlu0 %1671  ;;  %v11729_v37 = vrot.slane %v8561_v26, 7 }
 0x329   : > { %11722 = vst [vmem:[#allocation72_spill] sm:$0xff] %v8623_v48  ;;  %v1690_v43 = vmul.f32 %v8436_v41, %v8623_v48  ;;  %v1691_v34 = vmul.f32 %v8333_v19, %v8632_v49  ;;  %v11724_v41 = vld [vmem:[#allocation82_spill] sm:$0xff]  ;;  %v11731_v19 = vrot.slane %v8613_v57, 7 }
 0x32a   : > { %11723 = vst [vmem:[#allocation38_spill] sm:$0xff] %v8632_v49  ;;  %v8650_v50 = vsel %vm1048_vm3, %v11729_v37, %v1028_v52  ;;  %v11735_v49 = vld [vmem:[#allocation76_spill] sm:$0xff]  ;;  %v1481_v55 = vpack.c.bf16 %v1449_v1, %v1449_v1  ;;  %4548 = vmatpush.bf16.msrb.mxu1 %v6443_v62 }
 0x32b   : > { %v1722_v23 = vpack.c.bf16 %v1690_v43, %v1690_v43  ;;  %11728 = vst [vmem:[#allocation83_spill] sm:$0xff] %v8644_v8  ;;  %v1723_v43 = vpack.c.bf16 %v1691_v34, %v1691_v34  ;;  %v11737_v34 = vld [vmem:[#allocation36_spill] sm:$0xff] }
 0x32c   : > { %11730 = vst [vmem:[#allocation61_spill] sm:$0xff] %v8650_v50 }
 0x32d   : > { %1999 = vperm.xlu1 %6598, %v11715_v13   ;;  %v2971_v8 = vunpack.c.l.b16 %v1723_v43  ;;  %v6435_v43 = vld [vmem:[#allocation5 + $0xc8] sm:$0xff] }
 0x32e   : > { %2051 = vperm.xlu0 %6599, %v8296_v10   ;;  %v1450_v10 = vmul.f32 %v11724_v41, %v8613_v57  ;;  %v8656_v41 = vsel %vm1048_vm3, %v1028_v52, %v11731_v19  ;;  %v11736_v52 = vld [vmem:[#allocation35_spill] sm:$0xff]  ;;  %4459 = vmatpush.bf16.msrb.mxu0 %v6435_v43 }
 0x32f   : > { %4318 = vmatmul.bf16.gmra.mxu2 %v2913_v30  ;;  %2031 = vperm.xlu2 %6600, %v11725_v4   ;;  %v2817_v30 = vpack.c.b16 %v2793_v40, %v2792_v5  ;;  %11732 = vst [vmem:[#allocation77_spill] sm:$0xff] %v8656_v41  ;;  %v8658_v4 = vpop.permute.xlu2 %1795  ;;  %v2970_v40 = vunpack.c.l.b16 %v1722_v23  ;;  %v11734_v5 = vld [vmem:[#allocation81_spill] sm:$0xff]  ;;  %v1258_v48 = vmul.f32 %v11735_v49, %v8656_v41  ;;  %v1498_v19 = vrot.slane %v11736_v52, 1  ;;  %v11751_v43 = vld [vmem:[#allocation71_spill] sm:$0xff]  ;;  %v11759_v41 = vld [vmem:[#allocation74_spill] sm:$0xff] }
 0x330   : > { %v1482_v60 = vpack.c.bf16 %v1450_v10, %v1450_v10  ;;  %v1257_v37 = vmul.f32 %v11734_v5, %v8650_v50  ;;  %v11740_v50 = vld [vmem:[#allocation64_spill] sm:$0xff] }
 0x331   : > { %v3002_v10 = vpack.c.b16 %v2971_v8, %v2970_v40  ;;  %v8675_v49 = vmax.f32 %v11740_v50, 0.0  ;;  %v11747_v40 = vrot.slane %v11716_v0, 1 }
 0x332   : > { %v2891_v24 = vunpack.c.l.b16 %v1482_v60  ;;  %v1289_v23 = vpack.c.bf16 %v1257_v37, %v1257_v37 }
 0x333   : > { %11741 = vst [vmem:[#allocation42_spill] sm:$0xff] %v8675_v49  ;;  %v8696_v37 = vsel %vm1529_vm4, %v11747_v40, %v1498_v19 }
 0x334   : > { %v2794_v8 = vunpack.c.l.b16 %v1289_v23  ;;  %11748 = vst [vmem:[#allocation64_spill] sm:$0xff] %v8696_v37  ;;  %v11750_v23 = vld [vmem:[#allocation43_spill] sm:$0xff] }
 0x335   : > { %2011 = vperm.xlu1 %6598, %v11726_v58   ;;  %v8660_v58 = vpop.permute.xlu1 %1643  ;;  %4229 = vmatmul.bf16.gmra.mxu1 %v2817_v30  ;;  %v2890_v30 = vunpack.c.l.b16 %v1481_v55 }
 0x336   : > { %11733 = vst [vmem:[#allocation82_spill] sm:$0xff] %v8660_v58  ;;  %2063 = vperm.xlu0 %6599, %v8348_v39   ;;  %v1290_v39 = vpack.c.bf16 %v1258_v48, %v1258_v48  ;;  %v11738_v58 = vld [vmem:[#allocation59_spill] sm:$0xff] }
 0x337   : > { %2043 = vperm.xlu2 %6600, %v8306_v20   ;;  %v8672_v5 = vmax.f32 %v11738_v58, 0.0  ;;  %v8677_v1 = vpop.permute.xlu2 %1807  ;;  %v8681_v20 = vpop.permute.xlu0 %1683  ;;  %v2914_v48 = vpack.c.b16 %v2891_v24, %v2890_v30  ;;  %v11289_v30 = vrot.slane %v8675_v49, 7 }
 0x338   : > { %4372 = vmatmul.bf16.vlgmr.msrb.gmra.mxu3 %v3002_v10  ;;  %11742 = vst [vmem:[#allocation78_spill] sm:$0xff] %v8677_v1  ;;  %v2795_v58 = vunpack.c.l.b16 %v1290_v39 }
 0x339   : > { %11739 = vst [vmem:[#allocation24_spill] sm:$0xff] %v8672_v5  ;;  %v1030_v24 = vrot.slane %v8672_v5, 7  ;;  %v1451_v39 = vmul.f32 %v11750_v23, %v8672_v5  ;;  %v11754_v23 = vrot.slane %v8613_v57, 7 }
 0x33a   : > { %11744 = vst [vmem:[#allocation76_spill] sm:$0xff] %v8681_v20  ;;  %v8698_v10 = vpop.f32.mrf.mxu3  ;;  %v2818_v62 = vpack.c.b16 %v2795_v58, %v2794_v8 }
 0x33d   : > { %2023 = vperm.xlu1 %6598, %v8330_v61   ;;  %v8679_v60 = vpop.permute.xlu1 %1655  ;;  %v11745_v61 = vrot.slane %v11737_v34, 1 }
 0x33e   : > { %11743 = vst [vmem:[#allocation81_spill] sm:$0xff] %v8679_v60  ;;  %2075 = vperm.xlu0 %6599, %v8382_v36  }
 0x33f   : > { %v8687_v55 = vsel %vm1529_vm4, %v1498_v19, %v11745_v61  ;;  %4323 = vmatmul.bf16.gmra.mxu2 %v2914_v48  ;;  %v1452_v61 = vmul.f32 %v11751_v43, %v8675_v49  ;;  %2055 = vperm.xlu2 %6600, %v8354_v31   ;;  %v8722_v43 = vsel %vm1048_vm3, %v11754_v23, %v1030_v24 }
 0x340   : > { %11746 = vst [vmem:[#allocation59_spill] sm:$0xff] %v8687_v55  ;;  %v1693_v50 = vmul.f32 %v8474_v44, %v8687_v55  ;;  %v11749_v44 = vld [vmem:[#allocation30_spill] sm:$0xff] }
 0x341   : > { %v1692_v36 = vmul.f32 %v11749_v44, %v8696_v37  ;;  %v8716_v44 = vsel %vm1048_vm3, %v1030_v24, %v11289_v30  ;;  %11755 = vst [vmem:[#allocation71_spill] sm:$0xff] %v8722_v43  ;;  %v1484_v8 = vpack.c.bf16 %v1452_v61, %v1452_v61  ;;  %v1760_v24 = vpop.permute.xlu0 %1759 }
 0x342   : > { %v1725_v19 = vpack.c.bf16 %v1693_v50, %v1693_v50  ;;  %v4195_v48 = vpop.f32.mrf.mxu1  ;;  %v4284_v40 = vpop.f32.mrf.mxu2  ;;  %11753 = vst [vmem:[#allocation43_spill] sm:$0xff] %v8716_v44 }
 0x343   : > { %v8710_v20 = vadd.f32 %v4284_v40, %v4195_v48  ;;  %v1724_v31 = vpack.c.bf16 %v1692_v36, %v1692_v36  ;;  %v8724_v50 = vpop.permute.xlu2 %1819  ;;  %v11292_v48 = vmov 8   ;;  %v11758_v40 = vld [vmem:[#allocation69_spill] sm:$0xff]  ;;  %v8734_v36 = vpop.f32.mrf.mxu3 }
 0x344   : > { %11756 = vst [vmem:[#allocation111_spill] sm:$0xff] %v8724_v50  ;;  %v2973_v58 = vunpack.c.l.b16 %v1725_v19  ;;  %v1259_v30 = vmul.f32 %v11758_v40, %v8722_v43  ;;  %v11760_v19 = vld [vmem:[#allocation41_spill] sm:$0xff]  ;;  %v11763_v43 = vld [vmem:[#allocation67_spill] sm:$0xff] }
 0x345   : > { %2035 = vperm.xlu1 %6598, %v8368_v63   ;;  %11752 = vst [vmem:[#allocation30_spill] sm:$0xff] %v8710_v20  ;;  %v8726_v60 = vpop.permute.xlu1 %1667  ;;  %v1483_v63 = vpack.c.bf16 %v1451_v39, %v1451_v39  ;;  %4234 = vmatmul.bf16.gmra.mxu1 %v2818_v62  ;;  %v1260_v20 = vmul.f32 %v11759_v41, %v8716_v44  ;;  %v2972_v23 = vunpack.c.l.b16 %v1724_v31  ;;  %v2893_v39 = vunpack.c.l.b16 %v1484_v8  ;;  %v11765_v31 = vld [vmem:[#allocation68_spill] sm:$0xff] }
 0x346   : > { %11757 = vst [vmem:[#allocation112_spill] sm:$0xff] %v8726_v60  ;;  %6605 = vset.pattern.permute.xlu0 %v11292_v48  ;;  %v1500_v62 = vrot.slane %v11760_v19, 1  ;;  %v1291_v41 = vpack.c.bf16 %v1259_v30, %v1259_v30  ;;  %v8745_v44 = vmax.f32 %v11763_v43, 0.0 }
 0x347   : > { %2559 = vperm.xlu0 %6605, %v8020_v21   ;;  %v2892_v60 = vunpack.c.l.b16 %v1483_v63  ;;  %2067 = vperm.xlu2 %6600, %v8390_v14   ;;  %v3003_v50 = vpack.c.b16 %v2973_v58, %v2972_v23  ;;  %v1292_v21 = vpack.c.bf16 %v1260_v20, %v1260_v20  ;;  %v8748_v63 = vmax.f32 %v11765_v31, 0.0 }
 0x348   : > { %11764 = vst [vmem:[#allocation67_spill] sm:$0xff] %v8745_v44  ;;  %v11769_v14 = vrot.slane %v8288_v54, 1  ;;  %v2796_v30 = vunpack.c.l.b16 %v1291_v41  ;;  %v11771_v23 = vrot.slane %v11737_v34, 1  ;;  %v11774_v41 = vld [vmem:[#allocation44_spill] sm:$0xff] }
 0x349   : > { %11766 = vst [vmem:[#allocation68_spill] sm:$0xff] %v8748_v63  ;;  %4377 = vmatmul.bf16.gmra.mxu3 %v3003_v50  ;;  %v2797_v43 = vunpack.c.l.b16 %v1292_v21  ;;  %v1453_v21 = vmul.f32 %v11774_v41, %v8745_v44  ;;  %v11780_v41 = vrot.slane %v8675_v49, 7  ;;  %v11306_v49 = vmov 6  }
 0x34a   : > { %v8739_v48 = vpop.f32.mrf.mxu1  ;;  %v8741_v40 = vpop.f32.mrf.mxu2  ;;  %v8758_v58 = vsel %vm1529_vm4, %v1500_v62, %v11769_v14  ;;  %v8766_v50 = vsel %vm1529_vm4, %v11771_v23, %v1500_v62  ;;  %v1032_v14 = vrot.slane %v8745_v44, 7  ;;  %v11776_v23 = vld [vmem:[#allocation60_spill] sm:$0xff] }
 0x34b   : > { %11761 = vst [vmem:[#allocation69_spill] sm:$0xff] %v8739_v48  ;;  %v8750_v8 = vpop.permute.xlu2 %1831  ;;  %v1695_v20 = vmul.f32 %v8513_v59, %v8758_v58  ;;  %v8769_v31 = vpop.f32.mrf.mxu3  ;;  %v2819_v48 = vpack.c.b16 %v2797_v43, %v2796_v30  ;;  %v1485_v43 = vpack.c.bf16 %v1453_v21, %v1453_v21 }
 0x34c   : > { %11762 = vst [vmem:[#allocation74_spill] sm:$0xff] %v8741_v40  ;;  %v8778_v40 = vpop.permute.xlu0 %1779 }
 0x34d   : > { %2047 = vperm.xlu1 %6598, %v8406_v47   ;;  %11767 = vst [vmem:[#allocation113_spill] sm:$0xff] %v8750_v8  ;;  %v8752_v61 = vpop.permute.xlu1 %1679  ;;  %v2915_v47 = vpack.c.b16 %v2893_v39, %v2892_v60  ;;  %v11773_v39 = vld [vmem:[#allocation25_spill] sm:$0xff]  ;;  %v1454_v60 = vmul.f32 %v11776_v23, %v8748_v63  ;;  %v6442_v23 = vld [vmem:[#allocation5 + $0x100] sm:$0xff] }
 0x34e   : > { %11768 = vst [vmem:[#allocation114_spill] sm:$0xff] %v8752_v61  ;;  %v1694_v59 = vmul.f32 %v11773_v39, %v8766_v50  ;;  %v11775_v61 = vld [vmem:[#allocation19_spill] sm:$0xff]  ;;  %v11778_v39 = vrot.slane %v8748_v63, 7  ;;  %4549 = vmatpush.bf16.msrb.mxu1 %v6442_v23 }
 0x34f   : > { %11770 = vst [vmem:[#allocation115_spill] sm:$0xff] %v8758_v58  ;;  %2563 = vperm.xlu0 %6605, %v11691_v12   ;;  %4328 = vmatmul.bf16.gmra.mxu2 %v2915_v47  ;;  %v1883_v8 = vmul.f32 %v1760_v24, %v11775_v61  ;;  %v1727_v12 = vpack.c.bf16 %v1695_v20, %v1695_v20  ;;  %v6434_v61 = vld [vmem:[#allocation5 + $0xc0] sm:$0xff] }
 0x350   : > { %11772 = vst [vmem:[#allocation116_spill] sm:$0xff] %v8766_v50  ;;  %2079 = vperm.xlu2 %6600, %v8425_v15   ;;  %v8790_v24 = vsel %vm1048_vm3, %v1032_v14, %v11778_v39  ;;  %v8796_v15 = vsel %vm1048_vm3, %v11780_v41, %v1032_v14  ;;  %v1726_v20 = vpack.c.bf16 %v1694_v59, %v1694_v59  ;;  %v11784_v39 = vld [vmem:[#allocation75_spill] sm:$0xff]  ;;  %v11785_v14 = vld [vmem:[#allocation57_spill] sm:$0xff] }
 0x351   : > { %11779 = vst [vmem:[#allocation44_spill] sm:$0xff] %v8790_v24  ;;  %v2975_v50 = vunpack.c.l.b16 %v1727_v12  ;;  %4460 = vmatpush.bf16.msrb.mxu0 %v6434_v61  ;;  %v1262_v44 = vmul.f32 %v11784_v39, %v8790_v24  ;;  %v1261_v41 = vmul.f32 %v11785_v14, %v8796_v15  ;;  %v1486_v59 = vpack.c.bf16 %v1454_v60, %v1454_v60 }
 0x352   : > { %v4200_v62 = vpop.f32.mrf.mxu1  ;;  %v4289_v47 = vpop.f32.mrf.mxu2  ;;  %11781 = vst [vmem:[#allocation60_spill] sm:$0xff] %v8796_v15  ;;  %v2974_v1 = vunpack.c.l.b16 %v1726_v20  ;;  %v2894_v12 = vunpack.c.l.b16 %v1485_v43  ;;  %v11793_v15 = vrot.slane %v8288_v54, 1 }
 0x353   : > { %v8784_v58 = vadd.f32 %v4289_v47, %v4200_v62  ;;  %v1915_v62 = vpack.c.bf16 %v1883_v8, %v1883_v8  ;;  %v11783_v47 = vld [vmem:[#allocation22_spill] sm:$0xff]  ;;  %v1293_v20 = vpack.c.bf16 %v1261_v41, %v1261_v41  ;;  %v2895_v61 = vunpack.c.l.b16 %v1486_v59 }
 0x354   : > { %v11786_v8 = vld [vmem:[#allocation90_spill] sm:$0xff]  ;;  %v3004_v14 = vpack.c.b16 %v2975_v50, %v2974_v1  ;;  %v8820_v43 = vpop.permute.xlu0 %1791 }
 0x355   : > { %2059 = vperm.xlu1 %6598, %v8441_v2   ;;  %11777 = vst [vmem:[#allocation25_spill] sm:$0xff] %v8784_v58  ;;  %v8798_v2 = vpop.permute.xlu2 %1843  ;;  %v1756_v30 = vpop.permute.xlu1 %1755  ;;  %4239 = vmatmul.bf16.gmra.mxu1 %v2819_v48  ;;  %v1502_v48 = vrot.slane %v11786_v8, 1  ;;  %v3067_v23 = vunpack.c.l.b16 %v1915_v62  ;;  %v2916_v50 = vpack.c.b16 %v2895_v61, %v2894_v12  ;;  %v2798_v59 = vunpack.c.l.b16 %v1293_v20  ;;  %v11796_v61 = vld [vmem:[#allocation79_spill] sm:$0xff]  ;;  %v11797_v12 = vld [vmem:[#allocation93_spill] sm:$0xff] }
 0x356   : > { %11782 = vst [vmem:[#allocation117_spill] sm:$0xff] %v8798_v2  ;;  %v1882_v58 = vmul.f32 %v1756_v30, %v11783_v47  ;;  %v8806_v2 = vpop.f32.mrf.mxu3 }
 0x357   : > { %6610 = vset.pattern.permute.xlu0 %v11306_v49 }
 0x358   : > { %v1914_v21 = vpack.c.bf16 %v1882_v58, %v1882_v58  ;;  %2171 = vperm.xlu0 %6610, %v8115_v3   ;;  %6601 = vset.pattern.permute.xlu2 %v11306_v49  ;;  %v6729_v58 = vld [vmem:[%s11118_s4 + $0x8] sm:$0xff]  ;;  %v1294_v3 = vpack.c.bf16 %v1262_v44, %v1262_v44  ;;  %v11790_v49 = vrot.slane %v8372_v42, 1 }
 0x359   : > { %2175 = vperm.xlu2 %6601, %v6729_v58   ;;  %4382 = vmatmul.bf16.gmra.mxu3 %v3004_v14 }
 0x35a   : > { %v3066_v30 = vunpack.c.l.b16 %v1914_v21  ;;  %v8812_v39 = vpop.f32.mrf.mxu1  ;;  %v8814_v60 = vpop.f32.mrf.mxu2  ;;  %v8828_v1 = vsel %vm1529_vm4, %v1502_v48, %v11790_v49  ;;  %v2799_v41 = vunpack.c.l.b16 %v1294_v3  ;;  %v11795_v49 = vld [vmem:[#allocation97_spill] sm:$0xff] }
 0x35b   : > { %11787 = vst [vmem:[#allocation75_spill] sm:$0xff] %v8812_v39 }
 0x35c   : > { %11788 = vst [vmem:[#allocation57_spill] sm:$0xff] %v8814_v60  ;;  %v3098_v62 = vpack.c.b16 %v3067_v23, %v3066_v30  ;;  %v8836_v23 = vsel %vm1529_vm4, %v11793_v15, %v1502_v48  ;;  %v11312_v60 = vmov 7   ;;  %v11799_v15 = vld [vmem:[#allocation29_spill] sm:$0xff]  ;;  %v11800_v48 = vld [vmem:[#allocation66_spill] sm:$0xff]  ;;  %v2820_v39 = vpack.c.b16 %v2799_v41, %v2798_v59 }
 0x35d   : > { %2071 = vperm.xlu1 %6598, %v8469_v32   ;;  %v8822_v21 = vpop.permute.xlu2 %1855  ;;  %11791 = vst [vmem:[#allocation119_spill] sm:$0xff] %v8828_v1  ;;  %v1768_v47 = vpop.permute.xlu1 %1767  ;;  %v11792_v32 = vld [vmem:[#allocation28_spill] sm:$0xff]  ;;  %v1696_v14 = vmul.f32 %v11795_v49, %v8836_v23  ;;  %v6465_v41 = vld [vmem:[#allocation5 + $0x1b8] sm:$0xff] }
 0x35e   : > { %11789 = vst [vmem:[#allocation118_spill] sm:$0xff] %v8822_v21  ;;  %4461 = vmatmul.bf16.vlgmr.msrb.gmra.mxu0 %v3098_v62  ;;  %v1697_v44 = vmul.f32 %v11792_v32, %v8828_v1  ;;  %v8838_v30 = vpop.f32.mrf.mxu3  ;;  %v1456_v62 = vmul.f32 %v11797_v12, %v11796_v61  ;;  %v11798_v21 = vld [vmem:[#allocation86_spill] sm:$0xff]  ;;  %4720 = vmatpush.bf16.msra.mxu3 %v6465_v41  ;;  %v11814_v41 = vmov 7  }
 0x35f   : > { %11794 = vst [vmem:[#allocation28_spill] sm:$0xff] %v8836_v23  ;;  %4333 = vmatmul.bf16.gmra.mxu2 %v2916_v50  ;;  %v1885_v24 = vmul.f32 %v1768_v47, %v11798_v21  ;;  %v1455_v50 = vmul.f32 %v11800_v48, %v11799_v15  ;;  %v1728_v47 = vpack.c.bf16 %v1696_v14, %v1696_v14  ;;  %v11805_v21 = vld [vmem:[#allocation85_spill] sm:$0xff]  ;;  %v8864_v48 = vpop.permute.xlu0 %1803  ;;  %v6473_v59 = vld [vmem:[#allocation5 + $0x1f8] sm:$0xff] }
 0x360   : > { %2191 = vperm.xlu0 %6610, %v11715_v13   ;;  %v1729_v32 = vpack.c.bf16 %v1697_v44, %v1697_v44  ;;  %v11802_v13 = vrot.slane %v11799_v15, 7  ;;  %v11803_v44 = vrot.slane %v8748_v63, 7  ;;  %v1488_v61 = vpack.c.bf16 %v1456_v62, %v1456_v62  ;;  %11807 = vst [vmem:[#allocation120_spill] sm:$0xff] %v8864_v48  ;;  %4809 = vmatpush.bf16.msra.mxu0 %v6473_v59  ;;  %v6731_v63 = vld [vmem:[%s11118_s4] sm:$0xff] }
 0x361   : > { %6603 = vset.pattern.permute.xlu2 %v11312_v60  ;;  %v1884_v60 = vmul.f32 %v8563_v29, %v11805_v21  ;;  %v1487_v1 = vpack.c.bf16 %v1455_v50, %v1455_v50  ;;  %v2976_v29 = vunpack.c.l.b16 %v1728_v47 }
 0x362   : > { %v4205_v3 = vpop.f32.mrf.mxu1  ;;  %v4294_v20 = vpop.f32.mrf.mxu2  ;;  %2367 = vperm.xlu2 %6603, %v6729_v58   ;;  %v8858_v12 = vsel %vm1048_vm3, %v11803_v44, %v11802_v13  ;;  %v11809_v13 = vld [vmem:[#allocation39_spill] sm:$0xff]  ;;  %v11810_v44 = vld [vmem:[#allocation73_spill] sm:$0xff] }
 0x363   : > { %v8850_v49 = vadd.f32 %v4294_v20, %v4205_v3  ;;  %11804 = vst [vmem:[#allocation93_spill] sm:$0xff] %v8858_v12  ;;  %v2977_v3 = vunpack.c.l.b16 %v1729_v32  ;;  %v1917_v20 = vpack.c.bf16 %v1885_v24, %v1885_v24  ;;  %v1264_v14 = vmul.f32 %v11810_v44, %v11809_v13  ;;  %v11811_v24 = vld [vmem:[#allocation96_spill] sm:$0xff] }
 0x364   : > { %v1916_v62 = vpack.c.bf16 %v1884_v60, %v1884_v60  ;;  %v1504_v32 = vrot.slane %v11811_v24, 1  ;;  %v2896_v59 = vunpack.c.l.b16 %v1487_v1  ;;  %v11817_v1 = vrot.slane %v8372_v42, 1 }
 0x365   : > { %2083 = vperm.xlu1 %6598, %v8500_v16   ;;  %11801 = vst [vmem:[#allocation97_spill] sm:$0xff] %v8850_v49  ;;  %v8862_v16 = vpop.permute.xlu2 %1867  ;;  %4244 = vmatmul.bf16.gmra.mxu1 %v2820_v39  ;;  %v1776_v58 = vpop.permute.xlu1 %1775  ;;  %v11808_v49 = vld [vmem:[#allocation63_spill] sm:$0xff]  ;;  %v8875_v39 = vld [vmem:[%s11118_s4 + $0x30] sm:$0xff]  ;;  %v3005_v50 = vpack.c.b16 %v2977_v3, %v2976_v29  ;;  %v3069_v21 = vunpack.c.l.b16 %v1917_v20  ;;  %v1296_v60 = vpack.c.bf16 %v1264_v14, %v1264_v14  ;;  %v6481_v14 = vld [vmem:[#allocation5 + $0x238] sm:$0xff] }
 0x366   : > { %11806 = vst [vmem:[#allocation66_spill] sm:$0xff] %v8862_v16  ;;  %v1263_v23 = vmul.f32 %v11808_v49, %v8858_v12  ;;  %v8870_v15 = vpop.f32.mrf.mxu3  ;;  %v2897_v49 = vunpack.c.l.b16 %v1488_v61  ;;  %v11815_v12 = vmov 6   ;;  %v3068_v61 = vunpack.c.l.b16 %v1916_v62  ;;  %v6732_v3 = vld [vmem:[%s11118_s4 + $0x10] sm:$0xff]  ;;  %4898 = vmatpush.bf16.msra.mxu1 %v6481_v14  ;;  %v11825_v14 = vld [vmem:[#allocation95_spill] sm:$0xff] }
 0x367   : > { %v8910_v37 = vpop.permute.xlu0 %1815 }
 0x368   : > { %2195 = vperm.xlu0 %6610, %v8875_v39   ;;  %v1295_v47 = vpack.c.bf16 %v1263_v23, %v1263_v23  ;;  %v8898_v23 = vsel %vm1529_vm4, %v11817_v1, %v1504_v32  ;;  %v2917_v20 = vpack.c.b16 %v2897_v49, %v2896_v59  ;;  %11821 = vst [vmem:[#allocation124_spill] sm:$0xff] %v8910_v37 }
 0x369   : > { %4387 = vmatmul.bf16.gmra.mxu3 %v3005_v50  ;;  %11818 = vst [vmem:[#allocation122_spill] sm:$0xff] %v8898_v23  ;;  %v1698_v62 = vmul.f32 %v8545_v56, %v8898_v23  ;;  %v3099_v50 = vpack.c.b16 %v3069_v21, %v3068_v61  ;;  %v8920_v56 = vld [vmem:[%s11118_s4 + $0x38] sm:$0xff] }
 0x36a   : > { %v8879_v16 = vpop.f32.mrf.mxu1  ;;  %v8881_v44 = vpop.f32.mrf.mxu2  ;;  %6606 = vset.pattern.permute.xlu2 %v11815_v12  ;;  %v2800_v13 = vunpack.c.l.b16 %v1295_v47  ;;  %v11822_v47 = vld [vmem:[#allocation94_spill] sm:$0xff] }
 0x36b   : > { %11812 = vst [vmem:[#allocation63_spill] sm:$0xff] %v8879_v16  ;;  %2179 = vperm.xlu2 %6606, %v6732_v3   ;;  %v1730_v21 = vpack.c.bf16 %v1698_v62, %v1698_v62 }
 0x36c   : > { %11813 = vst [vmem:[#allocation73_spill] sm:$0xff] %v8881_v44  ;;  %v11819_v44 = vrot.slane %v8445_v53, 1 }
 0x36d   : > { %6602 = vset.pattern.permute.xlu1 %v11814_v41  ;;  %v8889_v16 = vpop.permute.xlu2 %1879  ;;  %v8900_v29 = vpop.permute.xlu1 %1787 }
 0x36e   : > { %2363 = vperm.xlu1 %6602, %v6731_v63   ;;  %11816 = vst [vmem:[#allocation121_spill] sm:$0xff] %v8889_v16  ;;  %v2801_v16 = vunpack.c.l.b16 %v1296_v60  ;;  %v8908_v48 = vsel %vm1529_vm4, %v1504_v32, %v11819_v44  ;;  %v8912_v1 = vpop.f32.mrf.mxu3  ;;  %4466 = vmatmul.bf16.gmra.mxu0 %v3099_v50  ;;  %v1887_v60 = vmul.f32 %v1776_v58, %v11822_v47  ;;  %v11830_v47 = vrot.slane %v8506_v17, 1 }
 0x36f   : > { %11820 = vst [vmem:[#allocation123_spill] sm:$0xff] %v8908_v48  ;;  %4338 = vmatmul.bf16.gmra.mxu2 %v2917_v20  ;;  %v1699_v49 = vmul.f32 %v8432_v28, %v8908_v48  ;;  %v11824_v20 = vmov 8   ;;  %v1886_v50 = vmul.f32 %v8594_v6, %v11825_v14  ;;  %v2978_v48 = vunpack.c.l.b16 %v1730_v21  ;;  %v8938_v6 = vpop.permute.xlu0 %1827 }
 0x370   : > { %6619 = vset.pattern.permute.xlu0 %v11814_v41  ;;  %v2821_v59 = vpack.c.b16 %v2801_v16, %v2800_v13  ;;  %v1919_v58 = vpack.c.bf16 %v1887_v60, %v1887_v60  ;;  %11826 = vst [vmem:[#allocation126_spill] sm:$0xff] %v8938_v6 }
 0x371   : > { %2391 = vperm.xlu0 %6619, %v8920_v56   ;;  %v1731_v28 = vpack.c.bf16 %v1699_v49, %v1699_v49 }
 0x372   : > { %v4210_v32 = vpop.f32.mrf.mxu1  ;;  %v4299_v44 = vpop.f32.mrf.mxu2  ;;  %v3071_v21 = vunpack.c.l.b16 %v1919_v58 }
 0x373   : > { %v8924_v61 = vadd.f32 %v4299_v44, %v4210_v32  ;;  %6608 = vset.pattern.permute.xlu2 %v11814_v41  ;;  %v2979_v13 = vunpack.c.l.b16 %v1731_v28  ;;  %v1918_v32 = vpack.c.bf16 %v1886_v50, %v1886_v50  ;;  %v1506_v44 = vrot.slane %v8448_v38, 1 }
 0x374   : > { %2371 = vperm.xlu2 %6608, %v6732_v3   ;;  %v1946_v28 = vpack.c.bf16 %v11716_v0, %v11716_v0  ;;  %v1947_v50 = vpack.c.bf16 %v11736_v52, %v11736_v52  ;;  %v11832_v0 = vrot.slane %v8445_v53, 1 }
 0x375   : > { %11823 = vst [vmem:[#allocation125_spill] sm:$0xff] %v8924_v61  ;;  %v8929_v23 = vpop.permute.xlu2 %1987  ;;  %4249 = vmatmul.bf16.gmra.mxu1 %v2821_v59  ;;  %v8932_v62 = vpop.permute.xlu1 %1799  ;;  %v3006_v59 = vpack.c.b16 %v2979_v13, %v2978_v48  ;;  %v3070_v49 = vunpack.c.l.b16 %v1918_v32  ;;  %v8961_v58 = vsel %vm1529_vm4, %v1506_v44, %v11830_v47  ;;  %v6735_v13 = vld [vmem:[%s11118_s4 + $0x18] sm:$0xff] }
 0x376   : > { %6604 = vset.pattern.permute.xlu1 %v11824_v20  ;;  %v8934_v16 = vpop.f32.mrf.mxu3  ;;  %11831 = vst [vmem:[#allocation130_spill] sm:$0xff] %v8961_v58  ;;  %v1701_v32 = vmul.f32 %v8565_v33, %v8961_v58  ;;  %v8975_v47 = vsel %vm1529_vm4, %v11832_v0, %v1506_v44  ;;  %v3162_v52 = vunpack.c.l.b16 %v1946_v28  ;;  %v11834_v61 = vld [vmem:[#allocation26_spill] sm:$0xff]  ;;  %v8988_v0 = vld [vmem:[%s11118_s4 + $0x48] sm:$0xff]  ;;  %v6472_v58 = vld [vmem:[#allocation5 + $0x1f0] sm:$0xff] }
 0x377   : > { %2555 = vperm.xlu1 %6604, %v6731_v63   ;;  %v8943_v63 = vld [vmem:[%s11118_s4 + $0x40] sm:$0xff]  ;;  %11833 = vst [vmem:[#allocation131_spill] sm:$0xff] %v8975_v47  ;;  %v1700_v6 = vmul.f32 %v11834_v61, %v8975_v47  ;;  %v8991_v61 = vpop.permute.xlu0 %1839  ;;  %4810 = vmatpush.bf16.msra.mxu0 %v6472_v58  ;;  %v1949_v58 = vpack.c.bf16 %v11760_v19, %v11760_v19 }
 0x378   : > { %v1733_v33 = vpack.c.bf16 %v1701_v32, %v1701_v32 }
 0x379   : > { %2395 = vperm.xlu0 %6619, %v8943_v63   ;;  %4392 = vmatmul.bf16.gmra.mxu3 %v3006_v59  ;;  %v3100_v59 = vpack.c.b16 %v3071_v21, %v3070_v49  ;;  %v11836_v49 = vld [vmem:[#allocation99_spill] sm:$0xff] }
 0x37a   : > { %v8946_v3 = vpop.f32.mrf.mxu1  ;;  %v8948_v60 = vpop.f32.mrf.mxu2  ;;  %v1889_v21 = vmul.f32 %v8615_v46, %v11836_v49  ;;  %v6464_v46 = vld [vmem:[#allocation5 + $0x1b0] sm:$0xff]  ;;  %v2981_v47 = vunpack.c.l.b16 %v1733_v33  ;;  %v11337_v33 = vrot.slane %v8558_v9, 1 }
 0x37b   : > { %11827 = vst [vmem:[#allocation127_spill] sm:$0xff] %v8946_v3  ;;  %4721 = vmatpush.bf16.msra.mxu3 %v6464_v46 }
 0x37c   : > { %11828 = vst [vmem:[#allocation128_spill] sm:$0xff] %v8948_v60  ;;  %6611 = vset.pattern.permute.xlu2 %v11824_v20  ;;  %v3163_v60 = vunpack.c.l.b16 %v1947_v50  ;;  %v1732_v50 = vpack.c.bf16 %v1700_v6, %v1700_v6  ;;  %v1921_v37 = vpack.c.bf16 %v1889_v21, %v1889_v21 }
 0x37d   : > { %v8954_v14 = vpop.permute.xlu2 %1995  ;;  %v8964_v48 = vpop.permute.xlu1 %1811  ;;  %2567 = vperm.xlu2 %6611, %v6735_v13  }
 0x37e   : > { %11829 = vst [vmem:[#allocation129_spill] sm:$0xff] %v8954_v14  ;;  %v4344_v3 = vpop.f32.mrf.mxu3  ;;  %4471 = vmatmul.bf16.gmra.mxu0 %v3100_v59  ;;  %v11837_v59 = vld [vmem:[#allocation100_spill] sm:$0xff]  ;;  %v2980_v6 = vunpack.c.l.b16 %v1732_v50  ;;  %v3073_v21 = vunpack.c.l.b16 %v1921_v37 }
 0x37f   : > { %6607 = vset.pattern.permute.xlu1 %v11815_v12  ;;  %v8980_v14 = vadd.f32 %v4344_v3, %v8698_v10  ;;  %v3194_v10 = vpack.c.b16 %v3163_v60, %v3162_v52  ;;  %v1888_v32 = vmul.f32 %v8778_v40, %v11837_v59  ;;  %v6737_v40 = vld [vmem:[%s11118_s4 + $0x20] sm:$0xff]  ;;  %v6480_v59 = vld [vmem:[#allocation5 + $0x230] sm:$0xff] }
 0x380   : > { %2183 = vperm.xlu1 %6607, %v6735_v13   ;;  %4899 = vmatpush.bf16.msra.mxu1 %v6480_v59  ;;  %v9058_v59 = vld [vmem:[%s11118_s4 + $0x68] sm:$0xff] }
 0x381   : > { %11835 = vst [vmem:[#allocation26_spill] sm:$0xff] %v8980_v14  ;;  %6626 = vset.pattern.permute.xlu0 %v11824_v20  ;;  %v1920_v60 = vpack.c.bf16 %v1888_v32, %v1888_v32  ;;  %v3007_v32 = vpack.c.b16 %v2981_v47, %v2980_v6  ;;  %v11844_v6 = vld [vmem:[#allocation91_spill] sm:$0xff] }
 0x382   : > { %2591 = vperm.xlu0 %6626, %v8988_v0   ;;  %v4215_v44 = vpop.f32.mrf.mxu1  ;;  %v4304_v28 = vpop.f32.mrf.mxu2 }
 0x383   : > { %v8993_v3 = vadd.f32 %v4304_v28, %v4215_v44  ;;  %v1508_v28 = vrot.slane %v8509_v7, 1  ;;  %v3072_v46 = vunpack.c.l.b16 %v1920_v60  ;;  %v11845_v60 = vrot.slane %v8506_v17, 1 }
 0x385   : > { %v8997_v14 = vpop.permute.xlu2 %2007  ;;  %4550 = vmatmul.bf16.vlgmr.msrb.gmra.mxu1 %v3194_v10  ;;  %v8999_v49 = vpop.permute.xlu1 %1823  ;;  %6613 = vset.pattern.permute.xlu2 %v11814_v41 }
 0x386   : > { %v4346_v52 = vpop.f32.mrf.mxu3  ;;  %2379 = vperm.xlu2 %6613, %v6737_v40  }
 0x387   : > { %v9007_v44 = vadd.f32 %v4346_v52, %v8734_v36  ;;  %v1948_v36 = vpack.c.bf16 %v11737_v34, %v11737_v34  ;;  %v9031_v52 = vsel %vm1529_vm4, %v1508_v28, %v11337_v33  ;;  %v3165_v33 = vunpack.c.l.b16 %v1949_v58 }
 0x388   : > { %6609 = vset.pattern.permute.xlu1 %v11814_v41  ;;  %11842 = vst [vmem:[#allocation136_spill] sm:$0xff] %v9031_v52  ;;  %v1703_v34 = vmul.f32 %v11844_v6, %v9031_v52 }
 0x389   : > { %2375 = vperm.xlu1 %6609, %v6735_v13   ;;  %11838 = vst [vmem:[#allocation132_spill] sm:$0xff] %v9007_v44  ;;  %v9014_v13 = vld [vmem:[%s11118_s4 + $0x50] sm:$0xff]  ;;  %4397 = vmatmul.bf16.gmra.mxu3 %v3007_v32  ;;  %v9033_v44 = vpop.permute.xlu0 %1851  ;;  %v9044_v32 = vsel %vm1529_vm4, %v11845_v60, %v1508_v28  ;;  %v3164_v19 = vunpack.c.l.b16 %v1948_v36  ;;  %v1890_v28 = vmul.f32 %v8900_v29, %v8486_v18 }
 0x38a   : > { %2595 = vperm.xlu0 %6626, %v9014_v13   ;;  %v9017_v10 = vpop.f32.mrf.mxu1  ;;  %v9019_v50 = vpop.f32.mrf.mxu2  ;;  %11843 = vst [vmem:[#allocation137_spill] sm:$0xff] %v9033_v44  ;;  %v1702_v44 = vmul.f32 %v8464_v22, %v9044_v32 }
 0x38b   : > { %11839 = vst [vmem:[#allocation133_spill] sm:$0xff] %v9017_v10  ;;  %v3195_v22 = vpack.c.b16 %v3165_v33, %v3164_v19  ;;  %v1922_v60 = vpack.c.bf16 %v1890_v28, %v1890_v28 }
 0x38c   : > { %11840 = vst [vmem:[#allocation134_spill] sm:$0xff] %v9019_v50  ;;  %v3101_v50 = vpack.c.b16 %v3073_v21, %v3072_v46  ;;  %v1735_v21 = vpack.c.bf16 %v1703_v34, %v1703_v34  ;;  %v1891_v34 = vmul.f32 %v8820_v43, %v8482_v35  ;;  %v1510_v43 = vrot.slane %v8561_v26, 1 }
 0x38d   : > { %v9025_v37 = vpop.permute.xlu2 %2019  ;;  %v9035_v47 = vpop.permute.xlu1 %1835  ;;  %11846 = vst [vmem:[#allocation91_spill] sm:$0xff] %v9044_v32 }
 0x38e   : > { %11841 = vst [vmem:[#allocation135_spill] sm:$0xff] %v9025_v37  ;;  %v4349_v10 = vpop.f32.mrf.mxu3  ;;  %6615 = vset.pattern.permute.xlu2 %v11824_v20  ;;  %4476 = vmatmul.bf16.gmra.mxu0 %v3101_v50  ;;  %v6457_v50 = vld [vmem:[#allocation5 + $0x178] sm:$0xff]  ;;  %v2983_v46 = vunpack.c.l.b16 %v1735_v21  ;;  %v1923_v19 = vpack.c.bf16 %v1891_v34, %v1891_v34 }
 0x38f   : > { %v9050_v6 = vadd.f32 %v4349_v10, %v8769_v31  ;;  %2571 = vperm.xlu2 %6615, %v6737_v40   ;;  %v1734_v10 = vpack.c.bf16 %v1702_v44, %v1702_v44  ;;  %4631 = vmatpush.bf16.msrb.mxu2 %v6457_v50  ;;  %v3074_v44 = vunpack.c.l.b16 %v1922_v60  ;;  %v11852_v50 = vrot.slane %v8558_v9, 1 }
 0x391   : > { %6612 = vset.pattern.permute.xlu1 %v11815_v12  ;;  %11847 = vst [vmem:[#allocation138_spill] sm:$0xff] %v9050_v6  ;;  %v9069_v6 = vpop.permute.xlu0 %1863  ;;  %v2982_v37 = vunpack.c.l.b16 %v1734_v10  ;;  %v3075_v10 = vunpack.c.l.b16 %v1923_v19  ;;  %v6456_v19 = vld [vmem:[#allocation5 + $0x170] sm:$0xff] }
 0x392   : > { %2187 = vperm.xlu1 %6612, %v6737_v40   ;;  %6633 = vset.pattern.permute.xlu0 %v11815_v12  ;;  %v4220_v36 = vpop.f32.mrf.mxu1  ;;  %v4309_v58 = vpop.f32.mrf.mxu2  ;;  %11848 = vst [vmem:[#allocation139_spill] sm:$0xff] %v9069_v6 }
 0x393   : > { %2223 = vperm.xlu0 %6633, %v9058_v59   ;;  %v9061_v31 = vadd.f32 %v4309_v58, %v4220_v36  ;;  %v3008_v36 = vpack.c.b16 %v2983_v46, %v2982_v37  ;;  %v6740_v58 = vld [vmem:[%s11118_s4 + $0x28] sm:$0xff]  ;;  %v9094_v37 = vld [vmem:[%s11118_s4 + $0x78] sm:$0xff]  ;;  %v9103_v46 = vsel %vm1529_vm4, %v11852_v50, %v1510_v43  ;;  %4632 = vmatpush.bf16.msrb.mxu2 %v6456_v19 }
 0x394   : > { %11853 = vst [vmem:[#allocation143_spill] sm:$0xff] %v9103_v46  ;;  %v1704_v60 = vmul.f32 %v8596_v11, %v9103_v46  ;;  %v6455_v11 = vld [vmem:[#allocation5 + $0x168] sm:$0xff] }
 0x395   : > { %v9065_v40 = vpop.permute.xlu2 %2031  ;;  %4555 = vmatmul.bf16.gmra.mxu1 %v3195_v22  ;;  %v9067_v29 = vpop.permute.xlu1 %1847  ;;  %v1951_v22 = vpack.c.bf16 %v11786_v8, %v11786_v8  ;;  %v11855_v8 = vrot.slane %v8610_v25, 1 }
 0x396   : > { %v4351_v18 = vpop.f32.mrf.mxu3 }
 0x397   : > { %v9072_v33 = vadd.f32 %v4351_v18, %v8806_v2  ;;  %6617 = vset.pattern.permute.xlu2 %v11815_v12  ;;  %v1950_v2 = vpack.c.bf16 %v8288_v54, %v8288_v54  ;;  %v6463_v54 = vld [vmem:[#allocation5 + $0x1a8] sm:$0xff]  ;;  %4633 = vmatpush.bf16.msrb.mxu2 %v6455_v11  ;;  %v6453_v11 = vld [vmem:[#allocation5 + $0x158] sm:$0xff] }
 0x398   : > { %2199 = vperm.xlu2 %6617, %v8920_v56   ;;  %4722 = vmatpush.bf16.msra.mxu3 %v6463_v54  ;;  %v9134_v54 = vld [vmem:[%s11118_s4 + $0x80] sm:$0xff] }
 0x399   : > { %11849 = vst [vmem:[#allocation140_spill] sm:$0xff] %v9072_v33  ;;  %4402 = vmatmul.bf16.gmra.mxu3 %v3008_v36  ;;  %v3102_v33 = vpack.c.b16 %v3075_v10, %v3074_v44  ;;  %v9113_v36 = vsel %vm1529_vm4, %v1510_v43, %v11855_v8  ;;  %v3166_v35 = vunpack.c.l.b16 %v1950_v2  ;;  %v9120_v44 = vpop.permute.xlu0 %1875  ;;  %v1736_v10 = vpack.c.bf16 %v1704_v60, %v1704_v60  ;;  %v11859_v8 = vld [vmem:[#allocation54_spill] sm:$0xff] }
 0x39a   : > { %6614 = vset.pattern.permute.xlu1 %v11814_v41  ;;  %v9078_v21 = vpop.f32.mrf.mxu1  ;;  %v9080_v28 = vpop.f32.mrf.mxu2  ;;  %11856 = vst [vmem:[#allocation145_spill] sm:$0xff] %v9113_v36  ;;  %v1705_v50 = vmul.f32 %v8503_v27, %v9113_v36  ;;  %v1893_v43 = vmul.f32 %v8932_v62, %v11859_v8  ;;  %v1512_v8 = vrot.slane %v8613_v57, 1 }
 0x39b   : > { %11850 = vst [vmem:[#allocation141_spill] sm:$0xff] %v9080_v28  ;;  %2383 = vperm.xlu1 %6614, %v6740_v58   ;;  %6640 = vset.pattern.permute.xlu0 %v11814_v41  ;;  %v2984_v60 = vunpack.c.l.b16 %v1736_v10 }
 0x39c   : > { %2423 = vperm.xlu0 %6640, %v9094_v37   ;;  %11858 = vst [vmem:[#allocation147_spill] sm:$0xff] %v9120_v44 }
 0x39d   : > { %v9097_v34 = vpop.permute.xlu2 %2043  ;;  %v9107_v18 = vpop.permute.xlu1 %1859 }
 0x39e   : > { %11851 = vst [vmem:[#allocation142_spill] sm:$0xff] %v9097_v34  ;;  %v3167_v34 = vunpack.c.l.b16 %v1951_v22  ;;  %v4354_v6 = vpop.f32.mrf.mxu3  ;;  %4481 = vmatmul.bf16.gmra.mxu0 %v3102_v33  ;;  %v11861_v33 = vld [vmem:[#allocation108_spill] sm:$0xff] }
 0x39f   : > { %11854 = vst [vmem:[#allocation144_spill] sm:$0xff] %v9107_v18  ;;  %v9118_v28 = vadd.f32 %v4354_v6, %v8838_v30  ;;  %v1737_v6 = vpack.c.bf16 %v1705_v50, %v1705_v50  ;;  %v1892_v19 = vmul.f32 %v8658_v4, %v11861_v33  ;;  %v11342_v33 = vrot.slane %v8672_v5, 1 }
 0x3a0   : > { %6620 = vset.pattern.permute.xlu2 %v11824_v20  ;;  %v3196_v27 = vpack.c.b16 %v3167_v34, %v3166_v35  ;;  %v1925_v35 = vpack.c.bf16 %v1893_v43, %v1893_v43  ;;  %v6454_v34 = vld [vmem:[#allocation5 + $0x160] sm:$0xff] }
 0x3a1   : > { %11857 = vst [vmem:[#allocation146_spill] sm:$0xff] %v9118_v28  ;;  %2579 = vperm.xlu2 %6620, %v8875_v39   ;;  %v1924_v4 = vpack.c.bf16 %v1892_v19, %v1892_v19  ;;  %4634 = vmatpush.bf16.msrb.mxu2 %v6454_v34  ;;  %v1984_v34 = vpop.permute.xlu0 %1983 }
 0x3a2   : > { %v4225_v2 = vpop.f32.mrf.mxu1  ;;  %v4314_v22 = vpop.f32.mrf.mxu2 }
 0x3a3   : > { %6616 = vset.pattern.permute.xlu1 %v11824_v20  ;;  %v9127_v30 = vadd.f32 %v4314_v22, %v4225_v2  ;;  %v2985_v22 = vunpack.c.l.b16 %v1737_v6  ;;  %v1952_v6 = vpack.c.bf16 %v8372_v42, %v8372_v42  ;;  %v3076_v19 = vunpack.c.l.b16 %v1924_v4 }
 0x3a4   : > { %2575 = vperm.xlu1 %6616, %v6740_v58   ;;  %2427 = vperm.xlu0 %6640, %v9134_v54   ;;  %v6471_v58 = vld [vmem:[#allocation5 + $0x1e8] sm:$0xff] }
 0x3a5   : > { %11860 = vst [vmem:[#allocation148_spill] sm:$0xff] %v9127_v30  ;;  %v9137_v62 = vpop.permute.xlu2 %2055  ;;  %4560 = vmatmul.bf16.gmra.mxu1 %v3196_v27  ;;  %v9139_v2 = vpop.permute.xlu1 %1871  ;;  %4811 = vmatpush.bf16.msra.mxu0 %v6471_v58  ;;  %v3077_v27 = vunpack.c.l.b16 %v1925_v35  ;;  %v3009_v44 = vpack.c.b16 %v2985_v22, %v2984_v60  ;;  %v9164_v60 = vsel %vm1529_vm4, %v1512_v8, %v11342_v33  ;;  %v9169_v58 = vld [vmem:[%s11118_s4 + $0x70] sm:$0xff]  ;;  %v11869_v22 = vrot.slane %v8610_v25, 1 }
 0x3a6   : > { %11862 = vst [vmem:[#allocation149_spill] sm:$0xff] %v9137_v62  ;;  %v4356_v50 = vpop.f32.mrf.mxu3  ;;  %4635 = vmatpush.bf16.msrb.mxu2 %v6453_v11  ;;  %v2107_v33 = vmul.f32 %v1984_v34, %v8687_v55  ;;  %v6452_v62 = vld [vmem:[#allocation5 + $0x150] sm:$0xff]  ;;  %v11875_v34 = vld [vmem:[#allocation78_spill] sm:$0xff] }
 0x3a7   : > { %11863 = vst [vmem:[#allocation150_spill] sm:$0xff] %v9139_v2  ;;  %v9142_v28 = vadd.f32 %v4356_v50, %v8870_v15  ;;  %v1953_v15 = vpack.c.bf16 %v11811_v24, %v11811_v24  ;;  %v1707_v50 = vmul.f32 %v8617_v51, %v9164_v60  ;;  %v9179_v4 = vsel %vm1529_vm4, %v11869_v22, %v1512_v8  ;;  %v11871_v2 = vld [vmem:[#allocation48_spill] sm:$0xff]  ;;  %v11874_v22 = vld [vmem:[#allocation15_spill] sm:$0xff] }
 0x3a8   : > { %11868 = vst [vmem:[#allocation155_spill] sm:$0xff] %v9164_v60  ;;  %v1706_v51 = vmul.f32 %v11871_v2, %v9179_v4  ;;  %v2139_v18 = vpack.c.bf16 %v2107_v33, %v2107_v33  ;;  %v11878_v2 = vld [vmem:[#allocation120_spill] sm:$0xff] }
 0x3a9   : > { %11864 = vst [vmem:[#allocation151_spill] sm:$0xff] %v9142_v28  ;;  %6622 = vset.pattern.permute.xlu2 %v11815_v12  ;;  %4407 = vmatmul.bf16.gmra.mxu3 %v3009_v44  ;;  %v3103_v44 = vpack.c.b16 %v3077_v27, %v3076_v19  ;;  %v3168_v28 = vunpack.c.l.b16 %v1952_v6  ;;  %v3169_v42 = vunpack.c.l.b16 %v1953_v15  ;;  %v1739_v8 = vpack.c.bf16 %v1707_v50, %v1707_v50 }
 0x3aa   : > { %v9146_v10 = vpop.f32.mrf.mxu1  ;;  %v9148_v43 = vpop.f32.mrf.mxu2  ;;  %2203 = vperm.xlu2 %6622, %v8943_v63   ;;  %11870 = vst [vmem:[#allocation156_spill] sm:$0xff] %v9179_v4  ;;  %4636 = vmatpush.bf16.msrb.mxu2 %v6452_v62  ;;  %v1895_v6 = vmul.f32 %v11875_v34, %v11874_v22  ;;  %v6744_v62 = vld [vmem:[%s11118_s4 + $0xa8] sm:$0xff] }
 0x3ab   : > { %11865 = vst [vmem:[#allocation152_spill] sm:$0xff] %v9146_v10  ;;  %v6451_v10 = vld [vmem:[#allocation5 + $0x148] sm:$0xff]  ;;  %v3197_v60 = vpack.c.b16 %v3169_v42, %v3168_v28  ;;  %v2987_v42 = vunpack.c.l.b16 %v1739_v8  ;;  %v3259_v28 = vunpack.c.l.b16 %v2139_v18 }
 0x3ac   : > { %11866 = vst [vmem:[#allocation153_spill] sm:$0xff] %v9148_v43  ;;  %6618 = vset.pattern.permute.xlu1 %v11814_v41  ;;  %6645 = vset.pattern.permute.xlu0 %v11815_v12 }
 0x3ad   : > { %v9158_v35 = vpop.permute.xlu2 %2067  ;;  %2227 = vperm.xlu0 %6645, %v9169_v58   ;;  %2387 = vperm.xlu1 %6618, %v8875_v39   ;;  %v1980_v11 = vpop.permute.xlu1 %1979  ;;  %v11873_v39 = vld [vmem:[#allocation64_spill] sm:$0xff] }
 0x3ae   : > { %11867 = vst [vmem:[#allocation154_spill] sm:$0xff] %v9158_v35  ;;  %v4359_v24 = vpop.f32.mrf.mxu3  ;;  %v6479_v35 = vld [vmem:[#allocation5 + $0x228] sm:$0xff]  ;;  %4486 = vmatmul.bf16.gmra.mxu0 %v3103_v44  ;;  %v2106_v19 = vmul.f32 %v1980_v11, %v11873_v39  ;;  %4637 = vmatpush.bf16.msrb.mxu2 %v6451_v10  ;;  %v6450_v11 = vld [vmem:[#allocation5 + $0x140] sm:$0xff] }
 0x3af   : > { %v9185_v27 = vadd.f32 %v4359_v24, %v8912_v1  ;;  %4900 = vmatpush.bf16.msra.mxu1 %v6479_v35  ;;  %v1738_v24 = vpack.c.bf16 %v1706_v51, %v1706_v51  ;;  %v11877_v1 = vld [vmem:[#allocation55_spill] sm:$0xff] }
 0x3b0   : > { %v2138_v43 = vpack.c.bf16 %v2106_v19, %v2106_v19  ;;  %v1894_v44 = vmul.f32 %v11878_v2, %v11877_v1  ;;  %v11881_v2 = vld [vmem:[#allocation42_spill] sm:$0xff] }
 0x3b1   : > { %11872 = vst [vmem:[#allocation48_spill] sm:$0xff] %v9185_v27  ;;  %v2986_v19 = vunpack.c.l.b16 %v1738_v24  ;;  %v1955_v24 = vpack.c.bf16 %v8448_v38, %v8448_v38 }
 0x3b2   : > { %v4230_v15 = vpop.f32.mrf.mxu1  ;;  %v4319_v55 = vpop.f32.mrf.mxu2  ;;  %6624 = vset.pattern.permute.xlu2 %v11814_v41  ;;  %v3258_v33 = vunpack.c.l.b16 %v2138_v43  ;;  %v1926_v34 = vpack.c.bf16 %v1894_v44, %v1894_v44  ;;  %4638 = vmatpush.bf16.msrb.mxu2 %v6450_v11  ;;  %v11888_v11 = vrot.slane %v8672_v5, 1 }
 0x3b3   : > { %v9190_v30 = vadd.f32 %v4319_v55, %v4230_v15  ;;  %2399 = vperm.xlu2 %6624, %v8988_v0   ;;  %v1927_v55 = vpack.c.bf16 %v1895_v6, %v1895_v6  ;;  %v3010_v18 = vpack.c.b16 %v2987_v42, %v2986_v19  ;;  %v6745_v42 = vld [vmem:[%s11118_s4 + $0xb0] sm:$0xff] }
 0x3b4   : > { %v3290_v8 = vpack.c.b16 %v3259_v28, %v3258_v33 }
 0x3b5   : > { %11876 = vst [vmem:[#allocation78_spill] sm:$0xff] %v9190_v30  ;;  %v9195_v35 = vpop.permute.xlu2 %2079  ;;  %2255 = vperm.xlu0 %6645, %v6744_v62   ;;  %4565 = vmatmul.bf16.gmra.mxu1 %v3197_v60  ;;  %v1992_v51 = vpop.permute.xlu1 %1991  ;;  %v1514_v62 = vrot.slane %v11881_v2, 1  ;;  %v11882_v60 = vld [vmem:[#allocation67_spill] sm:$0xff]  ;;  %v3079_v6 = vunpack.c.l.b16 %v1927_v55  ;;  %v11887_v55 = vld [vmem:[#allocation98_spill] sm:$0xff]  ;;  %v11921_v30 = vld [vmem:[#allocation57_spill] sm:$0xff] }
 0x3b6   : > { %11879 = vst [vmem:[#allocation120_spill] sm:$0xff] %v9195_v35  ;;  %6621 = vset.pattern.permute.xlu1 %v11824_v20  ;;  %v4361_v50 = vpop.f32.mrf.mxu3  ;;  %v11348_v43 = vrot.slane %v11882_v60, 1  ;;  %4639 = vmatmul.bf16.vlgmr.msrb.gmra.mxu2 %v3290_v8  ;;  %v6462_v8 = vld [vmem:[#allocation5 + $0x1a0] sm:$0xff] }
 0x3b7   : > { %2583 = vperm.xlu1 %6621, %v8920_v56   ;;  %v9204_v15 = vadd.f32 %v4361_v50, %v8934_v16  ;;  %v1954_v56 = vpack.c.bf16 %v8445_v53, %v8445_v53  ;;  %v3078_v16 = vunpack.c.l.b16 %v1926_v34  ;;  %v9235_v19 = vsel %vm1529_vm4, %v11888_v11, %v1514_v62  ;;  %4723 = vmatpush.bf16.msra.mxu3 %v6462_v8  ;;  %v11900_v8 = vld [vmem:[#allocation74_spill] sm:$0xff] }
 0x3b8   : > { %v9223_v33 = vsel %vm1529_vm4, %v1514_v62, %v11348_v43  ;;  %11889 = vst [vmem:[#allocation98_spill] sm:$0xff] %v9235_v19  ;;  %v11893_v62 = vld [vmem:[#allocation116_spill] sm:$0xff] }
 0x3b9   : > { %11880 = vst [vmem:[#allocation157_spill] sm:$0xff] %v9204_v15  ;;  %4412 = vmatmul.bf16.gmra.mxu3 %v3010_v18  ;;  %v1709_v28 = vmul.f32 %v11887_v55, %v9223_v33  ;;  %v3104_v50 = vpack.c.b16 %v3079_v6, %v3078_v16  ;;  %v3170_v34 = vunpack.c.l.b16 %v1954_v56  ;;  %v3171_v18 = vunpack.c.l.b16 %v1955_v24  ;;  %v11890_v15 = vld [vmem:[#allocation115_spill] sm:$0xff]  ;;  %v11892_v6 = vld [vmem:[#allocation30_spill] sm:$0xff] }
 0x3ba   : > { %v9208_v10 = vpop.f32.mrf.mxu1  ;;  %v9210_v39 = vpop.f32.mrf.mxu2  ;;  %11886 = vst [vmem:[#allocation161_spill] sm:$0xff] %v9223_v33  ;;  %v2109_v27 = vmul.f32 %v1992_v51, %v11890_v15  ;;  %v2108_v56 = vmul.f32 %v8929_v23, %v11893_v62  ;;  %v11894_v51 = vld [vmem:[#allocation61_spill] sm:$0xff] }
 0x3bb   : > { %11883 = vst [vmem:[#allocation158_spill] sm:$0xff] %v9208_v10  ;;  %6627 = vset.pattern.permute.xlu2 %v11815_v12  ;;  %v1741_v24 = vpack.c.bf16 %v1709_v28, %v1709_v28  ;;  %v1896_v11 = vmul.f32 %v8964_v48, %v11894_v51  ;;  %v3198_v22 = vpack.c.b16 %v3171_v18, %v3170_v34  ;;  %v11899_v28 = vld [vmem:[#allocation69_spill] sm:$0xff] }
 0x3bc   : > { %11884 = vst [vmem:[#allocation159_spill] sm:$0xff] %v9210_v39  ;;  %2211 = vperm.xlu2 %6627, %v9014_v13   ;;  %v4287_v48 = vadd.f32 %v11900_v8, %v11899_v28 }
 0x3bd   : > { %v9216_v44 = vpop.permute.xlu2 %2175  ;;  %2259 = vperm.xlu0 %6645, %v6745_v42   ;;  %v9238_v38 = vpop.permute.xlu1 %1999  ;;  %v11891_v42 = vld [vmem:[#allocation110_spill] sm:$0xff]  ;;  %v2989_v23 = vunpack.c.l.b16 %v1741_v24  ;;  %v1928_v51 = vpack.c.bf16 %v1896_v11, %v1896_v11  ;;  %v6478_v24 = vld [vmem:[#allocation5 + $0x220] sm:$0xff]  ;;  %v11901_v11 = vld [vmem:[#allocation68_spill] sm:$0xff] }
 0x3be   : > { %11885 = vst [vmem:[#allocation160_spill] sm:$0xff] %v9216_v44  ;;  %v4373_v43 = vpop.f32.mrf.mxu3  ;;  %v1708_v55 = vmul.f32 %v11891_v42, %v9235_v19  ;;  %4491 = vmatmul.bf16.gmra.mxu0 %v3104_v50  ;;  %v2141_v42 = vpack.c.bf16 %v2109_v27, %v2109_v27  ;;  %4901 = vmatpush.bf16.msra.mxu1 %v6478_v24  ;;  %v9297_v24 = vld [vmem:[%s11118_s4 + $0x90] sm:$0xff] }
 0x3bf   : > { %6623 = vset.pattern.permute.xlu1 %v11815_v12  ;;  %v9244_v16 = vadd.f32 %v4373_v43, %v11892_v6  ;;  %v11896_v43 = vld [vmem:[#allocation77_spill] sm:$0xff]  ;;  %v11897_v6 = vld [vmem:[#allocation124_spill] sm:$0xff]  ;;  %v3080_v8 = vunpack.c.l.b16 %v1928_v51  ;;  %v11906_v51 = vrot.slane %v11882_v60, 1 }
 0x3c0   : > { %2207 = vperm.xlu1 %6623, %v8988_v0   ;;  %v1740_v35 = vpack.c.bf16 %v1708_v55, %v1708_v55  ;;  %v1897_v50 = vmul.f32 %v11897_v6, %v11896_v43  ;;  %v2140_v0 = vpack.c.bf16 %v2108_v56, %v2108_v56  ;;  %v6470_v56 = vld [vmem:[#allocation5 + $0x1e0] sm:$0xff]  ;;  %v1516_v6 = vrot.slane %v11901_v11, 1 }
 0x3c1   : > { %4812 = vmatpush.bf16.msra.mxu0 %v6470_v56 }
 0x3c2   : > { %v4235_v53 = vpop.f32.mrf.mxu1  ;;  %v4324_v1 = vpop.f32.mrf.mxu2  ;;  %v2988_v34 = vunpack.c.l.b16 %v1740_v35  ;;  %v3260_v28 = vunpack.c.l.b16 %v2140_v0 }
 0x3c3   : > { %v9251_v15 = vadd.f32 %v4324_v1, %v4235_v53  ;;  %v9263_v53 = vld [vmem:[%s11118_s4 + $0x88] sm:$0xff]  ;;  %v3261_v1 = vunpack.c.l.b16 %v2141_v42 }
 0x3c4   : > { %6629 = vset.pattern.permute.xlu2 %v11814_v41  ;;  %v3011_v42 = vpack.c.b16 %v2989_v23, %v2988_v34  ;;  %v9290_v23 = vsel %vm1529_vm4, %v11906_v51, %v1516_v6  ;;  %v11908_v34 = vld [vmem:[#allocation82_spill] sm:$0xff]  ;;  %v11910_v51 = vld [vmem:[#allocation119_spill] sm:$0xff] }
 0x3c5   : > { %11895 = vst [vmem:[#allocation110_spill] sm:$0xff] %v9251_v15  ;;  %v9255_v39 = vpop.permute.xlu2 %2367  ;;  %6658 = vset.pattern.permute.xlu0 %v11824_v20  ;;  %4570 = vmatmul.bf16.gmra.mxu1 %v3198_v22  ;;  %v1929_v22 = vpack.c.bf16 %v1897_v50, %v1897_v50  ;;  %v9270_v55 = vpop.permute.xlu1 %2011  ;;  %v3291_v62 = vpack.c.b16 %v3261_v1, %v3260_v28 }
 0x3c6   : > { %11898 = vst [vmem:[#allocation30_spill] sm:$0xff] %v9255_v39  ;;  %2623 = vperm.xlu0 %6658, %v9263_v53   ;;  %v4375_v27 = vpop.f32.mrf.mxu3  ;;  %2403 = vperm.xlu2 %6629, %v9014_v13   ;;  %v11903_v13 = vld [vmem:[#allocation29_spill] sm:$0xff]  ;;  %v1710_v56 = vmul.f32 %v11908_v34, %v9290_v23  ;;  %v2111_v34 = vmul.f32 %v9238_v38, %v11910_v51  ;;  %v11915_v51 = vld [vmem:[#allocation43_spill] sm:$0xff] }
 0x3c7   : > { %v9268_v18 = vadd.f32 %v4375_v27, %v4287_v48  ;;  %v11353_v35 = vrot.slane %v11903_v13, 1  ;;  %v1956_v48 = vpack.c.bf16 %v8506_v17, %v8506_v17  ;;  %v1957_v27 = vpack.c.bf16 %v8509_v7, %v8509_v7  ;;  %11907 = vst [vmem:[#allocation162_spill] sm:$0xff] %v9290_v23  ;;  %4644 = vmatmul.bf16.gmra.mxu2 %v3291_v62  ;;  %v11911_v17 = vld [vmem:[#allocation52_spill] sm:$0xff]  ;;  %v11912_v39 = vld [vmem:[#allocation25_spill] sm:$0xff] }
 0x3c8   : > { %6625 = vset.pattern.permute.xlu1 %v11824_v20  ;;  %v3081_v0 = vunpack.c.l.b16 %v1929_v22  ;;  %v1742_v38 = vpack.c.bf16 %v1710_v56, %v1710_v56 }
 0x3c9   : > { %2587 = vperm.xlu1 %6625, %v8943_v63   ;;  %4417 = vmatmul.bf16.gmra.mxu3 %v3011_v42  ;;  %v9304_v22 = vsel %vm1529_vm4, %v1516_v6, %v11353_v35  ;;  %v3172_v28 = vunpack.c.l.b16 %v1956_v48  ;;  %v3173_v42 = vunpack.c.l.b16 %v1957_v27  ;;  %v11913_v48 = vld [vmem:[#allocation28_spill] sm:$0xff]  ;;  %v11914_v27 = vld [vmem:[#allocation129_spill] sm:$0xff]  ;;  %v2004_v35 = vpop.permute.xlu0 %2003 }
 0x3ca   : > { %v9275_v43 = vpop.f32.mrf.mxu1  ;;  %v9278_v50 = vpop.f32.mrf.mxu2  ;;  %v3105_v1 = vpack.c.b16 %v3081_v0, %v3080_v8  ;;  %11909 = vst [vmem:[#allocation82_spill] sm:$0xff] %v9304_v22  ;;  %v1711_v7 = vmul.f32 %v11911_v17, %v9304_v22  ;;  %v6748_v8 = vld [vmem:[%s11118_s4 + $0x58] sm:$0xff]  ;;  %v2110_v0 = vmul.f32 %v11914_v27, %v11913_v48  ;;  %v1899_v17 = vmul.f32 %v8999_v49, %v11915_v51  ;;  %v11920_v48 = vld [vmem:[#allocation75_spill] sm:$0xff] }
 0x3cb   : > { %11902 = vst [vmem:[#allocation124_spill] sm:$0xff] %v9275_v43  ;;  %v2143_v43 = vpack.c.bf16 %v2111_v34, %v2111_v34  ;;  %v2990_v56 = vunpack.c.l.b16 %v1742_v38  ;;  %v4292_v33 = vadd.f32 %v11921_v30, %v11920_v48 }
 0x3cc   : > { %11904 = vst [vmem:[#allocation69_spill] sm:$0xff] %v9278_v50  ;;  %v1743_v15 = vpack.c.bf16 %v1711_v7, %v1711_v7  ;;  %v2142_v27 = vpack.c.bf16 %v2110_v0, %v2110_v0  ;;  %v1931_v49 = vpack.c.bf16 %v1899_v17, %v1899_v17  ;;  %v11923_v0 = vld [vmem:[#allocation70_spill] sm:$0xff] }
 0x3cd   : > { %v9284_v63 = vpop.permute.xlu2 %2179  ;;  %v9317_v6 = vpop.permute.xlu1 %2023  ;;  %v3263_v7 = vunpack.c.l.b16 %v2143_v43 }
 0x3ce   : > { %11905 = vst [vmem:[#allocation74_spill] sm:$0xff] %v9284_v63  ;;  %2627 = vperm.xlu0 %6658, %v9297_v24   ;;  %v4378_v62 = vpop.f32.mrf.mxu3  ;;  %6631 = vset.pattern.permute.xlu2 %v11824_v20  ;;  %v11916_v63 = vld [vmem:[#allocation71_spill] sm:$0xff]  ;;  %v3262_v48 = vunpack.c.l.b16 %v2142_v27  ;;  %v3083_v43 = vunpack.c.l.b16 %v1931_v49  ;;  %v1959_v27 = vpack.c.bf16 %v8561_v26, %v8561_v26 }
 0x3cf   : > { %v9312_v50 = vadd.f32 %v4378_v62, %v11912_v39  ;;  %2599 = vperm.xlu2 %6631, %v6748_v8   ;;  %4496 = vmatmul.bf16.gmra.mxu0 %v3105_v1  ;;  %v3199_v62 = vpack.c.b16 %v3173_v42, %v3172_v28  ;;  %v11917_v1 = vld [vmem:[#allocation111_spill] sm:$0xff]  ;;  %v9335_v28 = vld [vmem:[%s11118_s4 + $0xc8] sm:$0xff] }
 0x3d0   : > { %v1898_v22 = vmul.f32 %v11917_v1, %v11916_v63  ;;  %11922 = vst [vmem:[#allocation129_spill] sm:$0xff] %v9335_v28  ;;  %v6750_v1 = vld [vmem:[%s11118_s4 + $0x60] sm:$0xff] }
 0x3d1   : > { %6628 = vset.pattern.permute.xlu1 %v11815_v12 }
 0x3d2   : > { %v4240_v39 = vpop.f32.mrf.mxu1  ;;  %2215 = vperm.xlu1 %6628, %v6748_v8   ;;  %v4329_v23 = vpop.f32.mrf.mxu2  ;;  %v1930_v34 = vpack.c.bf16 %v1898_v22, %v1898_v22  ;;  %v1958_v22 = vpack.c.bf16 %v8558_v9, %v8558_v9 }
 0x3d3   : > { %v9326_v10 = vadd.f32 %v4329_v23, %v4240_v39  ;;  %v2991_v23 = vunpack.c.l.b16 %v1743_v15 }
 0x3d4   : > { %v3082_v51 = vunpack.c.l.b16 %v1930_v34  ;;  %v11931_v34 = vrot.slane %v11903_v13, 1 }
 0x3d5   : > { %11918 = vst [vmem:[#allocation52_spill] sm:$0xff] %v9326_v10  ;;  %v9328_v19 = vpop.permute.xlu2 %2371  ;;  %4575 = vmatmul.bf16.gmra.mxu1 %v3199_v62  ;;  %v11924_v62 = vld [vmem:[#allocation79_spill] sm:$0xff]  ;;  %v9343_v17 = vpop.permute.xlu1 %2035  ;;  %v3012_v15 = vpack.c.b16 %v2991_v23, %v2990_v56  ;;  %v11928_v23 = vrot.slane %v11923_v0, 1 }
 0x3d6   : > { %11919 = vst [vmem:[#allocation25_spill] sm:$0xff] %v9328_v19  ;;  %2655 = vperm.xlu0 %6658, %v9335_v28   ;;  %v4380_v42 = vpop.f32.mrf.mxu3  ;;  %v1518_v30 = vrot.slane %v11924_v62, 1  ;;  %v9357_v19 = vpop.permute.xlu0 %2015 }
 0x3d7   : > { %v9338_v39 = vadd.f32 %v4380_v42, %v4292_v33  ;;  %6634 = vset.pattern.permute.xlu2 %v11814_v41  ;;  %v3292_v42 = vpack.c.b16 %v3263_v7, %v3262_v48  ;;  %v11930_v7 = vld [vmem:[#allocation81_spill] sm:$0xff] }
 0x3d8   : > { %2411 = vperm.xlu2 %6634, %v6750_v1   ;;  %v9368_v9 = vsel %vm1529_vm4, %v1518_v30, %v11928_v23  ;;  %v9384_v23 = vld [vmem:[%s11118_s4 + $0xb8] sm:$0xff] }
 0x3d9   : > { %4422 = vmatmul.bf16.gmra.mxu3 %v3012_v15  ;;  %11929 = vst [vmem:[#allocation163_spill] sm:$0xff] %v9368_v9  ;;  %4649 = vmatmul.bf16.gmra.mxu2 %v3292_v42  ;;  %v1713_v48 = vmul.f32 %v11930_v7, %v9368_v9  ;;  %v9377_v15 = vsel %vm1529_vm4, %v11931_v34, %v1518_v30  ;;  %v3174_v42 = vunpack.c.l.b16 %v1958_v22  ;;  %v3175_v7 = vunpack.c.l.b16 %v1959_v27  ;;  %v11937_v30 = vld [vmem:[#allocation122_spill] sm:$0xff]  ;;  %v11940_v9 = vld [vmem:[#allocation113_spill] sm:$0xff] }
 0x3da   : > { %v9348_v63 = vpop.f32.mrf.mxu1  ;;  %6630 = vset.pattern.permute.xlu1 %v11814_v41  ;;  %v9351_v33 = vpop.f32.mrf.mxu2  ;;  %11932 = vst [vmem:[#allocation81_spill] sm:$0xff] %v9377_v15  ;;  %v2112_v34 = vmul.f32 %v2004_v35, %v11937_v30  ;;  %v11942_v35 = vld [vmem:[#allocation126_spill] sm:$0xff] }
 0x3db   : > { %11925 = vst [vmem:[#allocation111_spill] sm:$0xff] %v9348_v63  ;;  %v4462_v38 = vpop.f32.mrf.mxu0  ;;  %2407 = vperm.xlu1 %6630, %v6748_v8   ;;  %v3106_v8 = vpack.c.b16 %v3083_v43, %v3082_v51  ;;  %v11935_v51 = vld [vmem:[#allocation51_spill] sm:$0xff]  ;;  %v11939_v63 = vld [vmem:[#allocation44_spill] sm:$0xff] }
 0x3dc   : > { %11926 = vst [vmem:[#allocation75_spill] sm:$0xff] %v9351_v33  ;;  %v9362_v56 = vadd.f32 %v4462_v38, %v9244_v16  ;;  %v11933_v16 = vld [vmem:[#allocation123_spill] sm:$0xff]  ;;  %v1712_v43 = vmul.f32 %v11935_v51, %v9377_v15  ;;  %v1745_v33 = vpack.c.bf16 %v1713_v48, %v1713_v48  ;;  %v1901_v22 = vmul.f32 %v11940_v9, %v11939_v63 }
 0x3dd   : > { %v9359_v49 = vpop.permute.xlu2 %2567  ;;  %v2113_v38 = vmul.f32 %v8997_v14, %v11933_v16  ;;  %11934 = vst [vmem:[#allocation164_spill] sm:$0xff] %v9384_v23  ;;  %v9393_v14 = vpop.permute.xlu1 %2047  ;;  %v6461_v16 = vld [vmem:[#allocation5 + $0x198] sm:$0xff] }
 0x3de   : > { %11927 = vst [vmem:[#allocation57_spill] sm:$0xff] %v9359_v49  ;;  %6667 = vset.pattern.permute.xlu0 %v11814_v41  ;;  %v4383_v26 = vpop.f32.mrf.mxu3  ;;  %v11936_v49 = vld [vmem:[#allocation97_spill] sm:$0xff]  ;;  %4724 = vmatpush.bf16.msra.mxu3 %v6461_v16  ;;  %v11945_v16 = vld [vmem:[#allocation63_spill] sm:$0xff] }
 0x3df   : > { %2455 = vperm.xlu0 %6667, %v9384_v23   ;;  %v9390_v28 = vadd.f32 %v4383_v26, %v11936_v49  ;;  %4501 = vmatmul.bf16.gmra.mxu0 %v3106_v8  ;;  %11938 = vst [vmem:[#allocation51_spill] sm:$0xff] %v9393_v14  ;;  %v2145_v10 = vpack.c.bf16 %v2113_v38, %v2113_v38  ;;  %v11941_v49 = vld [vmem:[#allocation60_spill] sm:$0xff]  ;;  %v2993_v38 = vunpack.c.l.b16 %v1745_v33  ;;  %v11948_v33 = vld [vmem:[#allocation27_spill] sm:$0xff] }
 0x3e0   : > { %6636 = vset.pattern.permute.xlu2 %v11824_v20  ;;  %v3200_v23 = vpack.c.b16 %v3175_v7, %v3174_v42  ;;  %v1744_v26 = vpack.c.bf16 %v1712_v43, %v1712_v43  ;;  %v1900_v8 = vmul.f32 %v11942_v35, %v11941_v49  ;;  %v2144_v14 = vpack.c.bf16 %v2112_v34, %v2112_v34  ;;  %v11946_v7 = vld [vmem:[#allocation73_spill] sm:$0xff]  ;;  %v9410_v43 = vpop.permute.xlu0 %2027 }
 0x3e1   : > { %2603 = vperm.xlu2 %6636, %v6750_v1   ;;  %v1933_v42 = vpack.c.bf16 %v1901_v22, %v1901_v22  ;;  %v4297_v63 = vadd.f32 %v11946_v7, %v11945_v16  ;;  %v3265_v44 = vunpack.c.l.b16 %v2145_v10  ;;  %v1520_v22 = vrot.slane %v11948_v33, 1 }
 0x3e2   : > { %v4245_v27 = vpop.f32.mrf.mxu1  ;;  %v4334_v51 = vpop.f32.mrf.mxu2  ;;  %v1932_v34 = vpack.c.bf16 %v1900_v8, %v1900_v8 }
 0x3e3   : > { %6632 = vset.pattern.permute.xlu1 %v11815_v12  ;;  %v9401_v30 = vadd.f32 %v4334_v51, %v4245_v27  ;;  %v4464_v48 = vpop.f32.mrf.mxu0  ;;  %v9415_v27 = vld [vmem:[%s11118_s4 + $0xc0] sm:$0xff]  ;;  %v11949_v51 = vld [vmem:[#allocation45_spill] sm:$0xff]  ;;  %v3085_v16 = vunpack.c.l.b16 %v1933_v42 }
 0x3e4   : > { %2219 = vperm.xlu1 %6632, %v6750_v1   ;;  %v9406_v9 = vadd.f32 %v4464_v48, %v9268_v18  ;;  %11947 = vst [vmem:[#allocation126_spill] sm:$0xff] %v9415_v27  ;;  %v11373_v35 = vrot.slane %v11949_v51, 1  ;;  %v3264_v48 = vunpack.c.l.b16 %v2144_v14  ;;  %v3084_v14 = vunpack.c.l.b16 %v1932_v34 }
 0x3e5   : > { %11943 = vst [vmem:[#allocation97_spill] sm:$0xff] %v9401_v30  ;;  %v9403_v15 = vpop.permute.xlu2 %2379  ;;  %4580 = vmatmul.bf16.gmra.mxu1 %v3200_v23  ;;  %v2992_v23 = vunpack.c.l.b16 %v1744_v26  ;;  %v9424_v49 = vpop.permute.xlu1 %2059  ;;  %v6477_v30 = vld [vmem:[#allocation5 + $0x218] sm:$0xff]  ;;  %v1961_v26 = vpack.c.bf16 %v8613_v57, %v8613_v57 }
 0x3e6   : > { %11944 = vst [vmem:[#allocation113_spill] sm:$0xff] %v9403_v15  ;;  %v4385_v1 = vpop.f32.mrf.mxu3  ;;  %v6469_v15 = vld [vmem:[#allocation5 + $0x1d8] sm:$0xff]  ;;  %v3293_v8 = vpack.c.b16 %v3265_v44, %v3264_v48  ;;  %v9440_v42 = vsel %vm1529_vm4, %v1520_v22, %v11373_v35  ;;  %4902 = vmatpush.bf16.msra.mxu1 %v6477_v30  ;;  %v3107_v34 = vpack.c.b16 %v3085_v16, %v3084_v14 }
 0x3e7   : > { %2459 = vperm.xlu0 %6667, %v9415_v27   ;;  %v9418_v18 = vadd.f32 %v4385_v1, %v4297_v63  ;;  %v3013_v10 = vpack.c.b16 %v2993_v38, %v2992_v23  ;;  %v1960_v63 = vpack.c.bf16 %v8610_v25, %v8610_v25  ;;  %4813 = vmatpush.bf16.msra.mxu0 %v6469_v15  ;;  %v11954_v23 = vld [vmem:[#allocation102_spill] sm:$0xff]  ;;  %v11955_v15 = vrot.slane %v11923_v0, 1 }
 0x3e8   : > { %11953 = vst [vmem:[#allocation166_spill] sm:$0xff] %v9440_v42  ;;  %v1715_v25 = vmul.f32 %v11954_v23, %v9440_v42  ;;  %v9459_v30 = vld [vmem:[%s11118_s4 + $0xd8] sm:$0xff]  ;;  %v3177_v16 = vunpack.c.l.b16 %v1961_v26 }
 0x3e9   : > { %6638 = vset.pattern.permute.xlu2 %v11815_v12  ;;  %4427 = vmatmul.bf16.gmra.mxu3 %v3013_v10  ;;  %v9452_v48 = vsel %vm1529_vm4, %v11955_v15, %v1520_v22  ;;  %v11957_v10 = vld [vmem:[#allocation131_spill] sm:$0xff]  ;;  %11958 = vst [vmem:[#allocation167_spill] sm:$0xff] %v9459_v30  ;;  %v9465_v22 = vpop.permute.xlu0 %2039  ;;  %v11960_v15 = vld [vmem:[#allocation125_spill] sm:$0xff] }
 0x3ea   : > { %v9422_v7 = vpop.f32.mrf.mxu1  ;;  %v9427_v27 = vpop.f32.mrf.mxu2  ;;  %2231 = vperm.xlu2 %6638, %v9094_v37   ;;  %4654 = vmatmul.bf16.gmra.mxu2 %v3293_v8  ;;  %11956 = vst [vmem:[#allocation102_spill] sm:$0xff] %v9452_v48  ;;  %v2114_v8 = vmul.f32 %v9270_v55, %v11957_v10  ;;  %v11961_v55 = vld [vmem:[#allocation130_spill] sm:$0xff]  ;;  %v1747_v10 = vpack.c.bf16 %v1715_v25, %v1715_v25 }
 0x3eb   : > { %11950 = vst [vmem:[#allocation63_spill] sm:$0xff] %v9422_v7  ;;  %v4467_v1 = vpop.f32.mrf.mxu0  ;;  %v2115_v57 = vmul.f32 %v9357_v19, %v11961_v55 }
 0x3ec   : > { %11951 = vst [vmem:[#allocation73_spill] sm:$0xff] %v9427_v27  ;;  %v9445_v44 = vadd.f32 %v4467_v1, %v9312_v50  ;;  %6635 = vset.pattern.permute.xlu1 %v11814_v41  ;;  %v3176_v50 = vunpack.c.l.b16 %v1960_v63  ;;  %v11959_v1 = vld [vmem:[#allocation40_spill] sm:$0xff]  ;;  %v2146_v27 = vpack.c.bf16 %v2114_v8, %v2114_v8  ;;  %v2995_v8 = vunpack.c.l.b16 %v1747_v10 }
 0x3ed   : > { %v9434_v38 = vpop.permute.xlu2 %2571  ;;  %2415 = vperm.xlu1 %6635, %v9058_v59   ;;  %v1714_v23 = vmul.f32 %v11959_v1, %v9452_v48  ;;  %v9474_v42 = vpop.permute.xlu1 %2071  ;;  %v11963_v48 = vld [vmem:[#allocation39_spill] sm:$0xff]  ;;  %v2147_v19 = vpack.c.bf16 %v2115_v57, %v2115_v57 }
 0x3ee   : > { %11952 = vst [vmem:[#allocation165_spill] sm:$0xff] %v9434_v38  ;;  %v4388_v14 = vpop.f32.mrf.mxu3  ;;  %v11962_v38 = vld [vmem:[#allocation93_spill] sm:$0xff]  ;;  %v3201_v7 = vpack.c.b16 %v3177_v16, %v3176_v50  ;;  %v11965_v50 = vld [vmem:[#allocation127_spill] sm:$0xff]  ;;  %v11966_v16 = vld [vmem:[#allocation128_spill] sm:$0xff] }
 0x3ef   : > { %2471 = vperm.xlu0 %6667, %v9459_v30   ;;  %v9468_v35 = vadd.f32 %v4388_v14, %v11960_v15  ;;  %4506 = vmatmul.bf16.gmra.mxu0 %v3107_v34  ;;  %v1902_v63 = vmul.f32 %v9035_v47, %v11962_v38  ;;  %v1746_v1 = vpack.c.bf16 %v1714_v23, %v1714_v23  ;;  %v3266_v23 = vunpack.c.l.b16 %v2146_v27  ;;  %v9494_v57 = vld [vmem:[%s11118_s4 + $0xe0] sm:$0xff] }
 0x3f0   : > { %v1903_v14 = vmul.f32 %v8991_v61, %v11963_v48  ;;  %v4302_v15 = vadd.f32 %v11966_v16, %v11965_v50  ;;  %11967 = vst [vmem:[#allocation125_spill] sm:$0xff] %v9494_v57  ;;  %v3267_v10 = vunpack.c.l.b16 %v2147_v19  ;;  %v1962_v48 = vpack.c.bf16 %v8672_v5, %v8672_v5  ;;  %v11975_v16 = vld [vmem:[#allocation112_spill] sm:$0xff] }
 0x3f1   : > { %v1934_v38 = vpack.c.bf16 %v1902_v63, %v1902_v63  ;;  %v9501_v63 = vpop.permute.xlu0 %2051 }
 0x3f2   : > { %v4250_v26 = vpop.f32.mrf.mxu1  ;;  %v4339_v30 = vpop.f32.mrf.mxu2  ;;  %6641 = vset.pattern.permute.xlu2 %v11824_v20 }
 0x3f3   : > { %v9479_v34 = vadd.f32 %v4339_v30, %v4250_v26  ;;  %2611 = vperm.xlu2 %6641, %v9169_v58   ;;  %v4469_v47 = vpop.f32.mrf.mxu0  ;;  %v2994_v30 = vunpack.c.l.b16 %v1746_v1  ;;  %v1935_v26 = vpack.c.bf16 %v1903_v14, %v1903_v14  ;;  %v11970_v14 = vld [vmem:[#allocation32_spill] sm:$0xff] }
 0x3f4   : > { %v9487_v55 = vadd.f32 %v4469_v47, %v9338_v39  ;;  %v11968_v39 = vld [vmem:[#allocation49_spill] sm:$0xff]  ;;  %v3086_v47 = vunpack.c.l.b16 %v1934_v38  ;;  %v11973_v38 = vrot.slane %v11949_v51, 1 }
 0x3f5   : > { %11964 = vst [vmem:[#allocation40_spill] sm:$0xff] %v9479_v34  ;;  %v9482_v25 = vpop.permute.xlu2 %2199  ;;  %4585 = vmatmul.bf16.gmra.mxu1 %v3201_v7  ;;  %6637 = vset.pattern.permute.xlu1 %v11824_v20  ;;  %v1522_v27 = vrot.slane %v11968_v39, 1  ;;  %v3014_v1 = vpack.c.b16 %v2995_v8, %v2994_v30  ;;  %v11987_v34 = vld [vmem:[#allocation17_spill] sm:$0xff] }
 0x3f6   : > { %v4390_v61 = vpop.f32.mrf.mxu3  ;;  %2607 = vperm.xlu1 %6637, %v9058_v59   ;;  %v3294_v59 = vpack.c.b16 %v3267_v10, %v3266_v23  ;;  %v11976_v10 = vrot.slane %v11970_v14, 1 }
 0x3f7   : > { %6676 = vset.pattern.permute.xlu0 %v11815_v12  ;;  %v9497_v7 = vadd.f32 %v4390_v61, %v4302_v15  ;;  %v1963_v15 = vpack.c.bf16 %v11881_v2, %v11881_v2  ;;  %v9510_v61 = vpop.permute.xlu1 %2083  ;;  %v9519_v8 = vsel %vm1529_vm4, %v11973_v38, %v1522_v27  ;;  %v2117_v38 = vmul.f32 %v9317_v6, %v9031_v52 }
 0x3f8   : > { %2283 = vperm.xlu0 %6676, %v9494_v57   ;;  %11971 = vst [vmem:[#allocation128_spill] sm:$0xff] %v9510_v61  ;;  %v3087_v57 = vunpack.c.l.b16 %v1935_v26  ;;  %v1716_v2 = vmul.f32 %v11975_v16, %v9519_v8 }
 0x3f9   : > { %4432 = vmatmul.bf16.gmra.mxu3 %v3014_v1  ;;  %11974 = vst [vmem:[#allocation169_spill] sm:$0xff] %v9519_v8  ;;  %v9531_v1 = vsel %vm1529_vm4, %v1522_v27, %v11976_v10  ;;  %v3179_v5 = vunpack.c.l.b16 %v1963_v15  ;;  %v9546_v27 = vld [vmem:[%s11118_s4 + $0xe8] sm:$0xff]  ;;  %v11983_v10 = vld [vmem:[#allocation117_spill] sm:$0xff]  ;;  %v9558_v52 = vpop.permute.xlu0 %2063 }
 0x3fa   : > { %v9503_v50 = vpop.f32.mrf.mxu1  ;;  %4659 = vmatmul.bf16.gmra.mxu2 %v3294_v59  ;;  %v3108_v26 = vpack.c.b16 %v3087_v57, %v3086_v47  ;;  %11977 = vst [vmem:[#allocation112_spill] sm:$0xff] %v9531_v1  ;;  %v3178_v59 = vunpack.c.l.b16 %v1962_v48  ;;  %v11979_v57 = vld [vmem:[#allocation135_spill] sm:$0xff]  ;;  %v1748_v6 = vpack.c.bf16 %v1716_v2, %v1716_v2  ;;  %v11981_v48 = vld [vmem:[#allocation33_spill] sm:$0xff]  ;;  %v11986_v8 = vld [vmem:[#allocation84_spill] sm:$0xff] }
 0x3fb   : > { %11969 = vst [vmem:[#allocation127_spill] sm:$0xff] %v9503_v50  ;;  %6643 = vset.pattern.permute.xlu2 %v11815_v12  ;;  %v4472_v30 = vpop.f32.mrf.mxu0  ;;  %v2116_v47 = vmul.f32 %v11979_v57, %v9044_v32  ;;  %v1905_v16 = vmul.f32 %v9067_v29, %v11981_v48  ;;  %v6460_v2 = vld [vmem:[#allocation5 + $0x190] sm:$0xff]  ;;  %v11985_v48 = vld [vmem:[#allocation134_spill] sm:$0xff] }
 0x3fc   : > { %2235 = vperm.xlu2 %6643, %v9134_v54   ;;  %v9525_v23 = vadd.f32 %v4472_v30, %v9390_v28  ;;  %4725 = vmatpush.bf16.msra.mxu3 %v6460_v2  ;;  %v1965_v2 = vpack.c.bf16 %v11901_v11, %v11901_v11 }
 0x3fd   : > { %v9513_v19 = vpop.permute.xlu2 %2579 }
 0x3fe   : > { %11972 = vst [vmem:[#allocation168_spill] sm:$0xff] %v9513_v19  ;;  %v4393_v61 = vpop.f32.mrf.mxu3  ;;  %v11978_v19 = vld [vmem:[#allocation83_spill] sm:$0xff]  ;;  %6639 = vset.pattern.permute.xlu1 %v11814_v41 }
 0x3ff   : > { %v1717_v50 = vmul.f32 %v11978_v19, %v9531_v1  ;;  %v9539_v28 = vadd.f32 %v4393_v61, %v8993_v3  ;;  %4511 = vmatmul.bf16.gmra.mxu0 %v3108_v26  ;;  %11980 = vst [vmem:[#allocation83_spill] sm:$0xff] %v9546_v27  ;;  %2419 = vperm.xlu1 %6639, %v9169_v58   ;;  %v11982_v26 = vld [vmem:[#allocation34_spill] sm:$0xff]  ;;  %v9560_v32 = vpop.permute.xlu1 %2363  ;;  %v2996_v58 = vunpack.c.l.b16 %v1748_v6  ;;  %v11391_v6 = vrot.slane %v11986_v8, 1 }
 0x400   : > { %6681 = vset.pattern.permute.xlu0 %v11824_v20  ;;  %v2149_v3 = vpack.c.bf16 %v2117_v38, %v2117_v38  ;;  %v3202_v19 = vpack.c.b16 %v3179_v5, %v3178_v59  ;;  %v1904_v57 = vmul.f32 %v11983_v10, %v11982_v26  ;;  %v11984_v38 = vld [vmem:[#allocation133_spill] sm:$0xff]  ;;  %v1524_v1 = vrot.slane %v11987_v34, 1 }
 0x401   : > { %2671 = vperm.xlu0 %6681, %v9546_v27   ;;  %v1749_v30 = vpack.c.bf16 %v1717_v50, %v1717_v50  ;;  %v2148_v27 = vpack.c.bf16 %v2116_v47, %v2116_v47 }
 0x402   : > { %v4551_v15 = vpop.f32.mrf.mxu1  ;;  %v3269_v59 = vunpack.c.l.b16 %v2149_v3 }
 0x403   : > { %v9554_v61 = vadd.f32 %v4551_v15, %v9362_v56  ;;  %v4474_v29 = vpop.f32.mrf.mxu0  ;;  %v4307_v56 = vadd.f32 %v11985_v48, %v11984_v38  ;;  %v1937_v15 = vpack.c.bf16 %v1905_v16, %v1905_v16  ;;  %v2997_v47 = vunpack.c.l.b16 %v1749_v30 }
 0x404   : > { %6646 = vset.pattern.permute.xlu2 %v11814_v41  ;;  %v9566_v5 = vadd.f32 %v4474_v29, %v9418_v18  ;;  %v3268_v48 = vunpack.c.l.b16 %v2148_v27  ;;  %v9579_v18 = vld [vmem:[%s11118_s4 + $0xf0] sm:$0xff]  ;;  %v1964_v27 = vpack.c.bf16 %v11882_v60, %v11882_v60  ;;  %v3181_v60 = vunpack.c.l.b16 %v1965_v2  ;;  %v11994_v2 = vld [vmem:[#allocation118_spill] sm:$0xff] }
 0x405   : > { %4590 = vmatmul.bf16.gmra.mxu1 %v3202_v19  ;;  %2431 = vperm.xlu2 %6646, %v9263_v53   ;;  %v9569_v50 = vpop.permute.xlu2 %2203  ;;  %v1936_v19 = vpack.c.bf16 %v1904_v57, %v1904_v57  ;;  %v3089_v16 = vunpack.c.l.b16 %v1937_v15  ;;  %v3015_v30 = vpack.c.b16 %v2997_v47, %v2996_v58  ;;  %v6476_v58 = vld [vmem:[#allocation5 + $0x210] sm:$0xff]  ;;  %v11989_v47 = vld [vmem:[#allocation114_spill] sm:$0xff] }
 0x406   : > { %v4395_v10 = vpop.f32.mrf.mxu3  ;;  %v3295_v29 = vpack.c.b16 %v3269_v59, %v3268_v48  ;;  %v9601_v59 = vpop.permute.xlu0 %2075  ;;  %4903 = vmatpush.bf16.msra.mxu1 %v6476_v58  ;;  %v11990_v48 = vrot.slane %v11970_v14, 1 }
 0x407   : > { %v9571_v26 = vadd.f32 %v4395_v10, %v4307_v56  ;;  %6642 = vset.pattern.permute.xlu1 %v11824_v20  ;;  %v3088_v38 = vunpack.c.l.b16 %v1936_v19  ;;  %v6468_v56 = vld [vmem:[#allocation5 + $0x1d0] sm:$0xff]  ;;  %v9591_v15 = vpop.permute.xlu1 %2555 }
 0x408   : > { %2615 = vperm.xlu1 %6642, %v9094_v37   ;;  %4814 = vmatpush.bf16.msra.mxu0 %v6468_v56 }
 0x409   : > { %6686 = vset.pattern.permute.xlu0 %v11814_v41  ;;  %4437 = vmatmul.bf16.gmra.mxu3 %v3015_v30  ;;  %v3109_v19 = vpack.c.b16 %v3089_v16, %v3088_v38  ;;  %v9610_v30 = vsel %vm1529_vm4, %v11990_v48, %v1524_v1 }
 0x40a   : > { %2483 = vperm.xlu0 %6686, %v9579_v18   ;;  %v4553_v3 = vpop.f32.mrf.mxu1  ;;  %4664 = vmatmul.bf16.gmra.mxu2 %v3295_v29  ;;  %11991 = vst [vmem:[#allocation117_spill] sm:$0xff] %v9610_v30  ;;  %v2119_v29 = vmul.f32 %v9065_v40, %v9113_v36 }
 0x40b   : > { %v9584_v57 = vadd.f32 %v4553_v3, %v9406_v9  ;;  %v9597_v9 = vsel %vm1529_vm4, %v1524_v1, %v11391_v6  ;;  %v4477_v10 = vpop.f32.mrf.mxu0  ;;  %v3180_v6 = vunpack.c.l.b16 %v1964_v27  ;;  %v2118_v1 = vmul.f32 %v9410_v43, %v9103_v46  ;;  %v11993_v27 = vld [vmem:[#allocation56_spill] sm:$0xff] }
 0x40c   : > { %11988 = vst [vmem:[#allocation135_spill] sm:$0xff] %v9597_v9  ;;  %v1719_v3 = vmul.f32 %v11989_v47, %v9597_v9  ;;  %v9604_v37 = vadd.f32 %v4477_v10, %v9468_v35  ;;  %v11992_v35 = vld [vmem:[#allocation107_spill] sm:$0xff]  ;;  %v1907_v38 = vmul.f32 %v11994_v2, %v11993_v27  ;;  %v2151_v48 = vpack.c.bf16 %v2119_v29, %v2119_v29  ;;  %v11997_v29 = vld [vmem:[#allocation141_spill] sm:$0xff] }
 0x40d   : > { %6648 = vset.pattern.permute.xlu2 %v11815_v12  ;;  %v9615_v56 = vpop.permute.xlu2 %2399  ;;  %v1718_v58 = vmul.f32 %v11992_v35, %v9610_v30  ;;  %v3203_v35 = vpack.c.b16 %v3181_v60, %v3180_v6  ;;  %v2150_v43 = vpack.c.bf16 %v2118_v1, %v2118_v1 }
 0x40e   : > { %v4398_v47 = vpop.f32.mrf.mxu3  ;;  %2243 = vperm.xlu2 %6648, %v9297_v24   ;;  %v1751_v40 = vpack.c.bf16 %v1719_v3, %v1719_v3  ;;  %v1939_v27 = vpack.c.bf16 %v1907_v38, %v1907_v38  ;;  %v3271_v6 = vunpack.c.l.b16 %v2151_v48  ;;  %v1967_v48 = vpack.c.bf16 %v11924_v62, %v11924_v62  ;;  %v6467_v62 = vld [vmem:[#allocation5 + $0x1c8] sm:$0xff] }
 0x40f   : > { %v9620_v16 = vadd.f32 %v4398_v47, %v9061_v31  ;;  %4516 = vmatmul.bf16.gmra.mxu0 %v3109_v19  ;;  %v1750_v31 = vpack.c.bf16 %v1718_v58, %v1718_v58  ;;  %v11995_v47 = vld [vmem:[#allocation58_spill] sm:$0xff]  ;;  %v11996_v19 = vld [vmem:[#allocation137_spill] sm:$0xff]  ;;  %v9634_v9 = vpop.permute.xlu1 %2183 }
 0x410   : > { %6644 = vset.pattern.permute.xlu1 %v11815_v12  ;;  %v1906_v36 = vmul.f32 %v11996_v19, %v11995_v47  ;;  %v2999_v2 = vunpack.c.l.b16 %v1751_v40  ;;  %v9642_v19 = vpop.permute.xlu0 %2559  ;;  %v3091_v40 = vunpack.c.l.b16 %v1939_v27  ;;  %4815 = vmatpush.bf16.msra.mxu0 %v6467_v62 }
 0x411   : > { %2239 = vperm.xlu1 %6644, %v9263_v53   ;;  %v3270_v53 = vunpack.c.l.b16 %v2150_v43  ;;  %v11999_v43 = vld [vmem:[#allocation92_spill] sm:$0xff] }
 0x412   : > { %v4556_v10 = vpop.f32.mrf.mxu1  ;;  %6690 = vset.pattern.permute.xlu0 %v11824_v20  ;;  %v1938_v46 = vpack.c.bf16 %v1906_v36, %v1906_v36  ;;  %v1966_v36 = vpack.c.bf16 %v11903_v13, %v11903_v13 }
 0x413   : > { %v9629_v11 = vadd.f32 %v4556_v10, %v9445_v44  ;;  %v4479_v3 = vpop.f32.mrf.mxu0  ;;  %v4312_v44 = vadd.f32 %v11997_v29, %v9078_v21  ;;  %v2998_v10 = vunpack.c.l.b16 %v1750_v31 }
 0x414   : > { %v9640_v60 = vadd.f32 %v4479_v3, %v9497_v7  ;;  %v3090_v31 = vunpack.c.l.b16 %v1938_v46  ;;  %v12003_v46 = vrot.slane %v11986_v8, 1 }
 0x415   : > { %4595 = vmatmul.bf16.gmra.mxu1 %v3203_v35  ;;  %v3016_v38 = vpack.c.b16 %v2999_v2, %v2998_v10  ;;  %v3296_v35 = vpack.c.b16 %v3271_v6, %v3270_v53  ;;  %v2120_v10 = vmul.f32 %v9343_v17, %v9179_v4  ;;  %v3182_v53 = vunpack.c.l.b16 %v1966_v36  ;;  %v12014_v4 = vld [vmem:[#allocation152_spill] sm:$0xff] }
 0x416   : > { %v4400_v58 = vpop.f32.mrf.mxu3  ;;  %6650 = vset.pattern.permute.xlu2 %v11814_v41  ;;  %v9648_v1 = vpop.permute.xlu2 %2211  ;;  %v3110_v29 = vpack.c.b16 %v3091_v40, %v3090_v31  ;;  %v12007_v40 = vld [vmem:[#allocation155_spill] sm:$0xff] }
 0x417   : > { %v9644_v47 = vadd.f32 %v4400_v58, %v4312_v44  ;;  %2435 = vperm.xlu2 %6650, %v9297_v24   ;;  %v9658_v24 = vpop.permute.xlu1 %2375  ;;  %v12001_v44 = vld [vmem:[#allocation50_spill] sm:$0xff]  ;;  %v2121_v31 = vmul.f32 %v9465_v22, %v12007_v40 }
 0x418   : > { %v12002_v58 = vrot.slane %v12001_v44, 1  ;;  %v9686_v17 = vpop.permute.xlu0 %2563 }
 0x419   : > { %4442 = vmatmul.bf16.gmra.mxu3 %v3016_v38  ;;  %6647 = vset.pattern.permute.xlu1 %v11824_v20  ;;  %v12005_v38 = vld [vmem:[#allocation76_spill] sm:$0xff] }
 0x41a   : > { %v4558_v21 = vpop.f32.mrf.mxu1  ;;  %4669 = vmatmul.bf16.gmra.mxu2 %v3296_v35  ;;  %2619 = vperm.xlu1 %6647, %v9134_v54   ;;  %v9672_v6 = vsel %vm1529_vm4, %v12003_v46, %v12002_v58  ;;  %v3183_v54 = vunpack.c.l.b16 %v1967_v48  ;;  %v12009_v58 = vld [vmem:[#allocation144_spill] sm:$0xff]  ;;  %v6757_v48 = vld [vmem:[%s11118_s4 + $0x98] sm:$0xff] }
 0x41b   : > { %v9651_v7 = vadd.f32 %v4558_v21, %v9487_v55  ;;  %v4482_v27 = vpop.f32.mrf.mxu0  ;;  %v12000_v55 = vld [vmem:[#allocation109_spill] sm:$0xff]  ;;  %12004 = vst [vmem:[#allocation134_spill] sm:$0xff] %v9672_v6  ;;  %v1720_v35 = vmul.f32 %v12005_v38, %v9672_v6 }
 0x41c   : > { %v1721_v3 = vmul.f32 %v12000_v55, %v11999_v43  ;;  %v9664_v2 = vadd.f32 %v4482_v27, %v9539_v28  ;;  %v12006_v28 = vld [vmem:[#allocation148_spill] sm:$0xff]  ;;  %v12008_v55 = vld [vmem:[#allocation21_spill] sm:$0xff]  ;;  %v3204_v38 = vpack.c.b16 %v3183_v54, %v3182_v53  ;;  %v12013_v43 = vld [vmem:[#allocation139_spill] sm:$0xff] }
 0x41d   : > { %11998 = vst [vmem:[#allocation133_spill] sm:$0xff] %v9651_v7  ;;  %v1908_v46 = vmul.f32 %v12009_v58, %v12008_v55  ;;  %v2153_v58 = vpack.c.bf16 %v2121_v31, %v2121_v31  ;;  %v6459_v7 = vld [vmem:[#allocation5 + $0x188] sm:$0xff]  ;;  %v6458_v31 = vld [vmem:[#allocation5 + $0x180] sm:$0xff] }
 0x41e   : > { %v4403_v21 = vpop.f32.mrf.mxu3  ;;  %v1753_v45 = vpack.c.bf16 %v1721_v3, %v1721_v3  ;;  %v12012_v3 = vld [vmem:[#allocation23_spill] sm:$0xff]  ;;  %4726 = vmatpush.bf16.msra.mxu3 %v6459_v7  ;;  %v1969_v7 = vpack.c.bf16 %v11948_v33, %v11948_v33 }
 0x41f   : > { %v9679_v27 = vadd.f32 %v4403_v21, %v12006_v28  ;;  %4521 = vmatmul.bf16.gmra.mxu0 %v3110_v29  ;;  %6652 = vset.pattern.permute.xlu2 %v11824_v20  ;;  %v2152_v21 = vpack.c.bf16 %v2120_v10, %v2120_v10  ;;  %v1752_v28 = vpack.c.bf16 %v1720_v35, %v1720_v35  ;;  %v9698_v13 = vpop.permute.xlu1 %2187  ;;  %v3273_v40 = vunpack.c.l.b16 %v2153_v58 }
 0x420   : > { %2631 = vperm.xlu2 %6652, %v6757_v48   ;;  %v9694_v22 = vpop.permute.xlu2 %2403  ;;  %v1909_v6 = vmul.f32 %v12013_v43, %v12012_v3  ;;  %v3001_v10 = vunpack.c.l.b16 %v1753_v45  ;;  %v1940_v53 = vpack.c.bf16 %v1908_v46, %v1908_v46  ;;  %v2172_v46 = vpop.permute.xlu0 %2171 }
 0x421   : > { %12011 = vst [vmem:[#allocation107_spill] sm:$0xff] %v9694_v22  ;;  %v3272_v35 = vunpack.c.l.b16 %v2152_v21 }
 0x422   : > { %v4561_v36 = vpop.f32.mrf.mxu1  ;;  %6649 = vset.pattern.permute.xlu1 %v11815_v12  ;;  %v3092_v30 = vunpack.c.l.b16 %v1940_v53  ;;  %4727 = vmatpush.bf16.msra.mxu3 %v6458_v31  ;;  %v3185_v31 = vunpack.c.l.b16 %v1969_v7 }
 0x423   : > { %v9692_v29 = vadd.f32 %v4561_v36, %v9525_v23  ;;  %v4484_v55 = vpop.f32.mrf.mxu0  ;;  %v12015_v23 = vld [vmem:[#allocation153_spill] sm:$0xff]  ;;  %2247 = vperm.xlu1 %6649, %v6757_v48   ;;  %v3297_v62 = vpack.c.b16 %v3273_v40, %v3272_v35 }
 0x424   : > { %v4317_v36 = vadd.f32 %v12015_v23, %v12014_v4  ;;  %v9704_v54 = vadd.f32 %v4484_v55, %v9571_v26  ;;  %v1968_v4 = vpack.c.bf16 %v11923_v0, %v11923_v0  ;;  %v12020_v35 = vld [vmem:[#allocation161_spill] sm:$0xff] }
 0x425   : > { %12010 = vst [vmem:[#allocation114_spill] sm:$0xff] %v9692_v29  ;;  %4600 = vmatmul.bf16.gmra.mxu1 %v3204_v38  ;;  %v3000_v38 = vunpack.c.l.b16 %v1752_v28  ;;  %v1941_v29 = vpack.c.bf16 %v1909_v6, %v1909_v6  ;;  %v6758_v6 = vld [vmem:[%s11118_s4 + $0xa0] sm:$0xff]  ;;  %v6475_v28 = vld [vmem:[#allocation5 + $0x208] sm:$0xff] }
 0x426   : > { %v4405_v43 = vpop.f32.mrf.mxu3  ;;  %4904 = vmatpush.bf16.msra.mxu1 %v6475_v28 }
 0x427   : > { %v9706_v3 = vadd.f32 %v4405_v43, %v4317_v36  ;;  %v3017_v22 = vpack.c.b16 %v3001_v10, %v3000_v38  ;;  %v3093_v55 = vunpack.c.l.b16 %v1941_v29  ;;  %v12019_v10 = vld [vmem:[#allocation160_spill] sm:$0xff]  ;;  %v9726_v40 = vpop.permute.xlu1 %2383  ;;  %v12021_v29 = vld [vmem:[#allocation51_spill] sm:$0xff] }
 0x428   : > { %6654 = vset.pattern.permute.xlu2 %v11814_v41  ;;  %v2123_v43 = vmul.f32 %v12021_v29, %v12020_v35  ;;  %v12049_v35 = vld [vmem:[#allocation69_spill] sm:$0xff] }
 0x429   : > { %2443 = vperm.xlu2 %6654, %v6758_v6   ;;  %4447 = vmatmul.bf16.gmra.mxu3 %v3017_v22  ;;  %v9719_v21 = vpop.permute.xlu2 %2599  ;;  %v3111_v53 = vpack.c.b16 %v3093_v55, %v3092_v30  ;;  %v3184_v22 = vunpack.c.l.b16 %v1968_v4  ;;  %v12026_v30 = vld [vmem:[#allocation88_spill] sm:$0xff]  ;;  %v12027_v55 = vld [vmem:[#allocation150_spill] sm:$0xff] }
 0x42a   : > { %v4563_v45 = vpop.f32.mrf.mxu1  ;;  %4674 = vmatmul.bf16.gmra.mxu2 %v3297_v62  ;;  %12017 = vst [vmem:[#allocation137_spill] sm:$0xff] %v9719_v21  ;;  %v1911_v0 = vmul.f32 %v12027_v55, %v12026_v30  ;;  %v2155_v29 = vpack.c.bf16 %v2123_v43, %v2123_v43 }
 0x42b   : > { %v9712_v26 = vadd.f32 %v4563_v45, %v9566_v5  ;;  %v4487_v58 = vpop.f32.mrf.mxu0  ;;  %v12018_v5 = vld [vmem:[#allocation86_spill] sm:$0xff]  ;;  %6651 = vset.pattern.permute.xlu1 %v11814_v41  ;;  %v12022_v45 = vld [vmem:[#allocation85_spill] sm:$0xff]  ;;  %v3205_v7 = vpack.c.b16 %v3185_v31, %v3184_v22 }
 0x42c   : > { %v2299_v23 = vmul.f32 %v12019_v10, %v12018_v5  ;;  %v9724_v36 = vadd.f32 %v4487_v58, %v9620_v16  ;;  %2439 = vperm.xlu1 %6651, %v6757_v48   ;;  %v2298_v62 = vmul.f32 %v2172_v46, %v12022_v45  ;;  %v12024_v16 = vld [vmem:[#allocation98_spill] sm:$0xff]  ;;  %v12029_v48 = vld [vmem:[#allocation87_spill] sm:$0xff] }
 0x42d   : > { %12016 = vst [vmem:[#allocation118_spill] sm:$0xff] %v9712_v26  ;;  %v12023_v26 = vld [vmem:[#allocation78_spill] sm:$0xff] }
 0x42e   : > { %v4408_v38 = vpop.f32.mrf.mxu3  ;;  %v12025_v58 = vld [vmem:[#allocation142_spill] sm:$0xff]  ;;  %v2331_v33 = vpack.c.bf16 %v2299_v23, %v2299_v23  ;;  %v2330_v28 = vpack.c.bf16 %v2298_v62, %v2298_v62 }
 0x42f   : > { %v9733_v5 = vadd.f32 %v4408_v38, %v12023_v26  ;;  %4526 = vmatmul.bf16.gmra.mxu0 %v3111_v53  ;;  %v2122_v10 = vmul.f32 %v12025_v58, %v12024_v16  ;;  %v12030_v46 = vld [vmem:[#allocation66_spill] sm:$0xff]  ;;  %v1943_v38 = vpack.c.bf16 %v1911_v0, %v1911_v0  ;;  %v12032_v58 = vld [vmem:[#allocation159_spill] sm:$0xff]  ;;  %v9752_v31 = vpop.permute.xlu1 %2575  ;;  %v12048_v16 = vld [vmem:[#allocation124_spill] sm:$0xff] }
 0x430   : > { %v1910_v26 = vmul.f32 %v12030_v46, %v12029_v48  ;;  %v12031_v45 = vld [vmem:[#allocation158_spill] sm:$0xff]  ;;  %v3355_v23 = vunpack.c.l.b16 %v2331_v33 }
 0x431   : > { %6656 = vset.pattern.permute.xlu2 %v11824_v20  ;;  %v2154_v53 = vpack.c.bf16 %v2122_v10, %v2122_v10  ;;  %v4322_v55 = vadd.f32 %v12032_v58, %v12031_v45  ;;  %v3354_v10 = vunpack.c.l.b16 %v2330_v28  ;;  %v3095_v46 = vunpack.c.l.b16 %v1943_v38 }
 0x432   : > { %v4566_v21 = vpop.f32.mrf.mxu1  ;;  %2635 = vperm.xlu2 %6656, %v6758_v6   ;;  %v9747_v30 = vpop.permute.xlu2 %2411  ;;  %v1942_v62 = vpack.c.bf16 %v1910_v26, %v1910_v26 }
 0x433   : > { %v9740_v4 = vadd.f32 %v4566_v21, %v9604_v37  ;;  %v4489_v43 = vpop.f32.mrf.mxu0  ;;  %v3275_v37 = vunpack.c.l.b16 %v2155_v29  ;;  %v3274_v33 = vunpack.c.l.b16 %v2154_v53  ;;  %v3386_v45 = vpack.c.b16 %v3355_v23, %v3354_v10  ;;  %v12035_v53 = vld [vmem:[#allocation94_spill] sm:$0xff]  ;;  %v12037_v10 = vld [vmem:[#allocation149_spill] sm:$0xff] }
 0x434   : > { %v9750_v22 = vadd.f32 %v4489_v43, %v9644_v47  ;;  %6653 = vset.pattern.permute.xlu1 %v11815_v12  ;;  %v1970_v47 = vpack.c.bf16 %v11949_v51, %v11949_v51  ;;  %v1971_v43 = vpack.c.bf16 %v11968_v39, %v11968_v39  ;;  %v3094_v28 = vunpack.c.l.b16 %v1942_v62  ;;  %v12040_v51 = vld [vmem:[#allocation110_spill] sm:$0xff] }
 0x435   : > { %12028 = vst [vmem:[#allocation141_spill] sm:$0xff] %v9740_v4  ;;  %4605 = vmatmul.bf16.gmra.mxu1 %v3205_v7  ;;  %v9755_v7 = vpop.f32.mrf.mxu2  ;;  %2251 = vperm.xlu1 %6653, %v6758_v6   ;;  %v3298_v26 = vpack.c.b16 %v3275_v37, %v3274_v33  ;;  %v12034_v6 = vld [vmem:[#allocation164_spill] sm:$0xff]  ;;  %v2301_v38 = vmul.f32 %v9634_v9, %v12035_v53 }
 0x436   : > { %v4410_v21 = vpop.f32.mrf.mxu3  ;;  %v3112_v23 = vpack.c.b16 %v3095_v46, %v3094_v28  ;;  %v3187_v4 = vunpack.c.l.b16 %v1971_v43  ;;  %v12041_v46 = vld [vmem:[#allocation162_spill] sm:$0xff] }
 0x437   : > { %v9757_v0 = vadd.f32 %v4410_v21, %v4322_v55  ;;  %v12036_v21 = vld [vmem:[#allocation82_spill] sm:$0xff]  ;;  %v9777_v33 = vpop.permute.xlu1 %2387 }
 0x438   : > { %v12043_v28 = vld [vmem:[#allocation18_spill] sm:$0xff] }
 0x439   : > { %4728 = vmatmul.bf16.vlgmr.msra.gmra.mxu3 %v3386_v45  ;;  %v12038_v45 = vld [vmem:[#allocation95_spill] sm:$0xff] }
 0x43a   : > { %v4568_v58 = vpop.f32.mrf.mxu1  ;;  %6659 = vset.pattern.permute.xlu2 %v11815_v12  ;;  %4679 = vmatmul.bf16.gmra.mxu2 %v3298_v26  ;;  %v12039_v26 = vld [vmem:[#allocation74_spill] sm:$0xff] }
 0x43b   : > { %v9760_v29 = vadd.f32 %v4568_v58, %v9640_v60  ;;  %2263 = vperm.xlu2 %6659, %v12034_v6   ;;  %v9770_v55 = vpop.permute.xlu2 %2603  ;;  %v4492_v60 = vpop.f32.mrf.mxu0  ;;  %v2125_v58 = vmul.f32 %v12037_v10, %v12036_v21  ;;  %v2300_v39 = vmul.f32 %v12039_v26, %v12038_v45  ;;  %v12047_v21 = vld [vmem:[#allocation147_spill] sm:$0xff] }
 0x43c   : > { %v9775_v62 = vadd.f32 %v4492_v60, %v9679_v27  ;;  %v6759_v27 = vld [vmem:[%s11118_s4 + $0xa8] sm:$0xff]  ;;  %v12044_v60 = vld [vmem:[#allocation121_spill] sm:$0xff] }
 0x43d   : > { %12033 = vst [vmem:[#allocation109_spill] sm:$0xff] %v9760_v29  ;;  %v3186_v29 = vunpack.c.l.b16 %v1970_v47  ;;  %v4640_v53 = vpop.f32.mrf.mxu2  ;;  %6655 = vset.pattern.permute.xlu1 %v11814_v41  ;;  %v2124_v47 = vmul.f32 %v9501_v63, %v12041_v46  ;;  %v1913_v10 = vmul.f32 %v12044_v60, %v12043_v28  ;;  %v12046_v63 = vld [vmem:[#allocation20_spill] sm:$0xff]  ;;  %v4327_v60 = vadd.f32 %v12049_v35, %v12048_v16 }
 0x43e   : > { %v4413_v37 = vpop.f32.mrf.mxu3  ;;  %v9788_v43 = vadd.f32 %v4640_v53, %v9554_v61  ;;  %2447 = vperm.xlu1 %6655, %v6759_v27   ;;  %v1912_v61 = vmul.f32 %v12047_v21, %v12046_v63  ;;  %v2332_v53 = vpack.c.bf16 %v2300_v39, %v2300_v39 }
 0x43f   : > { %v9782_v9 = vadd.f32 %v4413_v37, %v12040_v51  ;;  %4531 = vmatmul.bf16.gmra.mxu0 %v3112_v23  ;;  %v2192_v51 = vpop.permute.xlu0 %2191  ;;  %v2333_v37 = vpack.c.bf16 %v2301_v38, %v2301_v38  ;;  %v2157_v23 = vpack.c.bf16 %v2125_v58, %v2125_v58  ;;  %v3206_v48 = vpack.c.b16 %v3187_v4, %v3186_v29  ;;  %v6760_v38 = vld [vmem:[%s11118_s4 + $0xb0] sm:$0xff]  ;;  %v6466_v29 = vld [vmem:[#allocation5 + $0x1c0] sm:$0xff]  ;;  %v9811_v58 = vpop.permute.xlu1 %2583 }
 0x440   : > { %12042 = vst [vmem:[#allocation76_spill] sm:$0xff] %v9788_v43  ;;  %v2156_v43 = vpack.c.bf16 %v2124_v47, %v2124_v47  ;;  %v1945_v46 = vpack.c.bf16 %v1913_v10, %v1913_v10  ;;  %v1944_v47 = vpack.c.bf16 %v1912_v61, %v1912_v61  ;;  %v3356_v10 = vunpack.c.l.b16 %v2332_v53  ;;  %4816 = vmatpush.bf16.msra.mxu0 %v6466_v29 }
 0x441   : > { %v3357_v28 = vunpack.c.l.b16 %v2333_v37  ;;  %v3277_v21 = vunpack.c.l.b16 %v2157_v23  ;;  %v1972_v61 = vpack.c.bf16 %v11970_v14, %v11970_v14  ;;  %v1973_v53 = vpack.c.bf16 %v11987_v34, %v11987_v34  ;;  %v12062_v14 = vld [vmem:[#allocation111_spill] sm:$0xff] }
 0x442   : > { %v4571_v45 = vpop.f32.mrf.mxu1  ;;  %v3276_v37 = vunpack.c.l.b16 %v2156_v43  ;;  %v3096_v43 = vunpack.c.l.b16 %v1944_v47  ;;  %v12054_v47 = vld [vmem:[#allocation99_spill] sm:$0xff] }
 0x443   : > { %v9796_v26 = vadd.f32 %v4571_v45, %v9664_v2  ;;  %6661 = vset.pattern.permute.xlu2 %v11824_v20  ;;  %v4494_v4 = vpop.f32.mrf.mxu0  ;;  %v3387_v63 = vpack.c.b16 %v3357_v28, %v3356_v10  ;;  %v3188_v29 = vunpack.c.l.b16 %v1972_v61 }
 0x444   : > { %2643 = vperm.xlu2 %6661, %v6760_v38   ;;  %v9806_v2 = vpop.permute.xlu2 %2231 }
 0x445   : > { %12045 = vst [vmem:[#allocation148_spill] sm:$0xff] %v9796_v26  ;;  %4610 = vmatmul.bf16.gmra.mxu1 %v3206_v48  ;;  %v9809_v48 = vadd.f32 %v4494_v4, %v9706_v3  ;;  %v4642_v16 = vpop.f32.mrf.mxu2  ;;  %v3097_v26 = vunpack.c.l.b16 %v1945_v46 }
 0x446   : > { %v4415_v39 = vpop.f32.mrf.mxu3  ;;  %v9816_v45 = vadd.f32 %v4642_v16, %v9584_v57  ;;  %6657 = vset.pattern.permute.xlu1 %v11824_v20  ;;  %v12051_v57 = vld [vmem:[#allocation100_spill] sm:$0xff]  ;;  %v6474_v16 = vld [vmem:[#allocation5 + $0x200] sm:$0xff] }
 0x447   : > { %v9813_v35 = vadd.f32 %v4415_v39, %v4327_v60  ;;  %2639 = vperm.xlu1 %6657, %v6759_v27   ;;  %v3299_v60 = vpack.c.b16 %v3277_v21, %v3276_v37  ;;  %v9826_v4 = vpop.permute.xlu0 %2195  ;;  %v2302_v46 = vmul.f32 %v9698_v13, %v12051_v57  ;;  %v3113_v27 = vpack.c.b16 %v3097_v26, %v3096_v43  ;;  %v12053_v21 = vld [vmem:[#allocation126_spill] sm:$0xff]  ;;  %v9848_v43 = vpop.permute.xlu1 %2207 }
 0x448   : > { %v3189_v39 = vunpack.c.l.b16 %v1973_v53  ;;  %v2303_v37 = vmul.f32 %v2192_v51, %v12054_v47  ;;  %4905 = vmatpush.bf16.msra.mxu1 %v6474_v16  ;;  %v12058_v51 = vld [vmem:[#allocation36_spill] sm:$0xff]  ;;  %v12060_v16 = vld [vmem:[#allocation41_spill] sm:$0xff]  ;;  %v12061_v47 = vld [vmem:[#allocation30_spill] sm:$0xff] }
 0x449   : > { %4733 = vmatmul.bf16.gmra.mxu3 %v3387_v63  ;;  %v12055_v63 = vld [vmem:[#allocation52_spill] sm:$0xff]  ;;  %v2490_v57 = vmul.f32 %v9560_v32, %v12058_v51  ;;  %v12063_v32 = vld [vmem:[#allocation75_spill] sm:$0xff] }
 0x44a   : > { %v4573_v23 = vpop.f32.mrf.mxu1  ;;  %4684 = vmatmul.bf16.gmra.mxu2 %v3299_v60 }
 0x44b   : > { %v9820_v3 = vadd.f32 %v4573_v23, %v9704_v54  ;;  %v12052_v54 = vld [vmem:[#allocation81_spill] sm:$0xff]  ;;  %v2522_v51 = vpack.c.bf16 %v2490_v57, %v2490_v57 }
 0x44c   : > { %6663 = vset.pattern.permute.xlu2 %v11815_v12  ;;  %v2126_v28 = vmul.f32 %v9424_v49, %v12052_v54  ;;  %v4497_v23 = vpop.f32.mrf.mxu0  ;;  %v12056_v49 = vld [vmem:[#allocation163_spill] sm:$0xff] }
 0x44d   : > { %12050 = vst [vmem:[#allocation144_spill] sm:$0xff] %v9820_v3  ;;  %2267 = vperm.xlu2 %6663, %v12053_v21   ;;  %v4645_v3 = vpop.f32.mrf.mxu2  ;;  %v9839_v13 = vadd.f32 %v4497_v23, %v9733_v5  ;;  %v9841_v26 = vpop.permute.xlu2 %2611  ;;  %v2127_v61 = vmul.f32 %v9558_v52, %v12056_v49  ;;  %v2335_v52 = vpack.c.bf16 %v2303_v37, %v2303_v37  ;;  %v12064_v37 = vld [vmem:[#allocation129_spill] sm:$0xff] }
 0x44e   : > { %v4418_v10 = vpop.f32.mrf.mxu3  ;;  %v9846_v53 = vadd.f32 %v4645_v3, %v9629_v11  ;;  %v2158_v5 = vpack.c.bf16 %v2126_v28, %v2126_v28  ;;  %v2491_v11 = vmul.f32 %v12061_v47, %v12060_v16  ;;  %v1975_v47 = vpack.c.bf16 %v12001_v44, %v12001_v44 }
 0x44f   : > { %v9836_v60 = vadd.f32 %v4418_v10, %v12055_v63  ;;  %4536 = vmatmul.bf16.gmra.mxu0 %v3113_v27  ;;  %v2334_v10 = vpack.c.bf16 %v2302_v46, %v2302_v46  ;;  %6660 = vset.pattern.permute.xlu1 %v11814_v41  ;;  %v3207_v27 = vpack.c.b16 %v3189_v39, %v3188_v29  ;;  %v9858_v63 = vpop.permute.xlu0 %2391 }
 0x450   : > { %12057 = vst [vmem:[#allocation139_spill] sm:$0xff] %v9846_v53  ;;  %2451 = vperm.xlu1 %6660, %v6760_v38   ;;  %v2159_v3 = vpack.c.bf16 %v2127_v61, %v2127_v61  ;;  %v4332_v46 = vadd.f32 %v12063_v32, %v12062_v14  ;;  %v3278_v53 = vunpack.c.l.b16 %v2158_v5  ;;  %v2523_v29 = vpack.c.bf16 %v2491_v11, %v2491_v11  ;;  %v9871_v5 = vpop.permute.xlu1 %2587 }
 0x451   : > { %v3358_v34 = vunpack.c.l.b16 %v2334_v10  ;;  %v3450_v14 = vunpack.c.l.b16 %v2522_v51 }
 0x452   : > { %v4576_v21 = vpop.f32.mrf.mxu1  ;;  %v3279_v61 = vunpack.c.l.b16 %v2159_v3 }
 0x453   : > { %v9854_v23 = vadd.f32 %v4576_v21, %v9724_v36  ;;  %v3359_v36 = vunpack.c.l.b16 %v2335_v52  ;;  %v1974_v52 = vpack.c.bf16 %v11986_v8, %v11986_v8 }
 0x454   : > { %v4499_v39 = vpop.f32.mrf.mxu0  ;;  %v3300_v11 = vpack.c.b16 %v3279_v61, %v3278_v53 }
 0x455   : > { %12059 = vst [vmem:[#allocation152_spill] sm:$0xff] %v9854_v23  ;;  %4615 = vmatmul.bf16.gmra.mxu1 %v3207_v27  ;;  %6665 = vset.pattern.permute.xlu2 %v11814_v41  ;;  %v9867_v21 = vadd.f32 %v4499_v39, %v9757_v0  ;;  %v3388_v10 = vpack.c.b16 %v3359_v36, %v3358_v34  ;;  %v3451_v0 = vunpack.c.l.b16 %v2523_v29  ;;  %v12066_v34 = vld [vmem:[#allocation103_spill] sm:$0xff]  ;;  %v3190_v51 = vunpack.c.l.b16 %v1974_v52  ;;  %v12068_v39 = vld [vmem:[#allocation104_spill] sm:$0xff]  ;;  %v12069_v29 = vld [vmem:[#allocation97_spill] sm:$0xff] }
 0x456   : > { %v4420_v28 = vpop.f32.mrf.mxu3  ;;  %2463 = vperm.xlu2 %6665, %v12064_v37   ;;  %v9869_v27 = vpop.permute.xlu2 %2235  ;;  %v2305_v3 = vmul.f32 %v9482_v25, %v12066_v34  ;;  %v2304_v53 = vmul.f32 %v9826_v4, %v12068_v39  ;;  %v12071_v25 = vld [vmem:[#allocation102_spill] sm:$0xff]  ;;  %v12073_v52 = vld [vmem:[#allocation167_spill] sm:$0xff] }
 0x457   : > { %v9863_v38 = vadd.f32 %v4420_v28, %v4332_v46  ;;  %v3482_v32 = vpack.c.b16 %v3451_v0, %v3450_v14  ;;  %v3191_v28 = vunpack.c.l.b16 %v1975_v47  ;;  %v9888_v37 = vpop.permute.xlu0 %2395  ;;  %v12072_v14 = vld [vmem:[#allocation154_spill] sm:$0xff] }
 0x458   : > { %6662 = vset.pattern.permute.xlu1 %v11824_v20  ;;  %v2337_v4 = vpack.c.bf16 %v2305_v3, %v2305_v3  ;;  %v12078_v3 = vld [vmem:[#allocation63_spill] sm:$0xff] }
 0x459   : > { %4738 = vmatmul.bf16.gmra.mxu3 %v3388_v10  ;;  %2647 = vperm.xlu1 %6662, %v12034_v6   ;;  %v2128_v10 = vmul.f32 %v12072_v14, %v12071_v25  ;;  %v2336_v14 = vpack.c.bf16 %v2304_v53, %v2304_v53 }
 0x45a   : > { %v4578_v57 = vpop.f32.mrf.mxu1  ;;  %4689 = vmatmul.bf16.gmra.mxu2 %v3300_v11  ;;  %v12074_v11 = vld [vmem:[#allocation90_spill] sm:$0xff]  ;;  %v3361_v44 = vunpack.c.l.b16 %v2337_v4 }
 0x45b   : > { %v9874_v16 = vadd.f32 %v4578_v57, %v9750_v22  ;;  %v12067_v22 = vld [vmem:[#allocation166_spill] sm:$0xff]  ;;  %v12070_v57 = vmov 5   ;;  %v2493_v0 = vmul.f32 %v9658_v24, %v12074_v11  ;;  %v2160_v23 = vpack.c.bf16 %v2128_v10, %v2128_v10  ;;  %v6761_v24 = vld [vmem:[%s11118_s4 + $0xc8] sm:$0xff]  ;;  %v12079_v11 = vld [vmem:[#allocation73_spill] sm:$0xff] }
 0x45c   : > { %v2129_v46 = vmul.f32 %v9474_v42, %v12067_v22  ;;  %v4502_v6 = vpop.f32.mrf.mxu0 }
 0x45d   : > { %12065 = vst [vmem:[#allocation153_spill] sm:$0xff] %v9874_v16  ;;  %v9897_v42 = vadd.f32 %v4502_v6, %v9782_v9  ;;  %v12076_v16 = vld [vmem:[#allocation89_spill] sm:$0xff] }
 0x45e   : > { %v4423_v36 = vpop.f32.mrf.mxu3  ;;  %6668 = vset.pattern.permute.xlu2 %v12070_v57  ;;  %v2161_v39 = vpack.c.bf16 %v2129_v46, %v2129_v46  ;;  %v12077_v9 = vld [vmem:[#allocation25_spill] sm:$0xff]  ;;  %v4337_v46 = vadd.f32 %v12079_v11, %v12078_v3 }
 0x45f   : > { %v9891_v61 = vadd.f32 %v4423_v36, %v12069_v29  ;;  %4817 = vmatmul.bf16.vlgmr.msra.gmra.mxu0 %v3482_v32  ;;  %2087 = vperm.xlu2 %6668, %v12073_v52   ;;  %v9900_v47 = vpop.permute.xlu2 %2431  ;;  %v9904_v36 = vpop.permute.xlu1 %2215  ;;  %v3208_v29 = vpack.c.b16 %v3191_v28, %v3190_v51  ;;  %v2492_v6 = vmul.f32 %v12077_v9, %v12076_v16  ;;  %v3360_v28 = vunpack.c.l.b16 %v2336_v14  ;;  %v12082_v14 = vld [vmem:[#allocation37_spill] sm:$0xff] }
 0x460   : > { %v3280_v9 = vunpack.c.l.b16 %v2160_v23  ;;  %v1977_v23 = vpack.c.bf16 %v12082_v14, %v12082_v14 }
 0x461   : > { %6664 = vset.pattern.permute.xlu1 %v11815_v12  ;;  %v2524_v53 = vpack.c.bf16 %v2492_v6, %v2492_v6  ;;  %v3389_v3 = vpack.c.b16 %v3361_v44, %v3360_v28  ;;  %v12083_v44 = vld [vmem:[#allocation54_spill] sm:$0xff] }
 0x462   : > { %v4581_v34 = vpop.f32.mrf.mxu1  ;;  %2271 = vperm.xlu1 %6664, %v6761_v24  }
 0x463   : > { %v9907_v32 = vadd.f32 %v4581_v34, %v9775_v62  ;;  %v2525_v62 = vpack.c.bf16 %v2493_v0, %v2493_v0  ;;  %v3281_v34 = vunpack.c.l.b16 %v2161_v39  ;;  %v12081_v0 = vld [vmem:[#allocation53_spill] sm:$0xff] }
 0x464   : > { %v4504_v16 = vpop.f32.mrf.mxu0  ;;  %v1976_v39 = vpack.c.bf16 %v12081_v0, %v12081_v0 }
 0x465   : > { %12075 = vst [vmem:[#allocation86_spill] sm:$0xff] %v9907_v32  ;;  %4620 = vmatmul.bf16.gmra.mxu1 %v3208_v29  ;;  %v9920_v10 = vadd.f32 %v4504_v16, %v9813_v35  ;;  %v9923_v29 = vpop.permute.xlu0 %2591  ;;  %v3453_v24 = vunpack.c.l.b16 %v2525_v62  ;;  %v3301_v6 = vpack.c.b16 %v3281_v34, %v3280_v9  ;;  %v12084_v62 = vld [vmem:[#allocation112_spill] sm:$0xff]  ;;  %v3193_v16 = vunpack.c.l.b16 %v1977_v23 }
 0x466   : > { %v4425_v51 = vpop.f32.mrf.mxu3  ;;  %v3192_v34 = vunpack.c.l.b16 %v1976_v39 }
 0x467   : > { %v9917_v32 = vadd.f32 %v4425_v51, %v4337_v46  ;;  %6670 = vset.pattern.permute.xlu2 %v11815_v12  ;;  %v9935_v11 = vpop.permute.xlu1 %2407  ;;  %v3452_v46 = vunpack.c.l.b16 %v2524_v53  ;;  %v12085_v51 = vld [vmem:[#allocation120_spill] sm:$0xff] }
 0x468   : > { %2279 = vperm.xlu2 %6670, %v12073_v52   ;;  %v9933_v35 = vpop.permute.xlu2 %2243  ;;  %v6762_v52 = vld [vmem:[%s11118_s4 + $0xc0] sm:$0xff]  ;;  %v2131_v28 = vmul.f32 %v12085_v51, %v12084_v62  ;;  %v12086_v53 = vld [vmem:[#allocation108_spill] sm:$0xff] }
 0x469   : > { %4743 = vmatmul.bf16.gmra.mxu3 %v3389_v3  ;;  %v2306_v3 = vmul.f32 %v9569_v50, %v12086_v53 }
 0x46a   : > { %v4583_v8 = vpop.f32.mrf.mxu1  ;;  %4694 = vmatmul.bf16.gmra.mxu2 %v3301_v6  ;;  %6666 = vset.pattern.permute.xlu1 %v11824_v20  ;;  %v12087_v6 = vld [vmem:[#allocation40_spill] sm:$0xff]  ;;  %v2163_v51 = vpack.c.bf16 %v2131_v28, %v2131_v28 }
 0x46b   : > { %v9927_v4 = vadd.f32 %v4583_v8, %v9809_v48  ;;  %v2307_v8 = vmul.f32 %v9848_v43, %v12083_v44  ;;  %v3483_v48 = vpack.c.b16 %v3453_v24, %v3452_v46  ;;  %2651 = vperm.xlu1 %6666, %v6762_v52   ;;  %v12088_v43 = vld [vmem:[#allocation169_spill] sm:$0xff]  ;;  %v12089_v44 = vld [vmem:[#allocation96_spill] sm:$0xff] }
 0x46c   : > { %v4507_v14 = vpop.f32.mrf.mxu0  ;;  %v2130_v24 = vmul.f32 %v9601_v59, %v12088_v43  ;;  %v2495_v52 = vmul.f32 %v9726_v40, %v12089_v44  ;;  %v2338_v40 = vpack.c.bf16 %v2306_v3, %v2306_v3 }
 0x46d   : > { %12080 = vst [vmem:[#allocation160_spill] sm:$0xff] %v9927_v4  ;;  %v9953_v46 = vadd.f32 %v4507_v14, %v9836_v60  ;;  %v2339_v39 = vpack.c.bf16 %v2307_v8, %v2307_v8  ;;  %v12091_v60 = vld [vmem:[#allocation47_spill] sm:$0xff]  ;;  %v12092_v14 = vld [vmem:[#allocation113_spill] sm:$0xff]  ;;  %v9970_v44 = vpop.permute.xlu0 %2595 }
 0x46e   : > { %v4428_v9 = vpop.f32.mrf.mxu3  ;;  %v2494_v53 = vmul.f32 %v12092_v14, %v12091_v60  ;;  %v3362_v60 = vunpack.c.l.b16 %v2338_v40 }
 0x46f   : > { %v9948_v4 = vadd.f32 %v4428_v9, %v12087_v6  ;;  %4822 = vmatmul.bf16.gmra.mxu0 %v3483_v48  ;;  %v3209_v9 = vpack.c.b16 %v3193_v16, %v3192_v34  ;;  %v6763_v48 = vld [vmem:[%s11118_s4 + $0xd0] sm:$0xff]  ;;  %v9968_v8 = vpop.permute.xlu1 %2219  ;;  %v2162_v6 = vpack.c.bf16 %v2130_v24, %v2130_v24  ;;  %v2527_v34 = vpack.c.bf16 %v2495_v52, %v2495_v52 }
 0x470   : > { %6672 = vset.pattern.permute.xlu2 %v11824_v20  ;;  %v3363_v16 = vunpack.c.l.b16 %v2339_v39  ;;  %v2526_v3 = vpack.c.bf16 %v2494_v53, %v2494_v53  ;;  %v12096_v53 = vld [vmem:[#allocation125_spill] sm:$0xff] }
 0x471   : > { %2659 = vperm.xlu2 %6672, %v6763_v48   ;;  %v9964_v59 = vpop.permute.xlu2 %2435  ;;  %v3282_v62 = vunpack.c.l.b16 %v2162_v6  ;;  %v3455_v52 = vunpack.c.l.b16 %v2527_v34  ;;  %v12097_v6 = vld [vmem:[#allocation15_spill] sm:$0xff] }
 0x472   : > { %v4586_v23 = vpop.f32.mrf.mxu1 }
 0x473   : > { %v9959_v50 = vadd.f32 %v4586_v23, %v9839_v13  ;;  %v12093_v13 = vld [vmem:[#allocation127_spill] sm:$0xff]  ;;  %6669 = vset.pattern.permute.xlu1 %v11815_v12  ;;  %v3283_v23 = vunpack.c.l.b16 %v2163_v51  ;;  %v3390_v51 = vpack.c.b16 %v3363_v16, %v3362_v60 }
 0x474   : > { %v4342_v28 = vadd.f32 %v9755_v7, %v12093_v13  ;;  %2275 = vperm.xlu1 %6669, %v6763_v48   ;;  %v4509_v24 = vpop.f32.mrf.mxu0 }
 0x475   : > { %12090 = vst [vmem:[#allocation51_spill] sm:$0xff] %v9959_v50  ;;  %4625 = vmatmul.bf16.gmra.mxu1 %v3209_v9  ;;  %v12094_v50 = vld [vmem:[#allocation116_spill] sm:$0xff]  ;;  %v12095_v9 = vld [vmem:[#allocation115_spill] sm:$0xff]  ;;  %v9982_v7 = vadd.f32 %v4509_v24, %v9863_v38  ;;  %v2224_v34 = vpop.permute.xlu0 %2223 }
 0x476   : > { %v2682_v0 = vmul.f32 %v9591_v15, %v12094_v50  ;;  %v4430_v43 = vpop.f32.mrf.mxu3  ;;  %v2683_v25 = vmul.f32 %v9642_v19, %v12095_v9  ;;  %v3302_v50 = vpack.c.b16 %v3283_v23, %v3282_v62  ;;  %v12098_v62 = vld [vmem:[#allocation55_spill] sm:$0xff] }
 0x477   : > { %v9977_v14 = vadd.f32 %v4430_v43, %v4342_v28  ;;  %v3454_v43 = vunpack.c.l.b16 %v2526_v3  ;;  %v9991_v38 = vpop.permute.xlu1 %2415  ;;  %v2309_v28 = vmul.f32 %v9904_v36, %v12097_v6  ;;  %v2308_v23 = vmul.f32 %v9648_v1, %v12098_v62  ;;  %v12099_v3 = vld [vmem:[#allocation26_spill] sm:$0xff]  ;;  %v12101_v1 = vld [vmem:[#allocation101_spill] sm:$0xff] }
 0x478   : > { %v2714_v13 = vpack.c.bf16 %v2682_v0, %v2682_v0  ;;  %v2715_v19 = vpack.c.bf16 %v2683_v25, %v2683_v25  ;;  %v12100_v36 = vld [vmem:[#allocation46_spill] sm:$0xff] }
 0x479   : > { %6674 = vset.pattern.permute.xlu2 %v12070_v57  ;;  %4748 = vmatmul.bf16.gmra.mxu3 %v3390_v51  ;;  %v3484_v0 = vpack.c.b16 %v3455_v52, %v3454_v43  ;;  %v2496_v52 = vmul.f32 %v9777_v33, %v12100_v36  ;;  %v2497_v43 = vmul.f32 %v9858_v63, %v12101_v1 }
 0x47a   : > { %v4588_v39 = vpop.f32.mrf.mxu1  ;;  %2091 = vperm.xlu2 %6674, %v12096_v53   ;;  %v9989_v40 = vpop.permute.xlu2 %2631  ;;  %4699 = vmatmul.bf16.gmra.mxu2 %v3302_v50  ;;  %v3547_v25 = vunpack.c.l.b16 %v2715_v19  ;;  %v2340_v53 = vpack.c.bf16 %v2308_v23, %v2308_v23 }
 0x47b   : > { %v9985_v15 = vadd.f32 %v4588_v39, %v9867_v21  ;;  %v3546_v21 = vunpack.c.l.b16 %v2714_v13  ;;  %v2341_v39 = vpack.c.bf16 %v2309_v28, %v2309_v28  ;;  %v2528_v33 = vpack.c.bf16 %v2496_v52, %v2496_v52  ;;  %v12103_v28 = vld [vmem:[#allocation119_spill] sm:$0xff] }
 0x47c   : > { %6671 = vset.pattern.permute.xlu1 %v11814_v41  ;;  %v4512_v24 = vpop.f32.mrf.mxu0  ;;  %v3364_v62 = vunpack.c.l.b16 %v2340_v53 }
 0x47d   : > { %2467 = vperm.xlu1 %6671, %v6763_v48   ;;  %v10002_v9 = vadd.f32 %v4512_v24, %v9891_v61  ;;  %v3578_v13 = vpack.c.b16 %v3547_v25, %v3546_v21  ;;  %v12102_v48 = vld [vmem:[#allocation83_spill] sm:$0xff]  ;;  %v3365_v6 = vunpack.c.l.b16 %v2341_v39  ;;  %v12106_v24 = vld [vmem:[#allocation28_spill] sm:$0xff]  ;;  %v10025_v36 = vpop.permute.xlu0 %2423  ;;  %v6764_v39 = vld [vmem:[%s11118_s4 + $0xd8] sm:$0xff] }
 0x47e   : > { %v4433_v16 = vpop.f32.mrf.mxu3  ;;  %v2684_v25 = vmul.f32 %v9686_v17, %v12106_v24 }
 0x47f   : > { %v9999_v60 = vadd.f32 %v4433_v16, %v12099_v3  ;;  %4827 = vmatmul.bf16.gmra.mxu0 %v3484_v0  ;;  %v10015_v19 = vpop.permute.xlu1 %2607  ;;  %v12104_v0 = vld [vmem:[#allocation57_spill] sm:$0xff]  ;;  %v2529_v16 = vpack.c.bf16 %v2497_v43, %v2497_v43  ;;  %v12105_v3 = vld [vmem:[#allocation132_spill] sm:$0xff]  ;;  %v3391_v1 = vpack.c.b16 %v3365_v6, %v3364_v62 }
 0x480   : > { %v2685_v21 = vmul.f32 %v12104_v0, %v12103_v28  ;;  %v2716_v17 = vpack.c.bf16 %v2684_v25, %v2684_v25 }
 0x482   : > { %v4591_v51 = vpop.f32.mrf.mxu1  ;;  %6677 = vset.pattern.permute.xlu2 %v11815_v12  ;;  %v2717_v43 = vpack.c.bf16 %v2685_v21, %v2685_v21  ;;  %v3548_v25 = vunpack.c.l.b16 %v2716_v17 }
 0x483   : > { %v10007_v50 = vadd.f32 %v4591_v51, %v9897_v42  ;;  %2287 = vperm.xlu2 %6677, %v12102_v48   ;;  %v10013_v61 = vpop.permute.xlu2 %2443  ;;  %v3456_v51 = vunpack.c.l.b16 %v2528_v33  ;;  %v3457_v48 = vunpack.c.l.b16 %v2529_v16  ;;  %v6765_v33 = vld [vmem:[%s11118_s4 + $0xe8] sm:$0xff]  ;;  %v12109_v16 = vld [vmem:[#allocation77_spill] sm:$0xff] }
 0x484   : > { %v4514_v23 = vpop.f32.mrf.mxu0  ;;  %v2311_v62 = vmul.f32 %v2224_v34, %v12109_v16 }
 0x485   : > { %4906 = vmatmul.bf16.vlgmr.msra.gmra.mxu1 %v3578_v13  ;;  %6673 = vset.pattern.permute.xlu1 %v11824_v20  ;;  %v10028_v52 = vadd.f32 %v4514_v23, %v9917_v32  ;;  %v12108_v32 = vld [vmem:[#allocation61_spill] sm:$0xff]  ;;  %v3485_v21 = vpack.c.b16 %v3457_v48, %v3456_v51 }
 0x486   : > { %v4435_v42 = vpop.f32.mrf.mxu3  ;;  %2663 = vperm.xlu1 %6673, %v6764_v39   ;;  %v2310_v0 = vmul.f32 %v9968_v8, %v12108_v32  ;;  %v12111_v39 = vld [vmem:[#allocation106_spill] sm:$0xff]  ;;  %v12113_v32 = vld [vmem:[#allocation105_spill] sm:$0xff] }
 0x487   : > { %v10020_v63 = vadd.f32 %v4435_v42, %v12105_v3  ;;  %v10037_v28 = vpop.permute.xlu1 %2419  ;;  %v12110_v3 = vld [vmem:[#allocation138_spill] sm:$0xff]  ;;  %v2498_v17 = vmul.f32 %v9888_v37, %v12113_v32 }
 0x489   : > { %4753 = vmatmul.bf16.gmra.mxu3 %v3391_v1  ;;  %v2342_v1 = vpack.c.bf16 %v2310_v0, %v2310_v0 }
 0x48a   : > { %v4593_v13 = vpop.f32.mrf.mxu1 }
 0x48b   : > { %v10034_v53 = vadd.f32 %v4593_v13, %v9920_v10  ;;  %6679 = vset.pattern.permute.xlu2 %v11814_v41  ;;  %v3549_v10 = vunpack.c.l.b16 %v2717_v43  ;;  %v2499_v13 = vmul.f32 %v9615_v56, %v12111_v39  ;;  %v10056_v43 = vpop.permute.xlu0 %2427  ;;  %v3366_v16 = vunpack.c.l.b16 %v2342_v1  ;;  %v12114_v56 = vld [vmem:[#allocation123_spill] sm:$0xff]  ;;  %v12117_v39 = vld [vmem:[#allocation165_spill] sm:$0xff] }
 0x48c   : > { %2479 = vperm.xlu2 %6679, %v6765_v33   ;;  %v10044_v6 = vpop.permute.xlu2 %2635  ;;  %v4517_v24 = vpop.f32.mrf.mxu0  ;;  %v2687_v0 = vmul.f32 %v9752_v31, %v12114_v56 }
 0x48d   : > { %12107 = vst [vmem:[#allocation85_spill] sm:$0xff] %v10034_v53  ;;  %v10051_v8 = vadd.f32 %v4517_v24, %v9948_v4  ;;  %v3579_v48 = vpack.c.b16 %v3549_v10, %v3548_v25  ;;  %v2530_v10 = vpack.c.bf16 %v2498_v17, %v2498_v17  ;;  %v12115_v24 = vld [vmem:[#allocation140_spill] sm:$0xff]  ;;  %v12116_v25 = vld [vmem:[#allocation122_spill] sm:$0xff]  ;;  %v6766_v17 = vld [vmem:[%s11118_s4 + $0xe0] sm:$0xff] }
 0x48e   : > { %v4438_v42 = vpop.f32.mrf.mxu3  ;;  %6675 = vset.pattern.permute.xlu1 %v12070_v57 }
 0x48f   : > { %v10048_v23 = vadd.f32 %v4438_v42, %v12110_v3  ;;  %4832 = vmatmul.bf16.gmra.mxu0 %v3485_v21  ;;  %2095 = vperm.xlu1 %6675, %v6765_v33   ;;  %v2343_v21 = vpack.c.bf16 %v2311_v62, %v2311_v62  ;;  %v10063_v4 = vpop.permute.xlu1 %2615  ;;  %v2531_v42 = vpack.c.bf16 %v2499_v13, %v2499_v13 }
 0x490   : > { %v2686_v13 = vmul.f32 %v12117_v39, %v12116_v25  ;;  %v12121_v25 = vld [vmem:[#allocation146_spill] sm:$0xff] }
 0x491   : > { %v3367_v3 = vunpack.c.l.b16 %v2343_v21  ;;  %v3458_v21 = vunpack.c.l.b16 %v2530_v10  ;;  %v10096_v10 = vld [vmem:[%s11118_s4 + $0xf0] sm:$0xff] }
 0x492   : > { %v4596_v51 = vpop.f32.mrf.mxu1  ;;  %v2718_v56 = vpack.c.bf16 %v2686_v13, %v2686_v13 }
 0x493   : > { %v10059_v34 = vadd.f32 %v4596_v51, %v9953_v46  ;;  %v3459_v51 = vunpack.c.l.b16 %v2531_v42  ;;  %v3392_v31 = vpack.c.b16 %v3367_v3, %v3366_v16 }
 0x494   : > { %6682 = vset.pattern.permute.xlu2 %v12070_v57  ;;  %v4519_v62 = vpop.f32.mrf.mxu0 }
 0x495   : > { %12112 = vst [vmem:[#allocation78_spill] sm:$0xff] %v10059_v34  ;;  %4911 = vmatmul.bf16.gmra.mxu1 %v3579_v48  ;;  %2099 = vperm.xlu2 %6682, %v9579_v18   ;;  %v10069_v46 = vpop.permute.xlu2 %2263  ;;  %v10077_v1 = vadd.f32 %v4519_v62, %v9977_v14  ;;  %v2719_v18 = vpack.c.bf16 %v2687_v0, %v2687_v0 }
 0x496   : > { %v4440_v33 = vpop.f32.mrf.mxu3  ;;  %v3486_v16 = vpack.c.b16 %v3459_v51, %v3458_v21 }
 0x497   : > { %v10072_v37 = vadd.f32 %v4440_v33, %v12115_v24  ;;  %6678 = vset.pattern.permute.xlu1 %v11814_v41  ;;  %v2228_v33 = vpop.permute.xlu0 %2227  ;;  %v2240_v14 = vpop.permute.xlu1 %2239  ;;  %v12119_v24 = vld [vmem:[#allocation43_spill] sm:$0xff]  ;;  %v3551_v3 = vunpack.c.l.b16 %v2719_v18  ;;  %v12122_v18 = vld [vmem:[#allocation80_spill] sm:$0xff] }
 0x498   : > { %2475 = vperm.xlu1 %6678, %v6766_v17   ;;  %v2313_v42 = vmul.f32 %v9806_v2, %v12119_v24  ;;  %v3550_v2 = vunpack.c.l.b16 %v2718_v56  ;;  %v2501_v21 = vmul.f32 %v9935_v11, %v12122_v18 }
 0x499   : > { %4758 = vmatmul.bf16.gmra.mxu3 %v3392_v31 }
 0x49a   : > { %v4598_v48 = vpop.f32.mrf.mxu1  ;;  %v2345_v31 = vpack.c.bf16 %v2313_v42, %v2313_v42  ;;  %v2533_v42 = vpack.c.bf16 %v2501_v21, %v2501_v21 }
 0x49b   : > { %v10081_v32 = vadd.f32 %v4598_v48, %v9982_v7  ;;  %v12120_v7 = vld [vmem:[#allocation71_spill] sm:$0xff] }
 0x49c   : > { %v2312_v0 = vmul.f32 %v2228_v33, %v12120_v7  ;;  %v4522_v48 = vpop.f32.mrf.mxu0 }
 0x49d   : > { %12118 = vst [vmem:[#allocation142_spill] sm:$0xff] %v10081_v32  ;;  %6684 = vset.pattern.permute.xlu2 %v11815_v12  ;;  %v10100_v13 = vadd.f32 %v4522_v48, %v9999_v60  ;;  %v3369_v48 = vunpack.c.l.b16 %v2345_v31  ;;  %v12126_v32 = vld [vmem:[#allocation130_spill] sm:$0xff] }
 0x49e   : > { %v4443_v62 = vpop.f32.mrf.mxu3  ;;  %2291 = vperm.xlu2 %6684, %v10096_v10   ;;  %v10102_v51 = vpop.permute.xlu2 %2643  ;;  %v2344_v7 = vpack.c.bf16 %v2312_v0, %v2312_v0  ;;  %v2689_v11 = vmul.f32 %v9811_v58, %v12126_v32  ;;  %v12128_v0 = vld [vmem:[#allocation131_spill] sm:$0xff]  ;;  %v6768_v31 = vld [vmem:[%s11118_s4 + $0xf8] sm:$0xff]  ;;  %v3461_v32 = vunpack.c.l.b16 %v2533_v42 }
 0x49f   : > { %v10091_v39 = vadd.f32 %v4443_v62, %v12121_v25  ;;  %4837 = vmatmul.bf16.gmra.mxu0 %v3486_v16  ;;  %v3580_v62 = vpack.c.b16 %v3551_v3, %v3550_v2  ;;  %v12124_v25 = vld [vmem:[#allocation65_spill] sm:$0xff]  ;;  %v12125_v16 = vld [vmem:[#allocation107_spill] sm:$0xff]  ;;  %v10112_v60 = vpop.permute.xlu1 %2619 }
 0x4a0   : > { %6680 = vset.pattern.permute.xlu1 %v11824_v20  ;;  %v2500_v56 = vmul.f32 %v12125_v16, %v12124_v25  ;;  %v3368_v34 = vunpack.c.l.b16 %v2344_v7  ;;  %v12129_v25 = vld [vmem:[#allocation168_spill] sm:$0xff]  ;;  %v2721_v16 = vpack.c.bf16 %v2689_v11, %v2689_v11 }
 0x4a1   : > { %2667 = vperm.xlu1 %6680, %v6766_v17   ;;  %v2688_v17 = vmul.f32 %v12129_v25, %v12128_v0  ;;  %v12131_v0 = vld [vmem:[#allocation60_spill] sm:$0xff] }
 0x4a2   : > { %v4601_v33 = vpop.f32.mrf.mxu1  ;;  %v3393_v7 = vpack.c.b16 %v3369_v48, %v3368_v34  ;;  %v2314_v25 = vmul.f32 %v9869_v27, %v12131_v0  ;;  %v3553_v42 = vunpack.c.l.b16 %v2721_v16  ;;  %v12132_v34 = vld [vmem:[#allocation48_spill] sm:$0xff]  ;;  %v12134_v16 = vld [vmem:[#allocation31_spill] sm:$0xff] }
 0x4a3   : > { %v10107_v24 = vadd.f32 %v4601_v33, %v10002_v9  ;;  %v2532_v9 = vpack.c.bf16 %v2500_v56, %v2500_v56  ;;  %v12127_v33 = vld [vmem:[#allocation151_spill] sm:$0xff] }
 0x4a4   : > { %v4524_v2 = vpop.f32.mrf.mxu0 }
 0x4a5   : > { %12123 = vst [vmem:[#allocation150_spill] sm:$0xff] %v10107_v24  ;;  %4916 = vmatmul.bf16.gmra.mxu1 %v3580_v62  ;;  %v10123_v62 = vadd.f32 %v4524_v2, %v10020_v63  ;;  %v2720_v63 = vpack.c.bf16 %v2688_v17, %v2688_v17  ;;  %v12133_v17 = vld [vmem:[#allocation16_spill] sm:$0xff] }
 0x4a6   : > { %v4445_v18 = vpop.f32.mrf.mxu3  ;;  %6687 = vset.pattern.permute.xlu2 %v11814_v41  ;;  %v3460_v41 = vunpack.c.l.b16 %v2532_v9 }
 0x4a7   : > { %v10117_v3 = vadd.f32 %v4445_v18, %v12127_v33  ;;  %2487 = vperm.xlu2 %6687, %v6768_v31   ;;  %v10128_v58 = vpop.permute.xlu2 %2267  ;;  %v12130_v18 = vld [vmem:[#allocation44_spill] sm:$0xff]  ;;  %v2248_v2 = vpop.permute.xlu1 %2247  ;;  %v3552_v9 = vunpack.c.l.b16 %v2720_v63 }
 0x4a8   : > { %v2315_v33 = vmul.f32 %v2240_v14, %v12130_v18  ;;  %v3487_v24 = vpack.c.b16 %v3461_v32, %v3460_v41 }
 0x4a9   : > { %4763 = vmatmul.bf16.gmra.mxu3 %v3393_v7  ;;  %6683 = vset.pattern.permute.xlu1 %v12070_v57  ;;  %v2346_v57 = vpack.c.bf16 %v2314_v25, %v2314_v25  ;;  %v3581_v7 = vpack.c.b16 %v3553_v42, %v3552_v9  ;;  %v12136_v25 = vld [vmem:[#allocation117_spill] sm:$0xff] }
 0x4aa   : > { %v4603_v21 = vpop.f32.mrf.mxu1  ;;  %2103 = vperm.xlu1 %6683, %v6768_v31  }
 0x4ab   : > { %v10131_v56 = vadd.f32 %v4603_v21, %v10028_v52  ;;  %v2347_v52 = vpack.c.bf16 %v2315_v33, %v2315_v33  ;;  %v2503_v21 = vmul.f32 %v9991_v38, %v12133_v17  ;;  %v3370_v18 = vunpack.c.l.b16 %v2346_v57  ;;  %v12135_v38 = vld [vmem:[#allocation91_spill] sm:$0xff]  ;;  %v12139_v17 = vld [vmem:[#allocation136_spill] sm:$0xff] }
 0x4ac   : > { %v4527_v11 = vpop.f32.mrf.mxu0  ;;  %v2690_v63 = vmul.f32 %v9871_v5, %v12135_v38  ;;  %v12140_v38 = vld [vmem:[#allocation39_spill] sm:$0xff] }
 0x4ad   : > { %v10141_v14 = vadd.f32 %v4527_v11, %v10048_v23  ;;  %v3371_v41 = vunpack.c.l.b16 %v2347_v52  ;;  %v2535_v33 = vpack.c.bf16 %v2503_v21, %v2503_v21  ;;  %v12138_v11 = vld [vmem:[#allocation157_spill] sm:$0xff] }
 0x4ae   : > { %v4448_v53 = vpop.f32.mrf.mxu3  ;;  %v2722_v21 = vpack.c.bf16 %v2690_v63, %v2690_v63 }
 0x4af   : > { %v10138_v48 = vadd.f32 %v4448_v53, %v12132_v34  ;;  %4842 = vmatmul.bf16.gmra.mxu0 %v3487_v24  ;;  %6689 = vset.pattern.permute.xlu2 %v11824_v20  ;;  %v2502_v24 = vmul.f32 %v9747_v30, %v12134_v16  ;;  %v10153_v23 = vpop.permute.xlu1 %2439  ;;  %v3394_v30 = vpack.c.b16 %v3371_v41, %v3370_v18  ;;  %v12141_v41 = vld [vmem:[#allocation135_spill] sm:$0xff] }
 0x4b0   : > { %2679 = vperm.xlu2 %6689, %v6768_v31   ;;  %v10146_v32 = vpop.permute.xlu2 %2463  ;;  %v3554_v63 = vunpack.c.l.b16 %v2722_v21 }
 0x4b1   : > { %v2534_v42 = vpack.c.bf16 %v2502_v24, %v2502_v24 }
 0x4b2   : > { %v4606_v27 = vpop.f32.mrf.mxu1  ;;  %6685 = vset.pattern.permute.xlu1 %v11815_v12 }
 0x4b3   : > { %v10149_v53 = vadd.f32 %v4606_v27, %v10051_v8  ;;  %2295 = vperm.xlu1 %6685, %v6768_v31   ;;  %v12137_v8 = vld [vmem:[#allocation128_spill] sm:$0xff]  ;;  %v2691_v27 = vmul.f32 %v9923_v29, %v12139_v17  ;;  %v3463_v31 = vunpack.c.l.b16 %v2535_v33  ;;  %v3462_v24 = vunpack.c.l.b16 %v2534_v42  ;;  %v12142_v29 = vld [vmem:[#allocation93_spill] sm:$0xff] }
 0x4b4   : > { %v2132_v34 = vmul.f32 %v12137_v8, %v12136_v25  ;;  %v4529_v52 = vpop.f32.mrf.mxu0 }
 0x4b5   : > { %4921 = vmatmul.bf16.gmra.mxu1 %v3581_v7  ;;  %v10166_v12 = vadd.f32 %v4529_v52, %v10072_v37  ;;  %v2723_v8 = vpack.c.bf16 %v2691_v27, %v2691_v27  ;;  %v2316_v37 = vmul.f32 %v9933_v35, %v12142_v29  ;;  %v3488_v33 = vpack.c.b16 %v3463_v31, %v3462_v24 }
 0x4b6   : > { %v4450_v0 = vpop.f32.mrf.mxu3  ;;  %v2164_v16 = vpack.c.bf16 %v2132_v34, %v2132_v34 }
 0x4b7   : > { %v10161_v9 = vadd.f32 %v4450_v0, %v12138_v11  ;;  %v2317_v0 = vmul.f32 %v2248_v2, %v12140_v38  ;;  %v2256_v11 = vpop.permute.xlu0 %2255  ;;  %v3555_v2 = vunpack.c.l.b16 %v2723_v8  ;;  %v10187_v38 = vpop.f32.mrf.mxu2 }
 0x4b8   : > { %v3284_v34 = vunpack.c.l.b16 %v2164_v16 }
 0x4b9   : > { %v2088_v7 = vpop.permute.xlu2 %2087  ;;  %4768 = vmatmul.bf16.gmra.mxu3 %v3394_v30  ;;  %v2349_v42 = vpack.c.bf16 %v2317_v0, %v2317_v0  ;;  %v3582_v21 = vpack.c.b16 %v3555_v2, %v3554_v63  ;;  %v12147_v63 = vld [vmem:[#allocation143_spill] sm:$0xff] }
 0x4ba   : > { %v4608_v57 = vpop.f32.mrf.mxu1  ;;  %v2133_v18 = vmul.f32 %v2088_v7, %v12141_v41  ;;  %v12143_v7 = vld [vmem:[#allocation24_spill] sm:$0xff] }
 0x4bb   : > { %v10169_v5 = vadd.f32 %v4608_v57, %v10077_v1  ;;  %6688 = vset.pattern.permute.xlu1 %v11824_v20  ;;  %v2252_v1 = vpop.permute.xlu1 %2251  ;;  %v2348_v57 = vpack.c.bf16 %v2316_v37, %v2316_v37  ;;  %v2504_v35 = vmul.f32 %v10037_v28, %v12143_v7  ;;  %v12145_v28 = vld [vmem:[#allocation145_spill] sm:$0xff] }
 0x4bc   : > { %v2165_v52 = vpack.c.bf16 %v2133_v18, %v2133_v18  ;;  %2675 = vperm.xlu1 %6688, %v10096_v10   ;;  %v4532_v17 = vpop.f32.mrf.mxu0  ;;  %v12144_v10 = vld [vmem:[#allocation42_spill] sm:$0xff]  ;;  %v3373_v18 = vunpack.c.l.b16 %v2349_v42  ;;  %v12146_v37 = vld [vmem:[#allocation137_spill] sm:$0xff] }
 0x4bd   : > { %v10178_v27 = vadd.f32 %v4532_v17, %v10091_v39  ;;  %v2505_v16 = vmul.f32 %v10025_v36, %v12144_v10  ;;  %v3372_v39 = vunpack.c.l.b16 %v2348_v57  ;;  %v2536_v8 = vpack.c.bf16 %v2504_v35, %v2504_v35  ;;  %v12149_v10 = vld [vmem:[#allocation33_spill] sm:$0xff] }
 0x4be   : > { %v3285_v30 = vunpack.c.l.b16 %v2165_v52  ;;  %v10189_v0 = vpop.f32.mrf.mxu3  ;;  %v2693_v52 = vmul.f32 %v12146_v37, %v12145_v28 }
 0x4bf   : > { %4847 = vmatmul.bf16.gmra.mxu0 %v3488_v33  ;;  %v2260_v29 = vpop.permute.xlu0 %2259  ;;  %v2537_v33 = vpack.c.bf16 %v2505_v16, %v2505_v16  ;;  %v3464_v42 = vunpack.c.l.b16 %v2536_v8  ;;  %v2319_v16 = vmul.f32 %v2256_v11, %v12149_v10 }
 0x4c0   : > { %v3303_v24 = vpack.c.b16 %v3285_v30, %v3284_v34  ;;  %v2692_v30 = vmul.f32 %v9970_v44, %v12147_v63  ;;  %v2725_v7 = vpack.c.bf16 %v2693_v52, %v2693_v52 }
 0x4c1   : > { %v3465_v35 = vunpack.c.l.b16 %v2537_v33  ;;  %v2351_v52 = vpack.c.bf16 %v2319_v16, %v2319_v16  ;;  %v12150_v33 = vld [vmem:[#allocation68_spill] sm:$0xff] }
 0x4c2   : > { %v4611_v31 = vpop.f32.mrf.mxu1  ;;  %4704 = vmatmul.bf16.gmra.mxu2 %v3303_v24 }
 0x4c3   : > { %v10183_v20 = vadd.f32 %v4611_v31, %v10100_v13  ;;  %v3395_v13 = vpack.c.b16 %v3373_v18, %v3372_v39  ;;  %v10198_v17 = vpop.permute.xlu1 %2447  ;;  %v12148_v31 = vld [vmem:[#allocation34_spill] sm:$0xff]  ;;  %v3489_v44 = vpack.c.b16 %v3465_v35, %v3464_v42 }
 0x4c4   : > { %v4534_v34 = vpop.f32.mrf.mxu0  ;;  %v2318_v24 = vmul.f32 %v2252_v1, %v12148_v31  ;;  %v2507_v1 = vmul.f32 %v9900_v47, %v12150_v33 }
 0x4c5   : > { %4926 = vmatmul.bf16.gmra.mxu1 %v3582_v21  ;;  %v10196_v36 = vadd.f32 %v4534_v34, %v10117_v3  ;;  %v2724_v21 = vpack.c.bf16 %v2692_v30, %v2692_v30  ;;  %v3557_v3 = vunpack.c.l.b16 %v2725_v7  ;;  %v12151_v30 = vld [vmem:[#allocation67_spill] sm:$0xff]  ;;  %v3375_v7 = vunpack.c.l.b16 %v2351_v52 }
 0x4c6   : > { %v10205_v18 = vpop.f32.mrf.mxu3  ;;  %v2350_v39 = vpack.c.bf16 %v2318_v24, %v2318_v24  ;;  %v2506_v42 = vmul.f32 %v10056_v43, %v12151_v30  ;;  %v2539_v35 = vpack.c.bf16 %v2507_v1, %v2507_v1  ;;  %v12155_v1 = vld [vmem:[#allocation56_spill] sm:$0xff] }
 0x4c7   : > { %v3556_v8 = vunpack.c.l.b16 %v2724_v21  ;;  %v10207_v37 = vpop.permute.xlu0 %2623 }
 0x4c8   : > { %v2538_v24 = vpack.c.bf16 %v2506_v42, %v2506_v42 }
 0x4c9   : > { %4773 = vmatmul.bf16.gmra.mxu3 %v3395_v13  ;;  %v3583_v34 = vpack.c.b16 %v3557_v3, %v3556_v8  ;;  %v3467_v3 = vunpack.c.l.b16 %v2539_v35  ;;  %v12157_v35 = vld [vmem:[#allocation79_spill] sm:$0xff] }
 0x4ca   : > { %v4613_v2 = vpop.f32.mrf.mxu1  ;;  %v3466_v52 = vunpack.c.l.b16 %v2538_v24 }
 0x4cb   : > { %v10201_v57 = vadd.f32 %v4613_v2, %v10123_v62  ;;  %v10217_v63 = vpop.permute.xlu1 %2639  ;;  %v3374_v2 = vunpack.c.l.b16 %v2350_v39 }
 0x4cc   : > { %v4537_v28 = vpop.f32.mrf.mxu0 }
 0x4cd   : > { %v10210_v62 = vadd.f32 %v4537_v28, %v10138_v48  ;;  %v12152_v48 = vld [vmem:[#allocation155_spill] sm:$0xff]  ;;  %v3396_v47 = vpack.c.b16 %v3375_v7, %v3374_v2 }
 0x4ce   : > { %v2695_v31 = vmul.f32 %v10015_v19, %v12152_v48  ;;  %v10223_v21 = vpop.f32.mrf.mxu3 }
 0x4cf   : > { %4852 = vmatmul.bf16.gmra.mxu0 %v3489_v44  ;;  %v10230_v39 = vpop.permute.xlu0 %2627 }
 0x4d0   : > { %v2727_v28 = vpack.c.bf16 %v2695_v31, %v2695_v31 }
 0x4d2   : > { %v4616_v13 = vpop.f32.mrf.mxu1 }
 0x4d3   : > { %v10215_v11 = vadd.f32 %v4616_v13, %v10141_v14  ;;  %v12153_v14 = vld [vmem:[#allocation156_spill] sm:$0xff]  ;;  %v10235_v19 = vpop.permute.xlu1 %2451  ;;  %v2321_v13 = vmul.f32 %v10069_v46, %v12155_v1 }
 0x4d4   : > { %v4539_v10 = vpop.f32.mrf.mxu0  ;;  %v2694_v16 = vmul.f32 %v9770_v55, %v12153_v14  ;;  %v3490_v55 = vpack.c.b16 %v3467_v3, %v3466_v52  ;;  %v12159_v14 = vld [vmem:[#allocation29_spill] sm:$0xff] }
 0x4d5   : > { %4931 = vmatmul.bf16.gmra.mxu1 %v3583_v34  ;;  %v10228_v44 = vadd.f32 %v4539_v10, %v10161_v9  ;;  %v3559_v34 = vunpack.c.l.b16 %v2727_v28  ;;  %v12156_v9 = vld [vmem:[#allocation58_spill] sm:$0xff]  ;;  %v2353_v7 = vpack.c.bf16 %v2321_v13, %v2321_v13  ;;  %v10255_v28 = vpop.f32.mrf.mxu2 }
 0x4d6   : > { %v2726_v33 = vpack.c.bf16 %v2694_v16, %v2694_v16  ;;  %v2320_v30 = vmul.f32 %v2260_v29, %v12156_v9  ;;  %v10244_v48 = vpop.f32.mrf.mxu3  ;;  %v2508_v29 = vmul.f32 %v9964_v59, %v12159_v14  ;;  %v12161_v13 = vld [vmem:[#allocation98_spill] sm:$0xff] }
 0x4d7   : > { %v10253_v16 = vpop.permute.xlu0 %2655  ;;  %v3377_v3 = vunpack.c.l.b16 %v2353_v7 }
 0x4d8   : > { %v3558_v2 = vunpack.c.l.b16 %v2726_v33  ;;  %v2352_v10 = vpack.c.bf16 %v2320_v30, %v2320_v30 }
 0x4d9   : > { %4778 = vmatmul.bf16.gmra.mxu3 %v3396_v47 }
 0x4da   : > { %v4618_v43 = vpop.f32.mrf.mxu1  ;;  %v3584_v47 = vpack.c.b16 %v3559_v34, %v3558_v2  ;;  %v3376_v33 = vunpack.c.l.b16 %v2352_v10 }
 0x4db   : > { %v10233_v8 = vadd.f32 %v4618_v43, %v10166_v12  ;;  %v2509_v12 = vmul.f32 %v10153_v23, %v12157_v35  ;;  %v10249_v46 = vpop.permute.xlu1 %2647  ;;  %v12160_v23 = vld [vmem:[#allocation161_spill] sm:$0xff] }
 0x4dc   : > { %v10240_v42 = vpop.f32.mrf.mxu0  ;;  %v2697_v52 = vmul.f32 %v10063_v4, %v12160_v23  ;;  %v3397_v59 = vpack.c.b16 %v3377_v3, %v3376_v33  ;;  %v2280_v4 = vpop.permute.xlu2 %2279 }
 0x4dd   : > { %12154 = vst [vmem:[#allocation66_spill] sm:$0xff] %v10233_v8  ;;  %v2541_v43 = vpack.c.bf16 %v2509_v12, %v2509_v12  ;;  %v10273_v33 = vpop.f32.mrf.mxu2 }
 0x4de   : > { %v2729_v30 = vpack.c.bf16 %v2697_v52, %v2697_v52  ;;  %v10266_v35 = vpop.f32.mrf.mxu3 }
 0x4df   : > { %4857 = vmatmul.bf16.gmra.mxu0 %v3490_v55  ;;  %v2696_v55 = vmul.f32 %v9841_v26, %v12161_v13  ;;  %v3469_v34 = vunpack.c.l.b16 %v2541_v43  ;;  %v2456_v43 = vpop.permute.xlu0 %2455  ;;  %v12165_v13 = vld [vmem:[#allocation27_spill] sm:$0xff] }
 0x4e0   : > { %v3561_v23 = vunpack.c.l.b16 %v2729_v30 }
 0x4e1   : > { %v2728_v12 = vpack.c.bf16 %v2696_v55, %v2696_v55  ;;  %v2511_v55 = vmul.f32 %v10198_v17, %v12165_v13 }
 0x4e2   : > { %v4621_v31 = vpop.f32.mrf.mxu1 }
 0x4e3   : > { %v10247_v24 = vadd.f32 %v4621_v31, %v10178_v27  ;;  %v2540_v27 = vpack.c.bf16 %v2508_v29, %v2508_v29  ;;  %v2272_v31 = vpop.permute.xlu1 %2271  ;;  %v12164_v29 = vld [vmem:[#allocation23_spill] sm:$0xff]  ;;  %v3560_v52 = vunpack.c.l.b16 %v2728_v12  ;;  %v2543_v12 = vpack.c.bf16 %v2511_v55, %v2511_v55 }
 0x4e4   : > { %v10259_v1 = vpop.f32.mrf.mxu0  ;;  %v2323_v26 = vmul.f32 %v2272_v31, %v12164_v29  ;;  %v10288_v17 = vpop.permute.xlu2 %2659 }
 0x4e5   : > { %12158 = vst [vmem:[#allocation158_spill] sm:$0xff] %v10247_v24  ;;  %4936 = vmatmul.bf16.gmra.mxu1 %v3584_v47  ;;  %v3468_v7 = vunpack.c.l.b16 %v2540_v27  ;;  %v12163_v47 = vld [vmem:[#allocation21_spill] sm:$0xff]  ;;  %v3471_v13 = vunpack.c.l.b16 %v2543_v12 }
 0x4e6   : > { %v2322_v10 = vmul.f32 %v10128_v58, %v12163_v47  ;;  %v3585_v58 = vpack.c.b16 %v3561_v23, %v3560_v52  ;;  %v12169_v52 = vld [vmem:[#allocation82_spill] sm:$0xff] }
 0x4e7   : > { %v3491_v14 = vpack.c.b16 %v3469_v34, %v3468_v7  ;;  %v12167_v34 = vld [vmem:[#allocation70_spill] sm:$0xff] }
 0x4e8   : > { %v2354_v27 = vpack.c.bf16 %v2322_v10, %v2322_v10  ;;  %v2510_v7 = vmul.f32 %v10013_v61, %v12167_v34  ;;  %v12168_v10 = vld [vmem:[#allocation162_spill] sm:$0xff]  ;;  %v2699_v61 = vmul.f32 %v10207_v37, %v12169_v52  ;;  %v12172_v52 = vld [vmem:[#allocation76_spill] sm:$0xff] }
 0x4e9   : > { %4783 = vmatmul.bf16.gmra.mxu3 %v3397_v59  ;;  %v2698_v29 = vmul.f32 %v10112_v60, %v12168_v10  ;;  %v12170_v10 = vld [vmem:[#allocation88_spill] sm:$0xff]  ;;  %v4730_v12 = vadd.f32 %v10189_v0, %v12172_v52 }
 0x4ea   : > { %v4623_v9 = vpop.f32.mrf.mxu1  ;;  %v3378_v47 = vunpack.c.l.b16 %v2354_v27  ;;  %v10296_v27 = vpop.f32.mrf.mxu2  ;;  %v2731_v34 = vpack.c.bf16 %v2699_v61, %v2699_v61 }
 0x4eb   : > { %v10264_v2 = vadd.f32 %v4623_v9, %v10196_v36  ;;  %v2355_v36 = vpack.c.bf16 %v2323_v26, %v2323_v26  ;;  %v10282_v31 = vpop.permute.xlu1 %2651  ;;  %v2542_v26 = vpack.c.bf16 %v2510_v7, %v2510_v7  ;;  %v2730_v55 = vpack.c.bf16 %v2698_v29, %v2698_v29 }
 0x4ec   : > { %v10271_v3 = vpop.f32.mrf.mxu0  ;;  %v3563_v29 = vunpack.c.l.b16 %v2731_v34 }
 0x4ed   : > { %12162 = vst [vmem:[#allocation159_spill] sm:$0xff] %v10264_v2  ;;  %v3379_v30 = vunpack.c.l.b16 %v2355_v36  ;;  %v10294_v36 = vpop.permute.xlu0 %2459  ;;  %v3470_v60 = vunpack.c.l.b16 %v2542_v26  ;;  %v3562_v37 = vunpack.c.l.b16 %v2730_v55  ;;  %v10309_v26 = vpop.permute.xlu2 %2091 }
 0x4ef   : > { %4862 = vmatmul.bf16.gmra.mxu0 %v3491_v14  ;;  %v10284_v14 = vpop.f32.mrf.mxu3  ;;  %v3398_v23 = vpack.c.b16 %v3379_v30, %v3378_v47  ;;  %v3492_v30 = vpack.c.b16 %v3471_v13, %v3470_v60  ;;  %v12171_v47 = vld [vmem:[#allocation87_spill] sm:$0xff]  ;;  %v3586_v0 = vpack.c.b16 %v3563_v29, %v3562_v37 }
 0x4f2   : > { %v4626_v9 = vpop.f32.mrf.mxu1 }
 0x4f3   : > { %v10278_v59 = vadd.f32 %v4626_v9, %v10210_v62  ;;  %v2276_v7 = vpop.permute.xlu1 %2275 }
 0x4f4   : > { %v10290_v62 = vpop.f32.mrf.mxu0  ;;  %v2324_v2 = vmul.f32 %v2276_v7, %v12171_v47  ;;  %v12174_v7 = vld [vmem:[#allocation49_spill] sm:$0xff] }
 0x4f5   : > { %12166 = vst [vmem:[#allocation164_spill] sm:$0xff] %v10278_v59  ;;  %4941 = vmatmul.bf16.gmra.mxu1 %v3585_v58  ;;  %v2325_v59 = vmul.f32 %v2280_v4, %v12170_v10  ;;  %v12173_v4 = vld [vmem:[#allocation45_spill] sm:$0xff]  ;;  %v10314_v55 = vpop.permute.xlu0 %2471  ;;  %v2513_v10 = vmul.f32 %v2456_v43, %v12174_v7 }
 0x4f6   : > { %v2512_v13 = vmul.f32 %v10235_v19, %v12173_v4  ;;  %v4732_v19 = vadd.f32 %v10205_v18, %v9816_v45 }
 0x4f7   : > { %v10305_v24 = vpop.f32.mrf.mxu3  ;;  %v2357_v61 = vpack.c.bf16 %v2325_v59, %v2325_v59  ;;  %v2701_v59 = vmul.f32 %v9989_v40, %v12056_v49  ;;  %v2545_v52 = vpack.c.bf16 %v2513_v10, %v2513_v10  ;;  %v2288_v49 = vpop.permute.xlu2 %2287 }
 0x4f9   : > { %4788 = vmatmul.bf16.gmra.mxu3 %v3398_v23  ;;  %v4819_v23 = vadd.f32 %v10240_v42, %v4730_v12  ;;  %v2544_v42 = vpack.c.bf16 %v2512_v13, %v2512_v13  ;;  %v2700_v12 = vmul.f32 %v10230_v39, %v12052_v54  ;;  %v2733_v4 = vpack.c.bf16 %v2701_v59, %v2701_v59  ;;  %v12175_v39 = vld [vmem:[#allocation18_spill] sm:$0xff] }
 0x4fa   : > { %v4628_v9 = vpop.f32.mrf.mxu1  ;;  %v3473_v18 = vunpack.c.l.b16 %v2545_v52 }
 0x4fb   : > { %v10299_v58 = vadd.f32 %v4628_v9, %v10228_v44  ;;  %v2356_v44 = vpack.c.bf16 %v2324_v2, %v2324_v2  ;;  %v3381_v2 = vunpack.c.l.b16 %v2357_v61  ;;  %v10326_v34 = vpop.permute.xlu1 %2467  ;;  %v3472_v29 = vunpack.c.l.b16 %v2544_v42  ;;  %v12177_v42 = vld [vmem:[#allocation20_spill] sm:$0xff] }
 0x4fc   : > { %v10307_v8 = vpop.f32.mrf.mxu0  ;;  %v2732_v13 = vpack.c.bf16 %v2700_v12, %v2700_v12  ;;  %v3565_v7 = vunpack.c.l.b16 %v2733_v4 }
 0x4fd   : > { %v3380_v47 = vunpack.c.l.b16 %v2356_v44  ;;  %v4821_v44 = vadd.f32 %v10259_v1, %v4732_v19  ;;  %v2327_v1 = vmul.f32 %v2288_v49, %v12175_v39  ;;  %v12180_v39 = vld [vmem:[#allocation133_spill] sm:$0xff] }
 0x4fe   : > { %v3564_v52 = vunpack.c.l.b16 %v2732_v13  ;;  %v4648_v13 = vadd.f32 %v10187_v38, %v12180_v39 }
 0x4ff   : > { %4867 = vmatmul.bf16.gmra.mxu0 %v3492_v30  ;;  %v10319_v30 = vpop.f32.mrf.mxu2  ;;  %v3399_v43 = vpack.c.b16 %v3381_v2, %v3380_v47  ;;  %v12176_v47 = vld [vmem:[#allocation139_spill] sm:$0xff] }
 0x500   : > { %v4735_v2 = vadd.f32 %v10223_v21, %v12176_v47  ;;  %v12179_v21 = vld [vmem:[#allocation32_spill] sm:$0xff] }
 0x502   : > { %v4907_v9 = vpop.f32.mrf.mxu1 }
 0x503   : > { %v10316_v60 = vadd.f32 %v4907_v9, %v4819_v23  ;;  %v10333_v23 = vpop.f32.mrf.mxu3  ;;  %v2284_v9 = vpop.permute.xlu0 %2283 }
 0x504   : > { %v10328_v37 = vpop.f32.mrf.mxu0  ;;  %v2326_v59 = vmul.f32 %v2284_v9, %v12177_v42  ;;  %v10351_v12 = vpop.permute.xlu1 %2663  ;;  %v2703_v42 = vmul.f32 %v10217_v63, %v12067_v22  ;;  %v12183_v22 = vld [vmem:[#allocation92_spill] sm:$0xff] }
 0x505   : > { %4946 = vmatmul.bf16.gmra.mxu1 %v3586_v0  ;;  %4989 = vadd.xlane.f32.xlu1 %v10316_v60  ;;  %v5090_v45 = vmul.f32 %v10316_v60, %v10316_v60  ;;  %v3493_v0 = vpack.c.b16 %v3473_v18, %v3472_v29  ;;  %v2514_v18 = vmul.f32 %v10294_v36, %v12179_v21  ;;  %v12181_v36 = vld [vmem:[#allocation134_spill] sm:$0xff] }
 0x506   : > { %v2358_v9 = vpack.c.bf16 %v2326_v59, %v2326_v59 }
 0x507   : > { %v10343_v10 = vpop.f32.mrf.mxu2 }
 0x508   : > { %v3382_v47 = vunpack.c.l.b16 %v2358_v9  ;;  %v12184_v9 = vld [vmem:[#allocation114_spill] sm:$0xff] }
 0x509   : > { %4793 = vmatmul.bf16.gmra.mxu3 %v3399_v43  ;;  %v4824_v43 = vadd.f32 %v10271_v3, %v4735_v2  ;;  %v2134_v2 = vmul.f32 %v10309_v26, %v12181_v36  ;;  %v4651_v39 = vadd.f32 %v10255_v28, %v12184_v9 }
 0x50a   : > { %v4909_v61 = vpop.f32.mrf.mxu1 }
 0x50b   : > { %v10335_v40 = vadd.f32 %v4909_v61, %v4821_v44  ;;  %v12178_v44 = vld [vmem:[#allocation17_spill] sm:$0xff]  ;;  %v2359_v61 = vpack.c.bf16 %v2327_v1, %v2327_v1  ;;  %v4737_v1 = vadd.f32 %v10244_v48, %v4648_v13  ;;  %v2166_v26 = vpack.c.bf16 %v2134_v2, %v2134_v2  ;;  %v2480_v2 = vpop.permute.xlu2 %2479 }
 0x50c   : > { %v10348_v19 = vpop.f32.mrf.mxu0  ;;  %v2515_v29 = vmul.f32 %v10146_v32, %v12178_v44 }
 0x50d   : > { %4991 = vadd.xlane.f32.xlu0 %v10335_v40  ;;  %v5091_v54 = vmul.f32 %v10335_v40, %v10335_v40  ;;  %5122 = vadd.xlane.f32.xlu1 %v5090_v45  ;;  %v3587_v45 = vpack.c.b16 %v3565_v7, %v3564_v52  ;;  %v3383_v32 = vunpack.c.l.b16 %v2359_v61  ;;  %v2546_v7 = vpack.c.bf16 %v2514_v18, %v2514_v18 }
 0x50e   : > { %v4826_v52 = vadd.f32 %v10290_v62, %v4737_v1  ;;  %v2735_v18 = vpack.c.bf16 %v2703_v42, %v2703_v42 }
 0x50f   : > { %5124 = vadd.xlane.f32.xlu2 %v5091_v54  ;;  %4872 = vmatmul.bf16.gmra.mxu0 %v3493_v0  ;;  %v10359_v54 = vpop.f32.mrf.mxu3  ;;  %v2547_v0 = vpack.c.bf16 %v2515_v29, %v2515_v29  ;;  %v10373_v59 = vpop.f32.mrf.mxu2  ;;  %v3400_v29 = vpack.c.b16 %v3383_v32, %v3382_v47  ;;  %v3474_v21 = vunpack.c.l.b16 %v2546_v7  ;;  %v3286_v32 = vunpack.c.l.b16 %v2166_v26 }
 0x510   : > { %v3567_v1 = vunpack.c.l.b16 %v2735_v18 }
 0x511   : > { %v3475_v44 = vunpack.c.l.b16 %v2547_v0  ;;  %v4740_v0 = vadd.f32 %v10266_v35, %v4651_v39 }
 0x512   : > { %v4912_v4 = vpop.f32.mrf.mxu1 }
 0x513   : > { %v10355_v49 = vadd.f32 %v4912_v4, %v4824_v43  ;;  %v12182_v43 = vld [vmem:[#allocation102_spill] sm:$0xff]  ;;  %v4829_v42 = vadd.f32 %v10307_v8, %v4740_v0 }
 0x514   : > { %v10371_v38 = vpop.f32.mrf.mxu0  ;;  %v2702_v48 = vmul.f32 %v10044_v6, %v12182_v43  ;;  %v3494_v6 = vpack.c.b16 %v3475_v44, %v3474_v21  ;;  %v12185_v43 = vld [vmem:[#allocation84_spill] sm:$0xff]  ;;  %v12186_v21 = vld [vmem:[#allocation50_spill] sm:$0xff] }
 0x515   : > { %4951 = vmatmul.bf16.gmra.mxu1 %v3587_v45  ;;  %v5092_v3 = vmul.f32 %v10355_v49, %v10355_v49  ;;  %v2096_v45 = vpop.permute.xlu1 %2095  ;;  %v2517_v26 = vmul.f32 %v10314_v55, %v12186_v21  ;;  %v12187_v8 = vld [vmem:[#allocation118_spill] sm:$0xff] }
 0x516   : > { %v2135_v63 = vmul.f32 %v2096_v45, %v12183_v22  ;;  %v2734_v62 = vpack.c.bf16 %v2702_v48, %v2702_v48  ;;  %v2516_v48 = vmul.f32 %v10326_v34, %v12185_v43 }
 0x517   : > { %4993 = vadd.xlane.f32.xlu2 %v10355_v49  ;;  %5126 = vadd.xlane.f32.xlu1 %v5092_v3  ;;  %v10384_v13 = vpop.f32.mrf.mxu3  ;;  %v2549_v39 = vpack.c.bf16 %v2517_v26, %v2517_v26 }
 0x518   : > { %v2167_v3 = vpack.c.bf16 %v2135_v63, %v2135_v63  ;;  %v4653_v63 = vadd.f32 %v10273_v33, %v12187_v8  ;;  %v2548_v34 = vpack.c.bf16 %v2516_v48, %v2516_v48  ;;  %v12190_v48 = vld [vmem:[#allocation141_spill] sm:$0xff] }
 0x519   : > { %4798 = vmatmul.bf16.gmra.mxu3 %v3400_v29 }
 0x51a   : > { %v4914_v61 = vpop.f32.mrf.mxu1  ;;  %v3287_v47 = vunpack.c.l.b16 %v2167_v3  ;;  %v4742_v9 = vadd.f32 %v10284_v14, %v4653_v63 }
 0x51b   : > { %v10378_v4 = vadd.f32 %v4914_v61, %v4826_v52  ;;  %v3566_v52 = vunpack.c.l.b16 %v2734_v62  ;;  %v10392_v61 = vpop.f32.mrf.mxu2  ;;  %v12188_v62 = vld [vmem:[#allocation112_spill] sm:$0xff] }
 0x51c   : > { %v10387_v7 = vpop.f32.mrf.mxu0  ;;  %v3304_v29 = vpack.c.b16 %v3287_v47, %v3286_v32  ;;  %v4831_v55 = vadd.f32 %v10328_v37, %v4742_v9  ;;  %v12189_v32 = vld [vmem:[#allocation169_spill] sm:$0xff] }
 0x51d   : > { %4995 = vadd.xlane.f32.xlu0 %v10378_v4  ;;  %v5093_v35 = vmul.f32 %v10378_v4, %v10378_v4  ;;  %v2476_v45 = vpop.permute.xlu1 %2475  ;;  %v3588_v18 = vpack.c.b16 %v3567_v1, %v3566_v52  ;;  %v2704_v33 = vmul.f32 %v10102_v51, %v12189_v32  ;;  %v3476_v1 = vunpack.c.l.b16 %v2548_v34  ;;  %v12191_v34 = vld [vmem:[#allocation72_spill] sm:$0xff] }
 0x51e   : > { %4709 = vmatmul.bf16.gmra.mxu2 %v3304_v29  ;;  %v4656_v29 = vadd.f32 %v10296_v27, %v12190_v48 }
 0x51f   : > { %4877 = vmatmul.bf16.gmra.mxu0 %v3494_v6  ;;  %v2705_v6 = vmul.f32 %v10249_v46, %v12188_v62  ;;  %v10406_v3 = vpop.f32.mrf.mxu3  ;;  %v2736_v51 = vpack.c.bf16 %v2704_v33, %v2704_v33  ;;  %v12192_v62 = vld [vmem:[#allocation53_spill] sm:$0xff] }
 0x520   : > { %v4745_v21 = vadd.f32 %v10305_v24, %v4656_v29  ;;  %v12193_v24 = vld [vmem:[#allocation37_spill] sm:$0xff] }
 0x521   : > { %v2737_v43 = vpack.c.bf16 %v2705_v6, %v2705_v6  ;;  %v3568_v63 = vunpack.c.l.b16 %v2736_v51  ;;  %v2518_v6 = vmul.f32 %v2476_v45, %v12192_v62  ;;  %v2519_v33 = vmul.f32 %v2480_v2, %v12193_v24  ;;  %v10440_v45 = vpop.permute.xlu0 %2671  ;;  %v12195_v51 = vld [vmem:[#allocation38_spill] sm:$0xff] }
 0x522   : > { %v4917_v28 = vpop.f32.mrf.mxu1  ;;  %v4834_v8 = vadd.f32 %v10348_v19, %v4745_v21 }
 0x523   : > { %v10394_v44 = vadd.f32 %v4917_v28, %v4829_v42  ;;  %v2100_v42 = vpop.permute.xlu2 %2099  ;;  %v3477_v28 = vunpack.c.l.b16 %v2549_v39  ;;  %v3569_v26 = vunpack.c.l.b16 %v2737_v43 }
 0x524   : > { %v10408_v0 = vpop.f32.mrf.mxu0  ;;  %v2136_v9 = vmul.f32 %v2100_v42, %v12191_v34 }
 0x525   : > { %5128 = vadd.xlane.f32.xlu0 %v5093_v35  ;;  %4997 = vadd.xlane.f32.xlu2 %v10394_v44  ;;  %v5094_v14 = vmul.f32 %v10394_v44, %v10394_v44  ;;  %v10417_v46 = vpop.permute.xlu1 %2667  ;;  %v10421_v35 = vpop.f32.mrf.mxu2  ;;  %v3495_v37 = vpack.c.b16 %v3477_v28, %v3476_v1  ;;  %v3589_v1 = vpack.c.b16 %v3569_v26, %v3568_v63 }
 0x526   : > { %4956 = vmatmul.bf16.gmra.mxu1 %v3588_v18  ;;  %v2168_v42 = vpack.c.bf16 %v2136_v9, %v2136_v9  ;;  %v2550_v28 = vpack.c.bf16 %v2518_v6, %v2518_v6  ;;  %v2707_v63 = vmul.f32 %v10253_v16, %v12141_v41  ;;  %v12196_v6 = vld [vmem:[#allocation22_spill] sm:$0xff] }
 0x527   : > { %v10429_v39 = vpop.f32.mrf.mxu3 }
 0x528   : > { %v3288_v9 = vunpack.c.l.b16 %v2168_v42  ;;  %v3478_v62 = vunpack.c.l.b16 %v2550_v28  ;;  %v2739_v16 = vpack.c.bf16 %v2707_v63, %v2707_v63 }
 0x52a   : > { %v4919_v47 = vpop.f32.mrf.mxu1  ;;  %v3571_v63 = vunpack.c.l.b16 %v2739_v16 }
 0x52b   : > { %v10413_v52 = vadd.f32 %v4919_v47, %v4831_v55  ;;  %v12194_v47 = vld [vmem:[#allocation109_spill] sm:$0xff]  ;;  %v2292_v19 = vpop.permute.xlu2 %2291 }
 0x52c   : > { %v10425_v18 = vpop.f32.mrf.mxu0 }
 0x52d   : > { %5130 = vadd.xlane.f32.xlu2 %v5094_v14  ;;  %4999 = vadd.xlane.f32.xlu1 %v10413_v52  ;;  %v5095_v32 = vmul.f32 %v10413_v52, %v10413_v52  ;;  %v4658_v14 = vadd.f32 %v10319_v30, %v12194_v47  ;;  %v2104_v43 = vpop.permute.xlu1 %2103  ;;  %v10442_v48 = vpop.f32.mrf.mxu2  ;;  %v2706_v30 = vmul.f32 %v10282_v31, %v12136_v25 }
 0x52e   : > { %v2137_v2 = vmul.f32 %v2104_v43, %v12195_v51 }
 0x52f   : > { %4882 = vmatmul.bf16.gmra.mxu0 %v3495_v37  ;;  %v4747_v29 = vadd.f32 %v10333_v23, %v4658_v14  ;;  %v2551_v37 = vpack.c.bf16 %v2519_v33, %v2519_v33  ;;  %v2738_v31 = vpack.c.bf16 %v2706_v30, %v2706_v30 }
 0x531   : > { %v4836_v26 = vadd.f32 %v10371_v38, %v4747_v29  ;;  %v3479_v25 = vunpack.c.l.b16 %v2551_v37  ;;  %v12197_v38 = vld [vmem:[#allocation148_spill] sm:$0xff]  ;;  %v12198_v29 = vld [vmem:[#allocation19_spill] sm:$0xff]  ;;  %v3570_v37 = vunpack.c.l.b16 %v2738_v31 }
 0x532   : > { %v4922_v27 = vpop.f32.mrf.mxu1  ;;  %v4661_v47 = vadd.f32 %v10343_v10, %v12197_v38 }
 0x533   : > { %v10432_v55 = vadd.f32 %v4922_v27, %v4834_v8  ;;  %v2169_v8 = vpack.c.bf16 %v2137_v2, %v2137_v2  ;;  %v3496_v14 = vpack.c.b16 %v3479_v25, %v3478_v62  ;;  %v2488_v43 = vpop.permute.xlu2 %2487  ;;  %v12200_v25 = vld [vmem:[#allocation62_spill] sm:$0xff]  ;;  %v3590_v38 = vpack.c.b16 %v3571_v63, %v3570_v37 }
 0x534   : > { %v10448_v21 = vpop.f32.mrf.mxu0  ;;  %v4750_v42 = vadd.f32 %v10359_v54, %v4661_v47  ;;  %v12201_v47 = vld [vmem:[#allocation144_spill] sm:$0xff] }
 0x535   : > { %5001 = vadd.xlane.f32.xlu0 %v10432_v55  ;;  %5132 = vadd.xlane.f32.xlu1 %v5095_v32  ;;  %v2328_v32 = vmul.f32 %v2292_v19, %v12196_v6  ;;  %v5096_v24 = vmul.f32 %v10432_v55, %v10432_v55  ;;  %v3289_v33 = vunpack.c.l.b16 %v2169_v8  ;;  %v2296_v19 = vpop.permute.xlu1 %2295  ;;  %v10467_v10 = vpop.f32.mrf.mxu2 }
 0x536   : > { %4961 = vmatmul.bf16.gmra.mxu1 %v3589_v1  ;;  %v10458_v1 = vpop.f32.mrf.mxu3  ;;  %v2329_v2 = vmul.f32 %v2296_v19, %v12198_v29  ;;  %v4839_v8 = vadd.f32 %v10387_v7, %v4750_v42 }
 0x537   : > { %v3305_v41 = vpack.c.b16 %v3289_v33, %v3288_v9  ;;  %v2360_v28 = vpack.c.bf16 %v2328_v32, %v2328_v32 }
 0x538   : > { %v2361_v9 = vpack.c.bf16 %v2329_v2, %v2329_v2 }
 0x539   : > { %4714 = vmatmul.bf16.gmra.mxu2 %v3305_v41  ;;  %v3384_v54 = vunpack.c.l.b16 %v2360_v28  ;;  %v4663_v41 = vadd.f32 %v10373_v59, %v12201_v47  ;;  %v2709_v28 = vmul.f32 %v10351_v12, %v12183_v22  ;;  %v2708_v59 = vmul.f32 %v10288_v17, %v12181_v36 }
 0x53a   : > { %v4924_v27 = vpop.f32.mrf.mxu1  ;;  %v3385_v33 = vunpack.c.l.b16 %v2361_v9 }
 0x53b   : > { %v10454_v23 = vadd.f32 %v4924_v27, %v4836_v26  ;;  %v2484_v26 = vpop.permute.xlu0 %2483  ;;  %v12199_v27 = vld [vmem:[#allocation35_spill] sm:$0xff]  ;;  %v4752_v19 = vadd.f32 %v10384_v13, %v4663_v41  ;;  %v2741_v63 = vpack.c.bf16 %v2709_v28, %v2709_v28  ;;  %v2740_v22 = vpack.c.bf16 %v2708_v59, %v2708_v59 }
 0x53c   : > { %v10465_v30 = vpop.f32.mrf.mxu0  ;;  %v2521_v62 = vmul.f32 %v2488_v43, %v12199_v27  ;;  %v2520_v31 = vmul.f32 %v2484_v26, %v12200_v25  ;;  %v3401_v7 = vpack.c.b16 %v3385_v33, %v3384_v54  ;;  %v12202_v27 = vld [vmem:[#allocation152_spill] sm:$0xff] }
 0x53d   : > { %5003 = vadd.xlane.f32.xlu2 %v10454_v23  ;;  %5134 = vadd.xlane.f32.xlu0 %v5096_v24  ;;  %v5097_v24 = vmul.f32 %v10454_v23, %v10454_v23  ;;  %v4841_v29 = vadd.f32 %v10408_v0, %v4752_v19  ;;  %v10489_v26 = vpop.f32.mrf.mxu2  ;;  %v4666_v12 = vadd.f32 %v10392_v61, %v12202_v27  ;;  %v3573_v36 = vunpack.c.l.b16 %v2741_v63 }
 0x53e   : > { %v2553_v16 = vpack.c.bf16 %v2521_v62, %v2521_v62  ;;  %4803 = vmatmul.bf16.gmra.mxu3 %v3401_v7  ;;  %v2552_v42 = vpack.c.bf16 %v2520_v31, %v2520_v31  ;;  %v2711_v19 = vmul.f32 %v10440_v45, %v12195_v51 }
 0x53f   : > { %4887 = vmatmul.bf16.gmra.mxu0 %v3496_v14  ;;  %v10479_v14 = vpop.f32.mrf.mxu3  ;;  %v4755_v17 = vadd.f32 %v10406_v3, %v4666_v12 }
 0x540   : > { %v3481_v2 = vunpack.c.l.b16 %v2553_v16  ;;  %v3480_v9 = vunpack.c.l.b16 %v2552_v42 }
 0x541   : > { %v4844_v54 = vadd.f32 %v10425_v18, %v4755_v17  ;;  %v2710_v18 = vmul.f32 %v10417_v46, %v12191_v34  ;;  %v2743_v46 = vpack.c.bf16 %v2711_v19, %v2711_v19  ;;  %v2680_v17 = vpop.permute.xlu2 %2679 }
 0x542   : > { %v4927_v6 = vpop.f32.mrf.mxu1  ;;  %v3497_v0 = vpack.c.b16 %v3481_v2, %v3480_v9  ;;  %v12204_v2 = vld [vmem:[#allocation86_spill] sm:$0xff] }
 0x543   : > { %v10471_v32 = vadd.f32 %v4927_v6, %v4839_v8  ;;  %v2742_v59 = vpack.c.bf16 %v2710_v18, %v2710_v18  ;;  %v3575_v51 = vunpack.c.l.b16 %v2743_v46  ;;  %v12208_v18 = vld [vmem:[#allocation51_spill] sm:$0xff] }
 0x544   : > { %v10484_v43 = vpop.f32.mrf.mxu0 }
 0x545   : > { %5136 = vadd.xlane.f32.xlu2 %v5097_v24  ;;  %5005 = vadd.xlane.f32.xlu1 %v10471_v32  ;;  %v5098_v13 = vmul.f32 %v10471_v32, %v10471_v32  ;;  %v3572_v24 = vunpack.c.l.b16 %v2740_v22  ;;  %v4677_v41 = vpop.f32.mrf.mxu2  ;;  %v12205_v22 = vld [vmem:[#allocation160_spill] sm:$0xff] }
 0x546   : > { %4966 = vmatmul.bf16.gmra.mxu1 %v3590_v38  ;;  %v12203_v38 = vld [vmem:[#allocation153_spill] sm:$0xff] }
 0x547   : > { %v4764_v62 = vpop.f32.mrf.mxu3  ;;  %v3591_v31 = vpack.c.b16 %v3573_v36, %v3572_v24  ;;  %v4668_v47 = vadd.f32 %v10421_v35, %v12203_v38  ;;  %v12206_v36 = vld [vmem:[#allocation64_spill] sm:$0xff] }
 0x549   : > { %v4757_v3 = vadd.f32 %v10429_v39, %v4668_v47  ;;  %v4671_v39 = vadd.f32 %v10442_v48, %v12204_v2 }
 0x54a   : > { %v4929_v37 = vpop.f32.mrf.mxu1 }
 0x54b   : > { %v10491_v8 = vadd.f32 %v4929_v37, %v4841_v29  ;;  %v4846_v7 = vadd.f32 %v10448_v21, %v4757_v3  ;;  %v4760_v21 = vadd.f32 %v10458_v1, %v4671_v39  ;;  %v3574_v37 = vunpack.c.l.b16 %v2742_v59  ;;  %v2676_v1 = vpop.permute.xlu1 %2675 }
 0x54c   : > { %v4853_v6 = vpop.f32.mrf.mxu0 }
 0x54d   : > { %5007 = vadd.xlane.f32.xlu0 %v10491_v8  ;;  %5138 = vadd.xlane.f32.xlu1 %v5098_v13  ;;  %v5099_v61 = vmul.f32 %v10491_v8, %v10491_v8  ;;  %v4680_v34 = vpop.f32.mrf.mxu2  ;;  %v4849_v45 = vadd.f32 %v10465_v30, %v4760_v21  ;;  %v3592_v48 = vpack.c.b16 %v3575_v51, %v3574_v37 }
 0x54f   : > { %4892 = vmatmul.bf16.gmra.mxu0 %v3497_v0  ;;  %v4766_v42 = vpop.f32.mrf.mxu3  ;;  %v4673_v0 = vadd.f32 %v10467_v10, %v12205_v22 }
 0x551   : > { %v4762_v30 = vadd.f32 %v10479_v14, %v4673_v0 }
 0x552   : > { %v4932_v33 = vpop.f32.mrf.mxu1 }
 0x553   : > { %v10500_v25 = vadd.f32 %v4932_v33, %v4844_v54  ;;  %v2712_v54 = vmul.f32 %v2676_v1, %v12206_v36  ;;  %v4851_v33 = vadd.f32 %v10484_v43, %v4762_v30  ;;  %v4681_v1 = vadd.f32 %v4680_v34, %v10007_v50  ;;  %v12209_v50 = vld [vmem:[#allocation85_spill] sm:$0xff] }
 0x554   : > { %v4855_v16 = vpop.f32.mrf.mxu0 }
 0x555   : > { %5140 = vadd.xlane.f32.xlu0 %v5099_v61  ;;  %5009 = vadd.xlane.f32.xlu2 %v10500_v25  ;;  %v5100_v35 = vmul.f32 %v10500_v25, %v10500_v25  ;;  %v4682_v24 = vpop.f32.mrf.mxu2  ;;  %v12207_v61 = vld [vmem:[#allocation59_spill] sm:$0xff]  ;;  %v2744_v3 = vpack.c.bf16 %v2712_v54, %v2712_v54 }
 0x556   : > { %4971 = vmatmul.bf16.gmra.mxu1 %v3591_v31  ;;  %v2713_v31 = vmul.f32 %v2680_v17, %v12207_v61  ;;  %v4683_v34 = vadd.f32 %v4682_v24, %v12209_v50 }
 0x557   : > { %v4769_v12 = vpop.f32.mrf.mxu3  ;;  %v3576_v43 = vunpack.c.l.b16 %v2744_v3 }
 0x558   : > { %v2745_v19 = vpack.c.bf16 %v2713_v31, %v2713_v31 }
 0x55a   : > { %v4934_v28 = vpop.f32.mrf.mxu1  ;;  %v3577_v2 = vunpack.c.l.b16 %v2745_v19 }
 0x55b   : > { %v10513_v29 = vadd.f32 %v4934_v28, %v4846_v7  ;;  %v4676_v7 = vadd.f32 %v10489_v26, %v12208_v18  ;;  %v4678_v26 = vadd.f32 %v4677_v41, %v9985_v15  ;;  %v4770_v15 = vadd.f32 %v4769_v12, %v4681_v1 }
 0x55c   : > { %v4858_v27 = vpop.f32.mrf.mxu0 }
 0x55d   : > { %5011 = vadd.xlane.f32.xlu1 %v10513_v29  ;;  %5142 = vadd.xlane.f32.xlu2 %v5100_v35  ;;  %v5101_v63 = vmul.f32 %v10513_v29, %v10513_v29  ;;  %v4765_v35 = vadd.f32 %v4764_v62, %v4676_v7  ;;  %v4685_v46 = vpop.f32.mrf.mxu2  ;;  %v4859_v36 = vadd.f32 %v4858_v27, %v4770_v15  ;;  %v6489_v27 = vld [vmem:[%s11122_s8 + $0x38] sm:$0xff] }
 0x55e   : > { %5424 = vmatpush.bf16.msra.mxu2 %v6489_v27  ;;  %v12213_v15 = vld [vmem:[#allocation142_spill] sm:$0xff] }
 0x55f   : > { %v4771_v28 = vpop.f32.mrf.mxu3  ;;  %v4854_v59 = vadd.f32 %v4853_v6, %v4765_v35 }
 0x560   : > { %v4772_v3 = vadd.f32 %v4771_v28, %v4683_v34 }
 0x562   : > { %v4937_v13 = vpop.f32.mrf.mxu1 }
 0x563   : > { %v10522_v9 = vadd.f32 %v4937_v13, %v4849_v45  ;;  %v3593_v45 = vpack.c.b16 %v3577_v2, %v3576_v43  ;;  %v4767_v13 = vadd.f32 %v4766_v42, %v4678_v26 }
 0x564   : > { %v4860_v14 = vpop.f32.mrf.mxu0 }
 0x565   : > { %5144 = vadd.xlane.f32.xlu1 %v5101_v63  ;;  %5013 = vadd.xlane.f32.xlu0 %v10522_v9  ;;  %v5102_v10 = vmul.f32 %v10522_v9, %v10522_v9  ;;  %v4856_v6 = vadd.f32 %v4855_v16, %v4767_v13  ;;  %v4687_v17 = vpop.f32.mrf.mxu2  ;;  %v4861_v7 = vadd.f32 %v4860_v14, %v4772_v3 }
 0x566   : > { %4976 = vmatmul.bf16.gmra.mxu1 %v3592_v48 }
 0x567   : > { %v4774_v51 = vpop.f32.mrf.mxu3 }
 0x56a   : > { %v4939_v38 = vpop.f32.mrf.mxu1 }
 0x56b   : > { %v10533_v47 = vadd.f32 %v4939_v38, %v4851_v33 }
 0x56c   : > { %v4863_v62 = vpop.f32.mrf.mxu0 }
 0x56d   : > { %5015 = vadd.xlane.f32.xlu2 %v10533_v47  ;;  %5146 = vadd.xlane.f32.xlu0 %v5102_v10  ;;  %v5103_v37 = vmul.f32 %v10533_v47, %v10533_v47  ;;  %v4690_v12 = vpop.f32.mrf.mxu2 }
 0x56f   : > { %v4776_v41 = vpop.f32.mrf.mxu3 }
 0x572   : > { %v4942_v39 = vpop.f32.mrf.mxu1 }
 0x573   : > { %v10540_v21 = vadd.f32 %v4942_v39, %v4854_v59 }
 0x574   : > { %v4865_v42 = vpop.f32.mrf.mxu0 }
 0x575   : > { %5148 = vadd.xlane.f32.xlu2 %v5103_v37  ;;  %5017 = vadd.xlane.f32.xlu1 %v10540_v21  ;;  %v5104_v0 = vmul.f32 %v10540_v21, %v10540_v21  ;;  %v4692_v14 = vpop.f32.mrf.mxu2 }
 0x576   : > { %4981 = vmatmul.bf16.gmra.mxu1 %v3593_v45  ;;  %v12211_v45 = vld [vmem:[#allocation78_spill] sm:$0xff] }
 0x577   : > { %v4779_v18 = vpop.f32.mrf.mxu3  ;;  %v4686_v28 = vadd.f32 %v4685_v46, %v12211_v45 }
 0x578   : > { %v4990_v63 = vpop.xlane.xlu1 %4989 }
 0x579   : > { %v4775_v26 = vadd.f32 %v4774_v51, %v4686_v28 }
 0x57a   : > { %v4944_v48 = vpop.f32.mrf.mxu1 }
 0x57b   : > { %v10546_v22 = vadd.f32 %v4944_v48, %v4856_v6 }
 0x57c   : > { %v4868_v2 = vpop.f32.mrf.mxu0 }
 0x57d   : > { %5019 = vadd.xlane.f32.xlu0 %v10546_v22  ;;  %5150 = vadd.xlane.f32.xlu1 %v5104_v0  ;;  %v5105_v38 = vmul.f32 %v10546_v22, %v10546_v22 }
 0x580   : > { %v4992_v30 = vpop.xlane.xlu0 %4991  ;;  %v5123_v33 = vpop.xlane.xlu1 %5122 }
 0x581   : > { %v5053_v54 = vadd.f32 %v4992_v30, %v4990_v63  ;;  %v4864_v63 = vadd.f32 %v4863_v62, %v4775_v26  ;;  %v4688_v30 = vadd.f32 %v4687_v17, %v12213_v15  ;;  %v12215_v17 = vld [vmem:[#allocation150_spill] sm:$0xff]  ;;  %v4693_v26 = vadd.f32 %v4692_v14, %v10131_v56 }
 0x582   : > { %v5125_v16 = vpop.xlane.xlu2 %5124  ;;  %v4947_v61 = vpop.f32.mrf.mxu1  ;;  %v4691_v3 = vadd.f32 %v4690_v12, %v12215_v17 }
 0x583   : > { %v10552_v31 = vadd.f32 %v4947_v61, %v4859_v36  ;;  %v5186_v10 = vadd.f32 %v5125_v16, %v5123_v33  ;;  %v4781_v36 = vpop.f32.mrf.mxu3 }
 0x584   : > { %v4870_v46 = vpop.f32.mrf.mxu0  ;;  %v4782_v12 = vadd.f32 %v4781_v36, %v4693_v26 }
 0x585   : > { %5152 = vadd.xlane.f32.xlu0 %v5105_v38  ;;  %5021 = vadd.xlane.f32.xlu2 %v10552_v31  ;;  %v5106_v59 = vmul.f32 %v10552_v31, %v10552_v31 }
 0x586   : > { %v4871_v15 = vadd.f32 %v4870_v46, %v4782_v12 }
 0x58a   : > { %v4994_v19 = vpop.xlane.xlu2 %4993  ;;  %v4949_v35 = vpop.f32.mrf.mxu1 }
 0x58b   : > { %v10561_v43 = vadd.f32 %v4949_v35, %v4861_v7  ;;  %v5054_v24 = vadd.f32 %v5053_v54, %v4994_v19  ;;  %v5127_v39 = vpop.xlane.xlu1 %5126  ;;  %v4777_v54 = vadd.f32 %v4776_v41, %v4688_v30  ;;  %v4784_v27 = vpop.f32.mrf.mxu3  ;;  %v4780_v41 = vadd.f32 %v4779_v18, %v4691_v3 }
 0x58c   : > { %v5187_v37 = vadd.f32 %v5186_v10, %v5127_v39  ;;  %v4695_v10 = vpop.f32.mrf.mxu2  ;;  %v4873_v7 = vpop.f32.mrf.mxu0 }
 0x58d   : > { %12210 = vst [vmem:[#allocation94_spill] sm:$0xff] %v10561_v43  ;;  %5023 = vadd.xlane.f32.xlu1 %v10561_v43  ;;  %5154 = vadd.xlane.f32.xlu2 %v5106_v59  ;;  %v5107_v1 = vmul.f32 %v10561_v43, %v10561_v43  ;;  %v4866_v16 = vadd.f32 %v4865_v42, %v4777_v54 }
 0x58e   : > { %v4696_v14 = vadd.f32 %v4695_v10, %v10149_v53 }
 0x590   : > { %v4996_v13 = vpop.xlane.xlu0 %4995 }
 0x591   : > { %v5055_v6 = vadd.f32 %v5054_v24, %v4996_v13  ;;  %v4869_v24 = vadd.f32 %v4868_v2, %v4780_v41  ;;  %v6488_v2 = vld [vmem:[%s11122_s8 + $0x30] sm:$0xff] }
 0x592   : > { %v4952_v48 = vpop.f32.mrf.mxu1  ;;  %5425 = vmatpush.bf16.msra.mxu2 %v6488_v2 }
 0x593   : > { %v10567_v0 = vadd.f32 %v4952_v48, %v4864_v63  ;;  %v4786_v63 = vpop.f32.mrf.mxu3 }
 0x594   : > { %v4697_v28 = vpop.f32.mrf.mxu2 }
 0x595   : > { %12212 = vst [vmem:[#allocation149_spill] sm:$0xff] %v10567_v0  ;;  %5156 = vadd.xlane.f32.xlu1 %v5107_v1  ;;  %5025 = vadd.xlane.f32.xlu0 %v10567_v0  ;;  %v5108_v34 = vmul.f32 %v10567_v0, %v10567_v0  ;;  %v4698_v53 = vadd.f32 %v4697_v28, %v10169_v5 }
 0x597   : > { %v4787_v10 = vadd.f32 %v4786_v63, %v4698_v53 }
 0x598   : > { %v5129_v33 = vpop.xlane.xlu0 %5128  ;;  %v4998_v51 = vpop.xlane.xlu2 %4997 }
 0x599   : > { %v5056_v61 = vadd.f32 %v5055_v6, %v4998_v51  ;;  %v5188_v62 = vadd.f32 %v5187_v37, %v5129_v33  ;;  %v4875_v6 = vpop.f32.mrf.mxu0  ;;  %v4785_v33 = vadd.f32 %v4784_v27, %v4696_v14 }
 0x59a   : > { %v4954_v38 = vpop.f32.mrf.mxu1 }
 0x59b   : > { %v10573_v50 = vadd.f32 %v4954_v38, %v4866_v16  ;;  %v4874_v46 = vadd.f32 %v4873_v7, %v4785_v33 }
 0x59c   : > { %v4700_v36 = vpop.f32.mrf.mxu2 }
 0x59d   : > { %12214 = vst [vmem:[#allocation95_spill] sm:$0xff] %v10573_v50  ;;  %5027 = vadd.xlane.f32.xlu2 %v10573_v50  ;;  %5158 = vadd.xlane.f32.xlu0 %v5108_v34  ;;  %v5109_v37 = vmul.f32 %v10573_v50, %v10573_v50  ;;  %v4701_v5 = vadd.f32 %v4700_v36, %v10183_v20 }
 0x5a0   : > { %v5131_v19 = vpop.xlane.xlu2 %5130  ;;  %v5000_v35 = vpop.xlane.xlu1 %4999 }
 0x5a1   : > { %v5057_v42 = vadd.f32 %v5056_v61, %v5000_v35  ;;  %v5189_v59 = vadd.f32 %v5188_v62, %v5131_v19  ;;  %v4789_v61 = vpop.f32.mrf.mxu3  ;;  %v4878_v17 = vpop.f32.mrf.mxu0 }
 0x5a2   : > { %v4790_v28 = vadd.f32 %v4789_v61, %v4701_v5  ;;  %v12223_v5 = vld [vmem:[#allocation66_spill] sm:$0xff] }
 0x5a3   : > { %v4957_v39 = vpop.f32.mrf.mxu1 }
 0x5a4   : > { %v10581_v45 = vadd.f32 %v4957_v39, %v4869_v24  ;;  %v4876_v24 = vadd.f32 %v4875_v6, %v4787_v10  ;;  %v4879_v6 = vadd.f32 %v4878_v17, %v4790_v28 }
 0x5a5   : > { %5160 = vadd.xlane.f32.xlu2 %v5109_v37 }
 0x5a6   : > { %12216 = vst [vmem:[#allocation74_spill] sm:$0xff] %v10581_v45  ;;  %5029 = vadd.xlane.f32.xlu1 %v10581_v45  ;;  %v5110_v56 = vmul.f32 %v10581_v45, %v10581_v45 }
 0x5a8   : > { %v5002_v13 = vpop.xlane.xlu0 %5001  ;;  %v5133_v18 = vpop.xlane.xlu1 %5132 }
 0x5a9   : > { %v5058_v48 = vadd.f32 %v5057_v42, %v5002_v13  ;;  %v5190_v1 = vadd.f32 %v5189_v59, %v5133_v18  ;;  %v4702_v59 = vpop.f32.mrf.mxu2  ;;  %v4791_v7 = vpop.f32.mrf.mxu3 }
 0x5aa   : > { %v4880_v12 = vpop.f32.mrf.mxu0  ;;  %v4703_v14 = vadd.f32 %v4702_v59, %v10201_v57 }
 0x5ab   : > { %v4959_v30 = vpop.f32.mrf.mxu1 }
 0x5ac   : > { %v10588_v54 = vadd.f32 %v4959_v30, %v4871_v15  ;;  %v4792_v36 = vadd.f32 %v4791_v7, %v4703_v14 }
 0x5ae   : > { %12217 = vst [vmem:[#allocation110_spill] sm:$0xff] %v10588_v54  ;;  %5031 = vadd.xlane.f32.xlu0 %v10588_v54  ;;  %5162 = vadd.xlane.f32.xlu1 %v5110_v56  ;;  %v5111_v41 = vmul.f32 %v10588_v54, %v10588_v54 }
 0x5b0   : > { %v5004_v51 = vpop.xlane.xlu2 %5003  ;;  %v5135_v16 = vpop.xlane.xlu0 %5134 }
 0x5b1   : > { %v5059_v62 = vadd.f32 %v5058_v48, %v5004_v51  ;;  %v5191_v38 = vadd.f32 %v5190_v1, %v5135_v16  ;;  %v4705_v1 = vpop.f32.mrf.mxu2  ;;  %v4794_v2 = vpop.f32.mrf.mxu3 }
 0x5b2   : > { %v4883_v20 = vpop.f32.mrf.mxu0  ;;  %v4706_v53 = vadd.f32 %v4705_v1, %v10215_v11 }
 0x5b3   : > { %v4962_v34 = vpop.f32.mrf.mxu1 }
 0x5b4   : > { %v10594_v3 = vadd.f32 %v4962_v34, %v4874_v46  ;;  %v4795_v10 = vadd.f32 %v4794_v2, %v4706_v53 }
 0x5b6   : > { %12218 = vst [vmem:[#allocation121_spill] sm:$0xff] %v10594_v3  ;;  %5164 = vadd.xlane.f32.xlu0 %v5111_v41  ;;  %5033 = vadd.xlane.f32.xlu2 %v10594_v3  ;;  %v5112_v26 = vmul.f32 %v10594_v3, %v10594_v3 }
 0x5b8   : > { %v5137_v27 = vpop.xlane.xlu2 %5136  ;;  %v5006_v19 = vpop.xlane.xlu1 %5005 }
 0x5b9   : > { %v5192_v35 = vadd.f32 %v5191_v38, %v5137_v27  ;;  %v5060_v42 = vadd.f32 %v5059_v62, %v5006_v19  ;;  %v6487_v62 = vld [vmem:[%s11122_s8 + $0x28] sm:$0xff]  ;;  %v4881_v38 = vadd.f32 %v4880_v12, %v4792_v36  ;;  %v4707_v17 = vpop.f32.mrf.mxu2  ;;  %v4796_v41 = vpop.f32.mrf.mxu3 }
 0x5ba   : > { %5426 = vmatpush.bf16.msra.mxu2 %v6487_v62  ;;  %v4708_v28 = vadd.f32 %v4707_v17, %v12223_v5 }
 0x5bb   : > { %v4964_v39 = vpop.f32.mrf.mxu1 }
 0x5bc   : > { %v10600_v37 = vadd.f32 %v4964_v39, %v4876_v24  ;;  %v4884_v24 = vadd.f32 %v4883_v20, %v4795_v10 }
 0x5be   : > { %12219 = vst [vmem:[#allocation147_spill] sm:$0xff] %v10600_v37  ;;  %5035 = vadd.xlane.f32.xlu1 %v10600_v37  ;;  %5166 = vadd.xlane.f32.xlu2 %v5112_v26  ;;  %v5113_v56 = vmul.f32 %v10600_v37, %v10600_v37 }
 0x5c0   : > { %v5008_v13 = vpop.xlane.xlu0 %5007  ;;  %v5139_v18 = vpop.xlane.xlu1 %5138 }
 0x5c1   : > { %v5061_v63 = vadd.f32 %v5060_v42, %v5008_v13  ;;  %v5193_v48 = vadd.f32 %v5192_v35, %v5139_v18  ;;  %v4885_v35 = vpop.f32.mrf.mxu0  ;;  %v4710_v12 = vpop.f32.mrf.mxu2  ;;  %v4797_v13 = vadd.f32 %v4796_v41, %v4708_v28 }
 0x5c2   : > { %v4799_v11 = vpop.f32.mrf.mxu3 }
 0x5c3   : > { %v4967_v15 = vpop.f32.mrf.mxu1 }
 0x5c4   : > { %v10606_v30 = vadd.f32 %v4967_v15, %v4879_v6  ;;  %v4886_v6 = vadd.f32 %v4885_v35, %v4797_v13 }
 0x5c6   : > { %12220 = vst [vmem:[#allocation124_spill] sm:$0xff] %v10606_v30  ;;  %5168 = vadd.xlane.f32.xlu1 %v5113_v56  ;;  %5037 = vadd.xlane.f32.xlu0 %v10606_v30  ;;  %v5114_v57 = vmul.f32 %v10606_v30, %v10606_v30  ;;  %v12224_v56 = vld [vmem:[#allocation158_spill] sm:$0xff] }
 0x5c7   : > { %v4711_v14 = vadd.f32 %v4710_v12, %v12224_v56 }
 0x5c8   : > { %v5141_v33 = vpop.xlane.xlu0 %5140  ;;  %v5010_v51 = vpop.xlane.xlu2 %5009 }
 0x5c9   : > { %v5194_v16 = vadd.f32 %v5193_v48, %v5141_v33  ;;  %v5062_v61 = vadd.f32 %v5061_v63, %v5010_v51  ;;  %v4888_v2 = vpop.f32.mrf.mxu0  ;;  %v4712_v33 = vpop.f32.mrf.mxu2  ;;  %v4800_v51 = vadd.f32 %v4799_v11, %v4711_v14 }
 0x5cb   : > { %v4969_v46 = vpop.f32.mrf.mxu1 }
 0x5cc   : > { %v10615_v34 = vadd.f32 %v4969_v46, %v4881_v38  ;;  %v12226_v38 = vld [vmem:[#allocation159_spill] sm:$0xff] }
 0x5cd   : > { %v4713_v46 = vadd.f32 %v4712_v33, %v12226_v38  ;;  %v6485_v38 = vld [vmem:[%s11122_s8 + $0x18] sm:$0xff] }
 0x5ce   : > { %12221 = vst [vmem:[#allocation69_spill] sm:$0xff] %v10615_v34  ;;  %5039 = vadd.xlane.f32.xlu2 %v10615_v34  ;;  %5170 = vadd.xlane.f32.xlu0 %v5114_v57  ;;  %v5115_v26 = vmul.f32 %v10615_v34, %v10615_v34 }
 0x5d0   : > { %v5143_v27 = vpop.xlane.xlu2 %5142  ;;  %v5012_v19 = vpop.xlane.xlu1 %5011 }
 0x5d1   : > { %v5195_v42 = vadd.f32 %v5194_v16, %v5143_v27  ;;  %v5063_v59 = vadd.f32 %v5062_v61, %v5012_v19  ;;  %v4801_v16 = vpop.f32.mrf.mxu3  ;;  %v4889_v61 = vadd.f32 %v4888_v2, %v4800_v51  ;;  %v4890_v41 = vpop.f32.mrf.mxu0  ;;  %v6486_v19 = vld [vmem:[%s11122_s8 + $0x20] sm:$0xff] }
 0x5d2   : > { %v4715_v53 = vpop.f32.mrf.mxu2  ;;  %v4802_v10 = vadd.f32 %v4801_v16, %v4713_v46  ;;  %5427 = vmatpush.bf16.msra.mxu2 %v6486_v19 }
 0x5d3   : > { %v4972_v7 = vpop.f32.mrf.mxu1 }
 0x5d4   : > { %v10621_v39 = vadd.f32 %v4972_v7, %v4884_v24  ;;  %v4891_v35 = vadd.f32 %v4890_v41, %v4802_v10 }
 0x5d6   : > { %12222 = vst [vmem:[#allocation100_spill] sm:$0xff] %v10621_v39  ;;  %5172 = vadd.xlane.f32.xlu2 %v5115_v26  ;;  %5041 = vadd.xlane.f32.xlu1 %v10621_v39  ;;  %v5116_v36 = vmul.f32 %v10621_v39, %v10621_v39 }
 0x5d7   : > { %5428 = vmatpush.bf16.msra.mxu2 %v6485_v38 }
 0x5d8   : > { %v5014_v18 = vpop.xlane.xlu0 %5013  ;;  %v5145_v63 = vpop.xlane.xlu1 %5144 }
 0x5d9   : > { %v10627_v48 = vadd.f32 %v5063_v59, %v5014_v18  ;;  %v10629_v1 = vadd.f32 %v5195_v42, %v5145_v63  ;;  %v4804_v27 = vpop.f32.mrf.mxu3  ;;  %v12228_v59 = vld [vmem:[#allocation164_spill] sm:$0xff]  ;;  %v4893_v5 = vpop.f32.mrf.mxu0 }
 0x5da   : > { %v4716_v24 = vadd.f32 %v4715_v53, %v12228_v59  ;;  %v4717_v28 = vpop.f32.mrf.mxu2 }
 0x5db   : > { %v4974_v15 = vpop.f32.mrf.mxu1  ;;  %v4718_v63 = vadd.f32 %v4717_v28, %v10299_v58 }
 0x5dc   : > { %v10632_v20 = vadd.f32 %v4974_v15, %v4886_v6  ;;  %v4805_v12 = vadd.f32 %v4804_v27, %v4716_v24  ;;  %v6484_v24 = vld [vmem:[%s11122_s8 + $0x10] sm:$0xff] }
 0x5dd   : > { %5429 = vmatpush.bf16.msra.mxu2 %v6484_v24 }
 0x5de   : > { %12225 = vst [vmem:[#allocation81_spill] sm:$0xff] %v10632_v20  ;;  %5043 = vadd.xlane.f32.xlu0 %v10632_v20  ;;  %5174 = vadd.xlane.f32.xlu1 %v5116_v36  ;;  %v5117_v17 = vmul.f32 %v10632_v20, %v10632_v20  ;;  %v4894_v11 = vadd.f32 %v4893_v5, %v4805_v12 }
 0x5e0   : > { %v5016_v16 = vpop.xlane.xlu2 %5015 }
 0x5e1   : > { %v4806_v13 = vpop.f32.mrf.mxu3  ;;  %v4895_v56 = vpop.f32.mrf.mxu0 }
 0x5e2   : > { %v4807_v15 = vadd.f32 %v4806_v13, %v4718_v63 }
 0x5e3   : > { %v4977_v62 = vpop.f32.mrf.mxu1 }
 0x5e4   : > { %v10638_v57 = vadd.f32 %v4977_v62, %v4889_v61  ;;  %v4896_v14 = vadd.f32 %v4895_v56, %v4807_v15  ;;  %v5147_v61 = vpop.xlane.xlu0 %5146 }
 0x5e6   : > { %12227 = vst [vmem:[#allocation126_spill] sm:$0xff] %v10638_v57  ;;  %5176 = vadd.xlane.f32.xlu0 %v5117_v17  ;;  %5045 = vadd.xlane.f32.xlu2 %v10638_v57  ;;  %v5118_v26 = vmul.f32 %v10638_v57, %v10638_v57 }
 0x5e8   : > { %v5018_v62 = vpop.xlane.xlu1 %5017  ;;  %v5149_v46 = vpop.xlane.xlu2 %5148 }
 0x5eb   : > { %v4979_v42 = vpop.f32.mrf.mxu1 }
 0x5ec   : > { %v10647_v7 = vadd.f32 %v4979_v42, %v4891_v35 }
 0x5ee   : > { %12229 = vst [vmem:[#allocation99_spill] sm:$0xff] %v10647_v7  ;;  %5047 = vadd.xlane.f32.xlu1 %v10647_v7  ;;  %5178 = vadd.xlane.f32.xlu2 %v5118_v26  ;;  %v5119_v2 = vmul.f32 %v10647_v7, %v10647_v7 }
 0x5f0   : > { %v5020_v17 = vpop.xlane.xlu0 %5019  ;;  %v5151_v41 = vpop.xlane.xlu1 %5150 }
 0x5f3   : > { %v4982_v18 = vpop.f32.mrf.mxu1 }
 0x5f4   : > { %v10653_v6 = vadd.f32 %v4982_v18, %v4894_v11 }
 0x5f6   : > { %12230 = vst [vmem:[#allocation52_spill] sm:$0xff] %v10653_v6  ;;  %5180 = vadd.xlane.f32.xlu1 %v5119_v2  ;;  %5049 = vadd.xlane.f32.xlu0 %v10653_v6  ;;  %v5120_v51 = vmul.f32 %v10653_v6, %v10653_v6 }
 0x5f8   : > { %v5022_v53 = vpop.xlane.xlu2 %5021  ;;  %v5153_v10 = vpop.xlane.xlu0 %5152 }
 0x5fb   : > { %v4984_v36 = vpop.f32.mrf.mxu1 }
 0x5fc   : > { %v10658_v33 = vadd.f32 %v4984_v36, %v4896_v14  ;;  %v6483_v14 = vld [vmem:[%s11122_s8 + $0x8] sm:$0xff] }
 0x5fd   : > { %5430 = vmatpush.bf16.msra.mxu2 %v6483_v14 }
 0x5fe   : > { %12231 = vst [vmem:[#allocation163_spill] sm:$0xff] %v10658_v33  ;;  %5051 = vadd.xlane.f32.xlu2 %v10658_v33  ;;  %5182 = vadd.xlane.f32.xlu0 %v5120_v51  ;;  %v5121_v58 = vmul.f32 %v10658_v33, %v10658_v33  ;;  %v5065_v51 = vadd.f32 %v10627_v48, %v5016_v16 }
 0x600   : > { %5184 = vadd.xlane.f32.xlu1 %v5121_v58  ;;  %v5024_v27 = vpop.xlane.xlu1 %5023  ;;  %v5155_v19 = vpop.xlane.xlu2 %5154  ;;  %v5197_v58 = vadd.f32 %v10629_v1, %v5147_v61  ;;  %v5066_v6 = vadd.f32 %v5065_v51, %v5018_v62 }
 0x602   : > { %v5198_v33 = vadd.f32 %v5197_v58, %v5149_v46  ;;  %v5067_v7 = vadd.f32 %v5066_v6, %v5020_v17 }
 0x604   : > { %v5199_v57 = vadd.f32 %v5198_v33, %v5151_v41  ;;  %v5068_v39 = vadd.f32 %v5067_v7, %v5022_v53 }
 0x606   : > { %v5200_v20 = vadd.f32 %v5199_v57, %v5153_v10  ;;  %v5069_v30 = vadd.f32 %v5068_v39, %v5024_v27 }
 0x608   : > { %v5026_v35 = vpop.xlane.xlu0 %5025  ;;  %v5157_v42 = vpop.xlane.xlu1 %5156  ;;  %v5201_v34 = vadd.f32 %v5200_v20, %v5155_v19 }
 0x609   : > { %v5070_v54 = vadd.f32 %v5069_v30, %v5026_v35 }
 0x60a   : > { %v5202_v45 = vadd.f32 %v5201_v34, %v5157_v42 }
 0x610   : > { %v5028_v59 = vpop.xlane.xlu2 %5027  ;;  %v5159_v26 = vpop.xlane.xlu0 %5158 }
 0x611   : > { %v5071_v50 = vadd.f32 %v5070_v54, %v5028_v59  ;;  %v5203_v0 = vadd.f32 %v5202_v45, %v5159_v26 }
 0x618   : > { %v5161_v5 = vpop.xlane.xlu2 %5160 }
 0x619   : > { %v5030_v12 = vpop.xlane.xlu1 %5029  ;;  %v5204_v48 = vadd.f32 %v5203_v0, %v5161_v5 }
 0x61a   : > { %v5072_v16 = vadd.f32 %v5071_v50, %v5030_v12 }
 0x621   : > { %v5032_v28 = vpop.xlane.xlu0 %5031  ;;  %v5163_v11 = vpop.xlane.xlu1 %5162 }
 0x622   : > { %v5073_v1 = vadd.f32 %v5072_v16, %v5032_v28  ;;  %v5205_v61 = vadd.f32 %v5204_v48, %v5163_v11 }
 0x629   : > { %v5034_v13 = vpop.xlane.xlu2 %5033  ;;  %v5165_v18 = vpop.xlane.xlu0 %5164 }
 0x62a   : > { %v5206_v46 = vadd.f32 %v5205_v61, %v5165_v18  ;;  %v5074_v62 = vadd.f32 %v5073_v1, %v5034_v13 }
 0x631   : > { %v5036_v63 = vpop.xlane.xlu1 %5035  ;;  %v5167_v2 = vpop.xlane.xlu2 %5166 }
 0x632   : > { %v5207_v57 = vadd.f32 %v5206_v46, %v5167_v2  ;;  %v5075_v7 = vadd.f32 %v5074_v62, %v5036_v63  ;;  %v6482_v46 = vld [vmem:[%s11122_s8] sm:$0xff] }
 0x633   : > { %5431 = vmatpush.bf16.msra.mxu2 %v6482_v46  ;;  %v12232_v46 = vld [vmem:[#allocation94_spill] sm:$0xff] }
 0x639   : > { %v5038_v15 = vpop.xlane.xlu0 %5037  ;;  %v5169_v56 = vpop.xlane.xlu1 %5168 }
 0x63a   : > { %v5076_v20 = vadd.f32 %v5075_v7, %v5038_v15  ;;  %v5208_v39 = vadd.f32 %v5207_v57, %v5169_v56 }
 0x641   : > { %v5040_v36 = vpop.xlane.xlu2 %5039  ;;  %v5171_v38 = vpop.xlane.xlu0 %5170 }
 0x642   : > { %v5077_v17 = vadd.f32 %v5076_v20, %v5040_v36  ;;  %v5209_v41 = vadd.f32 %v5208_v39, %v5171_v38  ;;  %v4987_v20 = vld [vmem:[%s11120_s6] sm:$0x1] }
 0x649   : > { %v5042_v24 = vpop.xlane.xlu1 %5041  ;;  %v5173_v37 = vpop.xlane.xlu2 %5172 }
 0x64a   : > { %v5210_v30 = vadd.f32 %v5209_v41, %v5173_v37  ;;  %v5078_v34 = vadd.f32 %v5077_v17, %v5042_v24 }
 0x651   : > { %v5044_v3 = vpop.xlane.xlu0 %5043  ;;  %v5175_v14 = vpop.xlane.xlu1 %5174 }
 0x652   : > { %v5079_v45 = vadd.f32 %v5078_v34, %v5044_v3  ;;  %v5211_v0 = vadd.f32 %v5210_v30, %v5175_v14  ;;  %v4988_v30 = vld [vmem:[%s11121_s7] sm:$0x1] }
 0x659   : > { %v5046_v43 = vpop.xlane.xlu2 %5045  ;;  %v5177_v6 = vpop.xlane.xlu0 %5176 }
 0x65a   : > { %v5212_v10 = vadd.f32 %v5211_v0, %v5177_v6  ;;  %v5080_v27 = vadd.f32 %v5079_v45, %v5046_v43 }
 0x661   : > { %v5048_v33 = vpop.xlane.xlu1 %5047  ;;  %v5179_v53 = vpop.xlane.xlu2 %5178 }
 0x662   : > { %v5213_v19 = vadd.f32 %v5212_v10, %v5179_v53  ;;  %v5081_v35 = vadd.f32 %v5080_v27, %v5048_v33 }
 0x669   : > { %v5050_v54 = vpop.xlane.xlu0 %5049  ;;  %v5181_v50 = vpop.xlane.xlu1 %5180 }
 0x66a   : > { %v5082_v42 = vadd.f32 %v5081_v35, %v5050_v54  ;;  %v5214_v59 = vadd.f32 %v5213_v19, %v5181_v50 }
 0x671   : > { %v5052_v26 = vpop.xlane.xlu2 %5051  ;;  %v5183_v12 = vpop.xlane.xlu0 %5182 }
 0x672   : > { %v5083_v5 = vadd.f32 %v5082_v42, %v5052_v26  ;;  %v5215_v28 = vadd.f32 %v5214_v59, %v5183_v12 }
 0x673   : > { %v5185_v11 = vpop.xlane.xlu1 %5184 }
 0x674   : > { %v5084_v13 = vrot.slane %v5083_v5, 4  ;;  %v5216_v18 = vadd.f32 %v5215_v28, %v5185_v11 }
 0x676   : > { %v5085_v37 = vadd.f32 %v5084_v13, %v5083_v5  ;;  %v5217_v63 = vrot.slane %v5216_v18, 4 }
 0x678   : > { %v5086_v2 = vrot.slane %v5085_v37, 2  ;;  %v5218_v15 = vadd.f32 %v5217_v63, %v5216_v18 }
 0x67a   : > { %v5087_v3 = vadd.f32 %v5086_v2, %v5085_v37  ;;  %v5219_v56 = vrot.slane %v5218_v15, 2 }
 0x67c   : > { %v5088_v36 = vrot.slane %v5087_v3, 1  ;;  %v5220_v51 = vadd.f32 %v5219_v56, %v5218_v15 }
 0x67e   : > { %v5089_v43 = vadd.f32 %v5088_v36, %v5087_v3  ;;  %v5221_v58 = vrot.slane %v5220_v51, 1 }
 0x680   : > { %v5223_v38 = vmul.f32 0.00048828125, %v5089_v43  ;;  %v5222_v24 = vadd.f32 %v5221_v58, %v5220_v51 }
 0x682   : > { %v5225_v14 = vmul.f32 %v5223_v38, %v5223_v38  ;;  %v5224_v48 = vmul.f32 0.00048828125, %v5222_v24 }
 0x684   : > { %v5226_v16 = vsub.f32 %v5224_v48, %v5225_v14 }
 0x686   : > { %v5227_v1 = vmax.f32 %v5226_v16, 0.0 }
 0x688   : > { %v5228_v61 = vadd.f32 1e-05, %v5227_v1 }
 0x68a   : > { %6693 = vrsqrt.f32 %v5228_v61  ;;  %vm5235_vm6 = vweird.f32 %v5228_v61 }
 0x690   : > { %v6694_v62 = vpop.eup %6693 }
 0x691   : > { %v5230_v6 = vmul.f32 %v6694_v62, %v5228_v61  ;;  %vm5236_vm5 = vweird.f32 %v6694_v62 }
 0x692   : > { %vm5237_vm7 = vmor %vm5235_vm6, %vm5236_vm5 }
 0x693   : > { %v5231_v33 = vmul.f32 %v6694_v62, %v5230_v6  ;;  %v12233_v6 = vld [vmem:[#allocation149_spill] sm:$0xff] }
 0x695   : > { %v5232_v57 = vmul.f32 0.5, %v5231_v33 }
 0x697   : > { %v5233_v7 = vsub.f32 1.5, %v5232_v57  ;;  %v12234_v57 = vld [vmem:[#allocation95_spill] sm:$0xff] }
 0x699   : > { %v5234_v39 = vmul.f32 %v6694_v62, %v5233_v7 }
 0x69b   : > { %v5238_v17 = vsel %vm5237_vm7, %v6694_v62, %v5234_v39  ;;  %v12236_v39 = vld [vmem:[#allocation110_spill] sm:$0xff] }
 0x69c   : > { %v5239_v41 = vmul.f32 %v5238_v17, %v4987_v20  ;;  %v12235_v20 = vld [vmem:[#allocation74_spill] sm:$0xff]  ;;  %v12237_v17 = vld [vmem:[#allocation121_spill] sm:$0xff] }
 0x69e   : > { %v5240_v34 = vmul.f32 %v5239_v41, %v5223_v38  ;;  %v5243_v54 = vperm.slane %v5239_v41, 0  ;;  %v12238_v41 = vld [vmem:[#allocation147_spill] sm:$0xff] }
 0x6a0   : > { %v5241_v53 = vsub.f32 %v4988_v30, %v5240_v34  ;;  %v5245_v0 = vmul.f32 %v5243_v54, %v10316_v60  ;;  %v5246_v50 = vmul.f32 %v5243_v54, %v10335_v40  ;;  %v5247_v10 = vmul.f32 %v5243_v54, %v10355_v49  ;;  %v12239_v30 = vld [vmem:[#allocation124_spill] sm:$0xff]  ;;  %v12240_v34 = vld [vmem:[#allocation69_spill] sm:$0xff] }
 0x6a1   : > { %v5248_v27 = vmul.f32 %v5243_v54, %v10378_v4  ;;  %v5249_v19 = vmul.f32 %v5243_v54, %v10394_v44  ;;  %v5250_v35 = vmul.f32 %v5243_v54, %v10413_v52  ;;  %v5251_v52 = vmul.f32 %v5243_v54, %v10432_v55 }
 0x6a2   : > { %v10685_v45 = vperm.slane %v5241_v53, 0  ;;  %v5252_v13 = vmul.f32 %v5243_v54, %v10454_v23  ;;  %v5253_v51 = vmul.f32 %v5243_v54, %v10471_v32  ;;  %v5254_v43 = vmul.f32 %v5243_v54, %v10491_v8  ;;  %v12241_v53 = vld [vmem:[#allocation100_spill] sm:$0xff] }
 0x6a3   : > { %v5255_v14 = vmul.f32 %v5243_v54, %v10500_v25  ;;  %v5256_v48 = vmul.f32 %v5243_v54, %v10513_v29  ;;  %v5257_v16 = vmul.f32 %v5243_v54, %v10522_v9  ;;  %v5258_v1 = vmul.f32 %v5243_v54, %v10533_v47 }
 0x6a4   : > { %v5280_v42 = vadd.f32 %v10685_v45, %v5245_v0  ;;  %v5281_v59 = vadd.f32 %v10685_v45, %v5246_v50  ;;  %v5282_v26 = vadd.f32 %v10685_v45, %v5247_v10  ;;  %v5283_v12 = vadd.f32 %v10685_v45, %v5248_v27  ;;  %v12242_v0 = vld [vmem:[#allocation81_spill] sm:$0xff]  ;;  %v12243_v10 = vld [vmem:[#allocation126_spill] sm:$0xff] }
 0x6a5   : > { %v5284_v60 = vadd.f32 %v10685_v45, %v5249_v19  ;;  %v5285_v40 = vadd.f32 %v10685_v45, %v5250_v35  ;;  %v5286_v2 = vadd.f32 %v10685_v45, %v5251_v52  ;;  %v5287_v15 = vadd.f32 %v10685_v45, %v5252_v13  ;;  %v12244_v19 = vld [vmem:[#allocation99_spill] sm:$0xff] }
 0x6a6   : > { %v5312_v5 = vmax.f32 %v5280_v42, 0.0  ;;  %v5313_v49 = vmax.f32 %v5281_v59, 0.0  ;;  %v5314_v28 = vmax.f32 %v5282_v26, 0.0  ;;  %v5315_v4 = vmax.f32 %v5283_v12, 0.0  ;;  %v12245_v42 = vld [vmem:[#allocation52_spill] sm:$0xff]  ;;  %v12246_v26 = vld [vmem:[#allocation163_spill] sm:$0xff] }
 0x6a7   : > { %v5316_v11 = vmax.f32 %v5284_v60, 0.0  ;;  %v5317_v44 = vmax.f32 %v5285_v40, 0.0  ;;  %v5318_v3 = vmax.f32 %v5286_v2, 0.0  ;;  %v5319_v56 = vmax.f32 %v5287_v15, 0.0 }
 0x6a8   : > { %v5344_v18 = vpack.c.bf16 %v5313_v49, %v5312_v5  ;;  %v5345_v37 = vpack.c.bf16 %v5315_v4, %v5314_v28  ;;  %v5288_v55 = vadd.f32 %v10685_v45, %v5253_v51  ;;  %v5289_v23 = vadd.f32 %v10685_v45, %v5254_v43 }
 0x6a9   : > { %v5346_v63 = vpack.c.bf16 %v5317_v44, %v5316_v11  ;;  %v10703_v36 = vpack.c.bf16 %v5319_v56, %v5318_v3  ;;  %v5259_v32 = vmul.f32 %v5243_v54, %v10540_v21  ;;  %v5260_v8 = vmul.f32 %v5243_v54, %v10546_v22 }
 0x6aa   : > { %5432 = vmatmul.bf16.vlgmr.msra.gmra.mxu2 %v5344_v18  ;;  %v5320_v58 = vmax.f32 %v5288_v55, 0.0  ;;  %v5321_v38 = vmax.f32 %v5289_v23, 0.0  ;;  %v5261_v61 = vmul.f32 %v5243_v54, %v10552_v31  ;;  %v5262_v62 = vmul.f32 %v5243_v54, %v12232_v46 }
 0x6ab   : > { %v5263_v33 = vmul.f32 %v5243_v54, %v12233_v6  ;;  %v5264_v7 = vmul.f32 %v5243_v54, %v12234_v57  ;;  %v5265_v25 = vmul.f32 %v5243_v54, %v12235_v20  ;;  %v5266_v29 = vmul.f32 %v5243_v54, %v12236_v39 }
 0x6ac   : > { %v10709_v24 = vpack.c.bf16 %v5321_v38, %v5320_v58  ;;  %v5267_v9 = vmul.f32 %v5243_v54, %v12237_v17  ;;  %v5268_v47 = vmul.f32 %v5243_v54, %v12238_v41  ;;  %v5269_v21 = vmul.f32 %v5243_v54, %v12239_v30 }
 0x6ad   : > { %v5270_v22 = vmul.f32 %v5243_v54, %v12240_v34  ;;  %v5271_v31 = vmul.f32 %v5243_v54, %v12241_v53  ;;  %v5272_v50 = vmul.f32 %v5243_v54, %v12242_v0  ;;  %v5273_v27 = vmul.f32 %v5243_v54, %v12243_v10 }
 0x6ae   : > { %v5274_v35 = vmul.f32 %v5243_v54, %v12244_v19  ;;  %v5275_v59 = vmul.f32 %v5243_v54, %v12245_v42  ;;  %v5276_v12 = vmul.f32 %v5243_v54, %v12246_v26  ;;  %v5290_v60 = vadd.f32 %v10685_v45, %v5255_v14 }
 0x6af   : > { %v5291_v40 = vadd.f32 %v10685_v45, %v5256_v48  ;;  %v5292_v5 = vadd.f32 %v10685_v45, %v5257_v16  ;;  %v5293_v49 = vadd.f32 %v10685_v45, %v5258_v1  ;;  %v5294_v28 = vadd.f32 %v10685_v45, %v5259_v32 }
 0x6b0   : > { %v5295_v4 = vadd.f32 %v10685_v45, %v5260_v8  ;;  %v5296_v11 = vadd.f32 %v10685_v45, %v5261_v61  ;;  %v5297_v44 = vadd.f32 %v10685_v45, %v5262_v62  ;;  %v5322_v52 = vmax.f32 %v5290_v60, 0.0 }
 0x6b1   : > { %v5323_v13 = vmax.f32 %v5291_v40, 0.0  ;;  %v5324_v18 = vmax.f32 %v5292_v5, 0.0  ;;  %v5325_v54 = vmax.f32 %v5293_v49, 0.0  ;;  %v5298_v43 = vadd.f32 %v10685_v45, %v5263_v33 }
 0x6b2   : > { %v5327_v2 = vmax.f32 %v5295_v4, 0.0  ;;  %v5328_v15 = vmax.f32 %v5296_v11, 0.0  ;;  %v5329_v3 = vmax.f32 %v5297_v44, 0.0  ;;  %v5299_v55 = vadd.f32 %v10685_v45, %v5264_v7 }
 0x6b3   : > { %v5349_v56 = vpack.c.bf16 %v5323_v13, %v5322_v52  ;;  %v5350_v51 = vpack.c.bf16 %v5325_v54, %v5324_v18  ;;  %v5300_v38 = vadd.f32 %v10685_v45, %v5265_v25  ;;  %v5301_v14 = vadd.f32 %v10685_v45, %v5266_v29 }
 0x6b4   : > { %v5352_v58 = vpack.c.bf16 %v5329_v3, %v5328_v15  ;;  %v5330_v48 = vmax.f32 %v5298_v43, 0.0  ;;  %v5331_v16 = vmax.f32 %v5299_v55, 0.0  ;;  %v5302_v1 = vadd.f32 %v10685_v45, %v5267_v9 }
 0x6b5   : > { %v5303_v32 = vadd.f32 %v10685_v45, %v5268_v47  ;;  %v5332_v8 = vmax.f32 %v5300_v38, 0.0  ;;  %v5333_v61 = vmax.f32 %v5301_v14, 0.0  ;;  %v5304_v46 = vadd.f32 %v10685_v45, %v5269_v21 }
 0x6b6   : > { %v5305_v62 = vadd.f32 %v10685_v45, %v5270_v22  ;;  %v5353_v6 = vpack.c.bf16 %v5331_v16, %v5330_v48  ;;  %v5306_v57 = vadd.f32 %v10685_v45, %v5271_v31  ;;  %v5307_v39 = vadd.f32 %v10685_v45, %v5272_v50 }
 0x6b7   : > { %v5335_v33 = vmax.f32 %v5303_v32, 0.0  ;;  %v5354_v7 = vpack.c.bf16 %v5333_v61, %v5332_v8  ;;  %v5336_v20 = vmax.f32 %v5304_v46, 0.0  ;;  %v5308_v9 = vadd.f32 %v10685_v45, %v5273_v27 }
 0x6b8   : > { %v5337_v25 = vmax.f32 %v5305_v62, 0.0  ;;  %v5338_v17 = vmax.f32 %v5306_v57, 0.0  ;;  %v5309_v41 = vadd.f32 %v10685_v45, %v5274_v35  ;;  %v5339_v30 = vmax.f32 %v5307_v39, 0.0 }
 0x6b9   : > { %v5310_v21 = vadd.f32 %v10685_v45, %v5275_v59  ;;  %v5311_v34 = vadd.f32 %v10685_v45, %v5276_v12  ;;  %v5340_v22 = vmax.f32 %v5308_v9, 0.0 }
 0x6ba   : > { %5437 = vmatmul.bf16.gmra.mxu2 %v5345_v37  ;;  %v5326_v37 = vmax.f32 %v5294_v28, 0.0  ;;  %v5356_v47 = vpack.c.bf16 %v5337_v25, %v5336_v20  ;;  %v5341_v53 = vmax.f32 %v5309_v41, 0.0  ;;  %v5357_v31 = vpack.c.bf16 %v5339_v30, %v5338_v17 }
 0x6bb   : > { %v5342_v0 = vmax.f32 %v5310_v21, 0.0  ;;  %v5343_v10 = vmax.f32 %v5311_v34, 0.0 }
 0x6bc   : > { %v5351_v23 = vpack.c.bf16 %v5327_v2, %v5326_v37  ;;  %v5358_v19 = vpack.c.bf16 %v5341_v53, %v5340_v22 }
 0x6bd   : > { %v10755_v42 = vpack.c.bf16 %v5343_v10, %v5342_v0 }
 0x6ca   : > { %5442 = vmatmul.bf16.gmra.mxu2 %v5346_v63  ;;  %v5334_v63 = vmax.f32 %v5302_v1, 0.0 }
 0x6cc   : > { %v5355_v29 = vpack.c.bf16 %v5335_v33, %v5334_v63 }
 0x6da   : > { %5447 = vmatmul.bf16.gmra.mxu2 %v10703_v36 }
 0x6ea   : > { %5452 = vmatmul.bf16.gmra.mxu2 %v10709_v24 }
 0x6fa   : > { %5457 = vmatmul.bf16.gmra.mxu2 %v5349_v56 }
 0x70a   : > { %5462 = vmatmul.bf16.gmra.mxu2 %v5350_v51 }
 0x71a   : > { %5467 = vmatmul.bf16.gmra.mxu2 %v5351_v23 }
 0x72a   : > { %5472 = vmatmul.bf16.gmra.mxu2 %v5352_v58 }
 0x72d   : > { %v10759_v50 = vpop.f32.mrf.mxu2 }
 0x72e   : > { %v5616_v45 = vmul.f32 %v10759_v50, %v10759_v50  ;;  %5515 = vadd.xlane.f32.xlu2 %v10759_v50 }
 0x730   : > { %5648 = vadd.xlane.f32.xlu0 %v5616_v45 }
 0x735   : > { %v10764_v27 = vpop.f32.mrf.mxu2 }
 0x736   : > { %v5617_v35 = vmul.f32 %v10764_v27, %v10764_v27 }
 0x738   : > { %5517 = vadd.xlane.f32.xlu0 %v10764_v27  ;;  %5650 = vadd.xlane.f32.xlu1 %v5617_v35 }
 0x73a   : > { %5477 = vmatmul.bf16.gmra.mxu2 %v5353_v6 }
 0x73d   : > { %v10769_v36 = vpop.f32.mrf.mxu2 }
 0x73e   : > { %v5618_v24 = vmul.f32 %v10769_v36, %v10769_v36 }
 0x740   : > { %5519 = vadd.xlane.f32.xlu1 %v10769_v36  ;;  %5652 = vadd.xlane.f32.xlu2 %v5618_v24 }
 0x745   : > { %v10774_v59 = vpop.f32.mrf.mxu2 }
 0x746   : > { %v5619_v26 = vmul.f32 %v10774_v59, %v10774_v59 }
 0x748   : > { %5521 = vadd.xlane.f32.xlu2 %v10774_v59  ;;  %5654 = vadd.xlane.f32.xlu0 %v5619_v26 }
 0x74a   : > { %5482 = vmatmul.bf16.gmra.mxu2 %v5354_v7 }
 0x74d   : > { %v10779_v12 = vpop.f32.mrf.mxu2 }
 0x74e   : > { %v5620_v60 = vmul.f32 %v10779_v12, %v10779_v12 }
 0x750   : > { %5523 = vadd.xlane.f32.xlu0 %v10779_v12  ;;  %5656 = vadd.xlane.f32.xlu1 %v5620_v60 }
 0x755   : > { %v10784_v40 = vpop.f32.mrf.mxu2 }
 0x756   : > { %v5621_v5 = vmul.f32 %v10784_v40, %v10784_v40 }
 0x758   : > { %5525 = vadd.xlane.f32.xlu1 %v10784_v40  ;;  %5658 = vadd.xlane.f32.xlu2 %v5621_v5 }
 0x75a   : > { %5487 = vmatmul.bf16.gmra.mxu2 %v5355_v29 }
 0x75d   : > { %v10789_v49 = vpop.f32.mrf.mxu2 }
 0x75e   : > { %v5622_v28 = vmul.f32 %v10789_v49, %v10789_v49 }
 0x760   : > { %5527 = vadd.xlane.f32.xlu2 %v10789_v49  ;;  %5660 = vadd.xlane.f32.xlu0 %v5622_v28 }
 0x765   : > { %v10794_v4 = vpop.f32.mrf.mxu2 }
 0x766   : > { %v5623_v11 = vmul.f32 %v10794_v4, %v10794_v4 }
 0x768   : > { %5529 = vadd.xlane.f32.xlu0 %v10794_v4  ;;  %5662 = vadd.xlane.f32.xlu1 %v5623_v11 }
 0x76a   : > { %5492 = vmatmul.bf16.gmra.mxu2 %v5356_v47 }
 0x76d   : > { %v10799_v44 = vpop.f32.mrf.mxu2 }
 0x76e   : > { %v5624_v52 = vmul.f32 %v10799_v44, %v10799_v44 }
 0x770   : > { %5531 = vadd.xlane.f32.xlu1 %v10799_v44  ;;  %5664 = vadd.xlane.f32.xlu2 %v5624_v52 }
 0x775   : > { %v10804_v13 = vpop.f32.mrf.mxu2 }
 0x776   : > { %v5625_v18 = vmul.f32 %v10804_v13, %v10804_v13 }
 0x778   : > { %5533 = vadd.xlane.f32.xlu2 %v10804_v13  ;;  %5666 = vadd.xlane.f32.xlu0 %v5625_v18 }
 0x77a   : > { %5497 = vmatmul.bf16.gmra.mxu2 %v5357_v31 }
 0x77d   : > { %v10809_v54 = vpop.f32.mrf.mxu2 }
 0x77e   : > { %v5626_v37 = vmul.f32 %v10809_v54, %v10809_v54 }
 0x780   : > { %5535 = vadd.xlane.f32.xlu0 %v10809_v54  ;;  %5668 = vadd.xlane.f32.xlu1 %v5626_v37 }
 0x785   : > { %v10814_v2 = vpop.f32.mrf.mxu2 }
 0x786   : > { %v5627_v15 = vmul.f32 %v10814_v2, %v10814_v2 }
 0x788   : > { %5537 = vadd.xlane.f32.xlu1 %v10814_v2  ;;  %5670 = vadd.xlane.f32.xlu2 %v5627_v15 }
 0x78a   : > { %5502 = vmatmul.bf16.gmra.mxu2 %v5358_v19 }
 0x78d   : > { %v10819_v3 = vpop.f32.mrf.mxu2 }
 0x78e   : > { %v5628_v56 = vmul.f32 %v10819_v3, %v10819_v3 }
 0x790   : > { %5539 = vadd.xlane.f32.xlu2 %v10819_v3  ;;  %5672 = vadd.xlane.f32.xlu1 %v5628_v56 }
 0x795   : > { %v10824_v51 = vpop.f32.mrf.mxu2 }
 0x796   : > { %5541 = vadd.xlane.f32.xlu0 %v10824_v51  ;;  %v5629_v43 = vmul.f32 %v10824_v51, %v10824_v51 }
 0x79a   : > { %5507 = vmatmul.bf16.gmra.mxu2 %v10755_v42 }
 0x79d   : > { %v10830_v55 = vpop.f32.mrf.mxu2 }
 0x79e   : > { %5674 = vadd.xlane.f32.xlu0 %v5629_v43  ;;  %5543 = vadd.xlane.f32.xlu2 %v10830_v55  ;;  %v5630_v58 = vmul.f32 %v10830_v55, %v10830_v55 }
 0x7a1   : > { %v5516_v14 = vpop.xlane.xlu2 %5515 }
 0x7a3   : > { %v5649_v23 = vpop.xlane.xlu0 %5648 }
 0x7a5   : > { %v10835_v38 = vpop.f32.mrf.mxu2 }
 0x7a6   : > { %5676 = vadd.xlane.f32.xlu2 %v5630_v58  ;;  %5545 = vadd.xlane.f32.xlu1 %v10835_v38  ;;  %v5631_v1 = vmul.f32 %v10835_v38, %v10835_v38 }
 0x7ab   : > { %v5518_v48 = vpop.xlane.xlu0 %5517  ;;  %v5651_v16 = vpop.xlane.xlu1 %5650 }
 0x7ac   : > { %v5579_v32 = vadd.f32 %v5518_v48, %v5516_v14  ;;  %v5712_v8 = vadd.f32 %v5651_v16, %v5649_v23 }
 0x7ad   : > { %v10840_v61 = vpop.f32.mrf.mxu2 }
 0x7ae   : > { %5678 = vadd.xlane.f32.xlu1 %v5631_v1  ;;  %5547 = vadd.xlane.f32.xlu0 %v10840_v61  ;;  %v5632_v6 = vmul.f32 %v10840_v61, %v10840_v61 }
 0x7b3   : > { %v5520_v46 = vpop.xlane.xlu1 %5519  ;;  %v5653_v62 = vpop.xlane.xlu2 %5652 }
 0x7b4   : > { %v5580_v63 = vadd.f32 %v5579_v32, %v5520_v46  ;;  %v5713_v33 = vadd.f32 %v5712_v8, %v5653_v62 }
 0x7b5   : > { %v10845_v57 = vpop.f32.mrf.mxu2 }
 0x7b6   : > { %12247 = vst [vmem:[#allocation36_spill] sm:$0xff] %v10845_v57  ;;  %5680 = vadd.xlane.f32.xlu0 %v5632_v6  ;;  %5549 = vadd.xlane.f32.xlu2 %v10845_v57  ;;  %v5633_v25 = vmul.f32 %v10845_v57, %v10845_v57 }
 0x7bb   : > { %v5522_v7 = vpop.xlane.xlu2 %5521  ;;  %v5655_v20 = vpop.xlane.xlu0 %5654 }
 0x7bc   : > { %v5581_v39 = vadd.f32 %v5580_v63, %v5522_v7  ;;  %v5714_v29 = vadd.f32 %v5713_v33, %v5655_v20 }
 0x7bd   : > { %v10850_v17 = vpop.f32.mrf.mxu2 }
 0x7be   : > { %12248 = vst [vmem:[#allocation41_spill] sm:$0xff] %v10850_v17  ;;  %5682 = vadd.xlane.f32.xlu2 %v5633_v25  ;;  %5551 = vadd.xlane.f32.xlu1 %v10850_v17  ;;  %v5634_v47 = vmul.f32 %v10850_v17, %v10850_v17 }
 0x7c3   : > { %v5524_v9 = vpop.xlane.xlu0 %5523  ;;  %v5657_v41 = vpop.xlane.xlu1 %5656 }
 0x7c4   : > { %v5582_v30 = vadd.f32 %v5581_v39, %v5524_v9  ;;  %v5715_v21 = vadd.f32 %v5714_v29, %v5657_v41 }
 0x7c5   : > { %v10855_v34 = vpop.f32.mrf.mxu2 }
 0x7c6   : > { %12249 = vst [vmem:[#allocation30_spill] sm:$0xff] %v10855_v34  ;;  %5684 = vadd.xlane.f32.xlu1 %v5634_v47  ;;  %5553 = vadd.xlane.f32.xlu0 %v10855_v34  ;;  %v5635_v31 = vmul.f32 %v10855_v34, %v10855_v34 }
 0x7cb   : > { %v5526_v22 = vpop.xlane.xlu1 %5525  ;;  %v5659_v53 = vpop.xlane.xlu2 %5658 }
 0x7cc   : > { %v5583_v0 = vadd.f32 %v5582_v30, %v5526_v22  ;;  %v5716_v10 = vadd.f32 %v5715_v21, %v5659_v53 }
 0x7cd   : > { %v10860_v19 = vpop.f32.mrf.mxu2 }
 0x7ce   : > { %12250 = vst [vmem:[#allocation111_spill] sm:$0xff] %v10860_v19  ;;  %5686 = vadd.xlane.f32.xlu0 %v5635_v31  ;;  %5555 = vadd.xlane.f32.xlu2 %v10860_v19  ;;  %v5636_v35 = vmul.f32 %v10860_v19, %v10860_v19 }
 0x7d3   : > { %v5528_v42 = vpop.xlane.xlu2 %5527  ;;  %v5661_v45 = vpop.xlane.xlu0 %5660 }
 0x7d4   : > { %v5584_v24 = vadd.f32 %v5583_v0, %v5528_v42  ;;  %v5717_v26 = vadd.f32 %v5716_v10, %v5661_v45 }
 0x7d5   : > { %v10865_v60 = vpop.f32.mrf.mxu2 }
 0x7d6   : > { %12251 = vst [vmem:[#allocation75_spill] sm:$0xff] %v10865_v60  ;;  %5688 = vadd.xlane.f32.xlu2 %v5636_v35  ;;  %5557 = vadd.xlane.f32.xlu1 %v10865_v60  ;;  %v5637_v11 = vmul.f32 %v10865_v60, %v10865_v60 }
 0x7db   : > { %v5530_v5 = vpop.xlane.xlu0 %5529  ;;  %v5663_v28 = vpop.xlane.xlu1 %5662 }
 0x7dc   : > { %v5585_v52 = vadd.f32 %v5584_v24, %v5530_v5  ;;  %v5718_v18 = vadd.f32 %v5717_v26, %v5663_v28 }
 0x7dd   : > { %v10870_v37 = vpop.f32.mrf.mxu2 }
 0x7de   : > { %12252 = vst [vmem:[#allocation129_spill] sm:$0xff] %v10870_v37  ;;  %5690 = vadd.xlane.f32.xlu1 %v5637_v11  ;;  %5559 = vadd.xlane.f32.xlu0 %v10870_v37  ;;  %v5638_v43 = vmul.f32 %v10870_v37, %v10870_v37 }
 0x7e3   : > { %v5532_v15 = vpop.xlane.xlu1 %5531  ;;  %v5665_v56 = vpop.xlane.xlu2 %5664 }
 0x7e4   : > { %v5586_v23 = vadd.f32 %v5585_v52, %v5532_v15  ;;  %v5719_v58 = vadd.f32 %v5718_v18, %v5665_v56 }
 0x7e5   : > { %v10875_v14 = vpop.f32.mrf.mxu2 }
 0x7e6   : > { %12253 = vst [vmem:[#allocation103_spill] sm:$0xff] %v10875_v14  ;;  %5692 = vadd.xlane.f32.xlu0 %v5638_v43  ;;  %5561 = vadd.xlane.f32.xlu2 %v10875_v14  ;;  %v5639_v1 = vmul.f32 %v10875_v14, %v10875_v14 }
 0x7eb   : > { %v5534_v48 = vpop.xlane.xlu2 %5533  ;;  %v5667_v16 = vpop.xlane.xlu0 %5666 }
 0x7ec   : > { %v5587_v32 = vadd.f32 %v5586_v23, %v5534_v48  ;;  %v5720_v8 = vadd.f32 %v5719_v58, %v5667_v16 }
 0x7ed   : > { %v10880_v46 = vpop.f32.mrf.mxu2 }
 0x7ee   : > { %12254 = vst [vmem:[#allocation166_spill] sm:$0xff] %v10880_v46  ;;  %5694 = vadd.xlane.f32.xlu2 %v5639_v1  ;;  %5563 = vadd.xlane.f32.xlu1 %v10880_v46  ;;  %v5640_v6 = vmul.f32 %v10880_v46, %v10880_v46 }
 0x7f3   : > { %v5669_v62 = vpop.xlane.xlu1 %5668  ;;  %v5536_v7 = vpop.xlane.xlu0 %5535 }
 0x7f4   : > { %v5721_v63 = vadd.f32 %v5720_v8, %v5669_v62  ;;  %v5588_v20 = vadd.f32 %v5587_v32, %v5536_v7 }
 0x7f5   : > { %v10885_v33 = vpop.f32.mrf.mxu2 }
 0x7f6   : > { %12255 = vst [vmem:[#allocation104_spill] sm:$0xff] %v10885_v33  ;;  %5696 = vadd.xlane.f32.xlu1 %v5640_v6  ;;  %5565 = vadd.xlane.f32.xlu0 %v10885_v33  ;;  %v5641_v29 = vmul.f32 %v10885_v33, %v10885_v33 }
 0x7fb   : > { %v5538_v25 = vpop.xlane.xlu1 %5537  ;;  %v5671_v39 = vpop.xlane.xlu2 %5670 }
 0x7fc   : > { %v5589_v9 = vadd.f32 %v5588_v20, %v5538_v25  ;;  %v5722_v41 = vadd.f32 %v5721_v63, %v5671_v39 }
 0x7fd   : > { %v10890_v47 = vpop.f32.mrf.mxu2 }
 0x7fe   : > { %12256 = vst [vmem:[#allocation97_spill] sm:$0xff] %v10890_v47  ;;  %5698 = vadd.xlane.f32.xlu0 %v5641_v29  ;;  %5567 = vadd.xlane.f32.xlu2 %v10890_v47  ;;  %v5642_v21 = vmul.f32 %v10890_v47, %v10890_v47 }
 0x803   : > { %v5540_v30 = vpop.xlane.xlu2 %5539  ;;  %v5673_v11 = vpop.xlane.xlu1 %5672 }
 0x804   : > { %v5590_v22 = vadd.f32 %v5589_v9, %v5540_v30 }
 0x805   : > { %v10895_v53 = vpop.f32.mrf.mxu2 }
 0x806   : > { %12257 = vst [vmem:[#allocation154_spill] sm:$0xff] %v10895_v53  ;;  %5700 = vadd.xlane.f32.xlu2 %v5642_v21  ;;  %5569 = vadd.xlane.f32.xlu1 %v10895_v53  ;;  %v5643_v31 = vmul.f32 %v10895_v53, %v10895_v53 }
 0x809   : > { %v5542_v28 = vpop.xlane.xlu0 %5541 }
 0x80d   : > { %v10900_v0 = vpop.f32.mrf.mxu2 }
 0x80e   : > { %12258 = vst [vmem:[#allocation167_spill] sm:$0xff] %v10900_v0  ;;  %5702 = vadd.xlane.f32.xlu1 %v5643_v31  ;;  %5571 = vadd.xlane.f32.xlu0 %v10900_v0  ;;  %v5644_v10 = vmul.f32 %v10900_v0, %v10900_v0  ;;  %v5723_v31 = vadd.f32 %v5722_v41, %v5673_v11 }
 0x811   : > { %v5544_v52 = vpop.xlane.xlu2 %5543  ;;  %v5675_v18 = vpop.xlane.xlu0 %5674 }
 0x815   : > { %v10905_v42 = vpop.f32.mrf.mxu2 }
 0x816   : > { %12259 = vst [vmem:[#allocation90_spill] sm:$0xff] %v10905_v42  ;;  %5704 = vadd.xlane.f32.xlu0 %v5644_v10  ;;  %5573 = vadd.xlane.f32.xlu2 %v10905_v42  ;;  %v5645_v45 = vmul.f32 %v10905_v42, %v10905_v42  ;;  %v5591_v10 = vadd.f32 %v5590_v22, %v5542_v28 }
 0x819   : > { %v5546_v15 = vpop.xlane.xlu1 %5545  ;;  %v5677_v56 = vpop.xlane.xlu2 %5676 }
 0x81d   : > { %v10910_v35 = vpop.f32.mrf.mxu2 }
 0x81e   : > { %12260 = vst [vmem:[#allocation89_spill] sm:$0xff] %v10910_v35  ;;  %5706 = vadd.xlane.f32.xlu2 %v5645_v45  ;;  %5575 = vadd.xlane.f32.xlu1 %v10910_v35  ;;  %v5646_v24 = vmul.f32 %v10910_v35, %v10910_v35 }
 0x821   : > { %v5548_v43 = vpop.xlane.xlu0 %5547  ;;  %v5679_v23 = vpop.xlane.xlu1 %5678 }
 0x825   : > { %v10915_v26 = vpop.f32.mrf.mxu2 }
 0x826   : > { %12261 = vst [vmem:[#allocation25_spill] sm:$0xff] %v10915_v26  ;;  %v5647_v5 = vmul.f32 %v10915_v26, %v10915_v26  ;;  %5708 = vadd.xlane.f32.xlu1 %v5646_v24  ;;  %5577 = vadd.xlane.f32.xlu0 %v10915_v26  ;;  %v5592_v26 = vadd.f32 %v5591_v10, %v5544_v52 }
 0x828   : > { %5710 = vadd.xlane.f32.xlu2 %v5647_v5  ;;  %v5724_v5 = vadd.f32 %v5723_v31, %v5675_v18  ;;  %v5593_v42 = vadd.f32 %v5592_v26, %v5546_v15 }
 0x829   : > { %v5550_v58 = vpop.xlane.xlu2 %5549  ;;  %v5681_v48 = vpop.xlane.xlu0 %5680 }
 0x82a   : > { %v5725_v35 = vadd.f32 %v5724_v5, %v5677_v56  ;;  %v5594_v53 = vadd.f32 %v5593_v42, %v5548_v43 }
 0x82c   : > { %v5726_v0 = vadd.f32 %v5725_v35, %v5679_v23  ;;  %v5595_v33 = vadd.f32 %v5594_v53, %v5550_v58 }
 0x82e   : > { %v5727_v47 = vadd.f32 %v5726_v0, %v5681_v48 }
 0x831   : > { %v5552_v16 = vpop.xlane.xlu1 %5551  ;;  %v5683_v1 = vpop.xlane.xlu2 %5682 }
 0x832   : > { %v5728_v37 = vadd.f32 %v5727_v47, %v5683_v1  ;;  %v5596_v60 = vadd.f32 %v5595_v33, %v5552_v16 }
 0x839   : > { %v5554_v32 = vpop.xlane.xlu0 %5553  ;;  %v5685_v8 = vpop.xlane.xlu1 %5684 }
 0x83a   : > { %v5729_v34 = vadd.f32 %v5728_v37, %v5685_v8  ;;  %v5597_v17 = vadd.f32 %v5596_v60, %v5554_v32 }
 0x841   : > { %v5556_v62 = vpop.xlane.xlu2 %5555  ;;  %v5687_v6 = vpop.xlane.xlu0 %5686 }
 0x842   : > { %v5730_v57 = vadd.f32 %v5729_v34, %v5687_v6  ;;  %v5598_v41 = vadd.f32 %v5597_v17, %v5556_v62 }
 0x849   : > { %v5558_v63 = vpop.xlane.xlu1 %5557  ;;  %v5689_v7 = vpop.xlane.xlu2 %5688 }
 0x84a   : > { %v5731_v22 = vadd.f32 %v5730_v57, %v5689_v7  ;;  %v5599_v28 = vadd.f32 %v5598_v41, %v5558_v63 }
 0x851   : > { %v5560_v20 = vpop.xlane.xlu0 %5559  ;;  %v5691_v25 = vpop.xlane.xlu1 %5690 }
 0x852   : > { %v5732_v18 = vadd.f32 %v5731_v22, %v5691_v25  ;;  %v5600_v52 = vadd.f32 %v5599_v28, %v5560_v20 }
 0x859   : > { %v5562_v39 = vpop.xlane.xlu2 %5561  ;;  %v5693_v29 = vpop.xlane.xlu0 %5692 }
 0x85a   : > { %v5733_v35 = vadd.f32 %v5732_v18, %v5693_v29  ;;  %v5601_v42 = vadd.f32 %v5600_v52, %v5562_v39 }
 0x861   : > { %v5564_v9 = vpop.xlane.xlu1 %5563  ;;  %v5695_v30 = vpop.xlane.xlu2 %5694 }
 0x862   : > { %v5734_v0 = vadd.f32 %v5733_v35, %v5695_v30  ;;  %v5602_v53 = vadd.f32 %v5601_v42, %v5564_v9  ;;  %v5513_v42 = vld [vmem:[%s11123_s9] sm:$0x1] }
 0x869   : > { %v5566_v21 = vpop.xlane.xlu0 %5565  ;;  %v5697_v45 = vpop.xlane.xlu1 %5696 }
 0x86a   : > { %v5735_v15 = vadd.f32 %v5734_v0, %v5697_v45  ;;  %v5603_v43 = vadd.f32 %v5602_v53, %v5566_v21 }
 0x871   : > { %v5568_v24 = vpop.xlane.xlu2 %5567  ;;  %v5699_v46 = vpop.xlane.xlu0 %5698 }
 0x872   : > { %v5736_v47 = vadd.f32 %v5735_v15, %v5699_v46  ;;  %v5604_v33 = vadd.f32 %v5603_v43, %v5568_v24  ;;  %v5514_v43 = vld [vmem:[%s11124_s10] sm:$0x1] }
 0x879   : > { %v5570_v14 = vpop.xlane.xlu1 %5569  ;;  %v5701_v19 = vpop.xlane.xlu2 %5700 }
 0x87a   : > { %v5737_v60 = vadd.f32 %v5736_v47, %v5701_v19  ;;  %v5605_v34 = vadd.f32 %v5604_v33, %v5570_v14 }
 0x881   : > { %v5572_v11 = vpop.xlane.xlu0 %5571  ;;  %v5703_v56 = vpop.xlane.xlu1 %5702 }
 0x882   : > { %v5738_v57 = vadd.f32 %v5737_v60, %v5703_v56  ;;  %v5606_v58 = vadd.f32 %v5605_v34, %v5572_v11 }
 0x889   : > { %v5574_v26 = vpop.xlane.xlu2 %5573  ;;  %v5705_v23 = vpop.xlane.xlu0 %5704 }
 0x88a   : > { %v5739_v48 = vadd.f32 %v5738_v57, %v5705_v23  ;;  %v5607_v16 = vadd.f32 %v5606_v58, %v5574_v26 }
 0x891   : > { %v5576_v37 = vpop.xlane.xlu1 %5575  ;;  %v5707_v17 = vpop.xlane.xlu2 %5706 }
 0x892   : > { %v5740_v1 = vadd.f32 %v5739_v48, %v5707_v17  ;;  %v5608_v32 = vadd.f32 %v5607_v16, %v5576_v37 }
 0x899   : > { %v5709_v8 = vpop.xlane.xlu1 %5708  ;;  %v5578_v62 = vpop.xlane.xlu0 %5577 }
 0x89a   : > { %v5741_v6 = vadd.f32 %v5740_v1, %v5709_v8  ;;  %v5609_v63 = vadd.f32 %v5608_v32, %v5578_v62  ;;  %v12262_v62 = vld [vmem:[#allocation36_spill] sm:$0xff] }
 0x89b   : > { %v5711_v7 = vpop.xlane.xlu2 %5710 }
 0x89c   : > { %v5610_v20 = vrot.slane %v5609_v63, 4  ;;  %v5742_v25 = vadd.f32 %v5741_v6, %v5711_v7  ;;  %v12263_v6 = vld [vmem:[#allocation41_spill] sm:$0xff]  ;;  %v12265_v7 = vld [vmem:[#allocation111_spill] sm:$0xff] }
 0x89e   : > { %v5611_v46 = vadd.f32 %v5610_v20, %v5609_v63  ;;  %v5743_v39 = vrot.slane %v5742_v25, 4  ;;  %v12264_v63 = vld [vmem:[#allocation30_spill] sm:$0xff]  ;;  %v12266_v20 = vld [vmem:[#allocation75_spill] sm:$0xff] }
 0x8a0   : > { %v5612_v29 = vrot.slane %v5611_v46, 2  ;;  %v5744_v9 = vadd.f32 %v5743_v39, %v5742_v25  ;;  %v12267_v25 = vld [vmem:[#allocation129_spill] sm:$0xff]  ;;  %v12269_v39 = vld [vmem:[#allocation166_spill] sm:$0xff] }
 0x8a2   : > { %v5613_v19 = vadd.f32 %v5612_v29, %v5611_v46  ;;  %v5745_v14 = vrot.slane %v5744_v9, 2  ;;  %v12268_v46 = vld [vmem:[#allocation103_spill] sm:$0xff]  ;;  %v12270_v29 = vld [vmem:[#allocation104_spill] sm:$0xff] }
 0x8a4   : > { %v5614_v30 = vrot.slane %v5613_v19, 1  ;;  %v5746_v21 = vadd.f32 %v5745_v14, %v5744_v9  ;;  %v12271_v9 = vld [vmem:[#allocation97_spill] sm:$0xff] }
 0x8a6   : > { %v5615_v31 = vadd.f32 %v5614_v30, %v5613_v19  ;;  %v5747_v10 = vrot.slane %v5746_v21, 1  ;;  %v12272_v19 = vld [vmem:[#allocation154_spill] sm:$0xff]  ;;  %v12273_v30 = vld [vmem:[#allocation167_spill] sm:$0xff] }
 0x8a8   : > { %v5749_v45 = vmul.f32 0.00012207031, %v5615_v31  ;;  %v5748_v24 = vadd.f32 %v5747_v10, %v5746_v21  ;;  %v12274_v31 = vld [vmem:[#allocation90_spill] sm:$0xff] }
 0x8aa   : > { %v5751_v5 = vmul.f32 %v5749_v45, %v5749_v45  ;;  %v5750_v41 = vmul.f32 0.00012207031, %v5748_v24 }
 0x8ac   : > { %v5752_v22 = vsub.f32 %v5750_v41, %v5751_v5  ;;  %v12276_v5 = vld [vmem:[#allocation25_spill] sm:$0xff] }
 0x8ae   : > { %v5753_v28 = vmax.f32 %v5752_v22, 0.0 }
 0x8b0   : > { %v5754_v11 = vadd.f32 1e-05, %v5753_v28 }
 0x8b2   : > { %6695 = vrsqrt.f32 %v5754_v11  ;;  %vm5761_vm9 = vweird.f32 %v5754_v11 }
 0x8b8   : > { %v6696_v18 = vpop.eup %6695 }
 0x8b9   : > { %v5756_v52 = vmul.f32 %v6696_v18, %v5754_v11  ;;  %vm5762_vm8 = vweird.f32 %v6696_v18 }
 0x8ba   : > { %vm5763_vm10 = vmor %vm5761_vm9, %vm5762_vm8 }
 0x8bb   : > { %v5757_v56 = vmul.f32 %v6696_v18, %v5756_v52 }
 0x8bd   : > { %v5758_v26 = vmul.f32 0.5, %v5757_v56 }
 0x8bf   : > { %v5759_v35 = vsub.f32 1.5, %v5758_v26 }
 0x8c1   : > { %v5760_v0 = vmul.f32 %v6696_v18, %v5759_v35 }
 0x8c3   : > { %v5764_v53 = vsel %vm5763_vm10, %v6696_v18, %v5760_v0 }
 0x8c4   : > { %v5765_v15 = vmul.f32 %v5764_v53, %v5513_v42 }
 0x8c6   : > { %v5766_v47 = vmul.f32 %v5765_v15, %v5749_v45  ;;  %v5769_v33 = vperm.slane %v5765_v15, 0  ;;  %v12275_v45 = vld [vmem:[#allocation89_spill] sm:$0xff] }
 0x8c8   : > { %v5767_v23 = vsub.f32 %v5514_v43, %v5766_v47  ;;  %v5771_v37 = vmul.f32 %v5769_v33, %v10759_v50  ;;  %v5772_v60 = vmul.f32 %v5769_v33, %v10764_v27  ;;  %v5773_v34 = vmul.f32 %v5769_v33, %v10769_v36 }
 0x8c9   : > { %v5774_v17 = vmul.f32 %v5769_v33, %v10774_v59  ;;  %v5775_v57 = vmul.f32 %v5769_v33, %v10779_v12  ;;  %v5776_v58 = vmul.f32 %v5769_v33, %v10784_v40  ;;  %v5777_v48 = vmul.f32 %v5769_v33, %v10789_v49 }
 0x8ca   : > { %v5804_v16 = vperm.slane %v5767_v23, 0  ;;  %v5778_v1 = vmul.f32 %v5769_v33, %v10794_v4  ;;  %v5779_v32 = vmul.f32 %v5769_v33, %v10799_v44  ;;  %v5780_v8 = vmul.f32 %v5769_v33, %v10804_v13 }
 0x8cb   : > { %v5781_v50 = vmul.f32 %v5769_v33, %v10809_v54  ;;  %v5782_v27 = vmul.f32 %v5769_v33, %v10814_v2  ;;  %v5783_v36 = vmul.f32 %v5769_v33, %v10819_v3  ;;  %v5784_v59 = vmul.f32 %v5769_v33, %v10824_v51 }
 0x8cc   : > { %v5785_v12 = vmul.f32 %v5769_v33, %v10830_v55  ;;  %v5786_v40 = vmul.f32 %v5769_v33, %v10835_v38  ;;  %v5787_v49 = vmul.f32 %v5769_v33, %v10840_v61  ;;  %v5788_v4 = vmul.f32 %v5769_v33, %v12262_v62 }
 0x8cd   : > { %v5789_v44 = vmul.f32 %v5769_v33, %v12263_v6  ;;  %v5790_v13 = vmul.f32 %v5769_v33, %v12264_v63  ;;  %v5791_v54 = vmul.f32 %v5769_v33, %v12265_v7  ;;  %v5792_v2 = vmul.f32 %v5769_v33, %v12266_v20 }
 0x8ce   : > { %v5793_v3 = vmul.f32 %v5769_v33, %v12267_v25  ;;  %v5794_v51 = vmul.f32 %v5769_v33, %v12268_v46  ;;  %v5795_v55 = vmul.f32 %v5769_v33, %v12269_v39  ;;  %v5796_v38 = vmul.f32 %v5769_v33, %v12270_v29  ;;  %v6776_v39 = vld [vmem:[%s7109_s5 + $0x38] sm:$0xff] }
 0x8cf   : > { %v5797_v61 = vmul.f32 %v5769_v33, %v12271_v9  ;;  %v5798_v14 = vmul.f32 %v5769_v33, %v12272_v19  ;;  %v5799_v21 = vmul.f32 %v5769_v33, %v12273_v30  ;;  %v5800_v10 = vmul.f32 %v5769_v33, %v12274_v31  ;;  %v6777_v9 = vld [vmem:[%s7109_s5 + $0x40] sm:$0xff]  ;;  %v6779_v31 = vld [vmem:[%s7109_s5 + $0x50] sm:$0xff] }
 0x8d0   : > { %v5801_v24 = vmul.f32 %v5769_v33, %v12275_v45  ;;  %v5802_v41 = vmul.f32 %v5769_v33, %v12276_v5  ;;  %v5806_v22 = vadd.f32 %v5804_v16, %v5771_v37  ;;  %v5807_v28 = vadd.f32 %v5804_v16, %v5772_v60 }
 0x8d1   : > { %v5808_v11 = vadd.f32 %v5804_v16, %v5773_v34  ;;  %v5809_v18 = vadd.f32 %v5804_v16, %v5774_v17  ;;  %v5810_v52 = vadd.f32 %v5804_v16, %v5775_v57  ;;  %v5811_v56 = vadd.f32 %v5804_v16, %v5776_v58 }
 0x8d2   : > { %v5812_v26 = vadd.f32 %v5804_v16, %v5777_v48  ;;  %v5813_v35 = vadd.f32 %v5804_v16, %v5778_v1  ;;  %v5814_v42 = vadd.f32 %v5804_v16, %v5779_v32  ;;  %v5815_v0 = vadd.f32 %v5804_v16, %v5780_v8 }
 0x8d3   : > { %v5816_v53 = vadd.f32 %v5804_v16, %v5781_v50  ;;  %v5817_v15 = vadd.f32 %v5804_v16, %v5782_v27  ;;  %v5818_v43 = vadd.f32 %v5804_v16, %v5783_v36  ;;  %v5819_v47 = vadd.f32 %v5804_v16, %v5784_v59 }
 0x8d4   : > { %v10958_v23 = vadd.f32 %v5804_v16, %v5785_v12  ;;  %v10960_v62 = vadd.f32 %v5804_v16, %v5786_v40  ;;  %v10962_v6 = vadd.f32 %v5804_v16, %v5787_v49  ;;  %v10964_v33 = vadd.f32 %v5804_v16, %v5788_v4  ;;  %v6769_v12 = vld [vmem:[%s7109_s5] sm:$0xff]  ;;  %v6770_v49 = vld [vmem:[%s7109_s5 + $0x8] sm:$0xff] }
 0x8d5   : > { %v10966_v37 = vadd.f32 %v5804_v16, %v5789_v44  ;;  %v10968_v60 = vadd.f32 %v5804_v16, %v5790_v13  ;;  %v10970_v34 = vadd.f32 %v5804_v16, %v5791_v54  ;;  %v10972_v17 = vadd.f32 %v5804_v16, %v5792_v2  ;;  %v6771_v44 = vld [vmem:[%s7109_s5 + $0x10] sm:$0xff]  ;;  %v6772_v13 = vld [vmem:[%s7109_s5 + $0x18] sm:$0xff]  ;;  %v6773_v54 = vld [vmem:[%s7109_s5 + $0x20] sm:$0xff] }
 0x8d6   : > { %v10974_v57 = vadd.f32 %v5804_v16, %v5793_v3  ;;  %v10976_v58 = vadd.f32 %v5804_v16, %v5794_v51  ;;  %v10978_v48 = vadd.f32 %v5804_v16, %v5795_v55  ;;  %v10980_v1 = vadd.f32 %v5804_v16, %v5796_v38  ;;  %v6774_v2 = vld [vmem:[%s7109_s5 + $0x28] sm:$0xff]  ;;  %v6775_v3 = vld [vmem:[%s7109_s5 + $0x30] sm:$0xff] }
 0x8d7   : > { %v10982_v32 = vadd.f32 %v5804_v16, %v5797_v61  ;;  %v10984_v8 = vadd.f32 %v5804_v16, %v5798_v14  ;;  %v10986_v50 = vadd.f32 %v5804_v16, %v5799_v21  ;;  %v10988_v27 = vadd.f32 %v5804_v16, %v5800_v10  ;;  %v6778_v14 = vld [vmem:[%s7109_s5 + $0x48] sm:$0xff] }
 0x8d8   : > { %v10990_v36 = vadd.f32 %v5804_v16, %v5801_v24  ;;  %v10992_v59 = vadd.f32 %v5804_v16, %v5802_v41  ;;  %v5838_v40 = vadd.f32 %v6769_v12, %v5806_v22  ;;  %v5839_v4 = vadd.f32 %v6770_v49, %v5807_v28  ;;  %v6780_v24 = vld [vmem:[%s7109_s5 + $0x58] sm:$0xff]  ;;  %v6781_v22 = vld [vmem:[%s7109_s5 + $0x60] sm:$0xff] }
 0x8d9   : > { %v5840_v63 = vadd.f32 %v6771_v44, %v5808_v11  ;;  %v5841_v7 = vadd.f32 %v6772_v13, %v5809_v18  ;;  %v5842_v20 = vadd.f32 %v6773_v54, %v5810_v52  ;;  %v5843_v25 = vadd.f32 %v6774_v2, %v5811_v56  ;;  %v6782_v18 = vld [vmem:[%s7109_s5 + $0x68] sm:$0xff] }
 0x8da   : > { %v5844_v46 = vadd.f32 %v6775_v3, %v5812_v26  ;;  %v5870_v16 = vmax.f32 %v5838_v40, 0.0  ;;  %v5871_v51 = vmax.f32 %v5839_v4, 0.0  ;;  %v5845_v55 = vadd.f32 %v6776_v39, %v5813_v35  ;;  %v6783_v26 = vld [vmem:[%s7109_s5 + $0x70] sm:$0xff]  ;;  %v6786_v40 = vld [vmem:[%s7109_s5 + $0x88] sm:$0xff] }
 0x8db   : > { %v5872_v29 = vmax.f32 %v5840_v63, 0.0  ;;  %v5873_v38 = vmax.f32 %v5841_v7, 0.0  ;;  %v5846_v61 = vadd.f32 %v6777_v9, %v5814_v42  ;;  %v5874_v19 = vmax.f32 %v5842_v20, 0.0  ;;  %v6787_v4 = vld [vmem:[%s7109_s5 + $0x90] sm:$0xff]  ;;  %v6788_v63 = vld [vmem:[%s7109_s5 + $0x98] sm:$0xff]  ;;  %v6789_v7 = vld [vmem:[%s7109_s5 + $0xa0] sm:$0xff] }
 0x8dc   : > { %5902 = vst [vmem:[%s11005_s28] sm:$0xff] %v5870_v16  ;;  %v5847_v30 = vadd.f32 %v6778_v14, %v5815_v0  ;;  %v5875_v21 = vmax.f32 %v5843_v25, 0.0  ;;  %v5848_v10 = vadd.f32 %v6779_v31, %v5816_v53  ;;  %v5876_v45 = vmax.f32 %v5844_v46, 0.0  ;;  %v6784_v0 = vld [vmem:[%s7109_s5 + $0x78] sm:$0xff]  ;;  %v6790_v20 = vld [vmem:[%s7109_s5 + $0xa8] sm:$0xff]  ;;  %v6791_v25 = vld [vmem:[%s7109_s5 + $0xb0] sm:$0xff] }
 0x8dd   : > { %5903 = vst [vmem:[%s11005_s28 + $0x8] sm:$0xff] %v5871_v51  ;;  %v5849_v5 = vadd.f32 %v6780_v24, %v5817_v15  ;;  %v5877_v41 = vmax.f32 %v5845_v55, 0.0  ;;  %v5850_v28 = vadd.f32 %v6781_v22, %v5818_v43  ;;  %v5878_v11 = vmax.f32 %v5846_v61, 0.0  ;;  %v6785_v43 = vld [vmem:[%s7109_s5 + $0x80] sm:$0xff]  ;;  %v6792_v46 = vld [vmem:[%s7109_s5 + $0xb8] sm:$0xff]  ;;  %v6794_v55 = vld [vmem:[%s7109_s5 + $0xc8] sm:$0xff] }
 0x8de   : > { %5904 = vst [vmem:[%s11005_s28 + $0x10] sm:$0xff] %v5872_v29  ;;  %v5851_v52 = vadd.f32 %v6782_v18, %v5819_v47  ;;  %v5879_v56 = vmax.f32 %v5847_v30, 0.0  ;;  %v5852_v35 = vadd.f32 %v6783_v26, %v10958_v23  ;;  %v5880_v42 = vmax.f32 %v5848_v10, 0.0  ;;  %v6793_v51 = vld [vmem:[%s7109_s5 + $0xc0] sm:$0xff]  ;;  %v6796_v61 = vld [vmem:[%s7109_s5 + $0xd8] sm:$0xff]  ;;  %v6799_v10 = vld [vmem:[%s7109_s5 + $0xf0] sm:$0xff] }
 0x8df   : > { %5905 = vst [vmem:[%s11005_s28 + $0x18] sm:$0xff] %v5873_v38  ;;  %v5853_v53 = vadd.f32 %v6784_v0, %v10960_v62  ;;  %v5881_v15 = vmax.f32 %v5849_v5, 0.0  ;;  %v5854_v47 = vadd.f32 %v6785_v43, %v10962_v6  ;;  %v5882_v12 = vmax.f32 %v5850_v28, 0.0  ;;  %v6795_v38 = vld [vmem:[%s7109_s5 + $0xd0] sm:$0xff]  ;;  %v6797_v14 = vld [vmem:[%s7109_s5 + $0xe0] sm:$0xff] }
 0x8e0   : > { %5906 = vst [vmem:[%s11005_s28 + $0x20] sm:$0xff] %v5874_v19  ;;  %v5855_v23 = vadd.f32 %v6786_v40, %v10964_v33  ;;  %v5883_v49 = vmax.f32 %v5851_v52, 0.0  ;;  %v5856_v62 = vadd.f32 %v6787_v4, %v10966_v37  ;;  %v5884_v44 = vmax.f32 %v5852_v35, 0.0 }
 0x8e1   : > { %5907 = vst [vmem:[%s11005_s28 + $0x28] sm:$0xff] %v5875_v21  ;;  %v5857_v6 = vadd.f32 %v6788_v63, %v10968_v60  ;;  %v5885_v13 = vmax.f32 %v5853_v53, 0.0  ;;  %v5858_v33 = vadd.f32 %v6789_v7, %v10970_v34  ;;  %v5886_v54 = vmax.f32 %v5854_v47, 0.0  ;;  %v6798_v21 = vld [vmem:[%s7109_s5 + $0xe8] sm:$0xff] }
 0x8e2   : > { %5908 = vst [vmem:[%s11005_s28 + $0x30] sm:$0xff] %v5876_v45  ;;  %v5859_v37 = vadd.f32 %v6790_v20, %v10972_v17  ;;  %v5887_v2 = vmax.f32 %v5855_v23, 0.0  ;;  %v5860_v60 = vadd.f32 %v6791_v25, %v10974_v57  ;;  %v5888_v3 = vmax.f32 %v5856_v62, 0.0 }
 0x8e3   : > { %5909 = vst [vmem:[%s11005_s28 + $0x38] sm:$0xff] %v5877_v41  ;;  %v5861_v34 = vadd.f32 %v6792_v46, %v10976_v58  ;;  %v5889_v16 = vmax.f32 %v5857_v6, 0.0  ;;  %v5862_v17 = vadd.f32 %v6793_v51, %v10978_v48  ;;  %v5890_v39 = vmax.f32 %v5858_v33, 0.0 }
 0x8e4   : > { %5910 = vst [vmem:[%s11005_s28 + $0x40] sm:$0xff] %v5878_v11  ;;  %v5863_v57 = vadd.f32 %v6794_v55, %v10980_v1  ;;  %v5891_v29 = vmax.f32 %v5859_v37, 0.0  ;;  %v5864_v58 = vadd.f32 %v6795_v38, %v10982_v32  ;;  %v5892_v9 = vmax.f32 %v5860_v60, 0.0 }
 0x8e5   : > { %5911 = vst [vmem:[%s11005_s28 + $0x48] sm:$0xff] %v5879_v56  ;;  %v5865_v48 = vadd.f32 %v6796_v61, %v10984_v8  ;;  %v5893_v19 = vmax.f32 %v5861_v34, 0.0  ;;  %v5866_v1 = vadd.f32 %v6797_v14, %v10986_v50  ;;  %v5894_v30 = vmax.f32 %v5862_v17, 0.0  ;;  %v6800_v50 = vld [vmem:[%s7109_s5 + $0xf8] sm:$0xff]  ;;  %s5935_s5 = scalar_lea.sflag [#allocation4], %s7103_s24 }
 0x8e6   : > { %5912 = vst [vmem:[%s11005_s28 + $0x50] sm:$0xff] %v5880_v42  ;;  %v5867_v32 = vadd.f32 %v6798_v21, %v10988_v27  ;;  %v5895_v31 = vmax.f32 %v5863_v57, 0.0  ;;  %v5868_v8 = vadd.f32 %v6799_v10, %v10990_v36  ;;  %v5896_v45 = vmax.f32 %v5864_v58, 0.0 }
 0x8e7   : > { %5913 = vst [vmem:[%s11005_s28 + $0x58] sm:$0xff] %v5881_v15  ;;  %v5869_v24 = vadd.f32 %v6800_v50, %v10992_v59  ;;  %v5897_v27 = vmax.f32 %v5865_v48, 0.0  ;;  %v5898_v5 = vmax.f32 %v5866_v1, 0.0 }
 0x8e8   : > { %5914 = vst [vmem:[%s11005_s28 + $0x60] sm:$0xff] %v5882_v12  ;;  %v5899_v36 = vmax.f32 %v5867_v32, 0.0  ;;  %v5900_v41 = vmax.f32 %v5868_v8, 0.0 }
 0x8e9   : > { %5915 = vst [vmem:[%s11005_s28 + $0x68] sm:$0xff] %v5883_v49  ;;  %v5901_v22 = vmax.f32 %v5869_v24, 0.0 }
 0x8ea   : > { %5916 = vst [vmem:[%s11005_s28 + $0x70] sm:$0xff] %v5884_v44 }
 0x8eb   : > { %5917 = vst [vmem:[%s11005_s28 + $0x78] sm:$0xff] %v5885_v13 }
 0x8ec   : > { %5918 = vst [vmem:[%s11005_s28 + $0x80] sm:$0xff] %v5886_v54 }
 0x8ed   : > { %5919 = vst [vmem:[%s11005_s28 + $0x88] sm:$0xff] %v5887_v2 }
 0x8ee   : > { %5920 = vst [vmem:[%s11005_s28 + $0x90] sm:$0xff] %v5888_v3 }
 0x8ef   : > { %5921 = vst [vmem:[%s11005_s28 + $0x98] sm:$0xff] %v5889_v16 }
 0x8f0   : > { %5922 = vst [vmem:[%s11005_s28 + $0xa0] sm:$0xff] %v5890_v39 }
 0x8f1   : > { %5923 = vst [vmem:[%s11005_s28 + $0xa8] sm:$0xff] %v5891_v29 }
 0x8f2   : > { %5924 = vst [vmem:[%s11005_s28 + $0xb0] sm:$0xff] %v5892_v9 }
 0x8f3   : > { %5925 = vst [vmem:[%s11005_s28 + $0xb8] sm:$0xff] %v5893_v19 }
 0x8f4   : > { %5926 = vst [vmem:[%s11005_s28 + $0xc0] sm:$0xff] %v5894_v30 }
 0x8f5   : > { %5927 = vst [vmem:[%s11005_s28 + $0xc8] sm:$0xff] %v5895_v31 }
 0x8f6   : > { %5928 = vst [vmem:[%s11005_s28 + $0xd0] sm:$0xff] %v5896_v45 }
 0x8f7   : > { %5929 = vst [vmem:[%s11005_s28 + $0xd8] sm:$0xff] %v5897_v27 }
 0x8f8   : > { %5930 = vst [vmem:[%s11005_s28 + $0xe0] sm:$0xff] %v5898_v5 }
 0x8f9   : > { %5931 = vst [vmem:[%s11005_s28 + $0xe8] sm:$0xff] %v5899_v36 }
 0x8fa   : > { %5932 = vst [vmem:[%s11005_s28 + $0xf0] sm:$0xff] %v5900_v41 }
 0x8fb   : > { %5933 = vst [vmem:[%s11005_s28 + $0xf8] sm:$0xff] %v5901_v22 }
 0x8fc   : > { %6888 = shalt.err (!%p6885_p10)
}
 0x8fd   : > { %s6946_s24 = smov 128   ;;  %s6947_s28 = smov 8  }
 0x8fe   : > { %6521 = dma.vmem_to_hbm [thread:$0]  (%p7075_p7), %s5948_s15, 4096, %s5950_s23, %s5935_s5, %s6946_s24, %s6946_s24, %s6947_s28  }
 0x8ff PF: > { %s5964_s21 = sand.u32 1, %s6919_s17   ;;  %p12278_p12 = scmp.ge.s32.totalorder %s6931_s20, 2 }
 0x900   : > { %s5965_s22 = scalar_lea.sflag [#allocation4], %s5964_s21 }
 0x901   : > { %p6532_p13 = pnand %p12278_p12, %p7043_p6 }
 0x903   : > { %p6533_p0 = pneg %p6532_p13 }
 0x905   : > { %6914 = dma.done.wait (%p6533_p0), %s5965_s22, 4096  }
 0x906   : > { %6916 = vsyncadd (%p6533_p0), %s5965_s22, 4294963200  ;;  %s12279_s20 = sld [smem:[#allocation13_spill]]  ;;  %s12282_s17 = smov %s6923_s18 }
 0x907   : > { %s12280_s13 = sld [smem:[#allocation11_spill]] }
 0x908   : > { %s12281_s19 = sld [smem:[#allocation14_spill]] }
 0x90c   : > { %p25_p3 = scmp.ge.s32.totalorder %s12279_s20, 4  }
 0x90d   : > { %s12283_s18 = smov %s12280_s13 }
 0x90e   :  { %27 = sbr.rel (!%p25_p3) target bundleno = 8 (0x8), region = 113 }
 0x913   :  { %5971 = vsyncpa [#allocation3], 1 }
 0x914   :  { %5973 = vsyncpa [#allocation3 + $0x1], 1 }
 0x915   :  { %5974 = vsyncpa [#allocation6], 1 }
 0x916   :  { %5975 = vsyncpa [#allocation4], 1 }
 0x917   :  { %5977 = vsyncpa [#allocation4 + $0x1], 1 }

</bundles_post_ra>
